<compile_context>
chip_gen: v5e
topology: v5e:2x2
jax: 0.10.0
libtpu: 0.0.40
codegen_flags: <defaults>
</compile_context>

<pallas_src>
import functools

import jax
import jax.numpy as jnp
from jax.experimental import pallas as pl
from jax.experimental.pallas import tpu as pltpu


# ----------------------------- chip-aware tile plan --------------------------

def _tpu_generation() -> str:
    try:
        kind = jax.devices()[0].device_kind.lower()
    except Exception:
        return "unknown"
    if "v5 lite" in kind or "v5e" in kind or "v5lite" in kind:
        return "v5e"
    if "v6" in kind:
        return "v6e"
    if "7x" in kind or "v7" in kind:
        return "v7x"
    return "unknown"


def _vmem_need(tm, tf, D, out_bytes):
    return (
        2 * (tm * D + D * 2 * tf + tf * D) * 2   # double-buffered bf16 inputs
        + 2 * tm * D * out_bytes                 # double-buffered output
        + tm * D * 4                             # f32 accumulator
    )


def _vmem_cap():
    return {"v5e": 100 << 20, "v6e": 100 << 20,
            "v7x": 52 << 20, "unknown": 48 << 20}[_tpu_generation()]


def _tile_plan(M, D, F, out_bytes):
    """Pick (tm, tf, vmem_limit) for the current TPU generation.

    Weight-DMA/MXU balance points: tm ~ 240 (v5e), ~700 (v6e), ~600/TC (v7x).
    tm stays a multiple of the MXU input width (128 on v5e, 256 on v6e/v7x).
    """
    gen = _tpu_generation()
    if gen == "v5e":
        tm_pref, tf_pref, tm_quantum = 256, 512, 128
    elif gen == "v6e":
        tm_pref, tf_pref, tm_quantum = 768, 512, 256
    elif gen == "v7x":
        tm_pref, tf_pref, tm_quantum = 512, 384, 256
    else:                                   # unknown -> conservative, v7x-safe
        tm_pref, tf_pref, tm_quantum = 512, 512, 128
    vmem_cap = _vmem_cap()

    # tf: largest multiple of 128 that divides F and is <= tf_pref.
    tf = 0
    cand = (min(tf_pref, F) // 128) * 128
    while cand >= 128:
        if F % cand == 0:
            tf = cand
            break
        cand -= 128
    if tf == 0:
        # Awkward F: largest divisor of F that is a multiple of 8, else F.
        cand = (min(tf_pref, F) // 8) * 8
        while cand >= 8:
            if F % cand == 0:
                tf = cand
                break
            cand -= 8
        if tf == 0:
            tf = F

    # tm: preferred size, rounded down to what M actually needs.
    if M >= tm_pref:
        tm = tm_pref
    else:
        tm = ((M + 7) // 8) * 8            # single M tile, (8,128)-aligned

    # Shrink until the tile plan fits the generation's VMEM budget.
    while _vmem_need(tm, tf, D, out_bytes) > vmem_cap and tm > tm_quantum:
        tm = max(tm_quantum, tm - tm_quantum)
    while (_vmem_need(tm, tf, D, out_bytes) > vmem_cap
           and tf >= 256 and (tf // 2) % 8 == 0 and F % (tf // 2) == 0):
        tf //= 2

    need = _vmem_need(tm, tf, D, out_bytes)
    vmem_limit = int(min(vmem_cap, max(int(1.5 * need), 16 << 20)))
    vmem_limit = max(vmem_limit, int(1.15 * need))   # never under-provision
    return tm, tf, vmem_limit


# ----------------------------- weight packing (do ONCE at load) --------------

def pack_ffn_weights(w1, w3, w2, tf):
    """Fuse w1/w3 into per-FFN-tile [w1_tile | w3_tile] slabs, cast to bf16.

    w1, w3 : (D, F)  (nn.Linear weights pre-transposed to (in, out))
    w2     : (F, D)
    Returns (w13_packed (nf*D, 2*tf) bf16, w2 (F, D) bf16).
    """
    D, F = w1.shape
    assert F % tf == 0, (F, tf)
    nf = F // tf
    w13 = jnp.concatenate([w1.reshape(D, nf, tf), w3.reshape(D, nf, tf)], axis=-1)
    w13 = jnp.transpose(w13, (1, 0, 2)).reshape(nf * D, 2 * tf)
    return w13.astype(jnp.bfloat16), w2.astype(jnp.bfloat16)


# ----------------------------- Pallas kernel ---------------------------------

def _swiglu_ffn_kernel(x_ref, w13_ref, w2_ref, o_ref, acc_ref, *, tf):
    """One (M-tile, FFN-tile) grid step of the SwiGLU FFN.

    x_ref   : (tm, D)     bf16  activations (resident across the FFN axis)
    w13_ref : (D, 2*tf)   bf16  fused [w1_tile | w3_tile] up-projection tile
    w2_ref  : (tf, D)     bf16  down-projection tile
    o_ref   : (tm, D)           written on the last FFN step
    acc_ref : (tm, D)     f32   VMEM accumulator across the FFN axis
    """
    j = pl.program_id(1)

    @pl.when(j == 0)
    def _init():
        acc_ref[...] = jnp.zeros_like(acc_ref)

    # Single MXU pass for both up-projections of this FFN tile: (tm, 2*tf) f32.
    h13 = jnp.dot(x_ref[...], w13_ref[...], preferred_element_type=jnp.float32)
    h1 = h13[:, :tf]          # 128-aligned static slices
    h3 = h13[:, tf:]
    # SwiGLU gate in f32 (VPU + EUP sigmoid).
    h = (h1 * jax.nn.sigmoid(h1)) * h3
    # Down-projection tile, accumulated in f32; bf16 operands for the MXU.
    acc_ref[...] += jnp.dot(
        h.astype(jnp.bfloat16), w2_ref[...], preferred_element_type=jnp.float32
    )

    @pl.when(j == pl.num_programs(1) - 1)
    def _finalize():
        o_ref[...] = acc_ref[...].astype(o_ref.dtype)


# ----------------------------- pallas_call wrapper ---------------------------

def feed_forward_packed(x, w13, w2b, *, tm, tf, vmem_limit):
    """y = (silu(x @ w1) * (x @ w3)) @ w2, with pre-packed bf16 weights.

    x    : (..., D)
    w13  : (nf*D, 2*tf) bf16   from pack_ffn_weights
    w2b  : (F, D)       bf16
    """
    orig_shape = x.shape
    D = x.shape[-1]
    F, D2 = w2b.shape
    assert D2 == D, (w2b.shape, D)
    assert F % tf == 0, (F, tf)
    nf = F // tf
    assert w13.shape == (nf * D, 2 * tf), (w13.shape, nf, D, tf)
    if nf > 1:
        assert D % 8 == 0, "d_model must be a multiple of 8 when tiling the FFN dim"

    M = int(x.size // D)
    x2d = x.reshape(M, D).astype(jnp.bfloat16)

    # Clamp tm to what this call actually needs (shapes are static at trace time).
    if M < tm:
        tm = ((M + 7) // 8) * 8
    m_pad = (-M) % tm
    if m_pad:
        # TODO(synk): handle the ragged last M tile with a masked in-kernel write
        # instead of padding (pad rows are cheap here: silu(0)*0 == 0).
        x2d = jnp.pad(x2d, ((0, m_pad), (0, 0)))
    Mp = M + m_pad
    n_m = Mp // tm

    out_bytes = jnp.dtype(x.dtype).itemsize
    cost = pl.CostEstimate(
        flops=int(6 * Mp * D * F),
        transcendentals=int(Mp * F),
        bytes_accessed=int(Mp * D * 2            # x read (bf16)
                           + n_m * 3 * D * F * 2  # weights re-streamed per M-tile
                           + Mp * D * out_bytes), # output write
    )

    out = pl.pallas_call(
        functools.partial(_swiglu_ffn_kernel, tf=tf),
        grid=(n_m, nf),
        in_specs=[
            pl.BlockSpec((tm, D), lambda i, j: (i, 0)),       # x (resident over j)
            pl.BlockSpec((D, 2 * tf), lambda i, j: (j, 0)),   # fused [w1|w3] tile
            pl.BlockSpec((tf, D), lambda i, j: (j, 0)),       # w2 tile
        ],
        out_specs=pl.BlockSpec((tm, D), lambda i, j: (i, 0)),
        out_shape=jax.ShapeDtypeStruct((Mp, D), x.dtype),
        scratch_shapes=[pltpu.VMEM((tm, D), jnp.float32)],
        compiler_params=pltpu.CompilerParams(
            dimension_semantics=("parallel", "arbitrary"),
            vmem_limit_bytes=int(vmem_limit),
        ),
        cost_estimate=cost,
    )(x2d, w13, w2b)

    if m_pad:
        out = out[:M]
    return out.reshape(orig_shape)


def feed_forward(x, w1, w3, w2):
    """One-shot convenience wrapper (plans, packs, and calls).  For hot paths,
    call pack_ffn_weights once and jit feed_forward_packed instead."""
    D = x.shape[-1]
    F = w1.shape[1]
    M = int(x.size // D)
    tm, tf, vmem_limit = _tile_plan(M, D, F, jnp.dtype(x.dtype).itemsize)
    w13, w2b = pack_ffn_weights(w1, w3, w2, tf)
    return feed_forward_packed(x, w13, w2b, tm=tm, tf=tf, vmem_limit=vmem_limit)


# ----------------------------- reference -------------------------------------

def feed_forward_ref(x, w1, w3, w2):
    # Matches the kernel's dtype path: bf16 matmul operands, f32 accumulation,
    # f32 SwiGLU gate.
    f32 = jnp.float32
    xb = x.astype(jnp.bfloat16).astype(f32)
    h1 = xb @ w1.astype(jnp.bfloat16).astype(f32)
    h3 = xb @ w3.astype(jnp.bfloat16).astype(f32)
    h = (h1 * jax.nn.sigmoid(h1)) * h3
    y = h.astype(jnp.bfloat16).astype(f32) @ w2.astype(jnp.bfloat16).astype(f32)
    return y.astype(x.dtype)


# ----------------------------- main -------------------------------------------

if __name__ == "__main__":
    B, S, D, FFN = 2, 128, 256, 512   # batch, seq, d_model, d_ffn

    key = jax.random.PRNGKey(0)
    kx, k1, k2, k3 = jax.random.split(key, 4)

    # nn.Linear weights are (out, in); stored pre-transposed to (in, out) so
    # the kernel computes x @ W_t == x @ W.T (same math as the torch module).
    w1 = 0.05 * jax.random.normal(k1, (D, FFN), jnp.float32)
    w3 = 0.05 * jax.random.normal(k3, (D, FFN), jnp.float32)
    w2 = 0.05 * jax.random.normal(k2, (FFN, D), jnp.float32)
    x = jax.random.normal(kx, (B, S, D), jnp.float32)

    # --- hoisted path: plan + pack ONCE (weight-load time), jit only the call.
    M = B * S
    tm, tf, vmem_limit = _tile_plan(M, D, FFN, jnp.dtype(x.dtype).itemsize)
    w13, w2b = pack_ffn_weights(w1, w3, w2, tf)
    ffn = jax.jit(functools.partial(
        feed_forward_packed, tm=tm, tf=tf, vmem_limit=vmem_limit))

    y = ffn(x, w13, w2b)
    jax.block_until_ready(y)
    assert y.shape == (B, S, D)

    y_ref = feed_forward_ref(x, w1, w3, w2)
    max_err = float(jnp.max(jnp.abs(y - y_ref)))
    assert max_err < 1e-2, f"max abs error {max_err}"

    print("KERNEL_OK")
</pallas_src>

<mosaic_0001>
module attributes {stable_mosaic.version = 11 : i64} {
  func.func @_swiglu_ffn_kernel(%arg0: i32, %arg1: i32, %arg2: memref<256x256xbf16, #tpu.memory_space<vmem>>, %arg3: memref<256x1024xbf16, #tpu.memory_space<vmem>>, %arg4: memref<512x256xbf16, #tpu.memory_space<vmem>>, %arg5: memref<256x256xf32, #tpu.memory_space<vmem>>, %arg6: memref<256x256xf32, #tpu.memory_space<vmem>>) attributes {dimension_semantics = [#tpu.dimension_semantics<parallel>, #tpu.dimension_semantics<arbitrary>], iteration_bounds = array<i64: 1, 1>, scalar_prefetch = 0 : i64, scratch_operands = 1 : i64, tpu.core_type = #tpu.core_type<tc>, window_params = [{transform_indices = @transform_0, window_bounds = array<i64: 256, 256>}, {transform_indices = @transform_1, window_bounds = array<i64: 256, 1024>}, {transform_indices = @transform_2, window_bounds = array<i64: 512, 256>}, {transform_indices = @transform_3, window_bounds = array<i64: 256, 256>}]} {
    %c0_i32 = arith.constant 0 : i32
    %0 = arith.cmpi eq, %arg1, %c0_i32 : i32
    %1 = arith.extui %0 : i1 to i32
    %c0_i32_0 = arith.constant 0 : i32
    %2 = arith.cmpi ne, %1, %c0_i32_0 : i32
    scf.if %2 {
      %cst_14 = arith.constant 0.000000e+00 : f32
      %24 = vector.broadcast %cst_14 : f32 to vector<256x256xf32>
      %c0_15 = arith.constant 0 : index
      %c0_16 = arith.constant 0 : index
      %25 = vector.load %arg6[%c0_15, %c0_16] : memref<256x256xf32, #tpu.memory_space<vmem>>, vector<256x256xf32>
      tpu.vector_store %arg6[%c0_15, %c0_16], %24 {strides = array<i32>} : memref<256x256xf32, #tpu.memory_space<vmem>>, vector<256x256xf32>,
    } else {
    }
    %c0 = arith.constant 0 : index
    %c0_1 = arith.constant 0 : index
    %3 = vector.load %arg2[%c0, %c0_1] : memref<256x256xbf16, #tpu.memory_space<vmem>>, vector<256x256xbf16>
    %c0_2 = arith.constant 0 : index
    %c0_3 = arith.constant 0 : index
    %4 = vector.load %arg3[%c0_2, %c0_3] : memref<256x1024xbf16, #tpu.memory_space<vmem>>, vector<256x1024xbf16>
    %cst = arith.constant dense<0.000000e+00> : vector<256x1024xf32>
    %5 = tpu.matmul %3, %4, %cst {dimension_numbers = #tpu.dot_dimension_numbers<[1], [0], [0], [1], [0, 0, 1, 1], [], []>} : vector<256x256xbf16>, vector<256x1024xbf16>, vector<256x1024xf32> -> vector<256x1024xf32>
    %6 = vector.extract_strided_slice %5 {offsets = [0, 0], sizes = [256, 512], strides = [1, 1]} : vector<256x1024xf32> to vector<256x512xf32>
    %7 = vector.extract_strided_slice %5 {offsets = [0, 512], sizes = [256, 512], strides = [1, 1]} : vector<256x1024xf32> to vector<256x512xf32>
    %8 = arith.negf %6 : vector<256x512xf32>
    %9 = math.exp %8 : vector<256x512xf32>
    %cst_4 = arith.constant 1.000000e+00 : f32
    %10 = vector.broadcast %cst_4 : f32 to vector<256x512xf32>
    %11 = arith.addf %10, %9 : vector<256x512xf32>
    %12 = arith.divf %10, %11 : vector<256x512xf32>
    %13 = arith.mulf %6, %12 : vector<256x512xf32>
    %14 = arith.mulf %13, %7 : vector<256x512xf32>
    %c0_5 = arith.constant 0 : index
    %c0_6 = arith.constant 0 : index
    %15 = vector.load %arg6[%c0_5, %c0_6] : memref<256x256xf32, #tpu.memory_space<vmem>>, vector<256x256xf32>
    %16 = arith.truncf %14 : vector<256x512xf32> to vector<256x512xbf16>
    %c0_7 = arith.constant 0 : index
    %c0_8 = arith.constant 0 : index
    %17 = vector.load %arg4[%c0_7, %c0_8] : memref<512x256xbf16, #tpu.memory_space<vmem>>, vector<512x256xbf16>
    %cst_9 = arith.constant dense<0.000000e+00> : vector<256x256xf32>
    %18 = tpu.matmul %16, %17, %cst_9 {dimension_numbers = #tpu.dot_dimension_numbers<[1], [0], [0], [1], [0, 0, 1, 1], [], []>} : vector<256x512xbf16>, vector<512x256xbf16>, vector<256x256xf32> -> vector<256x256xf32>
    %19 = arith.addf %15, %18 : vector<256x256xf32>
    %c0_10 = arith.constant 0 : index
    %c0_11 = arith.constant 0 : index
    %20 = vector.load %arg6[%c0_10, %c0_11] : memref<256x256xf32, #tpu.memory_space<vmem>>, vector<256x256xf32>
    tpu.vector_store %arg6[%c0_10, %c0_11], %19 {strides = array<i32>} : memref<256x256xf32, #tpu.memory_space<vmem>>, vector<256x256xf32>,
    %c0_i32_12 = arith.constant 0 : i32
    %21 = arith.cmpi eq, %arg1, %c0_i32_12 : i32
    %22 = arith.extui %21 : i1 to i32
    %c0_i32_13 = arith.constant 0 : i32
    %23 = arith.cmpi ne, %22, %c0_i32_13 : i32
    scf.if %23 {
      %c0_14 = arith.constant 0 : index
      %c0_15 = arith.constant 0 : index
      %24 = vector.load %arg6[%c0_14, %c0_15] : memref<256x256xf32, #tpu.memory_space<vmem>>, vector<256x256xf32>
      %c0_16 = arith.constant 0 : index
      %c0_17 = arith.constant 0 : index
      %25 = vector.load %arg5[%c0_16, %c0_17] : memref<256x256xf32, #tpu.memory_space<vmem>>, vector<256x256xf32>
      tpu.vector_store %arg5[%c0_16, %c0_17], %24 {strides = array<i32>} : memref<256x256xf32, #tpu.memory_space<vmem>>, vector<256x256xf32>,
    } else {
    }
    return
  }
  func.func @transform_0(%arg0: i32, %arg1: i32) -> (i32, i32) {
    %c0_i32 = arith.constant 0 : i32
    %c0_i32_0 = arith.constant 0 : i32
    return %arg0, %c0_i32 : i32, i32
  }
  func.func @transform_1(%arg0: i32, %arg1: i32) -> (i32, i32) {
    %c0_i32 = arith.constant 0 : i32
    %c0_i32_0 = arith.constant 0 : i32
    return %arg1, %c0_i32 : i32, i32
  }
  func.func @transform_2(%arg0: i32, %arg1: i32) -> (i32, i32) {
    %c0_i32 = arith.constant 0 : i32
    %c0_i32_0 = arith.constant 0 : i32
    return %arg1, %c0_i32 : i32, i32
  }
  func.func @transform_3(%arg0: i32, %arg1: i32) -> (i32, i32) {
    %c0_i32 = arith.constant 0 : i32
    %c0_i32_0 = arith.constant 0 : i32
    return %arg0, %c0_i32 : i32, i32
  }
}

</mosaic_0001>

<bundles_post_ra>
// kernel: feed_forward_packed.1
= control target key start
LH: loop header
LB: loop body
LE: loop exit
PB: predicated region body
PF: predicated region fallthrough
CT: control target
= control target key end

     0   :  { %8 = vsyncpa [#allocation4], 0  ;;  %s14895_s0 = inlined_call_operand.vmem [shape: bf16[256,256], index: 0, kind: input, shape index: {}]   ;;  %s14896_s1 = inlined_call_operand.hbm [shape: bf16[256,1024], index: 1, kind: input, shape index: {}]   ;;  %s14897_s2 = inlined_call_operand.vmem [shape: bf16[512,256], index: 2, kind: input, shape index: {}]   ;;  %s14898_s3 = inlined_call_operand.hbm [shape: f32[256,256], index: 3, kind: output, shape index: {}]  }
   0x1   :  { %9 = vsyncpa [#allocation5], 0  ;;  %s16_s14 = sshll.u32 %s14896_s1, 4  ;;  %s8491_s15 = smov [#allocation3]   ;;  %s17_s14 = int_to_ptr.hbm [resolvable:$true] %s16_s14 }
   0x2   :  { %s18_s16 = sshll.u32 %s8491_s15, 4  ;;  %s8492_s17 = smov 512   ;;  %s19_s16 = int_to_ptr.vmem [resolvable:$true] %s18_s16 }
   0x3   :  { %s8493_s18 = smov 32  }
   0x4   :  { %24 = dma.hbm_to_vmem [thread:$0]  %s17_s14, 16384, %s19_s16, [#allocation4], %s8492_s17, %s8492_s17, %s8493_s18  }
   0x5   :  { %8487 = dma.done.wait [#allocation4], 16384  }
   0x6   :  { %8488 = vsyncadd [#allocation4], 4294950912  ;;  %v7027_v0 = vld [vmem:[#allocation3 + $0x1c0] sm:$0xf]  ;;  %v7785_v5 = vld [vmem:[#allocation3 + $0x1c4] sm:$0xf] }
   0x7   :  { %v7789_v1 = vld [vmem:[#allocation3 + $0x1dc] sm:$0xf0]  ;;  %v7029_v6 = vld [vmem:[#allocation3 + $0x1e0] sm:$0xf0]  ;;  %s6660_s5 = sshll.u32 %s14898_s3, 4  ;;  %s8495_s6 = smov 256   ;;  %s6661_s5 = int_to_ptr.hbm [resolvable:$true] %s6660_s5 }
   0x8   :  { %v7283_v2 = vld [vmem:[#allocation3 + $0x3c0] sm:$0xf]  ;;  %v7028_v3 = vor.u32 %v7789_v1, %v7027_v0  ;;  %v7032_v8 = vor.u32 %v7785_v5, %v7029_v6  ;;  %v7849_v9 = vld [vmem:[#allocation3 + $0x3c4] sm:$0xf] }
   0x9   :  { %v7853_v4 = vld [vmem:[#allocation3 + $0x3dc] sm:$0xf0]  ;;  %v7285_v10 = vld [vmem:[#allocation3 + $0x3e0] sm:$0xf0] }
   0xa   :  { %v7284_v7 = vor.u32 %v7853_v4, %v7283_v2  ;;  %v6995_v11 = vld [vmem:[#allocation3 + $0x180] sm:$0xf]  ;;  %1059 = vmatpush.bf16.msra.mxu0 %v7028_v3  ;;  %v7288_v12 = vor.u32 %v7849_v9, %v7285_v10  ;;  %1237 = vmatpush.bf16.msra.mxu2 %v7032_v8  ;;  %v7777_v18 = vld [vmem:[#allocation3 + $0x184] sm:$0xf] }
   0xb   :  { %v7781_v13 = vld [vmem:[#allocation3 + $0x19c] sm:$0xf0]  ;;  %v6997_v19 = vld [vmem:[#allocation3 + $0x1a0] sm:$0xf0] }
   0xc   :  { %v7251_v14 = vld [vmem:[#allocation3 + $0x380] sm:$0xf]  ;;  %1148 = vmatpush.bf16.msra.mxu1 %v7284_v7  ;;  %v6996_v16 = vor.u32 %v7781_v13, %v6995_v11  ;;  %v7841_v20 = vld [vmem:[#allocation3 + $0x384] sm:$0xf]  ;;  %1326 = vmatpush.bf16.msra.mxu3 %v7288_v12  ;;  %v7000_v21 = vor.u32 %v7777_v18, %v6997_v19 }
   0xd   :  { %v7845_v15 = vld [vmem:[#allocation3 + $0x39c] sm:$0xf0]  ;;  %v7253_v22 = vld [vmem:[#allocation3 + $0x3a0] sm:$0xf0] }
   0xe   :  { %v7252_v17 = vor.u32 %v7845_v15, %v7251_v14  ;;  %v6963_v23 = vld [vmem:[#allocation3 + $0x140] sm:$0xf]  ;;  %v7256_v25 = vor.u32 %v7841_v20, %v7253_v22  ;;  %v7769_v28 = vld [vmem:[#allocation3 + $0x144] sm:$0xf]  ;;  %1060 = vmatpush.bf16.msra.mxu0 %v6996_v16  ;;  %1238 = vmatpush.bf16.msra.mxu2 %v7000_v21 }
   0xf   :  { %v7773_v24 = vld [vmem:[#allocation3 + $0x15c] sm:$0xf0]  ;;  %v6965_v30 = vld [vmem:[#allocation3 + $0x160] sm:$0xf0] }
  0x10   :  { %v7219_v26 = vld [vmem:[#allocation3 + $0x340] sm:$0xf]  ;;  %v6964_v29 = vor.u32 %v7773_v24, %v6963_v23  ;;  %v7833_v31 = vld [vmem:[#allocation3 + $0x344] sm:$0xf]  ;;  %1149 = vmatpush.bf16.msra.mxu1 %v7252_v17  ;;  %v6968_v34 = vor.u32 %v7769_v28, %v6965_v30  ;;  %1327 = vmatpush.bf16.msra.mxu3 %v7256_v25  ;;  %v7037_v30 = vld [vmem:[#allocation3 + $0x1e8] sm:$0xf0] }
  0x11   :  { %v7837_v27 = vld [vmem:[#allocation3 + $0x35c] sm:$0xf0]  ;;  %v7221_v32 = vld [vmem:[#allocation3 + $0x360] sm:$0xf0] }
  0x12   :  { %v7220_v33 = vor.u32 %v7837_v27, %v7219_v26  ;;  %v6931_v35 = vld [vmem:[#allocation3 + $0x100] sm:$0xf]  ;;  %v7224_v38 = vor.u32 %v7833_v31, %v7221_v32  ;;  %v7761_v40 = vld [vmem:[#allocation3 + $0x104] sm:$0xf]  ;;  %1061 = vmatpush.bf16.msra.mxu0 %v6964_v29  ;;  %1239 = vmatpush.bf16.msra.mxu2 %v6968_v34  ;;  %v7786_v29 = vld [vmem:[#allocation3 + $0x1cc] sm:$0xf] }
  0x13   :  { %v7765_v36 = vld [vmem:[#allocation3 + $0x11c] sm:$0xf0]  ;;  %v6933_v41 = vld [vmem:[#allocation3 + $0x120] sm:$0xf0]  ;;  %v7698_v32 = vld [vmem:[%s14895_s0 + $0x4] sm:$0xf0] }
  0x14   :  { %v7187_v37 = vld [vmem:[#allocation3 + $0x300] sm:$0xf]  ;;  %v7825_v42 = vld [vmem:[#allocation3 + $0x304] sm:$0xf]  ;;  %v6932_v44 = vor.u32 %v7765_v36, %v6931_v35  ;;  %1150 = vmatpush.bf16.msra.mxu1 %v7220_v33  ;;  %v6936_v46 = vor.u32 %v7761_v40, %v6933_v41  ;;  %1328 = vmatpush.bf16.msra.mxu3 %v7224_v38  ;;  %v7850_v33 = vld [vmem:[#allocation3 + $0x3cc] sm:$0xf]  ;;  %v7040_v40 = vor.u32 %v7786_v29, %v7037_v30 }
  0x15   :  { %v7829_v39 = vld [vmem:[#allocation3 + $0x31c] sm:$0xf0]  ;;  %v7189_v43 = vld [vmem:[#allocation3 + $0x320] sm:$0xf0]  ;;  %v7293_v34 = vld [vmem:[#allocation3 + $0x3e8] sm:$0xf0] }
  0x16   :  { %v7188_v45 = vor.u32 %v7829_v39, %v7187_v37  ;;  %v6899_v47 = vld [vmem:[#allocation3 + $0xc0] sm:$0xf]  ;;  %v7192_v50 = vor.u32 %v7825_v42, %v7189_v43  ;;  %v7753_v52 = vld [vmem:[#allocation3 + $0xc4] sm:$0xf]  ;;  %1062 = vmatpush.bf16.msra.mxu0 %v6932_v44  ;;  %1240 = vmatpush.bf16.msra.mxu2 %v6936_v46  ;;  %v6677_v38 = vld [vmem:[%s14895_s0 + $0x8] sm:$0xf0]  ;;  %v7296_v44 = vor.u32 %v7850_v33, %v7293_v34 }
  0x17   :  { %v7757_v48 = vld [vmem:[#allocation3 + $0xdc] sm:$0xf0]  ;;  %v6901_v53 = vld [vmem:[#allocation3 + $0xe0] sm:$0xf0]  ;;  %v7035_v41 = vld [vmem:[#allocation3 + $0x1c8] sm:$0xf] }
  0x18   :  { %v7155_v49 = vld [vmem:[#allocation3 + $0x2c0] sm:$0xf]  ;;  %v7817_v54 = vld [vmem:[#allocation3 + $0x2c4] sm:$0xf]  ;;  %v6900_v56 = vor.u32 %v7757_v48, %v6899_v47  ;;  %1151 = vmatpush.bf16.msra.mxu1 %v7188_v45  ;;  %v6904_v58 = vor.u32 %v7753_v52, %v6901_v53  ;;  %1329 = vmatpush.bf16.msra.mxu3 %v7192_v50  ;;  %v7790_v42 = vld [vmem:[#allocation3 + $0x1e4] sm:$0xf0] }
  0x19   :  { %v7821_v51 = vld [vmem:[#allocation3 + $0x2dc] sm:$0xf0]  ;;  %v7157_v55 = vld [vmem:[#allocation3 + $0x2e0] sm:$0xf0]  ;;  %v7291_v45 = vld [vmem:[#allocation3 + $0x3c8] sm:$0xf]  ;;  %v7036_v48 = vor.u32 %v7790_v42, %v7035_v41 }
  0x1a   :  { %v7156_v57 = vor.u32 %v7821_v51, %v7155_v49  ;;  %v6867_v59 = vld [vmem:[#allocation3 + $0x80] sm:$0xf]  ;;  %v7160_v62 = vor.u32 %v7817_v54, %v7157_v55  ;;  %v7745_v0 = vld [vmem:[#allocation3 + $0x84] sm:$0xf]  ;;  %1063 = vmatpush.bf16.msra.mxu0 %v6900_v56  ;;  %1241 = vmatpush.bf16.msra.mxu2 %v6904_v58  ;;  %v7854_v46 = vld [vmem:[#allocation3 + $0x3e4] sm:$0xf0] }
  0x1b   :  { %v7749_v60 = vld [vmem:[#allocation3 + $0x9c] sm:$0xf0]  ;;  %v6869_v1 = vld [vmem:[#allocation3 + $0xa0] sm:$0xf0]  ;;  %v7292_v49 = vor.u32 %v7854_v46, %v7291_v45  ;;  %v7778_v50 = vld [vmem:[#allocation3 + $0x18c] sm:$0xf] }
  0x1c   :  { %v7123_v61 = vld [vmem:[#allocation3 + $0x280] sm:$0xf]  ;;  %v7809_v2 = vld [vmem:[#allocation3 + $0x284] sm:$0xf]  ;;  %v6868_v4 = vor.u32 %v7749_v60, %v6867_v59  ;;  %1152 = vmatpush.bf16.msra.mxu1 %v7156_v57  ;;  %v6872_v6 = vor.u32 %v7745_v0, %v6869_v1  ;;  %1330 = vmatpush.bf16.msra.mxu3 %v7160_v62  ;;  %v7005_v51 = vld [vmem:[#allocation3 + $0x1a8] sm:$0xf0] }
  0x1d   :  { %v7813_v63 = vld [vmem:[#allocation3 + $0x29c] sm:$0xf0]  ;;  %v7125_v3 = vld [vmem:[#allocation3 + $0x2a0] sm:$0xf0]  ;;  %v7842_v52 = vld [vmem:[#allocation3 + $0x38c] sm:$0xf]  ;;  %v7008_v53 = vor.u32 %v7778_v50, %v7005_v51 }
  0x1e   :  { %v7124_v5 = vor.u32 %v7813_v63, %v7123_v61  ;;  %v6835_v7 = vld [vmem:[#allocation3 + $0x40] sm:$0xf]  ;;  %v7128_v10 = vor.u32 %v7809_v2, %v7125_v3  ;;  %v7737_v12 = vld [vmem:[#allocation3 + $0x44] sm:$0xf]  ;;  %1064 = vmatpush.bf16.msra.mxu0 %v6868_v4  ;;  %1242 = vmatpush.bf16.msra.mxu2 %v6872_v6  ;;  %v7261_v54 = vld [vmem:[#allocation3 + $0x3a8] sm:$0xf0] }
  0x1f   :  { %v7741_v8 = vld [vmem:[#allocation3 + $0x5c] sm:$0xf0]  ;;  %v6837_v13 = vld [vmem:[#allocation3 + $0x60] sm:$0xf0]  ;;  %v7003_v55 = vld [vmem:[#allocation3 + $0x188] sm:$0xf]  ;;  %v7264_v57 = vor.u32 %v7842_v52, %v7261_v54 }
  0x20   :  { %v7091_v9 = vld [vmem:[#allocation3 + $0x240] sm:$0xf]  ;;  %v7801_v14 = vld [vmem:[#allocation3 + $0x244] sm:$0xf]  ;;  %v6836_v16 = vor.u32 %v7741_v8, %v6835_v7  ;;  %1153 = vmatpush.bf16.msra.mxu1 %v7124_v5  ;;  %v6840_v20 = vor.u32 %v7737_v12, %v6837_v13  ;;  %1331 = vmatpush.bf16.msra.mxu3 %v7128_v10  ;;  %v7782_v56 = vld [vmem:[#allocation3 + $0x1a4] sm:$0xf0] }
  0x21   :  { %v7805_v11 = vld [vmem:[#allocation3 + $0x25c] sm:$0xf0]  ;;  %v7093_v15 = vld [vmem:[#allocation3 + $0x260] sm:$0xf0]  ;;  %v7004_v58 = vor.u32 %v7782_v56, %v7003_v55  ;;  %v7259_v59 = vld [vmem:[#allocation3 + $0x388] sm:$0xf] }
  0x22   :  { %v6803_v17 = vld [vmem:[#allocation3] sm:$0xf]  ;;  %v7092_v19 = vor.u32 %v7805_v11, %v7091_v9  ;;  %v7729_v23 = vld [vmem:[#allocation3 + $0x4] sm:$0xf]  ;;  %v7096_v24 = vor.u32 %v7801_v14, %v7093_v15  ;;  %1065 = vmatpush.bf16.msra.mxu0 %v6836_v16  ;;  %1243 = vmatpush.bf16.msra.mxu2 %v6840_v20  ;;  %v7846_v60 = vld [vmem:[#allocation3 + $0x3a4] sm:$0xf0] }
  0x23   :  { %v7733_v18 = vld [vmem:[#allocation3 + $0x1c] sm:$0xf0]  ;;  %v6805_v25 = vld [vmem:[#allocation3 + $0x20] sm:$0xf0]  ;;  %v7260_v61 = vor.u32 %v7846_v60, %v7259_v59  ;;  %v6683_v62 = vld [vmem:[%s14895_s0 + $0x10] sm:$0xf] }
  0x24   :  { %v7059_v21 = vld [vmem:[#allocation3 + $0x200] sm:$0xf]  ;;  %v7793_v26 = vld [vmem:[#allocation3 + $0x204] sm:$0xf]  ;;  %v6804_v31 = vor.u32 %v7733_v18, %v6803_v17  ;;  %1154 = vmatpush.bf16.msra.mxu1 %v7092_v19  ;;  %v6808_v36 = vor.u32 %v7729_v23, %v6805_v25  ;;  %1332 = vmatpush.bf16.msra.mxu3 %v7096_v24  ;;  %v7700_v63 = vld [vmem:[%s14895_s0 + $0x14] sm:$0xf0] }
  0x25   :  { %v7797_v22 = vld [vmem:[#allocation3 + $0x21c] sm:$0xf0]  ;;  %v7061_v27 = vld [vmem:[#allocation3 + $0x220] sm:$0xf0]  ;;  %v7699_v0 = vld [vmem:[%s14895_s0 + $0x14] sm:$0xf]  ;;  %v8552_v2 = vor.u32 %v7700_v63, %v6683_v62 }
  0x26   :  { %v6675_v28 = vld [vmem:[%s14895_s0] sm:$0xf]  ;;  %v7060_v35 = vor.u32 %v7797_v22, %v7059_v21  ;;  %v7697_v37 = vld [vmem:[%s14895_s0 + $0x4] sm:$0xf]  ;;  %v7064_v39 = vor.u32 %v7793_v26, %v7061_v27  ;;  %1066 = vmatpush.bf16.msra.mxu0 %v6804_v31  ;;  %1244 = vmatpush.bf16.msra.mxu2 %v6808_v36  ;;  %v6685_v1 = vld [vmem:[%s14895_s0 + $0x18] sm:$0xf0] }
  0x27   :  { %v8532_v43 = vor.u32 %v7698_v32, %v6675_v28  ;;  %v8534_v47 = vor.u32 %v7697_v37, %v6677_v38  ;;  %15130 = vst [vmem:[#allocation11_spill] sm:$0xff] %v8552_v2  ;;  %v8554_v3 = vor.u32 %v7699_v0, %v6685_v1  ;;  %v6691_v4 = vld [vmem:[%s14895_s0 + $0x20] sm:$0xf]  ;;  %v7702_v5 = vld [vmem:[%s14895_s0 + $0x24] sm:$0xf0] }
  0x28   :  { %1155 = vmatpush.bf16.msra.mxu1 %v7060_v35  ;;  %1333 = vmatpush.bf16.msra.mxu3 %v7064_v39  ;;  %v7701_v6 = vld [vmem:[%s14895_s0 + $0x24] sm:$0xf]  ;;  %v6693_v7 = vld [vmem:[%s14895_s0 + $0x28] sm:$0xf0]  ;;  %v8572_v8 = vor.u32 %v7702_v5, %v6691_v4  ;;  %v6971_v15 = vld [vmem:[#allocation3 + $0x148] sm:$0xf] }
  0x29   :  { %15128 = vst [vmem:[#allocation9_spill] sm:$0xff] %v8532_v43  ;;  %1067 = vmatmul.bf16.vlgmr.msra.gmra.mxu0 %v8532_v43  ;;  %1245 = vmatmul.bf16.vlgmr.msra.gmra.mxu2 %v8532_v43  ;;  %v8574_v9 = vor.u32 %v7701_v6, %v6693_v7  ;;  %v7770_v10 = vld [vmem:[#allocation3 + $0x14c] sm:$0xf]  ;;  %v7774_v16 = vld [vmem:[#allocation3 + $0x164] sm:$0xf0] }
  0x2a   :  { %15129 = vst [vmem:[#allocation10_spill] sm:$0xff] %v8534_v47  ;;  %1593 = vmatpush.bf16.msrb.mxu2 %v7040_v40  ;;  %1415 = vmatpush.bf16.msrb.mxu0 %v7036_v48  ;;  %v6973_v11 = vld [vmem:[#allocation3 + $0x168] sm:$0xf0]  ;;  %v6972_v18 = vor.u32 %v7774_v16, %v6971_v15  ;;  %v7227_v19 = vld [vmem:[#allocation3 + $0x348] sm:$0xf] }
  0x2b   :  { %1156 = vmatmul.bf16.vlgmr.msra.gmra.mxu1 %v8534_v47  ;;  %1334 = vmatmul.bf16.vlgmr.msra.gmra.mxu3 %v8534_v47  ;;  %15131 = vst [vmem:[#allocation12_spill] sm:$0xff] %v8554_v3  ;;  %v7834_v12 = vld [vmem:[#allocation3 + $0x34c] sm:$0xf]  ;;  %v6976_v13 = vor.u32 %v7770_v10, %v6973_v11  ;;  %v7838_v20 = vld [vmem:[#allocation3 + $0x364] sm:$0xf0] }
  0x2c   :  { %1682 = vmatpush.bf16.msrb.mxu3 %v7296_v44  ;;  %1504 = vmatpush.bf16.msrb.mxu1 %v7292_v49  ;;  %15132 = vst [vmem:[#allocation13_spill] sm:$0xff] %v8572_v8  ;;  %v7229_v14 = vld [vmem:[#allocation3 + $0x368] sm:$0xf0]  ;;  %v7228_v21 = vor.u32 %v7838_v20, %v7227_v19  ;;  %v6699_v22 = vld [vmem:[%s14895_s0 + $0x30] sm:$0xf] }
  0x2d   :  { %15133 = vst [vmem:[#allocation14_spill] sm:$0xff] %v8574_v9  ;;  %v7232_v17 = vor.u32 %v7834_v12, %v7229_v14  ;;  %v7704_v23 = vld [vmem:[%s14895_s0 + $0x34] sm:$0xf0]  ;;  %v7703_v24 = vld [vmem:[%s14895_s0 + $0x34] sm:$0xf] }
  0x2e   :  { %1594 = vmatpush.bf16.msrb.mxu2 %v7008_v53  ;;  %1416 = vmatpush.bf16.msrb.mxu0 %v7004_v58  ;;  %v6701_v25 = vld [vmem:[%s14895_s0 + $0x38] sm:$0xf0]  ;;  %v8592_v26 = vor.u32 %v7704_v23, %v6699_v22  ;;  %v6707_v28 = vld [vmem:[%s14895_s0 + $0x40] sm:$0xf]  ;;  %v7706_v29 = vld [vmem:[%s14895_s0 + $0x44] sm:$0xf0] }
  0x2f   :  { %v8594_v27 = vor.u32 %v7703_v24, %v6701_v25  ;;  %v7705_v30 = vld [vmem:[%s14895_s0 + $0x44] sm:$0xf]  ;;  %v6709_v31 = vld [vmem:[%s14895_s0 + $0x48] sm:$0xf0]  ;;  %v8612_v32 = vor.u32 %v7706_v29, %v6707_v28  ;;  %v6939_v39 = vld [vmem:[#allocation3 + $0x108] sm:$0xf] }
  0x30   :  { %1683 = vmatpush.bf16.msrb.mxu3 %v7264_v57  ;;  %1505 = vmatpush.bf16.msrb.mxu1 %v7260_v61  ;;  %15134 = vst [vmem:[#allocation15_spill] sm:$0xff] %v8592_v26  ;;  %v8614_v33 = vor.u32 %v7705_v30, %v6709_v31  ;;  %v7762_v34 = vld [vmem:[#allocation3 + $0x10c] sm:$0xf]  ;;  %v7766_v40 = vld [vmem:[#allocation3 + $0x124] sm:$0xf0] }
  0x31   :  { %15135 = vst [vmem:[#allocation16_spill] sm:$0xff] %v8594_v27  ;;  %v6941_v35 = vld [vmem:[#allocation3 + $0x128] sm:$0xf0]  ;;  %v6940_v42 = vor.u32 %v7766_v40, %v6939_v39  ;;  %v7195_v44 = vld [vmem:[#allocation3 + $0x308] sm:$0xf] }
  0x32   :  { %1595 = vmatpush.bf16.msrb.mxu2 %v6976_v13  ;;  %1417 = vmatpush.bf16.msrb.mxu0 %v6972_v18  ;;  %15136 = vst [vmem:[#allocation17_spill] sm:$0xff] %v8612_v32  ;;  %v7826_v36 = vld [vmem:[#allocation3 + $0x30c] sm:$0xf]  ;;  %v6944_v37 = vor.u32 %v7762_v34, %v6941_v35  ;;  %v7830_v45 = vld [vmem:[#allocation3 + $0x324] sm:$0xf0] }
  0x33   :  { %15137 = vst [vmem:[#allocation18_spill] sm:$0xff] %v8614_v33  ;;  %v7197_v38 = vld [vmem:[#allocation3 + $0x328] sm:$0xf0]  ;;  %v7196_v46 = vor.u32 %v7830_v45, %v7195_v44  ;;  %v6715_v48 = vld [vmem:[%s14895_s0 + $0x50] sm:$0xf] }
  0x34   :  { %1684 = vmatpush.bf16.msrb.mxu3 %v7232_v17  ;;  %1506 = vmatpush.bf16.msrb.mxu1 %v7228_v21  ;;  %v7200_v41 = vor.u32 %v7826_v36, %v7197_v38  ;;  %v7708_v49 = vld [vmem:[%s14895_s0 + $0x54] sm:$0xf0]  ;;  %v7707_v50 = vld [vmem:[%s14895_s0 + $0x54] sm:$0xf]  ;;  %v6717_v51 = vld [vmem:[%s14895_s0 + $0x58] sm:$0xf0] }
  0x35   :  { %v8632_v52 = vor.u32 %v7708_v49, %v6715_v48  ;;  %v8634_v53 = vor.u32 %v7707_v50, %v6717_v51  ;;  %v6723_v54 = vld [vmem:[%s14895_s0 + $0x60] sm:$0xf]  ;;  %v7710_v55 = vld [vmem:[%s14895_s0 + $0x64] sm:$0xf0]  ;;  %v7709_v56 = vld [vmem:[%s14895_s0 + $0x64] sm:$0xf] }
  0x36   :  { %1596 = vmatpush.bf16.msrb.mxu2 %v6944_v37  ;;  %1418 = vmatpush.bf16.msrb.mxu0 %v6940_v42  ;;  %v6725_v57 = vld [vmem:[%s14895_s0 + $0x68] sm:$0xf0]  ;;  %v8652_v58 = vor.u32 %v7710_v55, %v6723_v54  ;;  %v6731_v60 = vld [vmem:[%s14895_s0 + $0x70] sm:$0xf]  ;;  %v7712_v61 = vld [vmem:[%s14895_s0 + $0x74] sm:$0xf0] }
  0x37   :  { %15138 = vst [vmem:[#allocation19_spill] sm:$0xff] %v8632_v52  ;;  %v8654_v59 = vor.u32 %v7709_v56, %v6725_v57  ;;  %v7711_v62 = vld [vmem:[%s14895_s0 + $0x74] sm:$0xf]  ;;  %v6733_v63 = vld [vmem:[%s14895_s0 + $0x78] sm:$0xf0]  ;;  %v8672_v0 = vor.u32 %v7712_v61, %v6731_v60 }
  0x38   :  { %1685 = vmatpush.bf16.msrb.mxu3 %v7200_v41  ;;  %1507 = vmatpush.bf16.msrb.mxu1 %v7196_v46  ;;  %15139 = vst [vmem:[#allocation20_spill] sm:$0xff] %v8634_v53  ;;  %v8674_v1 = vor.u32 %v7711_v62, %v6733_v63  ;;  %v6739_v4 = vld [vmem:[%s14895_s0 + $0x80] sm:$0xf]  ;;  %v7714_v5 = vld [vmem:[%s14895_s0 + $0x84] sm:$0xf0] }
  0x39   :  { %1072 = vmatmul.bf16.gmra.mxu0 %v8552_v2  ;;  %1250 = vmatmul.bf16.gmra.mxu2 %v8552_v2  ;;  %15140 = vst [vmem:[#allocation21_spill] sm:$0xff] %v8652_v58  ;;  %v7713_v6 = vld [vmem:[%s14895_s0 + $0x84] sm:$0xf]  ;;  %v6741_v7 = vld [vmem:[%s14895_s0 + $0x88] sm:$0xf0]  ;;  %v8692_v10 = vor.u32 %v7714_v5, %v6739_v4 }
  0x3a   :  { %15141 = vst [vmem:[#allocation22_spill] sm:$0xff] %v8654_v59  ;;  %v8694_v12 = vor.u32 %v7713_v6, %v6741_v7  ;;  %v7754_v13 = vld [vmem:[#allocation3 + $0xcc] sm:$0xf]  ;;  %v6907_v22 = vld [vmem:[#allocation3 + $0xc8] sm:$0xf] }
  0x3b   :  { %1161 = vmatmul.bf16.gmra.mxu1 %v8554_v3  ;;  %1339 = vmatmul.bf16.gmra.mxu3 %v8554_v3  ;;  %15142 = vst [vmem:[#allocation23_spill] sm:$0xff] %v8672_v0  ;;  %v6909_v14 = vld [vmem:[#allocation3 + $0xe8] sm:$0xf0]  ;;  %v7758_v23 = vld [vmem:[#allocation3 + $0xe4] sm:$0xf0] }
  0x3c   :  { %15143 = vst [vmem:[#allocation24_spill] sm:$0xff] %v8674_v1  ;;  %v7818_v15 = vld [vmem:[#allocation3 + $0x2cc] sm:$0xf]  ;;  %v6912_v17 = vor.u32 %v7754_v13, %v6909_v14  ;;  %v7163_v24 = vld [vmem:[#allocation3 + $0x2c8] sm:$0xf]  ;;  %v6908_v28 = vor.u32 %v7758_v23, %v6907_v22 }
  0x3d   :  { %15144 = vst [vmem:[#allocation25_spill] sm:$0xff] %v8692_v10  ;;  %v7165_v18 = vld [vmem:[#allocation3 + $0x2e8] sm:$0xf0]  ;;  %v7822_v29 = vld [vmem:[#allocation3 + $0x2e4] sm:$0xf0] }
  0x3e   :  { %15145 = vst [vmem:[#allocation26_spill] sm:$0xff] %v8694_v12  ;;  %v7168_v20 = vor.u32 %v7818_v15, %v7165_v18  ;;  %1597 = vmatpush.bf16.msrb.mxu2 %v6912_v17  ;;  %v7164_v34 = vor.u32 %v7822_v29, %v7163_v24  ;;  %1419 = vmatpush.bf16.msrb.mxu0 %v6908_v28  ;;  %v6747_v37 = vld [vmem:[%s14895_s0 + $0x90] sm:$0xf]  ;;  %v7716_v38 = vld [vmem:[%s14895_s0 + $0x94] sm:$0xf0] }
  0x3f   :  { %v7715_v39 = vld [vmem:[%s14895_s0 + $0x94] sm:$0xf]  ;;  %v6749_v40 = vld [vmem:[%s14895_s0 + $0x98] sm:$0xf0]  ;;  %v8718_v42 = vor.u32 %v7716_v38, %v6747_v37  ;;  %v6755_v60 = vld [vmem:[%s14895_s0 + $0xa0] sm:$0xf] }
  0x40   :  { %1686 = vmatpush.bf16.msrb.mxu3 %v7168_v20  ;;  %1508 = vmatpush.bf16.msrb.mxu1 %v7164_v34  ;;  %v8720_v46 = vor.u32 %v7715_v39, %v6749_v40  ;;  %v7718_v61 = vld [vmem:[%s14895_s0 + $0xa4] sm:$0xf0]  ;;  %v7717_v62 = vld [vmem:[%s14895_s0 + $0xa4] sm:$0xf]  ;;  %v6757_v63 = vld [vmem:[%s14895_s0 + $0xa8] sm:$0xf0] }
  0x41   :  { %15146 = vst [vmem:[#allocation27_spill] sm:$0xff] %v8718_v42  ;;  %v8748_v5 = vor.u32 %v7718_v61, %v6755_v60  ;;  %v7746_v17 = vld [vmem:[#allocation3 + $0x8c] sm:$0xf]  ;;  %v7720_v34 = vld [vmem:[%s14895_s0 + $0xb4] sm:$0xf0] }
  0x42   :  { %15147 = vst [vmem:[#allocation28_spill] sm:$0xff] %v8720_v46  ;;  %v7810_v22 = vld [vmem:[#allocation3 + $0x28c] sm:$0xf]  ;;  %v6765_v37 = vld [vmem:[%s14895_s0 + $0xb8] sm:$0xf0] }
  0x43   :  { %15148 = vst [vmem:[#allocation29_spill] sm:$0xff] %v8748_v5  ;;  %v7133_v23 = vld [vmem:[#allocation3 + $0x2a8] sm:$0xf0]  ;;  %v6875_v38 = vld [vmem:[#allocation3 + $0x88] sm:$0xf] }
  0x44   :  { %v7136_v28 = vor.u32 %v7810_v22, %v7133_v23  ;;  %v7750_v39 = vld [vmem:[#allocation3 + $0xa4] sm:$0xf0]  ;;  %v6773_v22 = vld [vmem:[%s14895_s0 + $0xc8] sm:$0xf0] }
  0x45   :  { %v7814_v60 = vld [vmem:[#allocation3 + $0x2a4] sm:$0xf0] }
  0x46   :  { %1687 = vmatpush.bf16.msrb.mxu3 %v7136_v28 }
  0x49   :  { %1077 = vmatmul.bf16.gmra.mxu0 %v8572_v8  ;;  %1255 = vmatmul.bf16.gmra.mxu2 %v8572_v8 }
  0x4b   :  { %1166 = vmatmul.bf16.gmra.mxu1 %v8574_v9  ;;  %1344 = vmatmul.bf16.gmra.mxu3 %v8574_v9 }
  0x59   :  { %1082 = vmatmul.bf16.gmra.mxu0 %v8592_v26  ;;  %1260 = vmatmul.bf16.gmra.mxu2 %v8592_v26 }
  0x5b   :  { %1171 = vmatmul.bf16.gmra.mxu1 %v8594_v27  ;;  %1349 = vmatmul.bf16.gmra.mxu3 %v8594_v27 }
  0x69   :  { %1087 = vmatmul.bf16.gmra.mxu0 %v8612_v32  ;;  %1265 = vmatmul.bf16.gmra.mxu2 %v8612_v32 }
  0x6b   :  { %1176 = vmatmul.bf16.gmra.mxu1 %v8614_v33  ;;  %1354 = vmatmul.bf16.gmra.mxu3 %v8614_v33 }
  0x79   :  { %1092 = vmatmul.bf16.gmra.mxu0 %v8632_v52  ;;  %1270 = vmatmul.bf16.gmra.mxu2 %v8632_v52 }
  0x7b   :  { %1181 = vmatmul.bf16.gmra.mxu1 %v8634_v53  ;;  %1359 = vmatmul.bf16.gmra.mxu3 %v8634_v53 }
  0x89   :  { %1097 = vmatmul.bf16.gmra.mxu0 %v8652_v58  ;;  %1275 = vmatmul.bf16.gmra.mxu2 %v8652_v58 }
  0x8b   :  { %1186 = vmatmul.bf16.gmra.mxu1 %v8654_v59  ;;  %1364 = vmatmul.bf16.gmra.mxu3 %v8654_v59 }
  0x99   :  { %1102 = vmatmul.bf16.gmra.mxu0 %v8672_v0  ;;  %1280 = vmatmul.bf16.gmra.mxu2 %v8672_v0 }
  0x9b   :  { %1191 = vmatmul.bf16.gmra.mxu1 %v8674_v1  ;;  %1369 = vmatmul.bf16.gmra.mxu3 %v8674_v1 }
  0xa6   :  { %v1068_v11 = vpop.f32.mrf.mxu0 }
  0xa8   :  { %v1157_v16 = vpop.f32.mrf.mxu1 }
  0xa9   :  { %v8696_v19 = vadd.f32 %v1157_v16, %v1068_v11  ;;  %1107 = vmatmul.bf16.gmra.mxu0 %v8692_v10  ;;  %1285 = vmatmul.bf16.gmra.mxu2 %v8692_v10  ;;  %v8750_v11 = vor.u32 %v7717_v62, %v6757_v63 }
  0xab   :  { %1196 = vmatmul.bf16.gmra.mxu1 %v8694_v12  ;;  %1374 = vmatmul.bf16.gmra.mxu3 %v8694_v12  ;;  %15149 = vst [vmem:[#allocation30_spill] sm:$0xff] %v8750_v11 }
  0xac   :  { %v1246_v21 = vpop.f32.mrf.mxu2 }
  0xae   :  { %v1335_v25 = vpop.f32.mrf.mxu3  ;;  %v1070_v30 = vpop.f32.mrf.mxu0 }
  0xaf   :  { %v8702_v31 = vadd.f32 %v1335_v25, %v1246_v21  ;;  %v6877_v21 = vld [vmem:[#allocation3 + $0xa8] sm:$0xf0] }
  0xb0   :  { %v1159_v35 = vpop.f32.mrf.mxu1  ;;  %v6880_v25 = vor.u32 %v7746_v17, %v6877_v21  ;;  %v6771_v17 = vld [vmem:[%s14895_s0 + $0xc0] sm:$0xf]  ;;  %v7721_v21 = vld [vmem:[%s14895_s0 + $0xc4] sm:$0xf] }
  0xb1   :  { %v8704_v36 = vadd.f32 %v1159_v35, %v1070_v30  ;;  %v6763_v30 = vld [vmem:[%s14895_s0 + $0xb0] sm:$0xf]  ;;  %v7719_v35 = vld [vmem:[%s14895_s0 + $0xb4] sm:$0xf] }
  0xb2   :  { %1598 = vmatpush.bf16.msrb.mxu2 %v6880_v25 }
  0xb4   :  { %v1248_v41 = vpop.f32.mrf.mxu2 }
  0xb6   :  { %v1337_v44 = vpop.f32.mrf.mxu3  ;;  %v1073_v45 = vpop.f32.mrf.mxu0 }
  0xb7   :  { %v8722_v48 = vadd.f32 %v1337_v44, %v1248_v41  ;;  %v8780_v41 = vor.u32 %v7720_v34, %v6763_v30  ;;  %v6876_v44 = vor.u32 %v7750_v39, %v6875_v38  ;;  %v8816_v34 = vor.u32 %v7721_v21, %v6773_v22  ;;  %v7802_v21 = vld [vmem:[#allocation3 + $0x24c] sm:$0xf] }
  0xb8   :  { %v1162_v49 = vpop.f32.mrf.mxu1  ;;  %v7101_v22 = vld [vmem:[#allocation3 + $0x268] sm:$0xf0] }
  0xb9   :  { %v8724_v50 = vadd.f32 %v1162_v49, %v1073_v45  ;;  %1112 = vmatmul.bf16.gmra.mxu0 %v8718_v42  ;;  %1290 = vmatmul.bf16.gmra.mxu2 %v8718_v42  ;;  %15153 = vst [vmem:[#allocation34_spill] sm:$0xff] %v8780_v41 }
  0xba   :  { %1420 = vmatpush.bf16.msrb.mxu0 %v6876_v44  ;;  %15163 = vst [vmem:[#allocation44_spill] sm:$0xff] %v8816_v34 }
  0xbb   :  { %1201 = vmatmul.bf16.gmra.mxu1 %v8720_v46  ;;  %1379 = vmatmul.bf16.gmra.mxu3 %v8720_v46 }
  0xbc   :  { %v1251_v51 = vpop.f32.mrf.mxu2 }
  0xbe   :  { %v1340_v54 = vpop.f32.mrf.mxu3  ;;  %v8730_v55 = vpop.f32.mrf.mxu0 }
  0xbf   :  { %v8732_v56 = vadd.f32 %v1340_v54, %v1251_v51  ;;  %v8784_v51 = vor.u32 %v7719_v35, %v6765_v37  ;;  %v7131_v54 = vld [vmem:[#allocation3 + $0x288] sm:$0xf] }
  0xc0   :  { %v8734_v57 = vpop.f32.mrf.mxu1  ;;  %v7132_v62 = vor.u32 %v7814_v60, %v7131_v54  ;;  %v7738_v54 = vld [vmem:[#allocation3 + $0x4c] sm:$0xf] }
  0xc1   :  { %15155 = vst [vmem:[#allocation36_spill] sm:$0xff] %v8784_v51  ;;  %v6845_v60 = vld [vmem:[#allocation3 + $0x68] sm:$0xf0] }
  0xc2   :  { %1509 = vmatpush.bf16.msrb.mxu1 %v7132_v62 }
  0xc4   :  { %v1253_v4 = vpop.f32.mrf.mxu2 }
  0xc6   :  { %v1342_v6 = vpop.f32.mrf.mxu3  ;;  %v1078_v7 = vpop.f32.mrf.mxu0 }
  0xc7   :  { %v8752_v13 = vadd.f32 %v1342_v6, %v1253_v4 }
  0xc8   :  { %v1167_v14 = vpop.f32.mrf.mxu1 }
  0xc9   :  { %1117 = vmatmul.bf16.gmra.mxu0 %v8748_v5  ;;  %v8755_v15 = vadd.f32 %v1167_v14, %v1078_v7  ;;  %1295 = vmatmul.bf16.gmra.mxu2 %v8748_v5 }
  0xcb   :  { %1206 = vmatmul.bf16.gmra.mxu1 %v8750_v11  ;;  %1384 = vmatmul.bf16.gmra.mxu3 %v8750_v11 }
  0xcc   :  { %v1256_v16 = vpop.f32.mrf.mxu2 }
  0xce   :  { %v1345_v18 = vpop.f32.mrf.mxu3  ;;  %v8760_v20 = vpop.f32.mrf.mxu0 }
  0xcf   :  { %v8764_v29 = vadd.f32 %v1345_v18, %v1256_v16  ;;  %v7722_v18 = vld [vmem:[%s14895_s0 + $0xc4] sm:$0xf0] }
  0xd0   :  { %v8762_v24 = vpop.f32.mrf.mxu1  ;;  %v8812_v25 = vor.u32 %v7722_v18, %v6771_v17  ;;  %v6848_v17 = vor.u32 %v7738_v54, %v6845_v60  ;;  %v6781_v54 = vld [vmem:[%s14895_s0 + $0xd8] sm:$0xf0] }
  0xd1   :  { %15150 = vst [vmem:[#allocation31_spill] sm:$0xff] %v8762_v24 }
  0xd2   :  { %15151 = vst [vmem:[#allocation32_spill] sm:$0xff] %v8764_v29  ;;  %1599 = vmatpush.bf16.msrb.mxu2 %v6848_v17 }
  0xd3   :  { %15161 = vst [vmem:[#allocation42_spill] sm:$0xff] %v8812_v25 }
  0xd4   :  { %v8778_v40 = vpop.f32.mrf.mxu2 }
  0xd5   :  { %15152 = vst [vmem:[#allocation33_spill] sm:$0xff] %v8778_v40  ;;  %v7798_v40 = vld [vmem:[#allocation3 + $0x224] sm:$0xf0] }
  0xd6   :  { %v8782_v45 = vpop.f32.mrf.mxu3  ;;  %v1083_v49 = vpop.f32.mrf.mxu0 }
  0xd7   :  { %15154 = vst [vmem:[#allocation35_spill] sm:$0xff] %v8782_v45  ;;  %v7067_v45 = vld [vmem:[#allocation3 + $0x208] sm:$0xf] }
  0xd8   :  { %v1172_v61 = vpop.f32.mrf.mxu1 }
  0xd9   :  { %1122 = vmatmul.bf16.gmra.mxu0 %v8780_v41  ;;  %1300 = vmatmul.bf16.gmra.mxu2 %v8780_v41  ;;  %v8790_v63 = vadd.f32 %v1172_v61, %v1083_v49 }
  0xdb   :  { %1211 = vmatmul.bf16.gmra.mxu1 %v8784_v51  ;;  %1389 = vmatmul.bf16.gmra.mxu3 %v8784_v51  ;;  %15156 = vst [vmem:[#allocation37_spill] sm:$0xff] %v8790_v63 }
  0xdc   :  { %v1261_v4 = vpop.f32.mrf.mxu2 }
  0xde   :  { %v1350_v6 = vpop.f32.mrf.mxu3  ;;  %v8792_v7 = vpop.f32.mrf.mxu0 }
  0xdf   :  { %15157 = vst [vmem:[#allocation38_spill] sm:$0xff] %v8792_v7  ;;  %v8796_v16 = vadd.f32 %v1350_v6, %v1261_v4 }
  0xe0   :  { %v8794_v14 = vpop.f32.mrf.mxu1 }
  0xe1   :  { %15158 = vst [vmem:[#allocation39_spill] sm:$0xff] %v8794_v14 }
  0xe2   :  { %15159 = vst [vmem:[#allocation40_spill] sm:$0xff] %v8796_v16 }
  0xe4   :  { %v8810_v23 = vpop.f32.mrf.mxu2 }
  0xe5   :  { %15160 = vst [vmem:[#allocation41_spill] sm:$0xff] %v8810_v23  ;;  %v7099_v23 = vld [vmem:[#allocation3 + $0x248] sm:$0xf] }
  0xe6   :  { %v8814_v28 = vpop.f32.mrf.mxu3  ;;  %v1088_v30 = vpop.f32.mrf.mxu0 }
  0xe7   :  { %15162 = vst [vmem:[#allocation43_spill] sm:$0xff] %v8814_v28  ;;  %v6843_v28 = vld [vmem:[#allocation3 + $0x48] sm:$0xf] }
  0xe8   :  { %v1177_v35 = vpop.f32.mrf.mxu1 }
  0xe9   :  { %1127 = vmatmul.bf16.gmra.mxu0 %v8812_v25  ;;  %1305 = vmatmul.bf16.gmra.mxu2 %v8812_v25  ;;  %v8826_v49 = vadd.f32 %v1177_v35, %v1088_v30  ;;  %v7104_v30 = vor.u32 %v7802_v21, %v7101_v22  ;;  %v6779_v35 = vld [vmem:[%s14895_s0 + $0xd0] sm:$0xf] }
  0xeb   :  { %1216 = vmatmul.bf16.gmra.mxu1 %v8816_v34  ;;  %1394 = vmatmul.bf16.gmra.mxu3 %v8816_v34  ;;  %15166 = vst [vmem:[#allocation47_spill] sm:$0xff] %v8826_v49 }
  0xec   :  { %v1266_v37 = vpop.f32.mrf.mxu2  ;;  %1688 = vmatpush.bf16.msrb.mxu3 %v7104_v30  ;;  %v7726_v30 = vld [vmem:[%s14895_s0 + $0xe4] sm:$0xf0] }
  0xee   :  { %v1355_v38 = vpop.f32.mrf.mxu3  ;;  %v8822_v39 = vpop.f32.mrf.mxu0 }
  0xef   :  { %15164 = vst [vmem:[#allocation45_spill] sm:$0xff] %v8822_v39  ;;  %v8828_v61 = vadd.f32 %v1355_v38, %v1266_v37  ;;  %v7742_v39 = vld [vmem:[#allocation3 + $0x64] sm:$0xf0]  ;;  %v7724_v37 = vld [vmem:[%s14895_s0 + $0xd4] sm:$0xf0] }
  0xf0   :  { %v8824_v44 = vpop.f32.mrf.mxu1  ;;  %v7723_v38 = vld [vmem:[%s14895_s0 + $0xd4] sm:$0xf]  ;;  %v6844_v60 = vor.u32 %v7742_v39, %v6843_v28 }
  0xf1   :  { %15165 = vst [vmem:[#allocation46_spill] sm:$0xff] %v8824_v44  ;;  %v7806_v44 = vld [vmem:[#allocation3 + $0x264] sm:$0xf0]  ;;  %v8852_v49 = vor.u32 %v7723_v38, %v6781_v54 }
  0xf2   :  { %15167 = vst [vmem:[#allocation48_spill] sm:$0xff] %v8828_v61  ;;  %v7100_v17 = vor.u32 %v7806_v44, %v7099_v23  ;;  %1421 = vmatpush.bf16.msrb.mxu0 %v6844_v60  ;;  %v8850_v61 = vor.u32 %v7724_v37, %v6779_v35 }
  0xf3   :  { %15173 = vst [vmem:[#allocation54_spill] sm:$0xff] %v8852_v49 }
  0xf4   :  { %v8830_v62 = vpop.f32.mrf.mxu2  ;;  %1510 = vmatpush.bf16.msrb.mxu1 %v7100_v17  ;;  %15172 = vst [vmem:[#allocation53_spill] sm:$0xff] %v8850_v61 }
  0xf5   :  { %15168 = vst [vmem:[#allocation49_spill] sm:$0xff] %v8830_v62 }
  0xf6   :  { %v8832_v4 = vpop.f32.mrf.mxu3  ;;  %v1093_v6 = vpop.f32.mrf.mxu0 }
  0xf7   :  { %15169 = vst [vmem:[#allocation50_spill] sm:$0xff] %v8832_v4 }
  0xf8   :  { %v1182_v18 = vpop.f32.mrf.mxu1 }
  0xf9   :  { %v8846_v22 = vadd.f32 %v1182_v18, %v1093_v6  ;;  %1132 = vmatmul.bf16.gmra.mxu0 %v8850_v61  ;;  %1310 = vmatmul.bf16.gmra.mxu2 %v8850_v61  ;;  %v6787_v18 = vld [vmem:[%s14895_s0 + $0xe0] sm:$0xf] }
  0xfa   :  { %v8872_v35 = vor.u32 %v7726_v30, %v6787_v18  ;;  %v7725_v18 = vld [vmem:[%s14895_s0 + $0xe4] sm:$0xf]  ;;  %v6789_v30 = vld [vmem:[%s14895_s0 + $0xe8] sm:$0xf0] }
  0xfb   :  { %15170 = vst [vmem:[#allocation51_spill] sm:$0xff] %v8846_v22  ;;  %1221 = vmatmul.bf16.gmra.mxu1 %v8852_v49  ;;  %1399 = vmatmul.bf16.gmra.mxu3 %v8852_v49 }
  0xfc   :  { %v1271_v21 = vpop.f32.mrf.mxu2  ;;  %15178 = vst [vmem:[#allocation59_spill] sm:$0xff] %v8872_v35 }
  0xfe   :  { %v1360_v4 = vpop.f32.mrf.mxu3  ;;  %v8848_v62 = vpop.f32.mrf.mxu0 }
  0xff   :  { %15171 = vst [vmem:[#allocation52_spill] sm:$0xff] %v8848_v62  ;;  %v8860_v23 = vadd.f32 %v1360_v4, %v1271_v21 }
 0x100   :  { %v8854_v16 = vpop.f32.mrf.mxu1 }
 0x101   :  { %15174 = vst [vmem:[#allocation55_spill] sm:$0xff] %v8854_v16  ;;  %v7069_v16 = vld [vmem:[#allocation3 + $0x228] sm:$0xf0] }
 0x102   :  { %15175 = vst [vmem:[#allocation56_spill] sm:$0xff] %v8860_v23  ;;  %v7794_v23 = vld [vmem:[#allocation3 + $0x20c] sm:$0xf] }
 0x103   :  { %v7072_v22 = vor.u32 %v7794_v23, %v7069_v16  ;;  %v7068_v16 = vor.u32 %v7798_v40, %v7067_v45  ;;  %v7727_v40 = vld [vmem:[%s14895_s0 + $0xf4] sm:$0xf]  ;;  %v6797_v45 = vld [vmem:[%s14895_s0 + $0xf8] sm:$0xf0] }
 0x104   :  { %v8862_v28 = vpop.f32.mrf.mxu2 }
 0x105   :  { %15176 = vst [vmem:[#allocation57_spill] sm:$0xff] %v8862_v28  ;;  %1689 = vmatpush.bf16.msrb.mxu3 %v7072_v22  ;;  %1511 = vmatpush.bf16.msrb.mxu1 %v7068_v16 }
 0x106   :  { %v8864_v39 = vpop.f32.mrf.mxu3  ;;  %v1098_v44 = vpop.f32.mrf.mxu0 }
 0x107   :  { %15177 = vst [vmem:[#allocation58_spill] sm:$0xff] %v8864_v39 }
 0x108   :  { %v1187_v6 = vpop.f32.mrf.mxu1 }
 0x109   :  { %1137 = vmatmul.bf16.gmra.mxu0 %v8872_v35  ;;  %1315 = vmatmul.bf16.gmra.mxu2 %v8872_v35  ;;  %v8884_v28 = vadd.f32 %v1187_v6, %v1098_v44  ;;  %v6811_v44 = vld [vmem:[#allocation3 + $0x8] sm:$0xf] }
 0x10a   :  { %v7734_v6 = vld [vmem:[#allocation3 + $0x24] sm:$0xf0] }
 0x10b   :  { %15183 = vst [vmem:[#allocation64_spill] sm:$0xff] %v8884_v28 }
 0x10c   :  { %v1276_v37 = vpop.f32.mrf.mxu2 }
 0x10e   :  { %v1365_v38 = vpop.f32.mrf.mxu3  ;;  %v8874_v4 = vpop.f32.mrf.mxu0 }
 0x10f   :  { %15179 = vst [vmem:[#allocation60_spill] sm:$0xff] %v8874_v4  ;;  %v6813_v4 = vld [vmem:[#allocation3 + $0x28] sm:$0xf0]  ;;  %v8894_v14 = vadd.f32 %v1365_v38, %v1276_v37  ;;  %v6795_v37 = vld [vmem:[%s14895_s0 + $0xf0] sm:$0xf] }
 0x110   :  { %v8876_v54 = vpop.f32.mrf.mxu1  ;;  %v7728_v38 = vld [vmem:[%s14895_s0 + $0xf4] sm:$0xf0]  ;;  %s8496_s0 = smov 16  }
 0x111   :  { %15180 = vst [vmem:[#allocation61_spill] sm:$0xff] %v8876_v54  ;;  %v7730_v54 = vld [vmem:[#allocation3 + $0xc] sm:$0xf] }
 0x112   :  { %15185 = vst [vmem:[#allocation66_spill] sm:$0xff] %v8894_v14 }
 0x114   :  { %v8880_v60 = vpop.f32.mrf.mxu2 }
 0x115   :  { %15181 = vst [vmem:[#allocation62_spill] sm:$0xff] %v8880_v60  ;;  %v8892_v60 = vor.u32 %v7725_v18, %v6789_v30  ;;  %v6812_v18 = vor.u32 %v7734_v6, %v6811_v44  ;;  %v8914_v30 = vor.u32 %v7728_v38, %v6795_v37 }
 0x116   :  { %v8882_v17 = vpop.f32.mrf.mxu3  ;;  %v1103_v21 = vpop.f32.mrf.mxu0 }
 0x117   :  { %15182 = vst [vmem:[#allocation63_spill] sm:$0xff] %v8882_v17  ;;  %v6816_v17 = vor.u32 %v7730_v54, %v6813_v4  ;;  %1226 = vmatmul.bf16.gmra.mxu1 %v8892_v60  ;;  %1404 = vmatmul.bf16.gmra.mxu3 %v8892_v60 }
 0x118   :  { %v1192_v39 = vpop.f32.mrf.mxu1  ;;  %15184 = vst [vmem:[#allocation65_spill] sm:$0xff] %v8892_v60  ;;  %1422 = vmatpush.bf16.msrb.mxu0 %v6812_v18 }
 0x119   :  { %1600 = vmatpush.bf16.msrb.mxu2 %v6816_v17  ;;  %v8902_v23 = vadd.f32 %v1192_v39, %v1103_v21  ;;  %15191 = vst [vmem:[#allocation72_spill] sm:$0xff] %v8914_v30  ;;  %1142 = vmatmul.bf16.gmra.mxu0 %v8914_v30  ;;  %v8924_v21 = vor.u32 %v7727_v40, %v6797_v45 }
 0x11a   :  { %1320 = vmatmul.bf16.gmra.mxu2 %v8914_v30 }
 0x11b   :  { %15188 = vst [vmem:[#allocation69_spill] sm:$0xff] %v8902_v23  ;;  %v7791_v23 = vld [vmem:[#allocation3 + $0x1ec] sm:$0xf0] }
 0x11c   :  { %v1281_v62 = vpop.f32.mrf.mxu2  ;;  %15192 = vst [vmem:[#allocation73_spill] sm:$0xff] %v8924_v21 }
 0x11e   :  { %v1370_v28 = vpop.f32.mrf.mxu3  ;;  %v8896_v7 = vpop.f32.mrf.mxu0 }
 0x11f   :  { %15186 = vst [vmem:[#allocation67_spill] sm:$0xff] %v8896_v7  ;;  %v8926_v44 = vadd.f32 %v1370_v28, %v1281_v62  ;;  %v7043_v7 = vld [vmem:[#allocation3 + $0x1d0] sm:$0xf] }
 0x120   :  { %v8898_v63 = vpop.f32.mrf.mxu1 }
 0x121   :  { %15187 = vst [vmem:[#allocation68_spill] sm:$0xff] %v8898_v63 }
 0x122   :  { %15193 = vst [vmem:[#allocation74_spill] sm:$0xff] %v8926_v44 }
 0x124   :  { %v8910_v4 = vpop.f32.mrf.mxu2 }
 0x125   :  { %15189 = vst [vmem:[#allocation70_spill] sm:$0xff] %v8910_v4 }
 0x126   :  { %v8912_v54 = vpop.f32.mrf.mxu3  ;;  %v1108_v17 = vpop.f32.mrf.mxu0 }
 0x127   :  { %15190 = vst [vmem:[#allocation71_spill] sm:$0xff] %v8912_v54  ;;  %1231 = vmatmul.bf16.gmra.mxu1 %v8924_v21  ;;  %1409 = vmatmul.bf16.gmra.mxu3 %v8924_v21 }
 0x128   :  { %v1197_v22 = vpop.f32.mrf.mxu1 }
 0x129   :  { %1423 = vmatmul.bf16.vlgmr.msrb.gmra.mxu0 %v8532_v43  ;;  %v8940_v28 = vadd.f32 %v1197_v22, %v1108_v17  ;;  %v7299_v22 = vld [vmem:[#allocation3 + $0x3d0] sm:$0xf] }
 0x12a   :  { %1601 = vmatmul.bf16.vlgmr.msrb.gmra.mxu2 %v8532_v43 }
 0x12b   :  { %15198 = vst [vmem:[#allocation79_spill] sm:$0xff] %v8940_v28 }
 0x12c   :  { %v1286_v39 = vpop.f32.mrf.mxu2 }
 0x12e   :  { %v1375_v6 = vpop.f32.mrf.mxu3  ;;  %v8928_v18 = vpop.f32.mrf.mxu0 }
 0x12f   :  { %15194 = vst [vmem:[#allocation75_spill] sm:$0xff] %v8928_v18  ;;  %v8942_v40 = vadd.f32 %v1375_v6, %v1286_v39  ;;  %v7045_v18 = vld [vmem:[#allocation3 + $0x1f0] sm:$0xf0]  ;;  %v7855_v39 = vld [vmem:[#allocation3 + $0x3ec] sm:$0xf0] }
 0x130   :  { %v8930_v16 = vpop.f32.mrf.mxu1  ;;  %v7300_v28 = vor.u32 %v7855_v39, %v7299_v22  ;;  %v7013_v22 = vld [vmem:[#allocation3 + $0x1b0] sm:$0xf0] }
 0x131   :  { %15195 = vst [vmem:[#allocation76_spill] sm:$0xff] %v8930_v16  ;;  %v7787_v16 = vld [vmem:[#allocation3 + $0x1d4] sm:$0xf] }
 0x132   :  { %15199 = vst [vmem:[#allocation80_spill] sm:$0xff] %v8942_v40  ;;  %v7048_v63 = vor.u32 %v7787_v16, %v7045_v18  ;;  %1860 = vmatpush.bf16.msra.mxu1 %v7300_v28 }
 0x134   :  { %v8934_v37 = vpop.f32.mrf.mxu2  ;;  %1949 = vmatpush.bf16.msra.mxu2 %v7048_v63 }
 0x135   :  { %15196 = vst [vmem:[#allocation77_spill] sm:$0xff] %v8934_v37  ;;  %v7301_v37 = vld [vmem:[#allocation3 + $0x3f0] sm:$0xf0] }
 0x136   :  { %v8936_v38 = vpop.f32.mrf.mxu3  ;;  %v1113_v54 = vpop.f32.mrf.mxu0 }
 0x137   :  { %15197 = vst [vmem:[#allocation78_spill] sm:$0xff] %v8936_v38  ;;  %1512 = vmatmul.bf16.vlgmr.msrb.gmra.mxu1 %v8534_v47  ;;  %1690 = vmatmul.bf16.vlgmr.msrb.gmra.mxu3 %v8534_v47  ;;  %v7851_v38 = vld [vmem:[#allocation3 + $0x3d4] sm:$0xf] }
 0x138   :  { %v1202_v4 = vpop.f32.mrf.mxu1  ;;  %v7304_v17 = vor.u32 %v7851_v38, %v7301_v37 }
 0x139   :  { %v8954_v24 = vadd.f32 %v1202_v4, %v1113_v54  ;;  %1428 = vmatmul.bf16.gmra.mxu0 %v8552_v2 }
 0x13a   :  { %2038 = vmatpush.bf16.msra.mxu3 %v7304_v17  ;;  %1606 = vmatmul.bf16.gmra.mxu2 %v8552_v2  ;;  %v7779_v17 = vld [vmem:[#allocation3 + $0x194] sm:$0xf] }
 0x13b   :  { %15204 = vst [vmem:[#allocation85_spill] sm:$0xff] %v8954_v24  ;;  %v7016_v39 = vor.u32 %v7779_v17, %v7013_v22 }
 0x13c   :  { %v1291_v62 = vpop.f32.mrf.mxu2 }
 0x13d   :  { %1950 = vmatpush.bf16.msra.mxu2 %v7016_v39 }
 0x13e   :  { %v8944_v45 = vpop.f32.mrf.mxu0  ;;  %v1380_v44 = vpop.f32.mrf.mxu3 }
 0x13f   :  { %15200 = vst [vmem:[#allocation81_spill] sm:$0xff] %v8944_v45  ;;  %v7044_v45 = vor.u32 %v7791_v23, %v7043_v7  ;;  %v8958_v63 = vadd.f32 %v1380_v44, %v1291_v62 }
 0x140   :  { %v8948_v14 = vpop.f32.mrf.mxu1 }
 0x141   :  { %15201 = vst [vmem:[#allocation82_spill] sm:$0xff] %v8948_v14  ;;  %1771 = vmatpush.bf16.msra.mxu0 %v7044_v45 }
 0x142   :  { %15205 = vst [vmem:[#allocation86_spill] sm:$0xff] %v8958_v63 }
 0x144   :  { %v8950_v6 = vpop.f32.mrf.mxu2 }
 0x145   :  { %15202 = vst [vmem:[#allocation83_spill] sm:$0xff] %v8950_v6 }
 0x146   :  { %v1118_v40 = vpop.f32.mrf.mxu0  ;;  %v8952_v29 = vpop.f32.mrf.mxu3 }
 0x147   :  { %15203 = vst [vmem:[#allocation84_spill] sm:$0xff] %v8952_v29  ;;  %1517 = vmatmul.bf16.gmra.mxu1 %v8554_v3  ;;  %1695 = vmatmul.bf16.gmra.mxu3 %v8554_v3 }
 0x148   :  { %v1207_v18 = vpop.f32.mrf.mxu1 }
 0x149   :  { %1433 = vmatmul.bf16.gmra.mxu0 %v8572_v8  ;;  %v8970_v54 = vadd.f32 %v1207_v18, %v1118_v40  ;;  %v7011_v40 = vld [vmem:[#allocation3 + $0x190] sm:$0xf] }
 0x14a   :  { %1611 = vmatmul.bf16.gmra.mxu2 %v8572_v8  ;;  %v7783_v18 = vld [vmem:[#allocation3 + $0x1ac] sm:$0xf0] }
 0x14b   :  { %15209 = vst [vmem:[#allocation90_spill] sm:$0xff] %v8970_v54  ;;  %v7847_v54 = vld [vmem:[#allocation3 + $0x3ac] sm:$0xf0] }
 0x14c   :  { %v1296_v16 = vpop.f32.mrf.mxu2 }
 0x14e   :  { %v8960_v37 = vpop.f32.mrf.mxu0  ;;  %v1385_v7 = vpop.f32.mrf.mxu3 }
 0x14f   :  { %15206 = vst [vmem:[#allocation87_spill] sm:$0xff] %v8960_v37  ;;  %v8978_v37 = vadd.f32 %v1385_v7, %v1296_v16 }
 0x150   :  { %v8966_v38 = vpop.f32.mrf.mxu1 }
 0x151   :  { %15208 = vst [vmem:[#allocation89_spill] sm:$0xff] %v8966_v38  ;;  %v7269_v38 = vld [vmem:[#allocation3 + $0x3b0] sm:$0xf0] }
 0x152   :  { %15212 = vst [vmem:[#allocation93_spill] sm:$0xff] %v8978_v37 }
 0x154   :  { %v8964_v23 = vpop.f32.mrf.mxu2 }
 0x155   :  { %15207 = vst [vmem:[#allocation88_spill] sm:$0xff] %v8964_v23  ;;  %v7843_v23 = vld [vmem:[#allocation3 + $0x394] sm:$0xf] }
 0x156   :  { %v1123_v4 = vpop.f32.mrf.mxu0  ;;  %v8972_v44 = vpop.f32.mrf.mxu3  ;;  %v7272_v6 = vor.u32 %v7843_v23, %v7269_v38 }
 0x157   :  { %15210 = vst [vmem:[#allocation91_spill] sm:$0xff] %v8972_v44  ;;  %1522 = vmatmul.bf16.gmra.mxu1 %v8574_v9  ;;  %1700 = vmatmul.bf16.gmra.mxu3 %v8574_v9  ;;  %v7267_v44 = vld [vmem:[#allocation3 + $0x390] sm:$0xf] }
 0x158   :  { %v1212_v28 = vpop.f32.mrf.mxu1  ;;  %v7268_v14 = vor.u32 %v7847_v54, %v7267_v44  ;;  %2039 = vmatpush.bf16.msra.mxu3 %v7272_v6 }
 0x159   :  { %1438 = vmatmul.bf16.gmra.mxu0 %v8592_v26  ;;  %v8984_v16 = vadd.f32 %v1212_v28, %v1123_v4 }
 0x15a   :  { %1616 = vmatmul.bf16.gmra.mxu2 %v8592_v26  ;;  %1861 = vmatpush.bf16.msra.mxu1 %v7268_v14 }
 0x15b   :  { %15214 = vst [vmem:[#allocation95_spill] sm:$0xff] %v8984_v16 }
 0x15c   :  { %v1301_v62 = vpop.f32.mrf.mxu2 }
 0x15e   :  { %v8976_v45 = vpop.f32.mrf.mxu0  ;;  %v1390_v29 = vpop.f32.mrf.mxu3 }
 0x15f   :  { %15211 = vst [vmem:[#allocation92_spill] sm:$0xff] %v8976_v45  ;;  %v7012_v45 = vor.u32 %v7783_v18, %v7011_v40  ;;  %v8990_v39 = vadd.f32 %v1390_v29, %v1301_v62  ;;  %v7771_v62 = vld [vmem:[#allocation3 + $0x154] sm:$0xf] }
 0x160   :  { %v8982_v24 = vpop.f32.mrf.mxu1  ;;  %v6981_v40 = vld [vmem:[#allocation3 + $0x170] sm:$0xf0] }
 0x161   :  { %15213 = vst [vmem:[#allocation94_spill] sm:$0xff] %v8982_v24  ;;  %1772 = vmatpush.bf16.msra.mxu0 %v7012_v45  ;;  %v7835_v18 = vld [vmem:[#allocation3 + $0x354] sm:$0xf] }
 0x162   :  { %15216 = vst [vmem:[#allocation97_spill] sm:$0xff] %v8990_v39 }
 0x164   :  { %v1303_v63 = vpop.f32.mrf.mxu2 }
 0x166   :  { %v1128_v17 = vpop.f32.mrf.mxu0  ;;  %v1392_v7 = vpop.f32.mrf.mxu3 }
 0x167   :  { %1527 = vmatmul.bf16.gmra.mxu1 %v8594_v27  ;;  %1705 = vmatmul.bf16.gmra.mxu3 %v8594_v27  ;;  %v8994_v54 = vadd.f32 %v1392_v7, %v1303_v63  ;;  %v6984_v63 = vor.u32 %v7771_v62, %v6981_v40  ;;  %v7775_v7 = vld [vmem:[#allocation3 + $0x16c] sm:$0xf0] }
 0x168   :  { %v1217_v38 = vpop.f32.mrf.mxu1 }
 0x169   :  { %1443 = vmatmul.bf16.gmra.mxu0 %v8612_v32  ;;  %15217 = vst [vmem:[#allocation98_spill] sm:$0xff] %v8994_v54  ;;  %v8996_v14 = vadd.f32 %v1217_v38, %v1128_v17  ;;  %v6979_v17 = vld [vmem:[#allocation3 + $0x150] sm:$0xf]  ;;  %1951 = vmatpush.bf16.msra.mxu2 %v6984_v63 }
 0x16a   :  { %1621 = vmatmul.bf16.gmra.mxu2 %v8612_v32  ;;  %v7839_v54 = vld [vmem:[#allocation3 + $0x36c] sm:$0xf0]  ;;  %v6980_v16 = vor.u32 %v7775_v7, %v6979_v17 }
 0x16b   :  { %15218 = vst [vmem:[#allocation99_spill] sm:$0xff] %v8996_v14  ;;  %v7235_v14 = vld [vmem:[#allocation3 + $0x350] sm:$0xf] }
 0x16c   :  { %v1306_v23 = vpop.f32.mrf.mxu2  ;;  %v7236_v37 = vor.u32 %v7839_v54, %v7235_v14  ;;  %1773 = vmatpush.bf16.msra.mxu0 %v6980_v16 }
 0x16e   :  { %v8988_v22 = vpop.f32.mrf.mxu0  ;;  %v1395_v6 = vpop.f32.mrf.mxu3  ;;  %1862 = vmatpush.bf16.msra.mxu1 %v7236_v37 }
 0x16f   :  { %15215 = vst [vmem:[#allocation96_spill] sm:$0xff] %v8988_v22  ;;  %v7237_v22 = vld [vmem:[#allocation3 + $0x370] sm:$0xf0] }
 0x170   :  { %v8998_v44 = vpop.f32.mrf.mxu1  ;;  %v7240_v38 = vor.u32 %v7835_v18, %v7237_v22 }
 0x171   :  { %15219 = vst [vmem:[#allocation100_spill] sm:$0xff] %v8998_v44  ;;  %v9004_v44 = vadd.f32 %v1395_v6, %v1306_v23 }
 0x172   :  { %2040 = vmatpush.bf16.msra.mxu3 %v7240_v38  ;;  %v7763_v38 = vld [vmem:[#allocation3 + $0x114] sm:$0xf] }
 0x173   :  { %15220 = vst [vmem:[#allocation101_spill] sm:$0xff] %v9004_v44  ;;  %v7767_v44 = vld [vmem:[#allocation3 + $0x12c] sm:$0xf0] }
 0x174   :  { %v1308_v4 = vpop.f32.mrf.mxu2 }
 0x176   :  { %v1133_v28 = vpop.f32.mrf.mxu0  ;;  %v1397_v45 = vpop.f32.mrf.mxu3 }
 0x177   :  { %1532 = vmatmul.bf16.gmra.mxu1 %v8614_v33  ;;  %1710 = vmatmul.bf16.gmra.mxu3 %v8614_v33  ;;  %v9006_v33 = vadd.f32 %v1397_v45, %v1308_v4 }
 0x178   :  { %v1222_v24 = vpop.f32.mrf.mxu1 }
 0x179   :  { %1448 = vmatmul.bf16.gmra.mxu0 %v8632_v52  ;;  %15221 = vst [vmem:[#allocation102_spill] sm:$0xff] %v9006_v33  ;;  %v9008_v40 = vadd.f32 %v1222_v24, %v1133_v28  ;;  %v6947_v33 = vld [vmem:[#allocation3 + $0x110] sm:$0xf] }
 0x17a   :  { %1626 = vmatmul.bf16.gmra.mxu2 %v8632_v52 }
 0x17b   :  { %15222 = vst [vmem:[#allocation103_spill] sm:$0xff] %v9008_v40 }
 0x17c   :  { %v1311_v29 = vpop.f32.mrf.mxu2 }
 0x17e   :  { %v1135_v39 = vpop.f32.mrf.mxu0  ;;  %v1400_v62 = vpop.f32.mrf.mxu3 }
 0x17f   :  { %v9012_v6 = vadd.f32 %v1400_v62, %v1311_v29  ;;  %v7827_v62 = vld [vmem:[#allocation3 + $0x314] sm:$0xf] }
 0x180   :  { %v1224_v22 = vpop.f32.mrf.mxu1 }
 0x181   :  { %15223 = vst [vmem:[#allocation104_spill] sm:$0xff] %v9012_v6  ;;  %v9016_v14 = vadd.f32 %v1224_v22, %v1135_v39  ;;  %v6949_v39 = vld [vmem:[#allocation3 + $0x130] sm:$0xf0] }
 0x183   :  { %15224 = vst [vmem:[#allocation105_spill] sm:$0xff] %v9016_v14 }
 0x184   :  { %v1313_v63 = vpop.f32.mrf.mxu2 }
 0x186   :  { %v1138_v23 = vpop.f32.mrf.mxu0  ;;  %v1402_v18 = vpop.f32.mrf.mxu3 }
 0x187   :  { %1537 = vmatmul.bf16.gmra.mxu1 %v8634_v53  ;;  %1715 = vmatmul.bf16.gmra.mxu3 %v8634_v53  ;;  %v9018_v24 = vadd.f32 %v1402_v18, %v1313_v63  ;;  %v7205_v63 = vld [vmem:[#allocation3 + $0x330] sm:$0xf0]  ;;  %v6952_v18 = vor.u32 %v7763_v38, %v6949_v39  ;;  %v7203_v38 = vld [vmem:[#allocation3 + $0x310] sm:$0xf] }
 0x188   :  { %v7831_v39 = vld [vmem:[#allocation3 + $0x32c] sm:$0xf0] }
 0x189   :  { %1453 = vmatmul.bf16.gmra.mxu0 %v8652_v58  ;;  %15225 = vst [vmem:[#allocation106_spill] sm:$0xff] %v9018_v24  ;;  %1952 = vmatpush.bf16.msra.mxu2 %v6952_v18 }
 0x18a   :  { %1631 = vmatmul.bf16.gmra.mxu2 %v8652_v58 }
 0x18c   :  { %v1316_v37 = vpop.f32.mrf.mxu2 }
 0x18e   :  { %v1140_v54 = vpop.f32.mrf.mxu0 }
 0x194   :  { %v1227_v16 = vpop.f32.mrf.mxu1  ;;  %v1318_v45 = vpop.f32.mrf.mxu2 }
 0x195   :  { %v9020_v4 = vadd.f32 %v1227_v16, %v1138_v23  ;;  %v7208_v16 = vor.u32 %v7827_v62, %v7205_v63 }
 0x196   :  { %v1143_v17 = vpop.f32.mrf.mxu0 }
 0x197   :  { %15226 = vst [vmem:[#allocation107_spill] sm:$0xff] %v9020_v4  ;;  %1542 = vmatmul.bf16.gmra.mxu1 %v8654_v59  ;;  %1720 = vmatmul.bf16.gmra.mxu3 %v8654_v59  ;;  %v6948_v59 = vor.u32 %v7767_v44, %v6947_v33 }
 0x198   :  { %2041 = vmatpush.bf16.msra.mxu3 %v7208_v16  ;;  %v7204_v16 = vor.u32 %v7831_v39, %v7203_v38 }
 0x199   :  { %1458 = vmatmul.bf16.gmra.mxu0 %v8672_v0 }
 0x19a   :  { %v1405_v28 = vpop.f32.mrf.mxu3  ;;  %1636 = vmatmul.bf16.gmra.mxu2 %v8672_v0  ;;  %1774 = vmatpush.bf16.msra.mxu0 %v6948_v59 }
 0x19b   :  { %v9028_v14 = vadd.f32 %v1405_v28, %v1316_v37  ;;  %1863 = vmatpush.bf16.msra.mxu1 %v7204_v16 }
 0x19c   :  { %v1229_v29 = vpop.f32.mrf.mxu1 }
 0x19d   :  { %v1321_v23 = vpop.f32.mrf.mxu2  ;;  %15227 = vst [vmem:[#allocation108_spill] sm:$0xff] %v9028_v14 }
 0x19e   :  { %v1145_v4 = vpop.f32.mrf.mxu0 }
 0x1a2   :  { %v1407_v7 = vpop.f32.mrf.mxu3 }
 0x1a3   :  { %v9034_v37 = vadd.f32 %v1407_v7, %v1318_v45 }
 0x1a4   :  { %v1232_v22 = vpop.f32.mrf.mxu1 }
 0x1a5   :  { %v1323_v40 = vpop.f32.mrf.mxu2  ;;  %15229 = vst [vmem:[#allocation110_spill] sm:$0xff] %v9034_v37  ;;  %v9036_v28 = vadd.f32 %v1232_v22, %v1143_v17 }
 0x1a6   :  { %v1424_v0 = vpop.f32.mrf.mxu0 }
 0x1a7   :  { %1547 = vmatmul.bf16.gmra.mxu1 %v8674_v1  ;;  %1725 = vmatmul.bf16.gmra.mxu3 %v8674_v1  ;;  %v9032_v1 = vadd.f32 %v1229_v29, %v1140_v54  ;;  %15230 = vst [vmem:[#allocation111_spill] sm:$0xff] %v9036_v28 }
 0x1a9   :  { %1463 = vmatmul.bf16.gmra.mxu0 %v8692_v10  ;;  %15228 = vst [vmem:[#allocation109_spill] sm:$0xff] %v9032_v1 }
 0x1aa   :  { %v1410_v24 = vpop.f32.mrf.mxu3  ;;  %1641 = vmatmul.bf16.gmra.mxu2 %v8692_v10 }
 0x1ab   :  { %v9039_v33 = vadd.f32 %v1410_v24, %v1321_v23 }
 0x1ac   :  { %v1234_v6 = vpop.f32.mrf.mxu1 }
 0x1ad   :  { %v1602_v18 = vpop.f32.mrf.mxu2  ;;  %15231 = vst [vmem:[#allocation112_spill] sm:$0xff] %v9039_v33  ;;  %v9041_v44 = vadd.f32 %v1234_v6, %v1145_v4 }
 0x1ae   :  { %v1426_v14 = vpop.f32.mrf.mxu0 }
 0x1af   :  { %15232 = vst [vmem:[#allocation113_spill] sm:$0xff] %v9041_v44  ;;  %v7823_v44 = vld [vmem:[#allocation3 + $0x2ec] sm:$0xf0] }
 0x1b2   :  { %v1412_v62 = vpop.f32.mrf.mxu3 }
 0x1b3   :  { %v9044_v59 = vadd.f32 %v1412_v62, %v1323_v40  ;;  %v7819_v62 = vld [vmem:[#allocation3 + $0x2d4] sm:$0xf] }
 0x1b4   :  { %v1513_v63 = vpop.f32.mrf.mxu1 }
 0x1b5   :  { %15233 = vst [vmem:[#allocation114_spill] sm:$0xff] %v9044_v59  ;;  %v9046_v38 = vadd.f32 %v1513_v63, %v1424_v0  ;;  %v1604_v45 = vpop.f32.mrf.mxu2  ;;  %v7173_v63 = vld [vmem:[#allocation3 + $0x2f0] sm:$0xf0]  ;;  %v7171_v59 = vld [vmem:[#allocation3 + $0x2d0] sm:$0xf] }
 0x1b6   :  { %v1429_v7 = vpop.f32.mrf.mxu0  ;;  %v7172_v28 = vor.u32 %v7823_v44, %v7171_v59 }
 0x1b7   :  { %1730 = vmatmul.bf16.gmra.mxu3 %v8694_v12  ;;  %1552 = vmatmul.bf16.gmra.mxu1 %v8694_v12  ;;  %15234 = vst [vmem:[#allocation115_spill] sm:$0xff] %v9046_v38  ;;  %v7759_v38 = vld [vmem:[#allocation3 + $0xec] sm:$0xf0] }
 0x1b8   :  { %1864 = vmatpush.bf16.msra.mxu1 %v7172_v28 }
 0x1b9   :  { %1468 = vmatmul.bf16.gmra.mxu0 %v8718_v42 }
 0x1ba   :  { %v1691_v10 = vpop.f32.mrf.mxu3  ;;  %1646 = vmatmul.bf16.gmra.mxu2 %v8718_v42 }
 0x1bb   :  { %v9048_v29 = vadd.f32 %v1691_v10, %v1602_v18  ;;  %v7755_v10 = vld [vmem:[#allocation3 + $0xd4] sm:$0xf] }
 0x1bc   :  { %v1515_v54 = vpop.f32.mrf.mxu1 }
 0x1bd   :  { %15235 = vst [vmem:[#allocation116_spill] sm:$0xff] %v9048_v29  ;;  %v9050_v17 = vadd.f32 %v1515_v54, %v1426_v14  ;;  %v1607_v40 = vpop.f32.mrf.mxu2  ;;  %v6917_v14 = vld [vmem:[#allocation3 + $0xf0] sm:$0xf0]  ;;  %v6915_v29 = vld [vmem:[#allocation3 + $0xd0] sm:$0xf] }
 0x1be   :  { %v1431_v0 = vpop.f32.mrf.mxu0  ;;  %v6920_v54 = vor.u32 %v7755_v10, %v6917_v14  ;;  %v6916_v33 = vor.u32 %v7759_v38, %v6915_v29 }
 0x1bf   :  { %15236 = vst [vmem:[#allocation117_spill] sm:$0xff] %v9050_v17  ;;  %v7176_v17 = vor.u32 %v7819_v62, %v7173_v63 }
 0x1c0   :  { %1953 = vmatpush.bf16.msra.mxu2 %v6920_v54  ;;  %1775 = vmatpush.bf16.msra.mxu0 %v6916_v33 }
 0x1c1   :  { %2042 = vmatpush.bf16.msra.mxu3 %v7176_v17 }
 0x1c2   :  { %v1693_v6 = vpop.f32.mrf.mxu3 }
 0x1c4   :  { %v1518_v24 = vpop.f32.mrf.mxu1 }
 0x1c5   :  { %v1609_v23 = vpop.f32.mrf.mxu2  ;;  %v9062_v10 = vadd.f32 %v1518_v24, %v1429_v7  ;;  %v6885_v24 = vld [vmem:[#allocation3 + $0xb0] sm:$0xf0] }
 0x1c6   :  { %v1434_v18 = vpop.f32.mrf.mxu0 }
 0x1c7   :  { %1735 = vmatmul.bf16.gmra.mxu3 %v8720_v46  ;;  %1557 = vmatmul.bf16.gmra.mxu1 %v8720_v46  ;;  %15238 = vst [vmem:[#allocation119_spill] sm:$0xff] %v9062_v10 }
 0x1c9   :  { %1473 = vmatmul.bf16.gmra.mxu0 %v8748_v5 }
 0x1ca   :  { %v1696_v4 = vpop.f32.mrf.mxu3  ;;  %1651 = vmatmul.bf16.gmra.mxu2 %v8748_v5  ;;  %v9060_v5 = vadd.f32 %v1693_v6, %v1604_v45  ;;  %v7747_v6 = vld [vmem:[#allocation3 + $0x94] sm:$0xf] }
 0x1cb   :  { %v9064_v14 = vadd.f32 %v1696_v4, %v1607_v40  ;;  %v7811_v40 = vld [vmem:[#allocation3 + $0x294] sm:$0xf] }
 0x1cc   :  { %v1520_v22 = vpop.f32.mrf.mxu1  ;;  %15237 = vst [vmem:[#allocation118_spill] sm:$0xff] %v9060_v5 }
 0x1cd   :  { %v1612_v37 = vpop.f32.mrf.mxu2  ;;  %15239 = vst [vmem:[#allocation120_spill] sm:$0xff] %v9064_v14  ;;  %v9066_v54 = vadd.f32 %v1520_v22, %v1431_v0  ;;  %v7141_v0 = vld [vmem:[#allocation3 + $0x2b0] sm:$0xf0] }
 0x1ce   :  { %v1436_v62 = vpop.f32.mrf.mxu0 }
 0x1cf   :  { %15240 = vst [vmem:[#allocation121_spill] sm:$0xff] %v9066_v54 }
 0x1d2   :  { %v1698_v39 = vpop.f32.mrf.mxu3 }
 0x1d3   :  { %v9068_v17 = vadd.f32 %v1698_v39, %v1609_v23 }
 0x1d4   :  { %v1523_v16 = vpop.f32.mrf.mxu1 }
 0x1d5   :  { %15241 = vst [vmem:[#allocation122_spill] sm:$0xff] %v9068_v17  ;;  %v9070_v46 = vadd.f32 %v1523_v16, %v1434_v18  ;;  %v1614_v28 = vpop.f32.mrf.mxu2 }
 0x1d6   :  { %v1439_v38 = vpop.f32.mrf.mxu0 }
 0x1d7   :  { %1740 = vmatmul.bf16.gmra.mxu3 %v8750_v11  ;;  %1562 = vmatmul.bf16.gmra.mxu1 %v8750_v11  ;;  %15242 = vst [vmem:[#allocation123_spill] sm:$0xff] %v9070_v46 }
 0x1d9   :  { %1478 = vmatmul.bf16.gmra.mxu0 %v8780_v41 }
 0x1da   :  { %v1701_v1 = vpop.f32.mrf.mxu3  ;;  %1656 = vmatmul.bf16.gmra.mxu2 %v8780_v41 }
 0x1db   :  { %v9074_v33 = vadd.f32 %v1701_v1, %v1612_v37  ;;  %v6888_v1 = vor.u32 %v7747_v6, %v6885_v24  ;;  %v7144_v37 = vor.u32 %v7811_v40, %v7141_v0  ;;  %v7139_v24 = vld [vmem:[#allocation3 + $0x290] sm:$0xf] }
 0x1dc   :  { %v1525_v63 = vpop.f32.mrf.mxu1  ;;  %v7815_v40 = vld [vmem:[#allocation3 + $0x2ac] sm:$0xf0] }
 0x1dd   :  { %15243 = vst [vmem:[#allocation124_spill] sm:$0xff] %v9074_v33  ;;  %v9076_v44 = vadd.f32 %v1525_v63, %v1436_v62  ;;  %v1617_v4 = vpop.f32.mrf.mxu2  ;;  %1954 = vmatpush.bf16.msra.mxu2 %v6888_v1  ;;  %2043 = vmatpush.bf16.msra.mxu3 %v7144_v37  ;;  %v7140_v37 = vor.u32 %v7815_v40, %v7139_v24 }
 0x1de   :  { %v1441_v23 = vpop.f32.mrf.mxu0 }
 0x1df   :  { %15244 = vst [vmem:[#allocation125_spill] sm:$0xff] %v9076_v44  ;;  %1865 = vmatpush.bf16.msra.mxu1 %v7140_v37 }
 0x1e2   :  { %v1703_v59 = vpop.f32.mrf.mxu3 }
 0x1e3   :  { %v9080_v29 = vadd.f32 %v1703_v59, %v1614_v28  ;;  %v6883_v28 = vld [vmem:[#allocation3 + $0x90] sm:$0xf] }
 0x1e4   :  { %v1528_v45 = vpop.f32.mrf.mxu1  ;;  %v7751_v59 = vld [vmem:[#allocation3 + $0xac] sm:$0xf0] }
 0x1e5   :  { %15245 = vst [vmem:[#allocation126_spill] sm:$0xff] %v9080_v29  ;;  %v9082_v7 = vadd.f32 %v1528_v45, %v1439_v38  ;;  %v1619_v18 = vpop.f32.mrf.mxu2  ;;  %v6884_v38 = vor.u32 %v7751_v59, %v6883_v28 }
 0x1e6   :  { %v1444_v62 = vpop.f32.mrf.mxu0 }
 0x1e7   :  { %1745 = vmatmul.bf16.gmra.mxu3 %v8784_v51  ;;  %1567 = vmatmul.bf16.gmra.mxu1 %v8784_v51  ;;  %15246 = vst [vmem:[#allocation127_spill] sm:$0xff] %v9082_v7  ;;  %v7051_v51 = vld [vmem:[#allocation3 + $0x1d8] sm:$0xf] }
 0x1e8   :  { %1776 = vmatpush.bf16.msra.mxu0 %v6884_v38 }
 0x1e9   :  { %1483 = vmatmul.bf16.gmra.mxu0 %v8812_v25 }
 0x1ea   :  { %v1706_v22 = vpop.f32.mrf.mxu3  ;;  %1661 = vmatmul.bf16.gmra.mxu2 %v8812_v25 }
 0x1eb   :  { %v9094_v7 = vadd.f32 %v1706_v22, %v1617_v4 }
 0x1ec   :  { %v1530_v39 = vpop.f32.mrf.mxu1 }
 0x1ed   :  { %v1622_v45 = vpop.f32.mrf.mxu2  ;;  %15249 = vst [vmem:[#allocation130_spill] sm:$0xff] %v9094_v7  ;;  %v9096_v29 = vadd.f32 %v1530_v39, %v1441_v23  ;;  %v7739_v23 = vld [vmem:[#allocation3 + $0x54] sm:$0xf] }
 0x1ee   :  { %v9088_v0 = vpop.f32.mrf.mxu0  ;;  %v6853_v39 = vld [vmem:[#allocation3 + $0x70] sm:$0xf0] }
 0x1ef   :  { %15247 = vst [vmem:[#allocation128_spill] sm:$0xff] %v9088_v0 }
 0x1f0   :  { %15250 = vst [vmem:[#allocation131_spill] sm:$0xff] %v9096_v29 }
 0x1f2   :  { %v1708_v16 = vpop.f32.mrf.mxu3 }
 0x1f3   :  { %v9098_v28 = vadd.f32 %v1708_v16, %v1619_v18 }
 0x1f4   :  { %v1533_v63 = vpop.f32.mrf.mxu1 }
 0x1f5   :  { %15251 = vst [vmem:[#allocation132_spill] sm:$0xff] %v9098_v28  ;;  %v9100_v59 = vadd.f32 %v1533_v63, %v1444_v62  ;;  %v9104_v38 = vpop.f32.mrf.mxu2  ;;  %v6856_v62 = vor.u32 %v7739_v23, %v6853_v39 }
 0x1f6   :  { %15253 = vst [vmem:[#allocation134_spill] sm:$0xff] %v9104_v38  ;;  %v1449_v24 = vpop.f32.mrf.mxu0  ;;  %v7109_v38 = vld [vmem:[#allocation3 + $0x270] sm:$0xf0] }
 0x1f7   :  { %1750 = vmatmul.bf16.gmra.mxu3 %v8816_v34  ;;  %1572 = vmatmul.bf16.gmra.mxu1 %v8816_v34  ;;  %15252 = vst [vmem:[#allocation133_spill] sm:$0xff] %v9100_v59  ;;  %v7743_v59 = vld [vmem:[#allocation3 + $0x6c] sm:$0xf0]  ;;  %v7329_v34 = vmul.f32 -1.442695, %v8755_v15 }
 0x1f8   :  { %1955 = vmatpush.bf16.msra.mxu2 %v6856_v62 }
 0x1f9   :  { %1488 = vmatmul.bf16.gmra.mxu0 %v8850_v61 }
 0x1fa   :  { %v1711_v6 = vpop.f32.mrf.mxu3  ;;  %1666 = vmatmul.bf16.gmra.mxu2 %v8850_v61 }
 0x1fb   :  { %v9108_v0 = vadd.f32 %v1711_v6, %v1622_v45 }
 0x1fc   :  { %v9090_v1 = vpop.f32.mrf.mxu1 }
 0x1fd   :  { %15248 = vst [vmem:[#allocation129_spill] sm:$0xff] %v9090_v1  ;;  %v1627_v4 = vpop.f32.mrf.mxu2 }
 0x1fe   :  { %15255 = vst [vmem:[#allocation136_spill] sm:$0xff] %v9108_v0  ;;  %v9112_v18 = vpop.f32.mrf.mxu0  ;;  %v6851_v0 = vld [vmem:[#allocation3 + $0x50] sm:$0xf] }
 0x1ff   :  { %15256 = vst [vmem:[#allocation137_spill] sm:$0xff] %v9112_v18  ;;  %v7107_v18 = vld [vmem:[#allocation3 + $0x250] sm:$0xf]  ;;  %v6852_v39 = vor.u32 %v7743_v59, %v6851_v0 }
 0x201   :  { %1777 = vmatpush.bf16.msra.mxu0 %v6852_v39 }
 0x202   :  { %v9106_v1 = vpop.f32.mrf.mxu3 }
 0x203   :  { %15254 = vst [vmem:[#allocation135_spill] sm:$0xff] %v9106_v1  ;;  %v7803_v1 = vld [vmem:[#allocation3 + $0x254] sm:$0xf] }
 0x204   :  { %v1538_v40 = vpop.f32.mrf.mxu1  ;;  %v7112_v23 = vor.u32 %v7803_v1, %v7109_v38 }
 0x205   :  { %v1629_v63 = vpop.f32.mrf.mxu2  ;;  %v9120_v7 = vadd.f32 %v1538_v40, %v1449_v24 }
 0x206   :  { %v1454_v6 = vpop.f32.mrf.mxu0  ;;  %2044 = vmatpush.bf16.msra.mxu3 %v7112_v23 }
 0x207   :  { %1755 = vmatmul.bf16.gmra.mxu3 %v8852_v49  ;;  %1577 = vmatmul.bf16.gmra.mxu1 %v8852_v49  ;;  %15258 = vst [vmem:[#allocation139_spill] sm:$0xff] %v9120_v7  ;;  %v7314_v7 = vmul.f32 -1.442695, %v8702_v31 }
 0x209   :  { %1493 = vmatmul.bf16.gmra.mxu0 %v8872_v35 }
 0x20a   :  { %v1716_v22 = vpop.f32.mrf.mxu3  ;;  %1671 = vmatmul.bf16.gmra.mxu2 %v8872_v35 }
 0x20b   :  { %v9123_v46 = vadd.f32 %v1716_v22, %v1627_v4 }
 0x20c   :  { %v9114_v16 = vpop.f32.mrf.mxu1 }
 0x20d   :  { %15257 = vst [vmem:[#allocation138_spill] sm:$0xff] %v9114_v16  ;;  %v7807_v16 = vld [vmem:[#allocation3 + $0x26c] sm:$0xf0]  ;;  %v1632_v28 = vpop.f32.mrf.mxu2 }
 0x20e   :  { %v7108_v62 = vor.u32 %v7807_v16, %v7107_v18  ;;  %v1456_v44 = vpop.f32.mrf.mxu0  ;;  %15259 = vst [vmem:[#allocation140_spill] sm:$0xff] %v9123_v46 }
 0x210   :  { %1866 = vmatpush.bf16.msra.mxu1 %v7108_v62 }
 0x212   :  { %v1718_v45 = vpop.f32.mrf.mxu3 }
 0x213   :  { %v9126_v17 = vadd.f32 %v1718_v45, %v1629_v63 }
 0x214   :  { %v1543_v37 = vpop.f32.mrf.mxu1 }
 0x215   :  { %15260 = vst [vmem:[#allocation141_spill] sm:$0xff] %v9126_v17  ;;  %v9128_v1 = vadd.f32 %v1543_v37, %v1454_v6  ;;  %v1634_v59 = vpop.f32.mrf.mxu2  ;;  %v7731_v6 = vld [vmem:[#allocation3 + $0x14] sm:$0xf] }
 0x216   :  { %v1459_v18 = vpop.f32.mrf.mxu0  ;;  %v6821_v37 = vld [vmem:[#allocation3 + $0x30] sm:$0xf0] }
 0x217   :  { %1760 = vmatmul.bf16.gmra.mxu3 %v8892_v60  ;;  %1582 = vmatmul.bf16.gmra.mxu1 %v8892_v60  ;;  %15261 = vst [vmem:[#allocation142_spill] sm:$0xff] %v9128_v1  ;;  %v6819_v1 = vld [vmem:[#allocation3 + $0x10] sm:$0xf]  ;;  %v6824_v17 = vor.u32 %v7731_v6, %v6821_v37 }
 0x219   :  { %1498 = vmatmul.bf16.gmra.mxu0 %v8914_v30  ;;  %1956 = vmatpush.bf16.msra.mxu2 %v6824_v17 }
 0x21a   :  { %1676 = vmatmul.bf16.gmra.mxu2 %v8914_v30  ;;  %v1721_v29 = vpop.f32.mrf.mxu3  ;;  %v7317_v30 = vmul.f32 -1.442695, %v8704_v36 }
 0x21b   :  { %v9130_v0 = vadd.f32 %v1721_v29, %v1632_v28  ;;  %v7795_v29 = vld [vmem:[#allocation3 + $0x214] sm:$0xf] }
 0x21c   :  { %v1545_v33 = vpop.f32.mrf.mxu1  ;;  %v7077_v28 = vld [vmem:[#allocation3 + $0x230] sm:$0xf0] }
 0x21d   :  { %15262 = vst [vmem:[#allocation143_spill] sm:$0xff] %v9130_v0  ;;  %v9132_v24 = vadd.f32 %v1545_v33, %v1456_v44  ;;  %v1637_v23 = vpop.f32.mrf.mxu2  ;;  %v7313_v0 = vmul.f32 -1.442695, %v8696_v19  ;;  %v7080_v33 = vor.u32 %v7795_v29, %v7077_v28  ;;  %v7735_v44 = vld [vmem:[#allocation3 + $0x2c] sm:$0xf0] }
 0x21e   :  { %v1461_v4 = vpop.f32.mrf.mxu0  ;;  %v6820_v54 = vor.u32 %v7735_v44, %v6819_v1 }
 0x21f   :  { %15263 = vst [vmem:[#allocation144_spill] sm:$0xff] %v9132_v24  ;;  %2045 = vmatpush.bf16.msra.mxu3 %v7080_v33  ;;  %7927 = vpow2.f32 %v7313_v0 }
 0x220   :  { %1778 = vmatpush.bf16.msra.mxu0 %v6820_v54  ;;  %7929 = vpow2.f32 %v7314_v7 }
 0x221   :  { %7931 = vpow2.f32 %v7317_v30 }
 0x222   :  { %v1723_v38 = vpop.f32.mrf.mxu3 }
 0x223   :  { %v9134_v40 = vadd.f32 %v1723_v38, %v1634_v59  ;;  %v7075_v59 = vld [vmem:[#allocation3 + $0x210] sm:$0xf] }
 0x224   :  { %v1548_v16 = vpop.f32.mrf.mxu1  ;;  %v7799_v38 = vld [vmem:[#allocation3 + $0x22c] sm:$0xf0] }
 0x225   :  { %15264 = vst [vmem:[#allocation145_spill] sm:$0xff] %v9134_v40  ;;  %v1639_v62 = vpop.f32.mrf.mxu2  ;;  %v7076_v14 = vor.u32 %v7799_v38, %v7075_v59  ;;  %v9138_v10 = vadd.f32 %v1548_v16, %v1459_v18  ;;  %v7928_v1 = vpop.eup %7927 }
 0x226   :  { %v1464_v63 = vpop.f32.mrf.mxu0  ;;  %v9155_v54 = vadd.f32 1.0, %v7928_v1  ;;  %v7930_v16 = vpop.eup %7929 }
 0x227   :  { %1765 = vmatmul.bf16.gmra.mxu3 %v8924_v21  ;;  %1587 = vmatmul.bf16.gmra.mxu1 %v8924_v21  ;;  %15265 = vst [vmem:[#allocation146_spill] sm:$0xff] %v9138_v10  ;;  %v7932_v30 = vpop.eup %7931  ;;  %v7053_v10 = vld [vmem:[#allocation3 + $0x1f8] sm:$0xf0] }
 0x228   :  { %1867 = vmatpush.bf16.msra.mxu1 %v7076_v14  ;;  %7933 = vrcp.f32 %v9155_v54  ;;  %vm3000_vm0 = vweird.f32 %v9155_v54 }
 0x229   :  { %1779 = vmatmul.bf16.vlgmr.msra.gmra.mxu0 %v8532_v43 }
 0x22a   :  { %v1726_v39 = vpop.f32.mrf.mxu3  ;;  %1957 = vmatmul.bf16.vlgmr.msra.gmra.mxu2 %v8532_v43 }
 0x22b   :  { %v9141_v6 = vadd.f32 %v1726_v39, %v1637_v23  ;;  %v7318_v23 = vmul.f32 -1.442695, %v8722_v48 }
 0x22c   :  { %v1550_v22 = vpop.f32.mrf.mxu1 }
 0x22d   :  { %v1642_v40 = vpop.f32.mrf.mxu2  ;;  %15266 = vst [vmem:[#allocation147_spill] sm:$0xff] %v9141_v6  ;;  %v9143_v37 = vadd.f32 %v1550_v22, %v1461_v4  ;;  %v9172_v22 = vadd.f32 1.0, %v7932_v30  ;;  %7935 = vpow2.f32 %v7318_v23 }
 0x22e   :  { %v1466_v5 = vpop.f32.mrf.mxu0 }
 0x22f   :  { %15267 = vst [vmem:[#allocation148_spill] sm:$0xff] %v9143_v37  ;;  %vm3060_vm4 = vweird.f32 %v9172_v22 }
 0x232   :  { %v1728_v46 = vpop.f32.mrf.mxu3 }
 0x233   :  { %v9145_v17 = vadd.f32 %v1728_v46, %v1639_v62  ;;  %v9176_v62 = vadd.f32 %v8734_v57, %v8730_v55 }
 0x234   :  { %v1553_v45 = vpop.f32.mrf.mxu1 }
 0x235   :  { %15268 = vst [vmem:[#allocation149_spill] sm:$0xff] %v9145_v17  ;;  %v9151_v0 = vadd.f32 %v1553_v45, %v1464_v63  ;;  %v9157_v18 = vpop.f32.mrf.mxu2  ;;  %v7322_v63 = vmul.f32 -1.442695, %v8732_v56  ;;  %v9184_v45 = vpop.eup %7933  ;;  %v7325_v29 = vmul.f32 -1.442695, %v9176_v62 }
 0x236   :  { %v9164_v39 = vpop.f32.mrf.mxu0  ;;  %v7936_v28 = vpop.eup %7935  ;;  %v2996_v33 = vmul.f32 %v9184_v45, %v9155_v54  ;;  %v7788_v17 = vld [vmem:[#allocation3 + $0x1dc] sm:$0xf]  ;;  %vm3001_vm1 = vweird.f32 %v9184_v45 }
 0x237   :  { %2046 = vmatmul.bf16.vlgmr.msra.gmra.mxu3 %v8534_v47  ;;  %1868 = vmatmul.bf16.vlgmr.msra.gmra.mxu1 %v8534_v47  ;;  %15269 = vst [vmem:[#allocation150_spill] sm:$0xff] %v9151_v0  ;;  %v9200_v38 = vadd.f32 1.0, %v7936_v28  ;;  %vm9261_vm6 = vmor %vm3000_vm0, %vm3001_vm1 }
 0x238   :  { %v2997_v23 = vsub.f32 1.0, %v2996_v33  ;;  %v3004_v33 = vand.u32 2147483647, %v9155_v54 }
 0x239   :  { %1784 = vmatmul.bf16.gmra.mxu0 %v8552_v2  ;;  %vm3075_vm12 = vweird.f32 %v9200_v38 }
 0x23a   :  { %v1731_v24 = vpop.f32.mrf.mxu3  ;;  %1962 = vmatmul.bf16.gmra.mxu2 %v8552_v2  ;;  %v7309_v2 = vld [vmem:[#allocation3 + $0x3f8] sm:$0xf0]  ;;  %vm9238_vm2 = vcmp.eq.f32.partialorder %v3004_v33, 8.507059e+37 }
 0x23b   :  { %v9153_v14 = vadd.f32 %v1731_v24, %v1642_v40  ;;  %v9169_v24 = vadd.f32 1.0, %v7930_v16  ;;  %v7321_v40 = vmul.f32 -1.442695, %v8724_v50  ;;  %v7326_v16 = vmul.f32 -1.442695, %v8752_v13 }
 0x23c   :  { %v1555_v21 = vpop.f32.mrf.mxu1 }
 0x23d   :  { %15270 = vst [vmem:[#allocation151_spill] sm:$0xff] %v9153_v14  ;;  %v9162_v7 = vadd.f32 %v1555_v21, %v1466_v5  ;;  %7937 = vrcp.f32 %v9169_v24  ;;  %v9179_v5 = vpop.f32.mrf.mxu2  ;;  %v3021_v35 = vand.u32 2147483648, %v9169_v24  ;;  %v3019_v61 = vand.u32 2147483647, %v9169_v24 }
 0x23e   :  { %7939 = vpow2.f32 %v7321_v40  ;;  %v9190_v55 = vpop.f32.mrf.mxu0  ;;  %vm3015_vm3 = vweird.f32 %v9169_v24 }
 0x23f   :  { %15271 = vst [vmem:[#allocation152_spill] sm:$0xff] %v9162_v7  ;;  %7941 = vrcp.f32 %v9172_v22  ;;  %v9249_v33 = vor.u32 1.1754944e-38, %v3021_v35  ;;  %v15276_v35 = vld [vmem:[#allocation31_spill] sm:$0xff]  ;;  %vm9280_vm8 = vcmp.eq.f32.partialorder %v3019_v61, 8.507059e+37 }
 0x240   :  { %7943 = vpow2.f32 %v7322_v63 }
 0x241   :  { %7945 = vpow2.f32 %v7325_v29  ;;  %v3006_v29 = vand.u32 2147483648, %v9155_v54 }
 0x242   :  { %v9159_v46 = vpop.f32.mrf.mxu3  ;;  %7947 = vrcp.f32 %v9200_v38 }
 0x243   :  { %v9198_v44 = vpop.eup %7937  ;;  %7949 = vpow2.f32 %v7326_v16  ;;  %v9226_v60 = vor.u32 1.1754944e-38, %v3006_v29  ;;  %v7307_v29 = vld [vmem:[#allocation3 + $0x3d8] sm:$0xf] }
 0x244   :  { %v9166_v4 = vpop.f32.mrf.mxu1  ;;  %v7940_v59 = vpop.eup %7939  ;;  %v3011_v7 = vmul.f32 %v9198_v44, %v9169_v24  ;;  %vm3016_vm5 = vweird.f32 %v9198_v44 }
 0x245   :  { %v9202_v1 = vpop.eup %7941  ;;  %v9205_v30 = vpop.f32.mrf.mxu2  ;;  %v9211_v14 = vadd.f32 1.0, %v7940_v59  ;;  %v2998_v59 = vmul.f32 %v9184_v45, %v2997_v23  ;;  %v7056_v23 = vor.u32 %v7788_v17, %v7053_v10  ;;  %v3066_v17 = vand.u32 2147483648, %v9172_v22  ;;  %vm9333_vm10 = vmor %vm3015_vm3, %vm3016_vm5 }
 0x246   :  { %v7944_v63 = vpop.eup %7943  ;;  %v3056_v28 = vmul.f32 %v9202_v1, %v9172_v22  ;;  %v9218_v37 = vpop.f32.mrf.mxu0  ;;  %v3012_v47 = vsub.f32 1.0, %v3011_v7  ;;  %vm3061_vm7 = vweird.f32 %v9202_v1 }
 0x247   :  { %2051 = vmatmul.bf16.gmra.mxu3 %v8554_v3  ;;  %1873 = vmatmul.bf16.gmra.mxu1 %v8554_v3  ;;  %v7946_v0 = vpop.eup %7945  ;;  %v7852_v3 = vld [vmem:[#allocation3 + $0x3dc] sm:$0xf]  ;;  %7951 = vrcp.f32 %v9211_v14  ;;  %v9224_v43 = vadd.f32 1.0, %v7944_v63  ;;  %v2999_v7 = vadd.f32 %v9184_v45, %v2998_v59  ;;  %vm9346_vm11 = vmor %vm3060_vm4, %vm3061_vm7  ;;  %vm3120_vm15 = vweird.f32 %v9211_v14 }
 0x248   :  { %v3057_v16 = vsub.f32 1.0, %v3056_v28  ;;  %v9229_v49 = vadd.f32 1.0, %v7946_v0  ;;  %v7312_v25 = vor.u32 %v7852_v3, %v7309_v2  ;;  %v9233_v41 = vpop.eup %7947  ;;  %v7792_v0 = vld [vmem:[#allocation3 + $0x1f4] sm:$0xf0]  ;;  %v3013_v2 = vmul.f32 %v9198_v44, %v3012_v47  ;;  %2305 = vmatpush.bf16.msrb.mxu2 %v7056_v23 }
 0x249   :  { %v7856_v28 = vld [vmem:[#allocation3 + $0x3f4] sm:$0xf0]  ;;  %v7950_v10 = vpop.eup %7949  ;;  %v3064_v3 = vand.u32 2147483647, %v9172_v22  ;;  %7953 = vrcp.f32 %v9224_v43  ;;  %v7052_v23 = vor.u32 %v7792_v0, %v7051_v51  ;;  %1789 = vmatmul.bf16.gmra.mxu0 %v8572_v8  ;;  %v3003_v58 = vsel %vm9261_vm6, %v9184_v45, %v2999_v7 }
 0x24a   :  { %v9181_v21 = vpop.f32.mrf.mxu3  ;;  %2394 = vmatpush.bf16.msrb.mxu3 %v7312_v25  ;;  %v3058_v59 = vmul.f32 %v9202_v1, %v3057_v16  ;;  %7955 = vrcp.f32 %v9229_v49  ;;  %1967 = vmatmul.bf16.gmra.mxu2 %v8572_v8  ;;  %v9267_v16 = vadd.f32 %v15276_v35, %v8760_v20  ;;  %v7308_v12 = vor.u32 %v7856_v28, %v7307_v29  ;;  %v15279_v0 = vld [vmem:[#allocation32_spill] sm:$0xff] }
 0x24b   :  { %7957 = vpow2.f32 %v7329_v34  ;;  %v3071_v54 = vmul.f32 %v9233_v41, %v9200_v38  ;;  %v9277_v34 = vadd.f32 1.0, %v7950_v10  ;;  %v3014_v20 = vadd.f32 %v9198_v44, %v3013_v2  ;;  %2127 = vmatpush.bf16.msrb.mxu0 %v7052_v23 }
 0x24c   :  { %v9192_v57 = vpop.f32.mrf.mxu1  ;;  %v7330_v29 = vmul.f32 -1.442695, %v15279_v0  ;;  %2216 = vmatpush.bf16.msrb.mxu1 %v7308_v12  ;;  %v9287_v45 = vadd.f32 %v9159_v46, %v9157_v18  ;;  %v9291_v7 = vadd.f32 %v9166_v4, %v9164_v39  ;;  %v3059_v2 = vadd.f32 %v9202_v1, %v3058_v59  ;;  %v15284_v39 = vld [vmem:[#allocation33_spill] sm:$0xff]  ;;  %v15285_v4 = vld [vmem:[#allocation35_spill] sm:$0xff] }
 0x24d   :  { %v1652_v47 = vpop.f32.mrf.mxu2  ;;  %v9255_v42 = vpop.eup %7951  ;;  %v9298_v25 = vadd.f32 %v9181_v21, %v9179_v5  ;;  %v9302_v12 = vadd.f32 %v9192_v57, %v9190_v55  ;;  %v7333_v46 = vmul.f32 -1.442695, %v9267_v16  ;;  %v9309_v35 = vadd.f32 %v15285_v4, %v15284_v39 }
 0x24e   :  { %15280 = vst [vmem:[#allocation31_spill] sm:$0xff] %v9287_v45  ;;  %v1476_v28 = vpop.f32.mrf.mxu0  ;;  %v3116_v61 = vmul.f32 %v9255_v42, %v9211_v14  ;;  %vm9321_vm9 = vcmp.eq.f32.partialorder %v3064_v3, 8.507059e+37  ;;  %v3067_v57 = vor.u32 1.1754944e-38, %v3066_v17  ;;  %v3072_v23 = vsub.f32 1.0, %v3071_v54 }
 0x24f   :  { %15281 = vst [vmem:[#allocation32_spill] sm:$0xff] %v9291_v7  ;;  %v9304_v18 = vpop.eup %7953  ;;  %7959 = vrcp.f32 %v9277_v34  ;;  %v3018_v3 = vsel %vm9333_vm10, %v9198_v44, %v3014_v20  ;;  %v3063_v44 = vsel %vm9346_vm11, %v9202_v1, %v3059_v2  ;;  %v7334_v22 = vmul.f32 -1.442695, %v9309_v35 }
 0x250   :  { %15282 = vst [vmem:[#allocation153_spill] sm:$0xff] %v9298_v25  ;;  %v9319_v21 = vpop.eup %7955  ;;  %7961 = vpow2.f32 %v7330_v29  ;;  %v3117_v17 = vsub.f32 1.0, %v3116_v61  ;;  %v3073_v54 = vmul.f32 %v9233_v41, %v3072_v23  ;;  %v3131_v20 = vmul.f32 %v9304_v18, %v9224_v43  ;;  %v15297_v61 = vld [vmem:[#allocation37_spill] sm:$0xff] }
 0x251   :  { %15283 = vst [vmem:[#allocation154_spill] sm:$0xff] %v9302_v12  ;;  %v7958_v39 = vpop.eup %7957  ;;  %7963 = vpow2.f32 %v7333_v46  ;;  %v3176_v29 = vmul.f32 %v9319_v21, %v9229_v49  ;;  %v3124_v2 = vand.u32 2147483647, %v9211_v14  ;;  %v7337_v46 = vmul.f32 -1.442695, %v15297_v61 }
 0x252   :  { %v9207_v40 = vpop.f32.mrf.mxu3  ;;  %v3023_v23 = vsel %vm9280_vm8, %v9249_v33, %v3018_v3  ;;  %vm3076_vm13 = vweird.f32 %v9233_v41  ;;  %v3118_v33 = vmul.f32 %v9255_v42, %v3117_v17  ;;  %7965 = vpow2.f32 %v7334_v22 }
 0x253   :  { %v9313_v59 = vadd.f32 %v9207_v40, %v9205_v30  ;;  %v3008_v30 = vsel %vm9238_vm2, %v9226_v60, %v3003_v58  ;;  %v3081_v40 = vand.u32 2147483648, %v9200_v38  ;;  %v3126_v60 = vand.u32 2147483648, %v9211_v14  ;;  %vm9421_vm2 = vmor %vm3075_vm12, %vm3076_vm13 }
 0x254   :  { %v9220_v6 = vpop.f32.mrf.mxu1  ;;  %v3068_v58 = vsel %vm9321_vm9, %v3067_v57, %v3063_v44  ;;  %v3132_v3 = vsub.f32 1.0, %v3131_v20  ;;  %vm9394_vm0 = vcmp.eq.f32.partialorder %v3124_v2, 8.507059e+37  ;;  %v15303_v57 = vld [vmem:[#allocation38_spill] sm:$0xff]  ;;  %v9406_v17 = vmul.f32 %v3023_v23, %v8702_v31  ;;  %v15309_v2 = vld [vmem:[#allocation40_spill] sm:$0xff] }
 0x255   :  { %15286 = vst [vmem:[#allocation33_spill] sm:$0xff] %v9313_v59  ;;  %v9317_v5 = vadd.f32 %v9220_v6, %v9218_v37  ;;  %v3079_v37 = vand.u32 2147483647, %v9200_v38  ;;  %v3082_v1 = vor.u32 1.1754944e-38, %v3081_v40  ;;  %v9372_v4 = vpop.eup %7959  ;;  %v3127_v51 = vor.u32 1.1754944e-38, %v3126_v60  ;;  %v15304_v60 = vld [vmem:[#allocation39_spill] sm:$0xff] }
 0x256   :  { %v7962_v40 = vpop.eup %7961  ;;  %v3191_v55 = vmul.f32 %v9372_v4, %v9277_v34  ;;  %v9403_v44 = vadd.f32 %v15304_v60, %v15303_v57  ;;  %15305 = vst [vmem:[#allocation38_spill] sm:$0xff] %v9406_v17  ;;  %vm3135_vm1 = vweird.f32 %v9224_v43  ;;  %v3139_v22 = vand.u32 2147483647, %v9224_v43 }
 0x257   :  { %2056 = vmatmul.bf16.gmra.mxu3 %v8574_v9  ;;  %1878 = vmatmul.bf16.gmra.mxu1 %v8574_v9  ;;  %15287 = vst [vmem:[#allocation35_spill] sm:$0xff] %v9317_v5  ;;  %vm9378_vm14 = vcmp.eq.f32.partialorder %v3079_v37, 8.507059e+37  ;;  %v3074_v37 = vadd.f32 %v9233_v41, %v3073_v54  ;;  %v9410_v54 = vadd.f32 1.0, %v7962_v40  ;;  %v9415_v20 = vmul.f32 %v3068_v58, %v8704_v36 }
 0x258   :  { %vm3121_vm3 = vweird.f32 %v9255_v42  ;;  %v3133_v38 = vmul.f32 %v9304_v18, %v3132_v3  ;;  %v3192_v5 = vsub.f32 1.0, %v3191_v55  ;;  %v7341_v59 = vmul.f32 -1.442695, %v9403_v44 }
 0x259   :  { %15306 = vst [vmem:[#allocation39_spill] sm:$0xff] %v9415_v20  ;;  %1794 = vmatmul.bf16.gmra.mxu0 %v8592_v26  ;;  %v3078_v36 = vsel %vm9421_vm2, %v9233_v41, %v3074_v37  ;;  %vm9449_vm4 = vmor %vm3120_vm15, %vm3121_vm3  ;;  %vm3136_vm5 = vweird.f32 %v9304_v18  ;;  %vm9454_vm6 = vcmp.eq.f32.partialorder %v3139_v22, 8.507059e+37  ;;  %vm3180_vm7 = vweird.f32 %v9229_v49 }
 0x25a   :  { %v1741_v11 = vpop.f32.mrf.mxu3  ;;  %1972 = vmatmul.bf16.gmra.mxu2 %v8592_v26  ;;  %vm3181_vm8 = vweird.f32 %v9319_v21  ;;  %v3134_v22 = vadd.f32 %v9304_v18, %v3133_v38  ;;  %vm9489_vm10 = vmor %vm3135_vm1, %vm3136_vm5  ;;  %vm3195_vm12 = vweird.f32 %v9277_v34  ;;  %vm3196_vm13 = vweird.f32 %v9372_v4  ;;  %v7780_v26 = vld [vmem:[#allocation3 + $0x19c] sm:$0xf] }
 0x25b   :  { %v9352_v24 = vadd.f32 %v1741_v11, %v1652_v47  ;;  %v9365_v11 = vadd.f32 1.0, %v7958_v39  ;;  %v1654_v47 = vpop.f32.mrf.mxu2  ;;  %vm9507_vm11 = vmor %vm3180_vm7, %vm3181_vm8  ;;  %vm3255_vm3 = vweird.f32 %v9410_v54  ;;  %v15340_v17 = vand.u32 2147483647, %v9410_v54 }
 0x25c   :  { %v1565_v10 = vpop.f32.mrf.mxu1  ;;  %vm9548_vm15 = vmor %vm3195_vm12, %vm3196_vm13 }
 0x25d   :  { %15294 = vst [vmem:[#allocation155_spill] sm:$0xff] %v9352_v24  ;;  %v9354_v63 = vadd.f32 %v1565_v10, %v1476_v28  ;;  %v9368_v10 = vmul.f32 %v3008_v30, %v8696_v19  ;;  %v9385_v30 = vpop.f32.mrf.mxu0  ;;  %7967 = vrcp.f32 %v9365_v11  ;;  %v3184_v24 = vand.u32 2147483647, %v9229_v49 }
 0x25e   :  { %7969 = vpow2.f32 %v7337_v46  ;;  %v7338_v46 = vmul.f32 -1.442695, %v15309_v2  ;;  %vm9637_vm7 = vcmp.eq.f32.partialorder %v15340_v17, 8.507059e+37 }
 0x25f   :  { %15295 = vst [vmem:[#allocation156_spill] sm:$0xff] %v9354_v63  ;;  %v3177_v63 = vsub.f32 1.0, %v3176_v29  ;;  %v3119_v29 = vadd.f32 %v9255_v42, %v3118_v33  ;;  %7971 = vrcp.f32 %v9410_v54  ;;  %vm9476_vm9 = vcmp.eq.f32.partialorder %v3184_v24, 8.507059e+37 }
 0x260   :  { %15296 = vst [vmem:[#allocation157_spill] sm:$0xff] %v9368_v10  ;;  %7973 = vpow2.f32 %v7338_v46  ;;  %v3199_v24 = vand.u32 2147483647, %v9277_v34 }
 0x261   :  { %v3178_v23 = vmul.f32 %v9319_v21, %v3177_v63  ;;  %v3123_v55 = vsel %vm9449_vm4, %v9255_v42, %v3119_v29 }
 0x262   :  { %v1743_v28 = vpop.f32.mrf.mxu3  ;;  %v3128_v39 = vsel %vm9394_vm0, %v3127_v51, %v3123_v55  ;;  %vm3240_vm0 = vweird.f32 %v9365_v11 }
 0x263   :  { %v9383_v19 = vadd.f32 %v1743_v28, %v1654_v47  ;;  %v7964_v47 = vpop.eup %7963  ;;  %v9437_v58 = vpop.f32.mrf.mxu2  ;;  %v3179_v31 = vadd.f32 %v9319_v21, %v3178_v23  ;;  %v3201_v28 = vand.u32 2147483648, %v9277_v34 }
 0x264   :  { %v9387_v6 = vpop.f32.mrf.mxu1  ;;  %v9435_v40 = vadd.f32 1.0, %v7964_v47  ;;  %v7966_v57 = vpop.eup %7965  ;;  %v3083_v47 = vsel %vm9378_vm14, %v3082_v1, %v3078_v36  ;;  %v3193_v1 = vmul.f32 %v9372_v4, %v3192_v5  ;;  %v15318_v5 = vld [vmem:[#allocation41_spill] sm:$0xff]  ;;  %v15319_v36 = vld [vmem:[#allocation43_spill] sm:$0xff]  ;;  %vm9530_vm14 = vcmp.eq.f32.partialorder %v3199_v24, 8.507059e+37 }
 0x265   :  { %15300 = vst [vmem:[#allocation37_spill] sm:$0xff] %v9383_v19  ;;  %v3141_v19 = vand.u32 2147483648, %v9224_v43  ;;  %v9443_v12 = vpop.eup %7967  ;;  %v9461_v37 = vpop.f32.mrf.mxu0  ;;  %v9474_v25 = vadd.f32 1.0, %v7966_v57  ;;  %v9498_v38 = vadd.f32 %v15319_v36, %v15318_v5  ;;  %v3183_v57 = vsel %vm9507_vm11, %v9319_v21, %v3179_v31  ;;  %v7277_v5 = vld [vmem:[#allocation3 + $0x3b8] sm:$0xf0] }
 0x266   :  { %v7970_v14 = vpop.eup %7969  ;;  %7975 = vrcp.f32 %v9435_v40  ;;  %v3236_v42 = vmul.f32 %v9443_v12, %v9365_v11  ;;  %v3261_v21 = vand.u32 2147483648, %v9410_v54  ;;  %v3202_v29 = vor.u32 1.1754944e-38, %v3201_v28 }
 0x267   :  { %2061 = vmatmul.bf16.gmra.mxu3 %v8594_v27  ;;  %1883 = vmatmul.bf16.gmra.mxu1 %v8594_v27  ;;  %v3142_v60 = vor.u32 1.1754944e-38, %v3141_v19  ;;  %v3186_v19 = vand.u32 2147483648, %v9229_v49  ;;  %7977 = vpow2.f32 %v7341_v59  ;;  %v9494_v46 = vadd.f32 1.0, %v7970_v14  ;;  %v9513_v23 = vpop.eup %7971 }
 0x268   :  { %v9501_v59 = vmul.f32 %v3083_v47, %v8722_v48  ;;  %v3138_v48 = vsel %vm9489_vm10, %v9304_v18, %v3134_v22  ;;  %v3246_v49 = vand.u32 2147483648, %v9365_v11  ;;  %7979 = vrcp.f32 %v9474_v25  ;;  %v7974_v41 = vpop.eup %7973  ;;  %v15335_v18 = vld [vmem:[#allocation46_spill] sm:$0xff] }
 0x269   :  { %v3187_v51 = vor.u32 1.1754944e-38, %v3186_v19  ;;  %v9524_v19 = vmul.f32 %v3128_v39, %v8724_v50  ;;  %v3194_v14 = vadd.f32 %v9372_v4, %v3193_v1  ;;  %v3237_v47 = vsub.f32 1.0, %v3236_v42  ;;  %1799 = vmatmul.bf16.gmra.mxu0 %v8612_v32 }
 0x26a   :  { %v9439_v33 = vpop.f32.mrf.mxu3  ;;  %15320 = vst [vmem:[#allocation40_spill] sm:$0xff] %v9501_v59  ;;  %7981 = vrcp.f32 %v9494_v46  ;;  %v7342_v22 = vmul.f32 -1.442695, %v9498_v38  ;;  %v3143_v42 = vsel %vm9454_vm6, %v3142_v60, %v3138_v48  ;;  %v3244_v24 = vand.u32 2147483647, %v9365_v11  ;;  %1977 = vmatmul.bf16.gmra.mxu2 %v8612_v32 }
 0x26b   :  { %15323 = vst [vmem:[#allocation41_spill] sm:$0xff] %v9524_v19  ;;  %v9537_v31 = vpop.f32.mrf.mxu2  ;;  %v3188_v39 = vsel %vm9476_vm9, %v3187_v51, %v3183_v57  ;;  %v9552_v36 = vor.u32 1.1754944e-38, %v3246_v49  ;;  %v3251_v43 = vmul.f32 %v9513_v23, %v9410_v54  ;;  %v9557_v60 = vadd.f32 1.0, %v7974_v41  ;;  %v15328_v57 = vld [vmem:[#allocation47_spill] sm:$0xff]  ;;  %v7019_v32 = vld [vmem:[#allocation3 + $0x198] sm:$0xf] }
 0x26c   :  { %v9463_v3 = vpop.f32.mrf.mxu1  ;;  %v9528_v55 = vpop.eup %7975  ;;  %v3198_v34 = vsel %vm9548_vm15, %v9372_v4, %v3194_v14  ;;  %v3238_v28 = vmul.f32 %v9443_v12, %v3237_v47  ;;  %v7345_v49 = vmul.f32 -1.442695, %v15328_v57  ;;  %v9572_v63 = vor.u32 1.1754944e-38, %v3261_v21  ;;  %v15329_v4 = vld [vmem:[#allocation18_spill] sm:$0xff]  ;;  %v7848_v19 = vld [vmem:[#allocation3 + $0x3b4] sm:$0xf0] }
 0x26d   :  { %v7978_v1 = vpop.eup %7977  ;;  %v9559_v7 = vpop.f32.mrf.mxu0  ;;  %v3296_v48 = vmul.f32 %v9528_v55, %v9435_v40  ;;  %v3306_v41 = vand.u32 2147483648, %v9435_v40  ;;  %7983 = vpow2.f32 %v7342_v22  ;;  %v9580_v14 = vmul.f32 %v3143_v42, %v8732_v56  ;;  %v7021_v22 = vld [vmem:[#allocation3 + $0x1b8] sm:$0xf0] }
 0x26e   :  { %v9570_v45 = vpop.eup %7979  ;;  %v9575_v27 = vadd.f32 1.0, %v7978_v1  ;;  %v9583_v47 = vmul.f32 %v3188_v39, %v9176_v62  ;;  %vm3241_vm1 = vweird.f32 %v9443_v12  ;;  %vm9587_vm2 = vcmp.eq.f32.partialorder %v3244_v24, 8.507059e+37  ;;  %v7844_v1 = vld [vmem:[#allocation3 + $0x39c] sm:$0xf] }
 0x26f   :  { %15330 = vst [vmem:[#allocation43_spill] sm:$0xff] %v9580_v14  ;;  %v3203_v62 = vsel %vm9530_vm14, %v3202_v29, %v3198_v34  ;;  %v3252_v42 = vsub.f32 1.0, %v3251_v43  ;;  %v3304_v39 = vand.u32 2147483647, %v9435_v40  ;;  %7985 = vrcp.f32 %v9557_v60  ;;  %v7275_v14 = vld [vmem:[#allocation3 + $0x398] sm:$0xf]  ;;  %vm9620_vm5 = vmor %vm3240_vm0, %vm3241_vm1 }
 0x270   :  { %15331 = vst [vmem:[#allocation47_spill] sm:$0xff] %v9583_v47  ;;  %v9593_v56 = vpop.eup %7981  ;;  %v3239_v24 = vadd.f32 %v9443_v12, %v3238_v28  ;;  %v3297_v9 = vsub.f32 1.0, %v3296_v48  ;;  %v3311_v8 = vmul.f32 %v9570_v45, %v9474_v25  ;;  %7987 = vpow2.f32 %v7345_v49  ;;  %v7784_v47 = vld [vmem:[#allocation3 + $0x1b4] sm:$0xf0] }
 0x271   :  { %7989 = vrcp.f32 %v9575_v27  ;;  %v7024_v43 = vor.u32 %v7780_v26, %v7021_v22  ;;  %v7280_v34 = vor.u32 %v7844_v1, %v7277_v5  ;;  %v9609_v28 = vmul.f32 %v3203_v62, %v8752_v13  ;;  %v15339_v22 = vld [vmem:[#allocation48_spill] sm:$0xff] }
 0x272   :  { %v9539_v50 = vpop.f32.mrf.mxu3  ;;  %vm3256_vm4 = vweird.f32 %v9513_v23  ;;  %v9612_v48 = vor.u32 1.1754944e-38, %v3306_v41  ;;  %v3356_v49 = vmul.f32 %v9593_v56, %v9494_v46  ;;  %vm3300_vm6 = vweird.f32 %v9435_v40 }
 0x273   :  { %v7984_v59 = vpop.eup %7983  ;;  %v3319_v13 = vand.u32 2147483647, %v9474_v25  ;;  %v7346_v1 = vmul.f32 -1.442695, %v15339_v22  ;;  %2306 = vmatpush.bf16.msrb.mxu2 %v7024_v43  ;;  %2395 = vmatpush.bf16.msrb.mxu3 %v7280_v34  ;;  %v1662_v5 = vpop.f32.mrf.mxu2  ;;  %v3243_v11 = vsel %vm9620_vm5, %v9443_v12, %v3239_v24  ;;  %v3312_v43 = vsub.f32 1.0, %v3311_v8  ;;  %v15346_v8 = vld [vmem:[#allocation50_spill] sm:$0xff]  ;;  %vm9697_vm12 = vmor %vm3255_vm3, %vm3256_vm4 }
 0x274   :  { %v9561_v51 = vpop.f32.mrf.mxu1  ;;  %v9644_v10 = vadd.f32 %v9387_v6, %v9385_v30  ;;  %v3357_v17 = vsub.f32 1.0, %v3356_v49  ;;  %v9662_v30 = vadd.f32 %v9463_v3, %v9461_v37  ;;  %vm9670_vm8 = vcmp.eq.f32.partialorder %v3304_v39, 8.507059e+37 }
 0x275   :  { %v9633_v20 = vpop.eup %7985  ;;  %vm3315_vm9 = vweird.f32 %v9474_v25  ;;  %7991 = vpow2.f32 %v7346_v1  ;;  %vm3301_vm10 = vweird.f32 %v9528_v55  ;;  %vm3360_vm11 = vweird.f32 %v9494_v46  ;;  %v15355_v1 = vld [vmem:[#allocation51_spill] sm:$0xff] }
 0x276   :  { %15343 = vst [vmem:[#allocation46_spill] sm:$0xff] %v9644_v10  ;;  %v9684_v3 = vadd.f32 %v9561_v51, %v9559_v7  ;;  %v3313_v21 = vmul.f32 %v9570_v45, %v3312_v43  ;;  %v3371_v39 = vmul.f32 %v9633_v20, %v9557_v60  ;;  %v3366_v54 = vand.u32 2147483648, %v9494_v46  ;;  %vm9719_vm13 = vmor %vm3300_vm6, %vm3301_vm10 }
 0x277   :  { %2066 = vmatmul.bf16.gmra.mxu3 %v15329_v4  ;;  %1888 = vmatmul.bf16.gmra.mxu1 %v15329_v4  ;;  %v15334_v4 = vld [vmem:[#allocation45_spill] sm:$0xff]  ;;  %vm3316_vm14 = vweird.f32 %v9570_v45  ;;  %vm9724_vm15 = vcmp.eq.f32.partialorder %v3319_v13, 8.507059e+37  ;;  %vm3361_vm0 = vweird.f32 %v9593_v56  ;;  %vm3375_vm4 = vweird.f32 %v9557_v60 }
 0x278   :  { %v9606_v29 = vadd.f32 %v15335_v18, %v15334_v4  ;;  %15336 = vst [vmem:[#allocation45_spill] sm:$0xff] %v9609_v28  ;;  %v3253_v4 = vmul.f32 %v9513_v23, %v3252_v42  ;;  %v3298_v18 = vmul.f32 %v9528_v55, %v3297_v9  ;;  %v7020_v28 = vor.u32 %v7784_v47, %v7019_v32  ;;  %v9650_v32 = vpop.f32.mrf.mxu0  ;;  %v15345_v47 = vld [vmem:[#allocation49_spill] sm:$0xff]  ;;  %vm9763_vm1 = vmor %vm3315_vm9, %vm3316_vm14 }
 0x279   :  { %v7276_v42 = vor.u32 %v7848_v19, %v7275_v14  ;;  %v9648_v9 = vadd.f32 %v9439_v33, %v9437_v58  ;;  %v7988_v19 = vpop.eup %7987  ;;  %v9654_v14 = vadd.f32 1.0, %v7984_v59  ;;  %v9658_v24 = vadd.f32 %v15346_v8, %v15345_v47  ;;  %15347 = vst [vmem:[#allocation49_spill] sm:$0xff] %v9662_v30  ;;  %1804 = vmatmul.bf16.gmra.mxu0 %v8632_v52  ;;  %vm9783_vm3 = vmor %vm3360_vm11, %vm3361_vm0 }
 0x27a   :  { %v1751_v62 = vpop.f32.mrf.mxu3  ;;  %v7349_v34 = vmul.f32 -1.442695, %v9606_v29  ;;  %2128 = vmatpush.bf16.msrb.mxu0 %v7020_v28  ;;  %v9664_v6 = vpop.eup %7989  ;;  %v3248_v58 = vsel %vm9587_vm2, %v9552_v36, %v3243_v11  ;;  %v3254_v33 = vadd.f32 %v9513_v23, %v3253_v4  ;;  %v9677_v28 = vadd.f32 %v9539_v50, %v9537_v31  ;;  %15351 = vst [vmem:[#allocation158_spill] sm:$0xff] %v9684_v3  ;;  %v7772_v31 = vld [vmem:[#allocation3 + $0x15c] sm:$0xf] }
 0x27b   :  { %15344 = vst [vmem:[#allocation48_spill] sm:$0xff] %v9648_v9  ;;  %2217 = vmatpush.bf16.msrb.mxu1 %v7276_v42  ;;  %v3299_v37 = vadd.f32 %v9528_v55, %v3298_v18  ;;  %v9686_v36 = vadd.f32 %v1751_v62, %v1662_v5  ;;  %v9691_v49 = vadd.f32 1.0, %v7988_v19  ;;  %v3358_v50 = vmul.f32 %v9593_v56, %v3357_v17  ;;  %v7992_v18 = vpop.eup %7991  ;;  %v9734_v43 = vpop.f32.mrf.mxu2 }
 0x27c   :  { %v9652_v12 = vpop.f32.mrf.mxu1  ;;  %15350 = vst [vmem:[#allocation50_spill] sm:$0xff] %v9677_v28  ;;  %7993 = vpow2.f32 %v7349_v34  ;;  %v3416_v7 = vmul.f32 %v9664_v6, %v9575_v27  ;;  %v7350_v51 = vmul.f32 -1.442695, %v9658_v24  ;;  %v3258_v26 = vsel %vm9697_vm12, %v9513_v23, %v3254_v33  ;;  %1982 = vmatmul.bf16.gmra.mxu2 %v8632_v52  ;;  %v6987_v28 = vld [vmem:[#allocation3 + $0x158] sm:$0xf] }
 0x27d   :  { %15352 = vst [vmem:[#allocation159_spill] sm:$0xff] %v9686_v36  ;;  %7995 = vrcp.f32 %v9654_v14  ;;  %v3364_v4 = vand.u32 2147483647, %v9494_v46  ;;  %v7353_v5 = vmul.f32 -1.442695, %v15355_v1  ;;  %v9713_v62 = vmul.f32 %v3248_v58, %v8755_v15 }
 0x27e   :  { %v3303_v15 = vsel %vm9719_vm13, %v9528_v55, %v3299_v37  ;;  %v3314_v42 = vadd.f32 %v9570_v45, %v3313_v21  ;;  %v3372_v40 = vsub.f32 1.0, %v3371_v39  ;;  %7997 = vrcp.f32 %v9691_v49 }
 0x27f   :  { %15356 = vst [vmem:[#allocation51_spill] sm:$0xff] %v9713_v62  ;;  %v3263_v13 = vsel %vm9637_vm7, %v9572_v63, %v3258_v26  ;;  %v3359_v19 = vadd.f32 %v9593_v56, %v3358_v50  ;;  %v3417_v55 = vsub.f32 1.0, %v3416_v7  ;;  %7999 = vpow2.f32 %v7350_v51 }
 0x280   :  { %v15361_v47 = vand.u32 2147483648, %v9474_v25  ;;  %v3379_v58 = vand.u32 2147483647, %v9557_v60  ;;  %v3381_v33 = vand.u32 2147483648, %v9557_v60  ;;  %8001 = vpow2.f32 %v7353_v5  ;;  %v9750_v37 = vpop.f32.mrf.mxu0 }
 0x281   :  { %v3308_v21 = vsel %vm9670_vm8, %v9612_v48, %v3303_v15  ;;  %vm9767_vm2 = vcmp.eq.f32.partialorder %v3364_v4, 8.507059e+37  ;;  %v3367_v50 = vor.u32 1.1754944e-38, %v3366_v54  ;;  %v9771_v7 = vadd.f32 1.0, %v7992_v18  ;;  %v15370_v54 = vld [vmem:[#allocation55_spill] sm:$0xff]  ;;  %v15388_v18 = vld [vmem:[#allocation22_spill] sm:$0xff] }
 0x282   :  { %v9736_v34 = vpop.f32.mrf.mxu3  ;;  %v7994_v17 = vpop.eup %7993  ;;  %v3322_v8 = vor.u32 1.1754944e-38, %v15361_v47  ;;  %v9774_v51 = vmul.f32 %v3263_v13, %v15279_v0  ;;  %v3318_v48 = vsel %vm9763_vm1, %v9570_v45, %v3314_v42  ;;  %v3373_v59 = vmul.f32 %v9633_v20, %v3372_v40  ;;  %v15369_v45 = vld [vmem:[#allocation52_spill] sm:$0xff] }
 0x283   :  { %v9754_v41 = vpop.eup %7995  ;;  %v3363_v0 = vsel %vm9783_vm3, %v9593_v56, %v3359_v19  ;;  %v3418_v26 = vmul.f32 %v9664_v6, %v3417_v55  ;;  %v9793_v4 = vadd.f32 1.0, %v7994_v17  ;;  %v9797_v5 = vadd.f32 %v15370_v54, %v15369_v45  ;;  %v15374_v42 = vld [vmem:[#allocation56_spill] sm:$0xff] }
 0x284   :  { %v9752_v63 = vpop.f32.mrf.mxu1  ;;  %15366 = vst [vmem:[#allocation160_spill] sm:$0xff] %v9774_v51  ;;  %v9799_v46 = vpop.eup %7997  ;;  %v9802_v11 = vmul.f32 %v3308_v21, %v9267_v16  ;;  %vm9804_vm5 = vcmp.eq.f32.partialorder %v3379_v58, 8.507059e+37  ;;  %v3382_v15 = vor.u32 1.1754944e-38, %v3381_v33  ;;  %v3431_v56 = vmul.f32 %v9754_v41, %v9654_v14 }
 0x285   :  { %v7354_v40 = vmul.f32 -1.442695, %v15374_v42  ;;  %v8000_v13 = vpop.eup %7999  ;;  %v3323_v19 = vsel %vm9724_vm15, %v3322_v8, %v3318_v48  ;;  %vm3376_vm6 = vweird.f32 %v9633_v20  ;;  %v3424_v55 = vand.u32 2147483647, %v9575_v27  ;;  %v9821_v33 = vpop.f32.mrf.mxu2 }
 0x286   :  { %15371 = vst [vmem:[#allocation52_spill] sm:$0xff] %v9802_v11  ;;  %8003 = vrcp.f32 %v9771_v7  ;;  %v8002_v16 = vpop.eup %8001  ;;  %v3368_v17 = vsel %vm9767_vm2, %v3367_v50, %v3363_v0  ;;  %v3374_v47 = vadd.f32 %v9633_v20, %v3373_v59  ;;  %vm3421_vm7 = vweird.f32 %v9664_v6  ;;  %v6989_v50 = vld [vmem:[#allocation3 + $0x178] sm:$0xf0]  ;;  %v15375_v59 = vld [vmem:[#allocation57_spill] sm:$0xff]  ;;  %v15376_v0 = vld [vmem:[#allocation58_spill] sm:$0xff] }
 0x287   :  { %2071 = vmatmul.bf16.gmra.mxu3 %v8634_v53  ;;  %1893 = vmatmul.bf16.gmra.mxu1 %v8634_v53  ;;  %v3426_v58 = vand.u32 2147483648, %v9575_v27  ;;  %v3419_v8 = vadd.f32 %v9664_v6, %v3418_v26  ;;  %v3476_v21 = vmul.f32 %v9799_v46, %v9691_v49  ;;  %8005 = vrcp.f32 %v9793_v4  ;;  %vm9843_vm8 = vmor %vm3375_vm4, %vm3376_vm6 }
 0x288   :  { %v7357_v39 = vmul.f32 -1.442695, %v9797_v5  ;;  %v3432_v48 = vsub.f32 1.0, %v3431_v56  ;;  %v9830_v25 = vadd.f32 1.0, %v8000_v13  ;;  %8007 = vpow2.f32 %v7354_v40  ;;  %v9850_v13 = vpop.f32.mrf.mxu0 }
 0x289   :  { %v9834_v45 = vadd.f32 %v15376_v0, %v15375_v59  ;;  %v9837_v54 = vmul.f32 %v3323_v19, %v9309_v35  ;;  %vm3420_vm9 = vweird.f32 %v9575_v27  ;;  %v9848_v56 = vadd.f32 1.0, %v8002_v16  ;;  %v7776_v19 = vld [vmem:[#allocation3 + $0x174] sm:$0xf0] }
 0x28a   :  { %v9823_v23 = vpop.f32.mrf.mxu3  ;;  %v6992_v40 = vor.u32 %v7772_v31, %v6989_v50  ;;  %v3378_v35 = vsel %vm9843_vm8, %v9633_v20, %v3374_v47  ;;  %vm9857_vm10 = vcmp.eq.f32.partialorder %v3424_v55, 8.507059e+37  ;;  %v3439_v60 = vand.u32 2147483647, %v9654_v14  ;;  %vm9870_vm11 = vmor %vm3420_vm9, %vm3421_vm7  ;;  %v7836_v47 = vld [vmem:[#allocation3 + $0x35c] sm:$0xf]  ;;  %v15387_v31 = vld [vmem:[#allocation21_spill] sm:$0xff] }
 0x28b   :  { %15377 = vst [vmem:[#allocation55_spill] sm:$0xff] %v9837_v54  ;;  %v3441_v0 = vand.u32 2147483648, %v9654_v14  ;;  %v9866_v16 = vmul.f32 %v3368_v17, %v15297_v61  ;;  %v3427_v20 = vor.u32 1.1754944e-38, %v3426_v58  ;;  %v3477_v55 = vsub.f32 1.0, %v3476_v21  ;;  %v7245_v50 = vld [vmem:[#allocation3 + $0x378] sm:$0xf0]  ;;  %1809 = vmatmul.bf16.gmra.mxu0 %v15387_v31 }
 0x28c   :  { %v9852_v59 = vpop.f32.mrf.mxu1  ;;  %v9863_v27 = vpop.eup %8003  ;;  %8009 = vpow2.f32 %v7357_v39  ;;  %2307 = vmatpush.bf16.msrb.mxu2 %v6992_v40  ;;  %v3423_v26 = vsel %vm9870_vm11, %v9664_v6, %v3419_v8  ;;  %v3433_v36 = vmul.f32 %v9754_v41, %v3432_v48  ;;  %v7358_v61 = vmul.f32 -1.442695, %v9834_v45 }
 0x28d   :  { %15382 = vst [vmem:[#allocation56_spill] sm:$0xff] %v9866_v16  ;;  %8011 = vrcp.f32 %v9830_v25  ;;  %v9880_v17 = vpop.eup %8005  ;;  %v3383_v58 = vsel %vm9804_vm5, %v3382_v15, %v3378_v35  ;;  %vm3435_vm12 = vweird.f32 %v9654_v14  ;;  %v3486_v21 = vand.u32 2147483648, %v9691_v49  ;;  %1987 = vmatmul.bf16.gmra.mxu2 %v15387_v31 }
 0x28e   :  { %8013 = vrcp.f32 %v9848_v56  ;;  %v8008_v39 = vpop.eup %8007  ;;  %vm9887_vm13 = vcmp.eq.f32.partialorder %v3439_v60, 8.507059e+37  ;;  %v3442_v8 = vor.u32 1.1754944e-38, %v3441_v0  ;;  %v3491_v48 = vmul.f32 %v9863_v27, %v9771_v7 }
 0x28f   :  { %v7248_v40 = vor.u32 %v7836_v47, %v7245_v50  ;;  %v3428_v15 = vsel %vm9857_vm10, %v3427_v20, %v3423_v26  ;;  %v3478_v35 = vmul.f32 %v9799_v46, %v3477_v55  ;;  %v3484_v3 = vand.u32 2147483647, %v9691_v49  ;;  %v7243_v20 = vld [vmem:[#allocation3 + $0x358] sm:$0xf]  ;;  %v9907_v50 = vpop.f32.mrf.mxu2 }
 0x290   :  { %v3501_v60 = vand.u32 2147483648, %v9771_v7  ;;  %v9903_v0 = vmul.f32 %v3383_v58, %v15309_v2  ;;  %v3434_v47 = vadd.f32 %v9754_v41, %v3433_v36  ;;  %vm3436_vm14 = vweird.f32 %v9754_v41  ;;  %v7840_v55 = vld [vmem:[#allocation3 + $0x374] sm:$0xf0]  ;;  %v9939_v52 = vpop.f32.mrf.mxu0 }
 0x291   :  { %8015 = vpow2.f32 %v7358_v61  ;;  %2396 = vmatpush.bf16.msrb.mxu3 %v7248_v40  ;;  %vm3480_vm15 = vweird.f32 %v9691_v49  ;;  %v3487_v9 = vor.u32 1.1754944e-38, %v3486_v21  ;;  %v3536_v2 = vmul.f32 %v9880_v17, %v9793_v4  ;;  %vm9929_vm1 = vmor %vm3435_vm12, %vm3436_vm14  ;;  %v15400_v21 = vld [vmem:[#allocation61_spill] sm:$0xff] }
 0x292   :  { %15389 = vst [vmem:[#allocation57_spill] sm:$0xff] %v9903_v0  ;;  %v9909_v26 = vpop.f32.mrf.mxu3  ;;  %v8010_v30 = vpop.eup %8009  ;;  %v9914_v58 = vadd.f32 1.0, %v8008_v39  ;;  %v9919_v61 = vmul.f32 %v3428_v15, %v9403_v44  ;;  %vm3481_vm0 = vweird.f32 %v9799_v46  ;;  %v3492_v40 = vsub.f32 1.0, %v3491_v48  ;;  %v15395_v15 = vld [vmem:[#allocation64_spill] sm:$0xff] }
 0x293   :  { %v9916_v36 = vpop.eup %8011  ;;  %v3499_v10 = vand.u32 2147483647, %v9771_v7  ;;  %v3479_v39 = vadd.f32 %v9799_v46, %v3478_v35  ;;  %vm9934_vm2 = vcmp.eq.f32.partialorder %v3484_v3, 8.507059e+37  ;;  %v7361_v48 = vmul.f32 -1.442695, %v15395_v15  ;;  %vm9960_vm4 = vmor %vm3480_vm15, %vm3481_vm0 }
 0x294   :  { %15390 = vst [vmem:[#allocation58_spill] sm:$0xff] %v9919_v61  ;;  %v6988_v31 = vor.u32 %v7776_v19, %v6987_v28  ;;  %v7244_v53 = vor.u32 %v7840_v55, %v7243_v20  ;;  %v9941_v61 = vpop.f32.mrf.mxu1  ;;  %v3438_v14 = vsel %vm9929_vm1, %v9754_v41, %v3434_v47  ;;  %v9946_v0 = vor.u32 1.1754944e-38, %v3501_v60  ;;  %v15396_v19 = vld [vmem:[#allocation66_spill] sm:$0xff] }
 0x295   :  { %v3544_v35 = vand.u32 2147483647, %v9793_v4  ;;  %v9949_v3 = vadd.f32 1.0, %v8010_v30  ;;  %vm3495_vm3 = vweird.f32 %v9771_v7  ;;  %v3537_v16 = vsub.f32 1.0, %v3536_v2  ;;  %v15399_v2 = vld [vmem:[#allocation60_spill] sm:$0xff] }
 0x296   :  { %v3551_v28 = vmul.f32 %v9916_v36, %v9830_v25  ;;  %8017 = vrcp.f32 %v9914_v58  ;;  %v7362_v20 = vmul.f32 -1.442695, %v15396_v19  ;;  %2129 = vmatpush.bf16.msrb.mxu0 %v6988_v31  ;;  %2218 = vmatpush.bf16.msrb.mxu1 %v7244_v53  ;;  %v3546_v41 = vand.u32 2147483648, %v9793_v4 }
 0x297   :  { %2076 = vmatmul.bf16.gmra.mxu3 %v15388_v18  ;;  %1898 = vmatmul.bf16.gmra.mxu1 %v15388_v18  ;;  %v9923_v18 = vpop.eup %8013  ;;  %v3559_v60 = vand.u32 2147483647, %v9830_v25  ;;  %v9970_v31 = vadd.f32 %v15400_v21, %v15399_v2  ;;  %v3443_v53 = vsel %vm9887_vm13, %v3442_v8, %v3438_v14  ;;  %v3483_v49 = vsel %vm9960_vm4, %v9799_v46, %v3479_v39 }
 0x298   :  { %v8016_v55 = vpop.eup %8015  ;;  %v3596_v47 = vmul.f32 %v9923_v18, %v9848_v56  ;;  %v3493_v54 = vmul.f32 %v9863_v27, %v3492_v40  ;;  %vm3540_vm5 = vweird.f32 %v9793_v4  ;;  %8019 = vpow2.f32 %v7361_v48  ;;  %v1672_v48 = vpop.f32.mrf.mxu2 }
 0x299   :  { %8021 = vrcp.f32 %v9949_v3  ;;  %v9982_v11 = vadd.f32 %v9652_v12, %v9650_v32  ;;  %v9986_v2 = vadd.f32 %v9736_v34, %v9734_v43  ;;  %v9990_v6 = vadd.f32 %v9752_v63, %v9750_v37 }
 0x29a   :  { %v3538_v46 = vmul.f32 %v9880_v17, %v3537_v16  ;;  %v3552_v8 = vsub.f32 1.0, %v3551_v28  ;;  %v9993_v40 = vadd.f32 1.0, %v8016_v55  ;;  %8023 = vpow2.f32 %v7362_v20  ;;  %v1761_v43 = vpop.f32.mrf.mxu3  ;;  %v15407_v28 = vld [vmem:[#allocation62_spill] sm:$0xff]  ;;  %v15408_v20 = vld [vmem:[#allocation63_spill] sm:$0xff] }
 0x29b   :  { %15401 = vst [vmem:[#allocation64_spill] sm:$0xff] %v9982_v11  ;;  %vm3496_vm6 = vweird.f32 %v9863_v27  ;;  %v9996_v39 = vor.u32 1.1754944e-38, %v3546_v41  ;;  %v3597_v32 = vsub.f32 1.0, %v3596_v47  ;;  %v7365_v12 = vmul.f32 -1.442695, %v9970_v31  ;;  %v15442_v16 = vld [vmem:[#allocation71_spill] sm:$0xff] }
 0x29c   :  { %15402 = vst [vmem:[#allocation66_spill] sm:$0xff] %v9986_v2  ;;  %v9999_v34 = vpop.eup %8017  ;;  %v10002_v37 = vmul.f32 %v3443_v53, %v9498_v38  ;;  %v3494_v63 = vadd.f32 %v9863_v27, %v3493_v54  ;;  %vm10005_vm7 = vcmp.eq.f32.partialorder %v3499_v10, 8.507059e+37  ;;  %vm3555_vm8 = vweird.f32 %v9830_v25  ;;  %v1585_v44 = vpop.f32.mrf.mxu1  ;;  %vm10034_vm12 = vmor %vm3495_vm3, %vm3496_vm6 }
 0x29d   :  { %15403 = vst [vmem:[#allocation60_spill] sm:$0xff] %v9990_v6  ;;  %v3561_v14 = vand.u32 2147483648, %v9830_v25  ;;  %v10013_v55 = vadd.f32 %v15408_v20, %v15407_v28  ;;  %v3488_v30 = vsel %vm9934_vm2, %v3487_v9, %v3483_v49  ;;  %vm3541_vm9 = vweird.f32 %v9880_v17  ;;  %v1496_v9 = vpop.f32.mrf.mxu0  ;;  %v15414_v28 = vld [vmem:[#allocation23_spill] sm:$0xff]  ;;  %v15415_v20 = vld [vmem:[#allocation24_spill] sm:$0xff] }
 0x29e   :  { %15404 = vst [vmem:[#allocation61_spill] sm:$0xff] %v10002_v37  ;;  %vm10018_vm10 = vcmp.eq.f32.partialorder %v3544_v35, 8.507059e+37  ;;  %vm3556_vm11 = vweird.f32 %v9916_v36  ;;  %v3604_v10 = vand.u32 2147483647, %v9848_v56  ;;  %v8020_v54 = vpop.eup %8019  ;;  %v3539_v41 = vadd.f32 %v9880_v17, %v3538_v46  ;;  %1992 = vmatmul.bf16.gmra.mxu2 %v15414_v28  ;;  %1814 = vmatmul.bf16.gmra.mxu0 %v15414_v28  ;;  %vm10069_vm14 = vmor %vm3540_vm5, %vm3541_vm9 }
 0x29f   :  { %v3553_v47 = vmul.f32 %v9916_v36, %v3552_v8  ;;  %v3606_v21 = vand.u32 2147483648, %v9848_v56  ;;  %8025 = vrcp.f32 %v9993_v40  ;;  %v10028_v53 = vpop.eup %8021  ;;  %v3598_v49 = vmul.f32 %v9923_v18, %v3597_v32  ;;  %vm10107_vm1 = vmor %vm3555_vm8, %vm3556_vm11 }
 0x2a0   :  { %v3611_v46 = vmul.f32 %v9999_v34, %v9914_v58  ;;  %8027 = vpow2.f32 %v7365_v12  ;;  %v10043_v8 = vadd.f32 %v9823_v23, %v9821_v33  ;;  %v8024_v6 = vpop.eup %8023  ;;  %v3498_v7 = vsel %vm10034_vm12, %v9863_v27, %v3494_v63 }
 0x2a1   :  { %vm10050_vm13 = vcmp.eq.f32.partialorder %v3559_v60, 8.507059e+37  ;;  %v7366_v32 = vmul.f32 -1.442695, %v10013_v55  ;;  %v10057_v12 = vadd.f32 %v9852_v59, %v9850_v13  ;;  %v10061_v33 = vadd.f32 %v9909_v26, %v9907_v50  ;;  %v15425_v60 = vld [vmem:[#allocation69_spill] sm:$0xff] }
 0x2a2   :  { %15413 = vst [vmem:[#allocation62_spill] sm:$0xff] %v10043_v8  ;;  %v10073_v27 = vadd.f32 1.0, %v8020_v54  ;;  %v10077_v13 = vadd.f32 %v9941_v61, %v9939_v52  ;;  %v10079_v59 = vadd.f32 %v1761_v43, %v1672_v48  ;;  %v10081_v50 = vadd.f32 %v1585_v44, %v1496_v9 }
 0x2a3   :  { %15418 = vst [vmem:[#allocation63_spill] sm:$0xff] %v10057_v12  ;;  %v3543_v26 = vsel %vm10069_vm14, %v9880_v17, %v3539_v41  ;;  %v3554_v4 = vadd.f32 %v9916_v36, %v3553_v47  ;;  %vm3601_vm15 = vweird.f32 %v9923_v18  ;;  %v7369_v63 = vmul.f32 -1.442695, %v15425_v60 }
 0x2a4   :  { %15419 = vst [vmem:[#allocation161_spill] sm:$0xff] %v10061_v33  ;;  %v3599_v54 = vadd.f32 %v9923_v18, %v3598_v49  ;;  %v3612_v35 = vsub.f32 1.0, %v3611_v46  ;;  %v3656_v52 = vmul.f32 %v10028_v53, %v9949_v3  ;;  %v10092_v61 = vadd.f32 1.0, %v8024_v6  ;;  %v15456_v33 = vld [vmem:[#allocation80_spill] sm:$0xff] }
 0x2a5   :  { %15422 = vst [vmem:[#allocation162_spill] sm:$0xff] %v10077_v13  ;;  %v10094_v48 = vpop.eup %8025  ;;  %v10097_v43 = vmul.f32 %v3488_v30, %v15328_v57  ;;  %v3562_v17 = vor.u32 1.1754944e-38, %v3561_v14  ;;  %vm3600_vm0 = vweird.f32 %v9848_v56  ;;  %8029 = vpow2.f32 %v7366_v32  ;;  %v1674_v56 = vpop.f32.mrf.mxu2  ;;  %v15465_v13 = vld [vmem:[#allocation75_spill] sm:$0xff] }
 0x2a6   :  { %15423 = vst [vmem:[#allocation163_spill] sm:$0xff] %v10079_v59  ;;  %v8028_v41 = vpop.eup %8027  ;;  %v3503_v47 = vsel %vm10005_vm7, %v9946_v0, %v3498_v7  ;;  %vm10111_vm2 = vcmp.eq.f32.partialorder %v3604_v10, 8.507059e+37  ;;  %v3607_v14 = vor.u32 1.1754944e-38, %v3606_v21  ;;  %8031 = vrcp.f32 %v10073_v27  ;;  %v1763_v30 = vpop.f32.mrf.mxu3  ;;  %vm10124_vm3 = vmor %vm3600_vm0, %vm3601_vm15 }
 0x2a7   :  { %2081 = vmatmul.bf16.gmra.mxu3 %v15415_v20  ;;  %1903 = vmatmul.bf16.gmra.mxu1 %v15415_v20  ;;  %15424 = vst [vmem:[#allocation164_spill] sm:$0xff] %v10081_v50  ;;  %v3548_v0 = vsel %vm10018_vm10, %v9996_v39, %v3543_v26  ;;  %v3558_v25 = vsel %vm10107_vm1, %v9916_v36, %v3554_v4  ;;  %v3619_v10 = vand.u32 2147483647, %v9914_v58  ;;  %8033 = vpow2.f32 %v7369_v63  ;;  %v10134_v9 = vpop.f32.mrf.mxu0  ;;  %v10136_v36 = vpop.f32.mrf.mxu1  ;;  %v15437_v63 = vld [vmem:[#allocation67_spill] sm:$0xff] }
 0x2a8   :  { %15426 = vst [vmem:[#allocation69_spill] sm:$0xff] %v10097_v43  ;;  %v3603_v21 = vsel %vm10124_vm3, %v9923_v18, %v3599_v54  ;;  %v3613_v38 = vmul.f32 %v9999_v34, %v3612_v35  ;;  %v3657_v39 = vsub.f32 1.0, %v3656_v52  ;;  %8035 = vrcp.f32 %v10092_v61  ;;  %v15438_v54 = vld [vmem:[#allocation68_spill] sm:$0xff] }
 0x2a9   :  { %v10139_v44 = vmul.f32 %v3503_v47, %v15339_v22  ;;  %v3621_v49 = vand.u32 2147483648, %v9914_v58  ;;  %v3671_v46 = vmul.f32 %v10094_v48, %v9993_v40  ;;  %v10144_v7 = vadd.f32 1.0, %v8028_v41  ;;  %v15439_v41 = vld [vmem:[#allocation74_spill] sm:$0xff] }
 0x2aa   :  { %v10147_v18 = vmul.f32 %v3548_v0, %v9606_v29  ;;  %v3563_v32 = vsel %vm10050_vm13, %v3562_v17, %v3558_v25  ;;  %vm3615_vm4 = vweird.f32 %v9914_v58  ;;  %v3666_v23 = vand.u32 2147483648, %v9949_v3  ;;  %v15441_v25 = vld [vmem:[#allocation70_spill] sm:$0xff] }
 0x2ab   :  { %15433 = vst [vmem:[#allocation165_spill] sm:$0xff] %v10139_v44  ;;  %v8030_v26 = vpop.eup %8029  ;;  %v3608_v22 = vsel %vm10111_vm2, %v3607_v14, %v3603_v21  ;;  %vm3616_vm5 = vweird.f32 %v9999_v34  ;;  %vm10156_vm6 = vcmp.eq.f32.partialorder %v3619_v10, 8.507059e+37  ;;  %v3664_v29 = vand.u32 2147483647, %v9949_v3 }
 0x2ac   :  { %15434 = vst [vmem:[#allocation166_spill] sm:$0xff] %v10147_v18  ;;  %v10163_v2 = vadd.f32 %v15438_v54, %v15437_v63  ;;  %v10165_v35 = vpop.eup %8031  ;;  %v3614_v52 = vadd.f32 %v9999_v34, %v3613_v38  ;;  %v3658_v17 = vmul.f32 %v10028_v53, %v3657_v39  ;;  %v7370_v47 = vmul.f32 -1.442695, %v15439_v41  ;;  %vm10196_vm8 = vmor %vm3615_vm4, %vm3616_vm5  ;;  %v6957_v54 = vld [vmem:[#allocation3 + $0x138] sm:$0xf0] }
 0x2ad   :  { %v10170_v6 = vadd.f32 %v1763_v30, %v1674_v56  ;;  %v8034_v57 = vpop.eup %8033  ;;  %v3622_v14 = vor.u32 1.1754944e-38, %v3621_v49  ;;  %v3672_v0 = vsub.f32 1.0, %v3671_v46  ;;  %8037 = vrcp.f32 %v10144_v7  ;;  %v10185_v56 = vpop.f32.mrf.mxu2  ;;  %v7211_v18 = vld [vmem:[#allocation3 + $0x318] sm:$0xf] }
 0x2ae   :  { %v10175_v10 = vadd.f32 %v15442_v16, %v15441_v25  ;;  %v10177_v21 = vpop.eup %8035  ;;  %v10180_v63 = vmul.f32 %v3563_v32, %v9658_v24  ;;  %vm3660_vm7 = vweird.f32 %v9949_v3  ;;  %v3667_v38 = vor.u32 1.1754944e-38, %v3666_v23  ;;  %v10187_v30 = vpop.f32.mrf.mxu3  ;;  %v15449_v16 = vld [vmem:[#allocation25_spill] sm:$0xff] }
 0x2af   :  { %15440 = vst [vmem:[#allocation67_spill] sm:$0xff] %v10170_v6  ;;  %v10183_v39 = vadd.f32 1.0, %v8030_v26  ;;  %v10190_v49 = vmul.f32 %v3608_v22, %v15355_v1  ;;  %vm3661_vm9 = vweird.f32 %v10028_v53  ;;  %vm10201_vm10 = vcmp.eq.f32.partialorder %v3664_v29, 8.507059e+37  ;;  %v7764_v22 = vld [vmem:[#allocation3 + $0x11c] sm:$0xf]  ;;  %v10213_v25 = vpop.f32.mrf.mxu0  ;;  %v10215_v29 = vpop.f32.mrf.mxu1  ;;  %1997 = vmatmul.bf16.gmra.mxu2 %v15449_v16  ;;  %v15450_v6 = vld [vmem:[#allocation26_spill] sm:$0xff]  ;;  %1819 = vmatmul.bf16.gmra.mxu0 %v15449_v16 }
 0x2b0   :  { %15443 = vst [vmem:[#allocation68_spill] sm:$0xff] %v10180_v63  ;;  %v3679_v32 = vand.u32 2147483647, %v9993_v40  ;;  %v7373_v23 = vmul.f32 -1.442695, %v10163_v2  ;;  %v3618_v1 = vsel %vm10196_vm8, %v9999_v34, %v3614_v52  ;;  %v3659_v58 = vadd.f32 %v10028_v53, %v3658_v17  ;;  %vm10237_vm12 = vmor %vm3660_vm7, %vm3661_vm9 }
 0x2b1   :  { %15444 = vst [vmem:[#allocation74_spill] sm:$0xff] %v10190_v49  ;;  %v10211_v26 = vadd.f32 1.0, %v8034_v57  ;;  %8039 = vpow2.f32 %v7370_v47  ;;  %v3673_v50 = vmul.f32 %v10094_v48, %v3672_v0  ;;  %v3716_v34 = vmul.f32 %v10165_v35, %v10073_v27  ;;  %v15451_v57 = vld [vmem:[#allocation79_spill] sm:$0xff] }
 0x2b2   :  { %v3731_v52 = vmul.f32 %v10177_v21, %v10092_v61  ;;  %v7374_v17 = vmul.f32 -1.442695, %v10175_v10  ;;  %vm3675_vm11 = vweird.f32 %v9993_v40  ;;  %v3681_v47 = vand.u32 2147483648, %v9993_v40 }
 0x2b3   :  { %8041 = vrcp.f32 %v10183_v39  ;;  %v7377_v0 = vmul.f32 -1.442695, %v15451_v57  ;;  %v10231_v46 = vpop.eup %8037  ;;  %vm10241_vm13 = vcmp.eq.f32.partialorder %v3679_v32, 8.507059e+37  ;;  %v7378_v12 = vmul.f32 -1.442695, %v15456_v33 }
 0x2b4   :  { %8043 = vpow2.f32 %v7373_v23  ;;  %v6960_v8 = vor.u32 %v7764_v22, %v6957_v54  ;;  %v3623_v11 = vsel %vm10156_vm6, %v3622_v14, %v3618_v1  ;;  %vm3676_vm14 = vweird.f32 %v10094_v48 }
 0x2b5   :  { %8045 = vrcp.f32 %v10211_v26  ;;  %v3674_v3 = vadd.f32 %v10094_v48, %v3673_v50  ;;  %v3717_v32 = vsub.f32 1.0, %v3716_v34  ;;  %v3732_v16 = vsub.f32 1.0, %v3731_v52  ;;  %vm10275_vm0 = vmor %vm3675_vm11, %vm3676_vm14 }
 0x2b6   :  { %8047 = vpow2.f32 %v7374_v17  ;;  %2308 = vmatpush.bf16.msrb.mxu2 %v6960_v8  ;;  %v3726_v22 = vand.u32 2147483648, %v10073_v27  ;;  %v3741_v4 = vand.u32 2147483648, %v10092_v61  ;;  %v3776_v14 = vmul.f32 %v10231_v46, %v10144_v7  ;;  %v10260_v59 = vpop.f32.mrf.mxu3 }
 0x2b7   :  { %2086 = vmatmul.bf16.gmra.mxu3 %v15450_v6  ;;  %1908 = vmatmul.bf16.gmra.mxu1 %v15450_v6  ;;  %v3663_v6 = vsel %vm10237_vm12, %v10028_v53, %v3659_v58  ;;  %v8040_v23 = vpop.eup %8039  ;;  %8049 = vpow2.f32 %v7377_v0  ;;  %v10258_v53 = vpop.f32.mrf.mxu2  ;;  %v3682_v1 = vor.u32 1.1754944e-38, %v3681_v47  ;;  %vm3720_vm15 = vweird.f32 %v10073_v27 }
 0x2b8   :  { %v3724_v50 = vand.u32 2147483647, %v10073_v27  ;;  %8051 = vpow2.f32 %v7378_v12  ;;  %v10267_v58 = vmul.f32 %v3623_v11, %v15374_v42  ;;  %v3668_v54 = vsel %vm10201_vm10, %v3667_v38, %v3663_v6  ;;  %v10281_v17 = vpop.f32.mrf.mxu0  ;;  %v10283_v47 = vpop.f32.mrf.mxu1 }
 0x2b9   :  { %v10264_v8 = vpop.eup %8041  ;;  %v3739_v52 = vand.u32 2147483647, %v10092_v61  ;;  %v3786_v12 = vand.u32 2147483648, %v10144_v7  ;;  %v3678_v42 = vsel %vm10275_vm0, %v10094_v48, %v3674_v3  ;;  %v3718_v6 = vmul.f32 %v10165_v35, %v3717_v32  ;;  %v7828_v3 = vld [vmem:[#allocation3 + $0x31c] sm:$0xf] }
 0x2ba   :  { %15457 = vst [vmem:[#allocation70_spill] sm:$0xff] %v10267_v58  ;;  %v8044_v11 = vpop.eup %8043  ;;  %v3733_v40 = vmul.f32 %v10177_v21, %v3732_v16  ;;  %v10290_v38 = vadd.f32 1.0, %v8040_v23  ;;  %v10294_v0 = vor.u32 1.1754944e-38, %v3726_v22  ;;  %vm3735_vm1 = vweird.f32 %v10092_v61  ;;  %v7213_v32 = vld [vmem:[#allocation3 + $0x338] sm:$0xf0] }
 0x2bb   :  { %v10292_v24 = vpop.eup %8045  ;;  %v10297_v20 = vor.u32 1.1754944e-38, %v3741_v4  ;;  %v3777_v28 = vsub.f32 1.0, %v3776_v14  ;;  %v10300_v49 = vmul.f32 %v3668_v54, %v9797_v5  ;;  %vm3721_vm2 = vweird.f32 %v10165_v35  ;;  %v6955_v54 = vld [vmem:[#allocation3 + $0x118] sm:$0xf] }
 0x2bc   :  { %v8048_v58 = vpop.eup %8047  ;;  %vm10303_vm3 = vcmp.eq.f32.partialorder %v3724_v50, 8.507059e+37  ;;  %vm3736_vm4 = vweird.f32 %v10177_v21  ;;  %v3784_v16 = vand.u32 2147483647, %v10144_v7  ;;  %v3683_v22 = vsel %vm10241_vm13, %v3682_v1, %v3678_v42  ;;  %v15466_v1 = vld [vmem:[#allocation76_spill] sm:$0xff]  ;;  %vm10345_vm7 = vmor %vm3720_vm15, %vm3721_vm2 }
 0x2bd   :  { %15460 = vst [vmem:[#allocation71_spill] sm:$0xff] %v10300_v49  ;;  %v8050_v23 = vpop.eup %8049  ;;  %vm10311_vm5 = vcmp.eq.f32.partialorder %v3739_v52, 8.507059e+37  ;;  %vm3780_vm6 = vweird.f32 %v10144_v7  ;;  %v10316_v5 = vor.u32 1.1754944e-38, %v3786_v12  ;;  %v3801_v14 = vand.u32 2147483648, %v10183_v39  ;;  %v7768_v42 = vld [vmem:[#allocation3 + $0x134] sm:$0xf0]  ;;  %vm10363_vm10 = vmor %vm3735_vm1, %vm3736_vm4 }
 0x2be   :  { %v10319_v50 = vadd.f32 1.0, %v8044_v11  ;;  %v8052_v34 = vpop.eup %8051  ;;  %v3719_v49 = vadd.f32 %v10165_v35, %v3718_v6  ;;  %v3734_v63 = vadd.f32 %v10177_v21, %v3733_v40  ;;  %8053 = vrcp.f32 %v10290_v38  ;;  %v7832_v12 = vld [vmem:[#allocation3 + $0x334] sm:$0xf0]  ;;  %v2047_v51 = vpop.f32.mrf.mxu3 }
 0x2bf   :  { %v10326_v52 = vadd.f32 %v15466_v1, %v15465_v13  ;;  %v3778_v44 = vmul.f32 %v10231_v46, %v3777_v28  ;;  %v3791_v11 = vmul.f32 %v10264_v8, %v10183_v39  ;;  %v10331_v43 = vadd.f32 1.0, %v8048_v58  ;;  %v1958_v6 = vpop.f32.mrf.mxu2 }
 0x2c0   :  { %v7216_v37 = vor.u32 %v7828_v3, %v7213_v32  ;;  %v10334_v40 = vmul.f32 %v3683_v22, %v9834_v45  ;;  %v3836_v13 = vmul.f32 %v10292_v24, %v10211_v26  ;;  %v10339_v1 = vadd.f32 1.0, %v8050_v23  ;;  %v1782_v23 = vpop.f32.mrf.mxu0  ;;  %v1871_v22 = vpop.f32.mrf.mxu1 }
 0x2c1   :  { %vm3781_vm8 = vweird.f32 %v10231_v46  ;;  %vm10350_vm9 = vcmp.eq.f32.partialorder %v3784_v16, 8.507059e+37  ;;  %v10354_v58 = vadd.f32 1.0, %v8052_v34  ;;  %v6956_v3 = vor.u32 %v7768_v42, %v6955_v54  ;;  %v15474_v54 = vld [vmem:[#allocation28_spill] sm:$0xff] }
 0x2c2   :  { %2397 = vmatpush.bf16.msrb.mxu3 %v7216_v37  ;;  %v7212_v32 = vor.u32 %v7832_v12, %v7211_v18  ;;  %v3723_v27 = vsel %vm10345_vm7, %v10165_v35, %v3719_v49  ;;  %v10367_v62 = vor.u32 1.1754944e-38, %v3801_v14  ;;  %8055 = vrcp.f32 %v10319_v50  ;;  %v15473_v18 = vld [vmem:[#allocation27_spill] sm:$0xff]  ;;  %vm10408_vm12 = vmor %vm3780_vm6, %vm3781_vm8 }
 0x2c3   :  { %v7381_v37 = vmul.f32 -1.442695, %v10326_v52  ;;  %1824 = vmatmul.bf16.gmra.mxu0 %v15473_v18  ;;  %v3738_v35 = vsel %vm10363_vm10, %v10177_v21, %v3734_v63  ;;  %v3779_v61 = vadd.f32 %v10231_v46, %v3778_v44  ;;  %v3792_v49 = vsub.f32 1.0, %v3791_v11  ;;  %2002 = vmatmul.bf16.gmra.mxu2 %v15473_v18 }
 0x2c4   :  { %8057 = vrcp.f32 %v10331_v43  ;;  %2130 = vmatpush.bf16.msrb.mxu0 %v6956_v3  ;;  %2219 = vmatpush.bf16.msrb.mxu1 %v7212_v32  ;;  %v10378_v14 = vpop.eup %8053  ;;  %v3837_v34 = vsub.f32 1.0, %v3836_v13  ;;  %v10383_v42 = vadd.f32 %v10136_v36, %v10134_v9  ;;  %v10387_v12 = vadd.f32 %v10187_v30, %v10185_v56 }
 0x2c5   :  { %8059 = vrcp.f32 %v10339_v1  ;;  %v3728_v44 = vsel %vm10303_vm3, %v10294_v0, %v3723_v27  ;;  %vm3795_vm11 = vweird.f32 %v10183_v39  ;;  %v3844_v21 = vand.u32 2147483647, %v10211_v26 }
 0x2c6   :  { %15475 = vst [vmem:[#allocation79_spill] sm:$0xff] %v10383_v42  ;;  %8061 = vrcp.f32 %v10354_v58  ;;  %v10399_v9 = vadd.f32 %v10215_v29, %v10213_v25  ;;  %v3743_v36 = vsel %vm10311_vm5, %v10297_v20, %v3738_v35  ;;  %v3846_v56 = vand.u32 2147483648, %v10211_v26  ;;  %v2049_v48 = vpop.f32.mrf.mxu3 }
 0x2c7   :  { %1913 = vmatmul.bf16.gmra.mxu1 %v15474_v54  ;;  %15476 = vst [vmem:[#allocation80_spill] sm:$0xff] %v10387_v12  ;;  %2091 = vmatmul.bf16.gmra.mxu3 %v15474_v54  ;;  %8063 = vpow2.f32 %v7381_v37  ;;  %v10415_v30 = vadd.f32 %v10260_v59, %v10258_v53  ;;  %v3783_v25 = vsel %vm10408_vm12, %v10231_v46, %v3779_v61  ;;  %v1960_v0 = vpop.f32.mrf.mxu2  ;;  %v15481_v53 = vld [vmem:[#allocation77_spill] sm:$0xff]  ;;  %v15482_v59 = vld [vmem:[#allocation78_spill] sm:$0xff]  ;;  %vm3796_vm13 = vweird.f32 %v10264_v8 }
 0x2c8   :  { %15477 = vst [vmem:[#allocation75_spill] sm:$0xff] %v10399_v9  ;;  %v3793_v20 = vmul.f32 %v10264_v8, %v3792_v49  ;;  %v3851_v7 = vmul.f32 %v10378_v14, %v10290_v38  ;;  %v1870_v29 = vadd.f32 %v10283_v47, %v10281_v17  ;;  %v10425_v4 = vpop.eup %8055  ;;  %v3838_v11 = vmul.f32 %v10292_v24, %v3837_v34  ;;  %v15483_v17 = vld [vmem:[#allocation157_spill] sm:$0xff]  ;;  %v10440_v27 = vpop.f32.mrf.mxu0  ;;  %vm10489_vm3 = vmor %vm3795_vm11, %vm3796_vm13 }
 0x2c9   :  { %15480 = vst [vmem:[#allocation76_spill] sm:$0xff] %v10415_v30  ;;  %v10430_v13 = vadd.f32 %v15482_v59, %v15481_v53  ;;  %v2048_v28 = vadd.f32 %v2047_v51, %v1958_v6  ;;  %v1872_v46 = vadd.f32 %v1871_v22, %v1782_v23  ;;  %v10435_v32 = vmul.f32 %v3728_v44, %v15395_v15  ;;  %v10442_v16 = vpop.f32.mrf.mxu1  ;;  %v15484_v6 = vld [vmem:[#allocation38_spill] sm:$0xff]  ;;  %v15485_v15 = vld [vmem:[#allocation39_spill] sm:$0xff]  ;;  %v15494_v59 = vld [vmem:[#allocation85_spill] sm:$0xff] }
 0x2ca   :  { %v10432_v3 = vpop.eup %8057  ;;  %vm3840_vm14 = vweird.f32 %v10211_v26  ;;  %v5043_v47 = vmul.f32 %v15483_v17, %v1870_v29  ;;  %v3788_v51 = vsel %vm10350_vm9, %v10316_v5, %v3783_v25  ;;  %v10453_v35 = vadd.f32 %v2049_v48, %v1960_v0  ;;  %v15498_v30 = vld [vmem:[#allocation82_spill] sm:$0xff] }
 0x2cb   :  { %v10444_v37 = vpop.eup %8059  ;;  %v10450_v23 = vmul.f32 %v15484_v6, %v2048_v28  ;;  %v5047_v22 = vmul.f32 %v15485_v15, %v1872_v46  ;;  %v10458_v49 = vmul.f32 %v3743_v36, %v15396_v19  ;;  %v3794_v34 = vadd.f32 %v10264_v8, %v3793_v20  ;;  %v7756_v46 = vld [vmem:[#allocation3 + $0xdc] sm:$0xf] }
 0x2cc   :  { %v10455_v61 = vpop.eup %8061  ;;  %v15486_v44 = vand.u32 2147483647, %v10183_v39  ;;  %v3847_v5 = vor.u32 1.1754944e-38, %v3846_v56  ;;  %v3852_v45 = vsub.f32 1.0, %v3851_v7  ;;  %v3839_v29 = vadd.f32 %v10292_v24, %v3838_v11  ;;  %v6925_v15 = vld [vmem:[#allocation3 + $0xf8] sm:$0xf0] }
 0x2cd   :  { %v8064_v25 = vpop.eup %8063  ;;  %vm3841_vm0 = vweird.f32 %v10292_v24  ;;  %vm10469_vm1 = vcmp.eq.f32.partialorder %v3844_v21, 8.507059e+37  ;;  %v3896_v19 = vmul.f32 %v10425_v4, %v10319_v50  ;;  %v7382_v36 = vmul.f32 -1.442695, %v10430_v13  ;;  %v15497_v21 = vld [vmem:[#allocation81_spill] sm:$0xff]  ;;  %v15503_v39 = vld [vmem:[#allocation86_spill] sm:$0xff] }
 0x2ce   :  { %vm10463_vm15 = vcmp.eq.f32.partialorder %v15486_v44, 8.507059e+37  ;;  %v10477_v20 = vmul.f32 %v3788_v51, %v9970_v31  ;;  %vm3855_vm2 = vweird.f32 %v10290_v38  ;;  %v3859_v56 = vand.u32 2147483647, %v10290_v38  ;;  %vm10506_vm4 = vmor %vm3840_vm14, %vm3841_vm0  ;;  %v10516_v44 = vpop.f32.mrf.mxu3 }
 0x2cf   :  { %v3911_v7 = vmul.f32 %v10432_v3, %v10331_v43  ;;  %v10483_v48 = vpack.c.bf16 %v5047_v22, %v5043_v47  ;;  %v3861_v31 = vand.u32 2147483648, %v10290_v38  ;;  %v3956_v11 = vmul.f32 %v10444_v37, %v10339_v1  ;;  %v10514_v22 = vpop.f32.mrf.mxu2 }
 0x2d0   :  { %v3971_v53 = vmul.f32 %v10455_v61, %v10354_v58  ;;  %v7385_v28 = vmul.f32 -1.442695, %v15494_v59  ;;  %v3798_v17 = vsel %vm10489_vm3, %v10264_v8, %v3794_v34  ;;  %v3853_v47 = vmul.f32 %v10378_v14, %v3852_v45  ;;  %v10527_v12 = vpop.f32.mrf.mxu0 }
 0x2d1   :  { %15491 = vst [vmem:[#allocation77_spill] sm:$0xff] %v10483_v48  ;;  %v3904_v51 = vand.u32 2147483647, %v10319_v50  ;;  %v10512_v6 = vadd.f32 1.0, %v8064_v25  ;;  %v3843_v8 = vsel %vm10506_vm4, %v10292_v24, %v3839_v29  ;;  %v3897_v26 = vsub.f32 1.0, %v3896_v19  ;;  %v10529_v42 = vpop.f32.mrf.mxu1 }
 0x2d2   :  { %v3906_v34 = vand.u32 2147483648, %v10319_v50  ;;  %8065 = vpow2.f32 %v7382_v36  ;;  %vm3856_vm5 = vweird.f32 %v10378_v14  ;;  %v3912_v45 = vsub.f32 1.0, %v3911_v7  ;;  %v15501_v36 = vld [vmem:[#allocation29_spill] sm:$0xff]  ;;  %v15502_v7 = vld [vmem:[#allocation30_spill] sm:$0xff] }
 0x2d3   :  { %v10525_v25 = vadd.f32 %v15498_v30, %v15497_v21  ;;  %v6928_v9 = vor.u32 %v7756_v46, %v6925_v15  ;;  %vm10531_vm6 = vcmp.eq.f32.partialorder %v3859_v56, 8.507059e+37  ;;  %v3919_v24 = vand.u32 2147483647, %v10331_v43  ;;  %1829 = vmatmul.bf16.gmra.mxu0 %v15501_v36  ;;  %2007 = vmatmul.bf16.gmra.mxu2 %v15501_v36  ;;  %vm10557_vm8 = vmor %vm3855_vm2, %vm3856_vm5 }
 0x2d4   :  { %v3957_v29 = vsub.f32 1.0, %v3956_v11  ;;  %v3972_v19 = vsub.f32 1.0, %v3971_v53  ;;  %8067 = vpow2.f32 %v7385_v28  ;;  %v3854_v30 = vadd.f32 %v10378_v14, %v3853_v47 }
 0x2d5   :  { %v3921_v46 = vand.u32 2147483648, %v10331_v43  ;;  %8069 = vrcp.f32 %v10512_v6  ;;  %v7386_v56 = vmul.f32 -1.442695, %v15503_v39  ;;  %2309 = vmatpush.bf16.msrb.mxu2 %v6928_v9  ;;  %v3803_v15 = vsel %vm10463_vm15, %v10367_v62, %v3798_v17 }
 0x2d6   :  { %v3862_v11 = vor.u32 1.1754944e-38, %v3861_v31  ;;  %v3898_v53 = vmul.f32 %v10425_v4, %v3897_v26  ;;  %vm3900_vm7 = vweird.f32 %v10319_v50  ;;  %v3848_v28 = vsel %vm10469_vm1, %v3847_v5, %v3843_v8  ;;  %v10579_v26 = vpop.f32.mrf.mxu3  ;;  %v6923_v50 = vld [vmem:[#allocation3 + $0xd8] sm:$0xf]  ;;  %v6861_v31 = vld [vmem:[#allocation3 + $0x78] sm:$0xf0] }
 0x2d7   :  { %1918 = vmatmul.bf16.gmra.mxu1 %v15502_v7  ;;  %2096 = vmatmul.bf16.gmra.mxu3 %v15502_v7  ;;  %v3907_v47 = vor.u32 1.1754944e-38, %v3906_v34  ;;  %v3913_v21 = vmul.f32 %v10432_v3, %v3912_v45  ;;  %v7389_v9 = vmul.f32 -1.442695, %v10525_v25  ;;  %vm3901_vm9 = vweird.f32 %v10425_v4  ;;  %v10577_v8 = vpop.f32.mrf.mxu2  ;;  %v7760_v7 = vld [vmem:[#allocation3 + $0xf4] sm:$0xf0] }
 0x2d8   :  { %v8066_v54 = vpop.eup %8065  ;;  %vm10562_vm10 = vcmp.eq.f32.partialorder %v3904_v51, 8.507059e+37  ;;  %vm3915_vm11 = vweird.f32 %v10331_v43  ;;  %v3958_v5 = vmul.f32 %v10444_v37, %v3957_v29  ;;  %v3973_v0 = vmul.f32 %v10455_v61, %v3972_v19  ;;  %vm10599_vm15 = vmor %vm3900_vm7, %vm3901_vm9  ;;  %v15528_v43 = vld [vmem:[#allocation36_spill] sm:$0xff] }
 0x2d9   :  { %v3858_v38 = vsel %vm10557_vm8, %v10378_v14, %v3854_v30  ;;  %vm10572_vm12 = vcmp.eq.f32.partialorder %v3919_v24, 8.507059e+37  ;;  %v3922_v17 = vor.u32 1.1754944e-38, %v3921_v46  ;;  %v3964_v51 = vand.u32 2147483647, %v10339_v1  ;;  %v10591_v46 = vpop.f32.mrf.mxu0 }
 0x2da   :  { %8071 = vpow2.f32 %v7386_v56  ;;  %v8068_v34 = vpop.eup %8067  ;;  %v3899_v45 = vadd.f32 %v10425_v4, %v3898_v53  ;;  %vm3916_vm13 = vweird.f32 %v10432_v3  ;;  %v3966_v29 = vand.u32 2147483648, %v10339_v1  ;;  %v10593_v56 = vpop.f32.mrf.mxu1 }
 0x2db   :  { %v3979_v14 = vand.u32 2147483647, %v10354_v58  ;;  %v10585_v24 = vpop.eup %8069  ;;  %v3914_v19 = vadd.f32 %v10432_v3, %v3913_v21  ;;  %vm3961_vm14 = vweird.f32 %v10444_v37  ;;  %v10589_v30 = vadd.f32 1.0, %v8066_v54  ;;  %vm10613_vm2 = vmor %vm3915_vm11, %vm3916_vm13 }
 0x2dc   :  { %8073 = vpow2.f32 %v7389_v9  ;;  %v3959_v62 = vadd.f32 %v10444_v37, %v3958_v5  ;;  %vm3960_vm0 = vweird.f32 %v10339_v1  ;;  %v3974_v54 = vadd.f32 %v10455_v61, %v3973_v0 }
 0x2dd   :  { %vm3976_vm1 = vweird.f32 %v10455_v61  ;;  %v3863_v21 = vsel %vm10531_vm6, %v3862_v11, %v3858_v38  ;;  %vm3975_vm3 = vweird.f32 %v10354_v58  ;;  %v3981_v9 = vand.u32 2147483648, %v10354_v58  ;;  %vm10626_vm4 = vmor %vm3960_vm0, %vm3961_vm14 }
 0x2de   :  { %v10619_v1 = vadd.f32 1.0, %v8068_v34  ;;  %v3903_v5 = vsel %vm10599_vm15, %v10425_v4, %v3899_v45  ;;  %vm10630_vm5 = vcmp.eq.f32.partialorder %v3964_v51, 8.507059e+37  ;;  %v3967_v11 = vor.u32 1.1754944e-38, %v3966_v29  ;;  %vm10639_vm6 = vmor %vm3975_vm3, %vm3976_vm1  ;;  %v7820_v45 = vld [vmem:[#allocation3 + $0x2dc] sm:$0xf] }
 0x2df   :  { %v4016_v58 = vmul.f32 %v10585_v24, %v10512_v6  ;;  %v3918_v38 = vsel %vm10613_vm2, %v10432_v3, %v3914_v19  ;;  %vm10643_vm7 = vcmp.eq.f32.partialorder %v3979_v14, 8.507059e+37  ;;  %v4026_v51 = vand.u32 2147483648, %v10512_v6  ;;  %v7181_v19 = vld [vmem:[#allocation3 + $0x2f8] sm:$0xf0]  ;;  %v10668_v48 = vpop.f32.mrf.mxu2 }
 0x2e0   :  { %v8072_v0 = vpop.eup %8071  ;;  %8075 = vrcp.f32 %v10589_v30  ;;  %v10650_v29 = vmul.f32 %v3803_v15, %v10013_v55  ;;  %v10653_v53 = vmul.f32 %v3848_v28, %v15425_v60  ;;  %v3963_v3 = vsel %vm10626_vm4, %v10444_v37, %v3959_v62  ;;  %v15524_v60 = vld [vmem:[#allocation83_spill] sm:$0xff]  ;;  %v15525_v15 = vld [vmem:[#allocation84_spill] sm:$0xff]  ;;  %v10670_v37 = vpop.f32.mrf.mxu3 }
 0x2e1   :  { %v3978_v14 = vsel %vm10639_vm6, %v10455_v61, %v3974_v54  ;;  %v3908_v18 = vsel %vm10562_vm10, %v3907_v47, %v3903_v5  ;;  %v3982_v55 = vor.u32 1.1754944e-38, %v3981_v9  ;;  %8077 = vrcp.f32 %v10619_v1  ;;  %v7179_v47 = vld [vmem:[#allocation3 + $0x2d8] sm:$0xf] }
 0x2e2   :  { %15522 = vst [vmem:[#allocation78_spill] sm:$0xff] %v10650_v29  ;;  %v8074_v36 = vpop.eup %8073  ;;  %v10666_v28 = vadd.f32 %v15525_v15, %v15524_v60  ;;  %v10673_v61 = vmul.f32 %v3863_v21, %v15439_v41  ;;  %v3923_v62 = vsel %vm10572_vm12, %v3922_v17, %v3918_v38  ;;  %v4017_v54 = vsub.f32 1.0, %v4016_v58  ;;  %v7824_v9 = vld [vmem:[#allocation3 + $0x2f4] sm:$0xf0]  ;;  %v1881_v29 = vpop.f32.mrf.mxu1  ;;  %v15527_v58 = vld [vmem:[#allocation34_spill] sm:$0xff] }
 0x2e3   :  { %15523 = vst [vmem:[#allocation157_spill] sm:$0xff] %v10653_v53  ;;  %v10677_v63 = vadd.f32 1.0, %v8072_v0  ;;  %v3968_v5 = vsel %vm10630_vm5, %v3967_v11, %v3963_v3  ;;  %v3983_v4 = vsel %vm10643_vm7, %v3982_v55, %v3978_v14  ;;  %v7184_v60 = vor.u32 %v7820_v45, %v7181_v19  ;;  %v1792_v53 = vpop.f32.mrf.mxu0  ;;  %1834 = vmatmul.bf16.gmra.mxu0 %v15527_v58  ;;  %v7748_v14 = vld [vmem:[#allocation3 + $0x9c] sm:$0xf] }
 0x2e4   :  { %v6924_v15 = vor.u32 %v7760_v7, %v6923_v50  ;;  %v10684_v41 = vmul.f32 %v3908_v18, %v10163_v2  ;;  %v10687_v17 = vor.u32 1.1754944e-38, %v4026_v51  ;;  %v10689_v21 = vadd.f32 1.0, %v8074_v36  ;;  %2012 = vmatmul.bf16.gmra.mxu2 %v15527_v58  ;;  %v15532_v51 = vld [vmem:[#allocation40_spill] sm:$0xff] }
 0x2e5   :  { %v10696_v0 = vmul.f32 %v3923_v62, %v10175_v10  ;;  %v7390_v2 = vmul.f32 -1.442695, %v10666_v28  ;;  %2398 = vmatpush.bf16.msrb.mxu3 %v7184_v60  ;;  %v7180_v18 = vor.u32 %v7824_v9, %v7179_v47  ;;  %v10701_v38 = vmul.f32 %v3968_v5, %v15451_v57  ;;  %v6893_v19 = vld [vmem:[#allocation3 + $0xb8] sm:$0xf0]  ;;  %v15535_v62 = vld [vmem:[#allocation43_spill] sm:$0xff] }
 0x2e6   :  { %15526 = vst [vmem:[#allocation38_spill] sm:$0xff] %v10684_v41  ;;  %v10693_v11 = vpop.eup %8075  ;;  %2131 = vmatpush.bf16.msrb.mxu0 %v6924_v15  ;;  %v10704_v36 = vmul.f32 %v3983_v4, %v15456_v33  ;;  %v10707_v34 = vmul.f32 %v10585_v24, %v4017_v54  ;;  %8079 = vrcp.f32 %v10677_v63  ;;  %v5048_v45 = vmul.f32 %v15532_v51, %v10453_v35  ;;  %v7149_v55 = vld [vmem:[#allocation3 + $0x2b8] sm:$0xf0]  ;;  %v7752_v47 = vld [vmem:[#allocation3 + $0xb4] sm:$0xf0] }
 0x2e7   :  { %1923 = vmatmul.bf16.gmra.mxu1 %v15528_v43  ;;  %15529 = vst [vmem:[#allocation39_spill] sm:$0xff] %v10696_v0  ;;  %2101 = vmatmul.bf16.gmra.mxu3 %v15528_v43  ;;  %v10712_v10 = vpop.eup %8077  ;;  %v1875_v57 = vadd.f32 %v10442_v16, %v10440_v27  ;;  %v2053_v33 = vadd.f32 %v10516_v44, %v10514_v22  ;;  %8081 = vrcp.f32 %v10689_v21  ;;  %v7812_v16 = vld [vmem:[#allocation3 + $0x29c] sm:$0xf]  ;;  %v6891_v22 = vld [vmem:[#allocation3 + $0x98] sm:$0xf]  ;;  %v1970_v4 = vpop.f32.mrf.mxu2  ;;  %vm4020_vm8 = vweird.f32 %v10512_v6  ;;  %v15540_v43 = vld [vmem:[#allocation47_spill] sm:$0xff] }
 0x2e8   :  { %15530 = vst [vmem:[#allocation85_spill] sm:$0xff] %v10701_v38  ;;  %2220 = vmatpush.bf16.msrb.mxu1 %v7180_v18  ;;  %v1877_v3 = vadd.f32 %v10529_v42, %v10527_v12  ;;  %v10724_v50 = vmul.f32 %v10693_v11, %v10589_v30  ;;  %v2055_v35 = vadd.f32 %v10579_v26, %v10577_v8  ;;  %8083 = vpow2.f32 %v7390_v2  ;;  %v15534_v12 = vld [vmem:[#allocation41_spill] sm:$0xff]  ;;  %v7147_v9 = vld [vmem:[#allocation3 + $0x298] sm:$0xf]  ;;  %v2059_v60 = vpop.f32.mrf.mxu3  ;;  %v15536_v26 = vld [vmem:[#allocation90_spill] sm:$0xff] }
 0x2e9   :  { %15531 = vst [vmem:[#allocation81_spill] sm:$0xff] %v10704_v36  ;;  %v1880_v27 = vadd.f32 %v10593_v56, %v10591_v46  ;;  %v10732_v42 = vpack.c.bf16 %v5048_v45, %v10450_v23  ;;  %v5051_v44 = vmul.f32 %v15534_v12, %v1875_v57  ;;  %v5052_v54 = vmul.f32 %v15535_v62, %v2053_v33  ;;  %v7816_v5 = vld [vmem:[#allocation3 + $0x2b4] sm:$0xf0]  ;;  %v15537_v56 = vld [vmem:[#allocation93_spill] sm:$0xff]  ;;  %v15539_v18 = vld [vmem:[#allocation51_spill] sm:$0xff] }
 0x2ea   :  { %v10738_v8 = vmul.f32 %v10712_v10, %v10619_v1  ;;  %v7393_v46 = vmul.f32 -1.442695, %v15536_v26  ;;  %v7394_v15 = vmul.f32 -1.442695, %v15537_v56  ;;  %v15538_v2 = vld [vmem:[#allocation45_spill] sm:$0xff]  ;;  %v6896_v45 = vor.u32 %v7748_v14, %v6893_v19  ;;  %v1884_v62 = vpop.f32.mrf.mxu1 }
 0x2eb   :  { %15533 = vst [vmem:[#allocation82_spill] sm:$0xff] %v10732_v42  ;;  %v5056_v23 = vmul.f32 %v15538_v2, %v2055_v35  ;;  %v5059_v51 = vmul.f32 %v15539_v18, %v1880_v27  ;;  %v7152_v57 = vor.u32 %v7812_v16, %v7149_v55  ;;  %v2058_v33 = vadd.f32 %v10670_v37, %v10668_v48  ;;  %v1795_v12 = vpop.f32.mrf.mxu0  ;;  %v7740_v7 = vld [vmem:[#allocation3 + $0x5c] sm:$0xf]  ;;  %v6859_v14 = vld [vmem:[#allocation3 + $0x58] sm:$0xf] }
 0x2ec   :  { %v10746_v42 = vpop.eup %8079  ;;  %v5055_v58 = vmul.f32 %v15540_v43, %v1877_v3  ;;  %v6892_v36 = vor.u32 %v7752_v47, %v6891_v22  ;;  %v7148_v38 = vor.u32 %v7816_v5, %v7147_v9  ;;  %v1882_v35 = vadd.f32 %v1881_v29, %v1792_v53  ;;  %v7804_v2 = vld [vmem:[#allocation3 + $0x25c] sm:$0xf]  ;;  %2310 = vmatpush.bf16.msrb.mxu2 %v6896_v45  ;;  %v7744_v55 = vld [vmem:[#allocation3 + $0x74] sm:$0xf0]  ;;  %v15542_v43 = vld [vmem:[#allocation87_spill] sm:$0xff] }
 0x2ed   :  { %v7117_v27 = vld [vmem:[#allocation3 + $0x278] sm:$0xf0]  ;;  %vm4021_vm9 = vweird.f32 %v10585_v24  ;;  %2399 = vmatpush.bf16.msrb.mxu3 %v7152_v57  ;;  %v2060_v19 = vadd.f32 %v2059_v60, %v1970_v4  ;;  %v1885_v16 = vadd.f32 %v1884_v62, %v1795_v12  ;;  %v7115_v18 = vld [vmem:[#allocation3 + $0x258] sm:$0xf]  ;;  %v10752_v41 = vpop.eup %8081  ;;  %8085 = vpow2.f32 %v7393_v46  ;;  %v15543_v3 = vld [vmem:[#allocation89_spill] sm:$0xff] }
 0x2ee   :  { %v15541_v48 = vld [vmem:[#allocation160_spill] sm:$0xff]  ;;  %v10756_v29 = vadd.f32 %v15543_v3, %v15542_v43  ;;  %2132 = vmatpush.bf16.msrb.mxu0 %v6892_v36  ;;  %2221 = vmatpush.bf16.msrb.mxu1 %v7148_v38  ;;  %v6864_v47 = vor.u32 %v7740_v7, %v6861_v31  ;;  %v8084_v9 = vpop.eup %8083  ;;  %8087 = vpow2.f32 %v7394_v15  ;;  %v15545_v5 = vld [vmem:[#allocation55_spill] sm:$0xff]  ;;  %v7120_v57 = vor.u32 %v7804_v2, %v7117_v27  ;;  %v15557_v3 = vld [vmem:[#allocation57_spill] sm:$0xff] }
 0x2ef   :  { %v5060_v37 = vmul.f32 %v15541_v48, %v2058_v33  ;;  %v7808_v0 = vld [vmem:[#allocation3 + $0x274] sm:$0xf0]  ;;  %v5064_v4 = vmul.f32 %v15545_v5, %v2060_v19  ;;  %v15547_v33 = vand.u32 2147483647, %v10512_v6  ;;  %v15551_v62 = vld [vmem:[#allocation91_spill] sm:$0xff]  ;;  %v6860_v38 = vor.u32 %v7744_v55, %v6859_v14  ;;  %v1973_v15 = vpop.f32.mrf.mxu2  ;;  %vm10806_vm12 = vmor %vm4020_vm8, %vm4021_vm9 }
 0x2f0   :  { %v15544_v53 = vld [vmem:[#allocation52_spill] sm:$0xff]  ;;  %v10771_v31 = vpack.c.bf16 %v5055_v58, %v5051_v44  ;;  %v4039_v7 = vand.u32 2147483647, %v10589_v30  ;;  %v2062_v48 = vpop.f32.mrf.mxu3  ;;  %2311 = vmatpush.bf16.msrb.mxu2 %v6864_v47  ;;  %v10774_v2 = vpack.c.bf16 %v5056_v23, %v5052_v54  ;;  %v4032_v14 = vsub.f32 1.0, %v10724_v50  ;;  %v15558_v47 = vld [vmem:[#allocation42_spill] sm:$0xff] }
 0x2f1   :  { %v5063_v22 = vmul.f32 %v15544_v53, %v1882_v35  ;;  %v15546_v60 = vld [vmem:[#allocation56_spill] sm:$0xff]  ;;  %vm10763_vm10 = vcmp.eq.f32.partialorder %v15547_v33, 8.507059e+37  ;;  %v7116_v35 = vor.u32 %v7808_v0, %v7115_v18  ;;  %2400 = vmatpush.bf16.msrb.mxu3 %v7120_v57  ;;  %v10778_v19 = vpack.c.bf16 %v5064_v4, %v5060_v37  ;;  %v15562_v6 = vld [vmem:[#allocation58_spill] sm:$0xff] }
 0x2f2   :  { %v5067_v45 = vmul.f32 %v15546_v60, %v1885_v16  ;;  %v15550_v12 = vld [vmem:[#allocation88_spill] sm:$0xff]  ;;  %15552 = vst [vmem:[#allocation86_spill] sm:$0xff] %v10771_v31  ;;  %v4019_v16 = vadd.f32 %v10585_v24, %v10707_v34  ;;  %v10783_v0 = vadd.f32 1.0, %v8084_v9  ;;  %v2063_v58 = vadd.f32 %v2062_v48, %v1973_v15  ;;  %2133 = vmatpush.bf16.msrb.mxu0 %v6860_v38  ;;  %v1886_v50 = vpop.f32.mrf.mxu1 }
 0x2f3   :  { %v10769_v36 = vadd.f32 %v15551_v62, %v15550_v12  ;;  %15553 = vst [vmem:[#allocation83_spill] sm:$0xff] %v10774_v2  ;;  %v10776_v27 = vpack.c.bf16 %v5063_v22, %v5059_v51  ;;  %2222 = vmatpush.bf16.msrb.mxu1 %v7116_v35  ;;  %vm4035_vm11 = vweird.f32 %v10589_v30  ;;  %v15556_v44 = vand.u32 2147483648, %v10589_v30  ;;  %v1797_v37 = vpop.f32.mrf.mxu0  ;;  %v8086_v55 = vpop.eup %8085  ;;  %1839 = vmatmul.bf16.gmra.mxu0 %v15558_v47 }
 0x2f4   :  { %15555 = vst [vmem:[#allocation40_spill] sm:$0xff] %v10778_v19  ;;  %v4077_v23 = vsub.f32 1.0, %v10738_v8  ;;  %v4091_v51 = vmul.f32 %v10746_v42, %v10677_v63  ;;  %v7397_v34 = vmul.f32 -1.442695, %v10756_v29  ;;  %v4136_v18 = vmul.f32 %v10752_v41, %v10689_v21  ;;  %v15559_v8 = vld [vmem:[#allocation44_spill] sm:$0xff]  ;;  %v8088_v9 = vpop.eup %8087  ;;  %2017 = vmatmul.bf16.gmra.mxu2 %v15558_v47 }
 0x2f5   :  { %15554 = vst [vmem:[#allocation84_spill] sm:$0xff] %v10776_v27  ;;  %v10788_v54 = vor.u32 1.1754944e-38, %v15556_v44  ;;  %v7398_v43 = vmul.f32 -1.442695, %v10769_v36  ;;  %v10798_v53 = vmul.f32 %v15557_v3, %v2063_v58  ;;  %v1887_v22 = vadd.f32 %v1886_v50, %v1797_v37 }
 0x2f6   :  { %vm4080_vm13 = vweird.f32 %v10619_v1  ;;  %v4084_v4 = vand.u32 2147483647, %v10619_v1  ;;  %v4086_v60 = vand.u32 2147483648, %v10619_v1  ;;  %v4099_v57 = vand.u32 2147483647, %v10677_v63 }
 0x2f7   :  { %1928 = vmatmul.bf16.gmra.mxu1 %v15559_v8  ;;  %v4023_v33 = vsel %vm10806_vm12, %v10585_v24, %v4019_v16  ;;  %v4033_v12 = vmul.f32 %v10693_v11, %v4032_v14  ;;  %8089 = vrcp.f32 %v10783_v0  ;;  %v5071_v62 = vmul.f32 %v15562_v6, %v1887_v22  ;;  %2106 = vmatmul.bf16.gmra.mxu3 %v15559_v8 }
 0x2f8   :  { %v4078_v38 = vmul.f32 %v10712_v10, %v4077_v23  ;;  %v4092_v35 = vsub.f32 1.0, %v4091_v51  ;;  %v4101_v15 = vand.u32 2147483648, %v10677_v63  ;;  %8091 = vpow2.f32 %v7397_v34  ;;  %v2064_v34 = vpop.f32.mrf.mxu3 }
 0x2f9   :  { %v4137_v48 = vsub.f32 1.0, %v4136_v18  ;;  %v10824_v58 = vadd.f32 1.0, %v8086_v55  ;;  %8093 = vpow2.f32 %v7398_v43  ;;  %v10826_v24 = vpack.c.bf16 %v5071_v62, %v5067_v45  ;;  %v1975_v45 = vpop.f32.mrf.mxu2 }
 0x2fa   :  { %v4028_v16 = vsel %vm10763_vm10, %v10687_v17, %v4023_v33  ;;  %vm4036_vm14 = vweird.f32 %v10693_v11  ;;  %vm10832_vm15 = vcmp.eq.f32.partialorder %v4039_v7, 8.507059e+37  ;;  %vm10836_vm0 = vcmp.eq.f32.partialorder %v4084_v4, 8.507059e+37  ;;  %v15568_v17 = vld [vmem:[#allocation95_spill] sm:$0xff]  ;;  %v1889_v3 = vpop.f32.mrf.mxu1  ;;  %v15571_v4 = vld [vmem:[#allocation61_spill] sm:$0xff] }
 0x2fb   :  { %15563 = vst [vmem:[#allocation41_spill] sm:$0xff] %v10826_v24  ;;  %v4087_v23 = vor.u32 1.1754944e-38, %v4086_v60  ;;  %vm4095_vm1 = vweird.f32 %v10677_v63  ;;  %v10841_v51 = vadd.f32 1.0, %v8088_v9  ;;  %v4034_v46 = vadd.f32 %v10693_v11, %v4033_v12  ;;  %v1800_v43 = vpop.f32.mrf.mxu0  ;;  %vm10857_vm4 = vmor %vm4035_vm11, %vm4036_vm14  ;;  %v7800_v63 = vld [vmem:[#allocation3 + $0x234] sm:$0xf0] }
 0x2fc   :  { %vm4081_vm2 = vweird.f32 %v10712_v10  ;;  %v7401_v7 = vmul.f32 -1.442695, %v15568_v17  ;;  %v2065_v37 = vadd.f32 %v2064_v34, %v1975_v45  ;;  %v4079_v50 = vadd.f32 %v10712_v10, %v4078_v38  ;;  %v7732_v45 = vld [vmem:[#allocation3 + $0x1c] sm:$0xf] }
 0x2fd   :  { %v4093_v55 = vmul.f32 %v10746_v42, %v4092_v35  ;;  %v10848_v18 = vor.u32 1.1754944e-38, %v4101_v15  ;;  %vm4140_vm3 = vweird.f32 %v10689_v21  ;;  %v10851_v22 = vpop.eup %8089  ;;  %v4138_v5 = vmul.f32 %v10752_v41, %v4137_v48  ;;  %vm10868_vm5 = vmor %vm4080_vm13, %vm4081_vm2  ;;  %v15576_v15 = vld [vmem:[#allocation69_spill] sm:$0xff]  ;;  %v7796_v34 = vld [vmem:[#allocation3 + $0x21c] sm:$0xf] }
 0x2fe   :  { %8095 = vrcp.f32 %v10824_v58  ;;  %v5072_v60 = vmul.f32 %v15571_v4, %v2065_v37  ;;  %v1890_v33 = vadd.f32 %v1889_v3, %v1800_v43  ;;  %v8092_v12 = vpop.eup %8091  ;;  %vm4096_vm6 = vweird.f32 %v10746_v42 }
 0x2ff   :  { %vm10873_vm7 = vcmp.eq.f32.partialorder %v4099_v57, 8.507059e+37  ;;  %v4144_v62 = vand.u32 2147483647, %v10689_v21  ;;  %v4146_v38 = vand.u32 2147483648, %v10689_v21  ;;  %8097 = vrcp.f32 %v10841_v51  ;;  %v8094_v35 = vpop.eup %8093  ;;  %v6829_v57 = vld [vmem:[#allocation3 + $0x38] sm:$0xf0]  ;;  %vm10919_vm10 = vmor %vm4095_vm1, %vm4096_vm6 }
 0x300   :  { %v4038_v1 = vsel %vm10857_vm4, %v10693_v11, %v4034_v46  ;;  %8099 = vpow2.f32 %v7401_v7  ;;  %v10884_v48 = vmul.f32 %v15576_v15, %v1890_v33  ;;  %v10887_v37 = vpack.c.bf16 %v5072_v60, %v10798_v53  ;;  %v7085_v46 = vld [vmem:[#allocation3 + $0x238] sm:$0xf0]  ;;  %v2067_v6 = vpop.f32.mrf.mxu3  ;;  %v15608_v60 = vld [vmem:[#allocation65_spill] sm:$0xff] }
 0x301   :  { %v4083_v43 = vsel %vm10868_vm5, %v10712_v10, %v4079_v50  ;;  %v4094_v3 = vadd.f32 %v10746_v42, %v4093_v55  ;;  %v4151_v9 = vmul.f32 %v10851_v22, %v10783_v0  ;;  %v6832_v11 = vor.u32 %v7732_v45, %v6829_v57  ;;  %v1978_v55 = vpop.f32.mrf.mxu2 }
 0x302   :  { %15577 = vst [vmem:[#allocation43_spill] sm:$0xff] %v10887_v37  ;;  %v4139_v7 = vadd.f32 %v10752_v41, %v4138_v5  ;;  %vm4141_vm8 = vweird.f32 %v10752_v41  ;;  %v10897_v4 = vadd.f32 1.0, %v8092_v12  ;;  %v7088_v33 = vor.u32 %v7796_v34, %v7085_v46  ;;  %v15582_v12 = vld [vmem:[#allocation97_spill] sm:$0xff]  ;;  %v1891_v45 = vpop.f32.mrf.mxu1  ;;  %v7736_v46 = vld [vmem:[#allocation3 + $0x34] sm:$0xf0] }
 0x303   :  { %v10900_v53 = vmul.f32 %v4028_v16, %v10326_v52  ;;  %vm10902_vm9 = vcmp.eq.f32.partialorder %v4144_v62, 8.507059e+37  ;;  %v4147_v10 = vor.u32 1.1754944e-38, %v4146_v38  ;;  %v10906_v50 = vadd.f32 1.0, %v8094_v35  ;;  %2312 = vmatpush.bf16.msrb.mxu2 %v6832_v11  ;;  %vm10933_vm11 = vmor %vm4140_vm3, %vm4141_vm8  ;;  %v15585_v34 = vld [vmem:[#allocation165_spill] sm:$0xff]  ;;  %v15587_v11 = vld [vmem:[#allocation54_spill] sm:$0xff] }
 0x304   :  { %v10908_v15 = vpop.eup %8095  ;;  %v4043_v5 = vsel %vm10832_vm15, %v10788_v54, %v4038_v1  ;;  %v4088_v52 = vsel %vm10836_vm0, %v4087_v23, %v4083_v43  ;;  %v7402_v62 = vmul.f32 -1.442695, %v15582_v12  ;;  %v2068_v38 = vadd.f32 %v2067_v6, %v1978_v55  ;;  %2401 = vmatpush.bf16.msrb.mxu3 %v7088_v33  ;;  %v1802_v1 = vpop.f32.mrf.mxu0  ;;  %v7083_v33 = vld [vmem:[#allocation3 + $0x218] sm:$0xf]  ;;  %v15589_v16 = vld [vmem:[#allocation94_spill] sm:$0xff] }
 0x305   :  { %v10924_v35 = vpop.eup %8097  ;;  %v4098_v54 = vsel %vm10919_vm10, %v10746_v42, %v4094_v3  ;;  %v4152_v14 = vsub.f32 1.0, %v4151_v9  ;;  %v4159_v44 = vand.u32 2147483647, %v10783_v0  ;;  %v4161_v23 = vand.u32 2147483648, %v10783_v0  ;;  %v15586_v3 = vld [vmem:[#allocation53_spill] sm:$0xff]  ;;  %v15588_v6 = vld [vmem:[#allocation92_spill] sm:$0xff] }
 0x306   :  { %v8100_v57 = vpop.eup %8099  ;;  %v4143_v42 = vsel %vm10933_vm11, %v10752_v41, %v4139_v7  ;;  %8101 = vrcp.f32 %v10897_v4  ;;  %v5076_v21 = vmul.f32 %v15585_v34, %v2068_v38  ;;  %v1892_v43 = vadd.f32 %v1891_v45, %v1802_v1  ;;  %1844 = vmatmul.bf16.gmra.mxu0 %v15586_v3  ;;  %v6827_v9 = vld [vmem:[#allocation3 + $0x18] sm:$0xf]  ;;  %v15590_v1 = vld [vmem:[#allocation166_spill] sm:$0xff]  ;;  %2022 = vmatmul.bf16.gmra.mxu2 %v15586_v3 }
 0x307   :  { %1933 = vmatmul.bf16.gmra.mxu1 %v15587_v11  ;;  %v4196_v55 = vmul.f32 %v10908_v15, %v10824_v58  ;;  %8103 = vrcp.f32 %v10906_v50  ;;  %v10951_v41 = vadd.f32 %v15589_v16, %v15588_v6  ;;  %v6828_v7 = vor.u32 %v7736_v46, %v6827_v9  ;;  %2111 = vmatmul.bf16.gmra.mxu3 %v15587_v11  ;;  %v15594_v6 = vld [vmem:[#allocation98_spill] sm:$0xff] }
 0x308   :  { %v4103_v38 = vsel %vm10873_vm7, %v10848_v18, %v4098_v54  ;;  %8105 = vpow2.f32 %v7402_v62  ;;  %v5079_v45 = vmul.f32 %v15590_v1, %v1892_v43  ;;  %v7084_v34 = vor.u32 %v7800_v63, %v7083_v33  ;;  %v7886_v3 = vld [vmem:[%s14897_s2 + $0xe4] sm:$0xf0] }
 0x309   :  { %v10960_v37 = vmul.f32 %v4043_v5, %v10430_v13  ;;  %vm4155_vm12 = vweird.f32 %v10783_v0  ;;  %v4211_v9 = vmul.f32 %v10924_v35, %v10841_v51  ;;  %v10965_v46 = vadd.f32 1.0, %v8100_v57  ;;  %2134 = vmatpush.bf16.msrb.mxu0 %v6828_v7  ;;  %v1980_v33 = vpop.f32.mrf.mxu2 }
 0x30a   :  { %v10968_v18 = vmul.f32 %v4088_v52, %v15494_v59  ;;  %v4148_v30 = vsel %vm10902_vm9, %v4147_v10, %v4143_v42  ;;  %v4153_v62 = vmul.f32 %v10851_v22, %v4152_v14  ;;  %2223 = vmatpush.bf16.msrb.mxu1 %v7084_v34  ;;  %v10974_v13 = vpack.c.bf16 %v5079_v45, %v10884_v48  ;;  %v2069_v59 = vpop.f32.mrf.mxu3  ;;  %v1894_v63 = vpop.f32.mrf.mxu1 }
 0x30b   :  { %v10977_v5 = vmul.f32 %v4103_v38, %v15503_v39  ;;  %v4197_v54 = vsub.f32 1.0, %v4196_v55  ;;  %v4206_v57 = vand.u32 2147483648, %v10824_v58  ;;  %v7405_v43 = vmul.f32 -1.442695, %v10951_v41 }
 0x30c   :  { %15591 = vst [vmem:[#allocation90_spill] sm:$0xff] %v10974_v13  ;;  %v10981_v52 = vpop.eup %8101  ;;  %vm10983_vm13 = vcmp.eq.f32.partialorder %v4159_v44, 8.507059e+37  ;;  %v4162_v10 = vor.u32 1.1754944e-38, %v4161_v23  ;;  %v4204_v48 = vand.u32 2147483647, %v10824_v58  ;;  %v2070_v14 = vadd.f32 %v2069_v59, %v1980_v33  ;;  %v1805_v7 = vpop.f32.mrf.mxu0  ;;  %v15595_v23 = vld [vmem:[#allocation68_spill] sm:$0xff] }
 0x30d   :  { %v10988_v42 = vpop.eup %8103  ;;  %v10991_v39 = vmul.f32 %v4148_v30, %v10525_v25  ;;  %v4212_v55 = vsub.f32 1.0, %v4211_v9  ;;  %8107 = vrcp.f32 %v10965_v46  ;;  %v7406_v16 = vmul.f32 -1.442695, %v15594_v6  ;;  %v15596_v33 = vld [vmem:[#allocation99_spill] sm:$0xff] }
 0x30e   :  { %v8106_v44 = vpop.eup %8105  ;;  %v4154_v38 = vadd.f32 %v10851_v22, %v4153_v62  ;;  %vm4156_vm14 = vweird.f32 %v10851_v22  ;;  %vm4200_vm15 = vweird.f32 %v10824_v58  ;;  %v5080_v1 = vmul.f32 %v15595_v23, %v2070_v14  ;;  %v15597_v62 = vld [vmem:[#allocation74_spill] sm:$0xff]  ;;  %v15611_v58 = vld [vmem:[#allocation71_spill] sm:$0xff] }
 0x30f   :  { %v1895_v45 = vadd.f32 %v1894_v63, %v1805_v7  ;;  %v4198_v25 = vmul.f32 %v10908_v15, %v4197_v54  ;;  %v11000_v34 = vor.u32 1.1754944e-38, %v4206_v57  ;;  %v4219_v9 = vand.u32 2147483647, %v10841_v51  ;;  %vm11011_vm0 = vmor %vm4155_vm12, %vm4156_vm14  ;;  %v15603_v63 = vld [vmem:[#allocation101_spill] sm:$0xff] }
 0x310   :  { %8109 = vpow2.f32 %v7405_v43  ;;  %v4256_v30 = vmul.f32 %v10981_v52, %v10897_v4  ;;  %v7409_v59 = vmul.f32 -1.442695, %v15596_v33  ;;  %v11007_v24 = vpack.c.bf16 %v5080_v1, %v5076_v21 }
 0x311   :  { %v5083_v13 = vmul.f32 %v15597_v62, %v1895_v45  ;;  %v4213_v54 = vmul.f32 %v10924_v35, %v4212_v55  ;;  %v4271_v57 = vmul.f32 %v10988_v42, %v10906_v50  ;;  %v11018_v43 = vadd.f32 1.0, %v8106_v44 }
 0x312   :  { %15598 = vst [vmem:[#allocation93_spill] sm:$0xff] %v11007_v24  ;;  %8111 = vpow2.f32 %v7406_v16  ;;  %v4158_v7 = vsel %vm11011_vm0, %v10851_v22, %v4154_v38  ;;  %vm11023_vm1 = vcmp.eq.f32.partialorder %v4204_v48, 8.507059e+37  ;;  %vm4215_vm2 = vweird.f32 %v10841_v51  ;;  %v1983_v48 = vpop.f32.mrf.mxu2  ;;  %v2072_v44 = vpop.f32.mrf.mxu3 }
 0x313   :  { %v4221_v0 = vand.u32 2147483648, %v10841_v51  ;;  %v7410_v55 = vmul.f32 -1.442695, %v15603_v63  ;;  %v11030_v23 = vpop.eup %8107  ;;  %vm4201_vm3 = vweird.f32 %v10908_v15  ;;  %vm4216_vm4 = vweird.f32 %v10924_v35  ;;  %v1896_v31 = vpop.f32.mrf.mxu1 }
 0x314   :  { %v4264_v16 = vand.u32 2147483647, %v10897_v4  ;;  %v4266_v22 = vand.u32 2147483648, %v10897_v4  ;;  %v4199_v38 = vadd.f32 %v10908_v15, %v4198_v25  ;;  %vm11037_vm5 = vcmp.eq.f32.partialorder %v4219_v9, 8.507059e+37  ;;  %v1807_v2 = vpop.f32.mrf.mxu0  ;;  %v15606_v9 = vld [vmem:[#allocation70_spill] sm:$0xff]  ;;  %vm11055_vm7 = vmor %vm4200_vm15, %vm4201_vm3 }
 0x315   :  { %v4257_v45 = vsub.f32 1.0, %v4256_v30  ;;  %8113 = vpow2.f32 %v7409_v59  ;;  %v2073_v62 = vadd.f32 %v2072_v44, %v1983_v48  ;;  %v4163_v24 = vsel %vm10983_vm13, %v4162_v10, %v4158_v7  ;;  %v15607_v48 = vld [vmem:[#allocation59_spill] sm:$0xff]  ;;  %vm11079_vm8 = vmor %vm4215_vm2, %vm4216_vm4 }
 0x316   :  { %v8110_v14 = vpop.eup %8109  ;;  %v4214_v19 = vadd.f32 %v10924_v35, %v4213_v54  ;;  %v4272_v27 = vsub.f32 1.0, %v4271_v57  ;;  %8115 = vrcp.f32 %v11018_v43  ;;  %vm4260_vm6 = vweird.f32 %v10897_v4  ;;  %1849 = vmatmul.bf16.gmra.mxu0 %v15607_v48  ;;  %2027 = vmatmul.bf16.gmra.mxu2 %v15607_v48 }
 0x317   :  { %v4316_v25 = vmul.f32 %v11030_v23, %v10965_v46  ;;  %8117 = vpow2.f32 %v7410_v55  ;;  %v5084_v30 = vmul.f32 %v15606_v9, %v2073_v62  ;;  %v1897_v59 = vadd.f32 %v1896_v31, %v1807_v2  ;;  %1938 = vmatmul.bf16.gmra.mxu1 %v15608_v60  ;;  %2116 = vmatmul.bf16.gmra.mxu3 %v15608_v60 }
 0x318   :  { %v8112_v10 = vpop.eup %8111  ;;  %v4222_v57 = vor.u32 1.1754944e-38, %v4221_v0  ;;  %v11059_v7 = vor.u32 1.1754944e-38, %v4266_v22  ;;  %v4279_v55 = vand.u32 2147483647, %v10906_v50  ;;  %v4281_v31 = vand.u32 2147483648, %v10906_v50 }
 0x319   :  { %v4203_v2 = vsel %vm11055_vm7, %v10908_v15, %v4199_v38  ;;  %v4258_v44 = vmul.f32 %v10981_v52, %v4257_v45  ;;  %v11067_v62 = vadd.f32 1.0, %v8110_v14  ;;  %v5087_v9 = vmul.f32 %v15611_v58, %v1897_v59 }
 0x31a   :  { %v11073_v0 = vmul.f32 %v4163_v24, %v10666_v28  ;;  %vm4261_vm9 = vweird.f32 %v10981_v52  ;;  %v4273_v15 = vmul.f32 %v10988_v42, %v4272_v27  ;;  %vm4275_vm10 = vweird.f32 %v10906_v50 }
 0x31b   :  { %v8114_v38 = vpop.eup %8113  ;;  %v4218_v28 = vsel %vm11079_vm8, %v10924_v35, %v4214_v19  ;;  %vm11089_vm11 = vcmp.eq.f32.partialorder %v4264_v16, 8.507059e+37  ;;  %v4317_v51 = vsub.f32 1.0, %v4316_v25  ;;  %v11093_v45 = vadd.f32 1.0, %v8112_v10  ;;  %v1985_v35 = vpop.f32.mrf.mxu2  ;;  %vm11127_vm14 = vmor %vm4260_vm6, %vm4261_vm9 }
 0x31c   :  { %v11095_v14 = vpack.c.bf16 %v5087_v9, %v5083_v13  ;;  %v11097_v59 = vpop.eup %8115  ;;  %v4208_v27 = vsel %vm11023_vm1, %v11000_v34, %v4203_v2  ;;  %v4282_v54 = vor.u32 1.1754944e-38, %v4281_v31  ;;  %v4324_v58 = vand.u32 2147483647, %v10965_v46  ;;  %v2074_v16 = vpop.f32.mrf.mxu3  ;;  %v15619_v2 = vld [vmem:[#allocation96_spill] sm:$0xff] }
 0x31d   :  { %v4326_v19 = vand.u32 2147483648, %v10965_v46  ;;  %v8118_v22 = vpop.eup %8117  ;;  %v4259_v25 = vadd.f32 %v10981_v52, %v4258_v44  ;;  %vm4276_vm12 = vweird.f32 %v10988_v42  ;;  %vm11106_vm13 = vcmp.eq.f32.partialorder %v4279_v55, 8.507059e+37  ;;  %v15620_v9 = vld [vmem:[#allocation100_spill] sm:$0xff]  ;;  %v1810_v44 = vpop.f32.mrf.mxu0 }
 0x31e   :  { %15616 = vst [vmem:[#allocation45_spill] sm:$0xff] %v11095_v14  ;;  %8119 = vrcp.f32 %v11067_v62  ;;  %v2075_v21 = vadd.f32 %v2074_v16, %v1985_v35  ;;  %v4223_v34 = vsel %vm11037_vm5, %v4222_v57, %v4218_v28  ;;  %v4274_v10 = vadd.f32 %v10988_v42, %v4273_v15  ;;  %v1899_v60 = vpop.f32.mrf.mxu1  ;;  %vm11169_vm1 = vmor %vm4275_vm10, %vm4276_vm12 }
 0x31f   :  { %v11114_v31 = vadd.f32 1.0, %v8114_v38  ;;  %v11118_v14 = vadd.f32 %v15620_v9, %v15619_v2  ;;  %v4318_v55 = vmul.f32 %v11030_v23, %v4317_v51  ;;  %8121 = vrcp.f32 %v11093_v45  ;;  %v7627_v51 = vld [vmem:[%s14897_s2 + $0x170] sm:$0xf]  ;;  %v15628_v2 = vld [vmem:[#allocation102_spill] sm:$0xff] }
 0x320   :  { %v5088_v48 = vmul.f32 %v10334_v40, %v2075_v21  ;;  %v1900_v35 = vadd.f32 %v1899_v60, %v1810_v44  ;;  %vm4320_vm15 = vweird.f32 %v10965_v46  ;;  %v11132_v57 = vor.u32 1.1754944e-38, %v4326_v19 }
 0x321   :  { %v4331_v15 = vmul.f32 %v11097_v59, %v11018_v43  ;;  %v11136_v38 = vadd.f32 1.0, %v8118_v22  ;;  %v11139_v40 = vmul.f32 %v4208_v27, %v15536_v26  ;;  %v4263_v4 = vsel %vm11127_vm14, %v10981_v52, %v4259_v25  ;;  %v7904_v26 = vld [vmem:[%s14897_s2 + $0x174] sm:$0xf0]  ;;  %v7691_v27 = vld [vmem:[%s14897_s2 + $0x1f0] sm:$0xf] }
 0x322   :  { %vm11144_vm0 = vcmp.eq.f32.partialorder %v4324_v58, 8.507059e+37  ;;  %v11149_v28 = vmul.f32 %v10435_v32, %v1900_v35  ;;  %v11160_v52 = vpack.c.bf16 %v5088_v48, %v5084_v30  ;;  %v11163_v58 = vmul.f32 %v4223_v34, %v15537_v56  ;;  %v7920_v30 = vld [vmem:[%s14897_s2 + $0x1f4] sm:$0xf0] }
 0x323   :  { %8123 = vrcp.f32 %v11114_v31  ;;  %v7413_v19 = vmul.f32 -1.442695, %v11118_v14  ;;  %v7628_v16 = vor.u32 %v7904_v26, %v7627_v51  ;;  %v4278_v56 = vsel %vm11169_vm1, %v10988_v42, %v4274_v10  ;;  %v1988_v44 = vpop.f32.mrf.mxu2  ;;  %v15629_v10 = vld [vmem:[#allocation103_spill] sm:$0xff]  ;;  %v15632_v32 = vld [vmem:[#allocation72_spill] sm:$0xff] }
 0x324   :  { %15625 = vst [vmem:[#allocation51_spill] sm:$0xff] %v11160_v52  ;;  %v11178_v48 = vpop.eup %8119  ;;  %v4319_v50 = vadd.f32 %v11030_v23, %v4318_v55  ;;  %vm4321_vm2 = vweird.f32 %v11030_v23  ;;  %v7692_v22 = vor.u32 %v7920_v30, %v7691_v27  ;;  %v4268_v25 = vsel %vm11089_vm11, %v11059_v7, %v4263_v4  ;;  %v2077_v35 = vpop.f32.mrf.mxu3  ;;  %v7499_v30 = vld [vmem:[%s14897_s2 + $0x70] sm:$0xf] }
 0x325   :  { %v4332_v21 = vsub.f32 1.0, %v4331_v15  ;;  %v4339_v34 = vand.u32 2147483647, %v11018_v43  ;;  %v7414_v9 = vmul.f32 -1.442695, %v15628_v2  ;;  %5861 = vmatpush.bf16.msra.mxu2 %v7628_v16  ;;  %v11190_v1 = vpop.eup %8121  ;;  %v4341_v42 = vand.u32 2147483648, %v11018_v43  ;;  %vm11201_vm3 = vmor %vm4320_vm15, %vm4321_vm2  ;;  %v1812_v26 = vpop.f32.mrf.mxu0 }
 0x326   :  { %8125 = vrcp.f32 %v11136_v38  ;;  %v7417_v55 = vmul.f32 -1.442695, %v15629_v10  ;;  %v2078_v51 = vadd.f32 %v2077_v35, %v1988_v44  ;;  %5950 = vmatpush.bf16.msra.mxu3 %v7692_v22  ;;  %v4283_v7 = vsel %vm11106_vm13, %v4282_v54, %v4278_v56  ;;  %v1901_v27 = vpop.f32.mrf.mxu1  ;;  %1854 = vmatmul.bf16.gmra.mxu0 %v15632_v32  ;;  %v15633_v16 = vld [vmem:[#allocation73_spill] sm:$0xff]  ;;  %v7888_v44 = vld [vmem:[%s14897_s2 + $0xf4] sm:$0xf0] }
 0x327   :  { %v4376_v15 = vmul.f32 %v11178_v48, %v11067_v62  ;;  %v4386_v4 = vand.u32 2147483648, %v11067_v62  ;;  %8127 = vpow2.f32 %v7413_v19  ;;  %v4323_v54 = vsel %vm11201_vm3, %v11030_v23, %v4319_v50  ;;  %1943 = vmatmul.bf16.gmra.mxu1 %v15633_v16  ;;  %v7872_v19 = vld [vmem:[%s14897_s2 + $0x74] sm:$0xf0]  ;;  %v7563_v23 = vld [vmem:[%s14897_s2 + $0xf0] sm:$0xf]  ;;  %2032 = vmatmul.bf16.gmra.mxu2 %v15632_v32 }
 0x328   :  { %v11212_v13 = vmul.f32 %v10458_v49, %v2078_v51  ;;  %v1902_v46 = vadd.f32 %v1901_v27, %v1812_v26  ;;  %v4333_v49 = vmul.f32 %v11097_v59, %v4332_v21  ;;  %v4391_v50 = vmul.f32 %v11190_v1, %v11093_v45  ;;  %2121 = vmatmul.bf16.gmra.mxu3 %v15633_v16 }
 0x329   :  { %v11225_v56 = vpop.eup %8123  ;;  %8129 = vpow2.f32 %v7414_v9  ;;  %v7500_v22 = vor.u32 %v7872_v19, %v7499_v30  ;;  %v11234_v35 = vmul.f32 %v4268_v25, %v10756_v29  ;;  %v7564_v21 = vor.u32 %v7888_v44, %v7563_v23  ;;  %v15637_v30 = vld [vmem:[#allocation104_spill] sm:$0xff]  ;;  %v15638_v44 = vld [vmem:[#allocation105_spill] sm:$0xff] }
 0x32a   :  { %8131 = vpow2.f32 %v7417_v55  ;;  %v5095_v51 = vmul.f32 %v10477_v20, %v1902_v46  ;;  %v4328_v9 = vsel %vm11144_vm0, %v11132_v57, %v4323_v54  ;;  %vm4335_vm4 = vweird.f32 %v11018_v43 }
 0x32b   :  { %v4342_v24 = vor.u32 1.1754944e-38, %v4341_v42  ;;  %v4377_v26 = vsub.f32 1.0, %v4376_v15  ;;  %5683 = vmatpush.bf16.msra.mxu0 %v7500_v22  ;;  %v11246_v29 = vmul.f32 %v4283_v7, %v10769_v36  ;;  %vm11248_vm5 = vcmp.eq.f32.partialorder %v4339_v34, 8.507059e+37  ;;  %5772 = vmatpush.bf16.msra.mxu1 %v7564_v21  ;;  %v1990_v7 = vpop.f32.mrf.mxu2 }
 0x32c   :  { %v11243_v27 = vpop.eup %8125  ;;  %v4384_v25 = vand.u32 2147483647, %v11067_v62  ;;  %v4436_v60 = vmul.f32 %v11225_v56, %v11114_v31  ;;  %v11256_v57 = vpack.c.bf16 %v5095_v51, %v11149_v28  ;;  %v4334_v55 = vadd.f32 %v11097_v59, %v4333_v49  ;;  %v2079_v15 = vpop.f32.mrf.mxu3 }
 0x32d   :  { %v8128_v42 = vpop.eup %8127  ;;  %vm4336_vm6 = vweird.f32 %v11097_v59  ;;  %vm4380_vm7 = vweird.f32 %v11067_v62  ;;  %v11261_v36 = vor.u32 1.1754944e-38, %v4386_v4  ;;  %v4392_v34 = vsub.f32 1.0, %v4391_v50  ;;  %v1815_v51 = vpop.f32.mrf.mxu0 }
 0x32e   :  { %15636 = vst [vmem:[#allocation47_spill] sm:$0xff] %v11256_v57  ;;  %v11264_v54 = vmul.f32 %v4328_v9, %v15568_v17  ;;  %v4399_v46 = vand.u32 2147483647, %v11093_v45  ;;  %v7418_v28 = vmul.f32 -1.442695, %v15637_v30  ;;  %v2080_v19 = vadd.f32 %v2079_v15, %v1990_v7  ;;  %v1904_v21 = vpop.f32.mrf.mxu1  ;;  %vm11277_vm8 = vmor %vm4335_vm4, %vm4336_vm6  ;;  %v15641_v7 = vld [vmem:[#allocation78_spill] sm:$0xff] }
 0x32f   :  { %v8130_v23 = vpop.eup %8129  ;;  %v4378_v49 = vmul.f32 %v11178_v48, %v4377_v26  ;;  %v4401_v22 = vand.u32 2147483648, %v11093_v45  ;;  %v4451_v4 = vmul.f32 %v11243_v27, %v11136_v38  ;;  %v7421_v50 = vmul.f32 -1.442695, %v15638_v44 }
 0x330   :  { %v8132_v57 = vpop.eup %8131  ;;  %v4437_v9 = vsub.f32 1.0, %v4436_v60  ;;  %v11281_v26 = vadd.f32 1.0, %v8128_v42  ;;  %v5096_v15 = vmul.f32 %v15641_v7, %v2080_v19  ;;  %v1905_v52 = vadd.f32 %v1904_v21, %v1815_v51  ;;  %v15644_v60 = vld [vmem:[#allocation106_spill] sm:$0xff]  ;;  %v15645_v19 = vld [vmem:[#allocation157_spill] sm:$0xff] }
 0x331   :  { %v4338_v16 = vsel %vm11277_vm8, %v11097_v59, %v4334_v55  ;;  %vm4381_vm9 = vweird.f32 %v11178_v48  ;;  %vm11288_vm10 = vcmp.eq.f32.partialorder %v4384_v25, 8.507059e+37  ;;  %v4393_v43 = vmul.f32 %v11190_v1, %v4392_v34 }
 0x332   :  { %vm4395_vm11 = vweird.f32 %v11093_v45  ;;  %v7422_v42 = vmul.f32 -1.442695, %v15644_v60  ;;  %v11295_v11 = vadd.f32 1.0, %v8130_v23  ;;  %8133 = vpow2.f32 %v7418_v28  ;;  %v15647_v23 = vld [vmem:[#allocation107_spill] sm:$0xff]  ;;  %vm11320_vm14 = vmor %vm4380_vm7, %vm4381_vm9 }
 0x333   :  { %v5099_v51 = vmul.f32 %v15645_v19, %v1905_v52  ;;  %v11299_v21 = vpack.c.bf16 %v5096_v15, %v11212_v13  ;;  %v4379_v59 = vadd.f32 %v11178_v48, %v4378_v49  ;;  %v4452_v25 = vsub.f32 1.0, %v4451_v4  ;;  %v1993_v28 = vpop.f32.mrf.mxu2 }
 0x334   :  { %v11302_v55 = vadd.f32 1.0, %v8132_v57  ;;  %8135 = vpow2.f32 %v7421_v50  ;;  %v4438_v34 = vmul.f32 %v11225_v56, %v4437_v9  ;;  %v4444_v17 = vand.u32 2147483647, %v11114_v31  ;;  %v2082_v49 = vpop.f32.mrf.mxu3 }
 0x335   :  { %15646 = vst [vmem:[#allocation160_spill] sm:$0xff] %v11299_v21  ;;  %8137 = vrcp.f32 %v11281_v26  ;;  %v7425_v7 = vmul.f32 -1.442695, %v15647_v23  ;;  %v4343_v52 = vsel %vm11248_vm5, %v4342_v24, %v4338_v16  ;;  %vm4396_vm12 = vweird.f32 %v11190_v1  ;;  %v1817_v62 = vpop.f32.mrf.mxu0 }
 0x336   :  { %vm11311_vm13 = vcmp.eq.f32.partialorder %v4399_v46, 8.507059e+37  ;;  %v4446_v57 = vand.u32 2147483648, %v11114_v31  ;;  %8139 = vpow2.f32 %v7422_v42  ;;  %vm4441_vm15 = vweird.f32 %v11225_v56  ;;  %v1906_v9 = vpop.f32.mrf.mxu1  ;;  %vm11352_vm2 = vmor %vm4395_vm11, %vm4396_vm12 }
 0x337   :  { %v4459_v16 = vand.u32 2147483647, %v11136_v38  ;;  %8141 = vrcp.f32 %v11295_v11  ;;  %v2083_v24 = vadd.f32 %v2082_v49, %v1993_v28  ;;  %v4383_v20 = vsel %vm11320_vm14, %v11178_v48, %v4379_v59  ;;  %v15652_v28 = vld [vmem:[#allocation9_spill] sm:$0xff]  ;;  %v15653_v49 = vld [vmem:[#allocation10_spill] sm:$0xff] }
 0x338   :  { %v4394_v46 = vadd.f32 %v11190_v1, %v4393_v43  ;;  %v4453_v50 = vmul.f32 %v11243_v27, %v4452_v25  ;;  %8143 = vrcp.f32 %v11302_v55  ;;  %v8134_v15 = vpop.eup %8133  ;;  %v4439_v42 = vadd.f32 %v11225_v56, %v4438_v34  ;;  %2135 = vmatmul.bf16.vlgmr.msrb.gmra.mxu0 %v15652_v28  ;;  %2224 = vmatmul.bf16.vlgmr.msrb.gmra.mxu1 %v15653_v49  ;;  %v15658_v34 = vld [vmem:[#allocation38_spill] sm:$0xff] }
 0x339   :  { %8145 = vpow2.f32 %v7425_v7  ;;  %v5100_v19 = vmul.f32 %v10673_v61, %v2083_v24  ;;  %v1907_v21 = vadd.f32 %v1906_v9, %v1817_v62  ;;  %v4402_v59 = vor.u32 1.1754944e-38, %v4401_v22  ;;  %2313 = vmatmul.bf16.vlgmr.msrb.gmra.mxu2 %v15652_v28  ;;  %2402 = vmatmul.bf16.vlgmr.msrb.gmra.mxu3 %v15653_v49 }
 0x33a   :  { %v8136_v48 = vpop.eup %8135  ;;  %vm4440_vm0 = vweird.f32 %v11114_v31  ;;  %vm11338_vm1 = vcmp.eq.f32.partialorder %v4444_v17, 8.507059e+37  ;;  %v4461_v25 = vand.u32 2147483648, %v11136_v38  ;;  %v4388_v61 = vsel %vm11288_vm10, %v11261_v36, %v4383_v20  ;;  %v15668_v36 = vld [vmem:[#allocation85_spill] sm:$0xff] }
 0x33b   :  { %v11343_v4 = vpop.eup %8137  ;;  %v4447_v31 = vor.u32 1.1754944e-38, %v4446_v57  ;;  %vm4455_vm3 = vweird.f32 %v11136_v38  ;;  %v5103_v17 = vmul.f32 %v15658_v34, %v1907_v21  ;;  %v11361_v32 = vmul.f32 %v4343_v52, %v15582_v12  ;;  %vm11368_vm4 = vmor %vm4440_vm0, %vm4441_vm15  ;;  %v15667_v34 = vld [vmem:[#allocation39_spill] sm:$0xff] }
 0x33c   :  { %v8140_v7 = vpop.eup %8139  ;;  %v4398_v45 = vsel %vm11352_vm2, %v11190_v1, %v4394_v46  ;;  %v4454_v21 = vadd.f32 %v11243_v27, %v4453_v50  ;;  %vm4456_vm5 = vweird.f32 %v11243_v27  ;;  %v4443_v12 = vsel %vm11368_vm4, %v11225_v56, %v4439_v42  ;;  %v1995_v56 = vpop.f32.mrf.mxu2 }
 0x33d   :  { %v11374_v57 = vpop.eup %8141  ;;  %vm11379_vm6 = vcmp.eq.f32.partialorder %v4459_v16, 8.507059e+37  ;;  %v11383_v1 = vadd.f32 1.0, %v8134_v15  ;;  %v11385_v24 = vpack.c.bf16 %v5103_v17, %v5099_v51  ;;  %v11390_v46 = vmul.f32 %v4388_v61, %v10951_v41  ;;  %v2084_v16 = vpop.f32.mrf.mxu3  ;;  %vm11402_vm7 = vmor %vm4455_vm3, %vm4456_vm5 }
 0x33e   :  { %v11387_v20 = vpop.eup %8143  ;;  %v4462_v50 = vor.u32 1.1754944e-38, %v4461_v25  ;;  %v4496_v62 = vmul.f32 %v11343_v4, %v11281_v26  ;;  %v11394_v9 = vadd.f32 1.0, %v8136_v48  ;;  %v4403_v15 = vsel %vm11311_vm13, %v4402_v59, %v4398_v45  ;;  %v1820_v25 = vpop.f32.mrf.mxu0 }
 0x33f   :  { %15663 = vst [vmem:[#allocation87_spill] sm:$0xff] %v11385_v24  ;;  %v8146_v42 = vpop.eup %8145  ;;  %v4504_v41 = vand.u32 2147483647, %v11281_v26  ;;  %v11407_v28 = vadd.f32 1.0, %v8140_v7  ;;  %v2085_v49 = vadd.f32 %v2084_v16, %v1995_v56  ;;  %v4448_v48 = vsel %vm11338_vm1, %v4447_v31, %v4443_v12  ;;  %v1909_v61 = vpop.f32.mrf.mxu1  ;;  %v7619_v12 = vld [vmem:[%s14897_s2 + $0x160] sm:$0xf] }
 0x340   :  { %15664 = vst [vmem:[#allocation89_spill] sm:$0xff] %v11390_v46  ;;  %v4458_v13 = vsel %vm11402_vm7, %v11243_v27, %v4454_v21  ;;  %v4506_v59 = vand.u32 2147483648, %v11281_v26  ;;  %v4521_v38 = vand.u32 2147483648, %v11295_v11  ;;  %v4511_v22 = vmul.f32 %v11374_v57, %v11295_v11  ;;  %v7683_v56 = vld [vmem:[%s14897_s2 + $0x1e0] sm:$0xf] }
 0x341   :  { %8147 = vrcp.f32 %v11383_v1  ;;  %v5104_v17 = vmul.f32 %v15667_v34, %v2085_v49  ;;  %v1910_v7 = vadd.f32 %v1909_v61, %v1820_v25  ;;  %v4497_v43 = vsub.f32 1.0, %v4496_v62  ;;  %v7902_v62 = vld [vmem:[%s14897_s2 + $0x164] sm:$0xf0]  ;;  %v7491_v24 = vld [vmem:[%s14897_s2 + $0x60] sm:$0xf] }
 0x342   :  { %v4556_v31 = vmul.f32 %v11387_v20, %v11302_v55  ;;  %8149 = vrcp.f32 %v11394_v9  ;;  %v11423_v27 = vadd.f32 1.0, %v8146_v42  ;;  %v4463_v45 = vsel %vm11379_vm6, %v4462_v50, %v4458_v13  ;;  %v15671_v42 = vld [vmem:[#allocation108_spill] sm:$0xff]  ;;  %v7918_v13 = vld [vmem:[%s14897_s2 + $0x1e4] sm:$0xf0] }
 0x343   :  { %8151 = vrcp.f32 %v11407_v28  ;;  %v11429_v21 = vmul.f32 %v15668_v36, %v1910_v7  ;;  %v11440_v16 = vpack.c.bf16 %v5104_v17, %v5100_v19  ;;  %v11443_v52 = vmul.f32 %v4403_v15, %v15594_v6 }
 0x344   :  { %v4519_v50 = vand.u32 2147483647, %v11295_v11  ;;  %v7426_v51 = vmul.f32 -1.442695, %v15671_v42  ;;  %v7620_v49 = vor.u32 %v7902_v62, %v7619_v12  ;;  %v11451_v25 = vmul.f32 %v4448_v48, %v15596_v33  ;;  %v1998_v36 = vpop.f32.mrf.mxu2 }
 0x345   :  { %15669 = vst [vmem:[#allocation52_spill] sm:$0xff] %v11440_v16  ;;  %vm4500_vm8 = vweird.f32 %v11281_v26  ;;  %v11454_v61 = vor.u32 1.1754944e-38, %v4506_v59  ;;  %v4512_v19 = vsub.f32 1.0, %v4511_v22  ;;  %v7684_v34 = vor.u32 %v7918_v13, %v7683_v56  ;;  %v2087_v12 = vpop.f32.mrf.mxu3  ;;  %v15679_v16 = vld [vmem:[#allocation12_spill] sm:$0xff] }
 0x346   :  { %15670 = vst [vmem:[#allocation55_spill] sm:$0xff] %v11443_v52  ;;  %v11457_v6 = vmul.f32 %v4463_v45, %v15603_v63  ;;  %v4498_v15 = vmul.f32 %v11343_v4, %v4497_v43  ;;  %v11460_v17 = vor.u32 1.1754944e-38, %v4521_v38  ;;  %v4557_v7 = vsub.f32 1.0, %v4556_v31  ;;  %5862 = vmatpush.bf16.msra.mxu2 %v7620_v49  ;;  %v15674_v43 = vld [vmem:[#allocation109_spill] sm:$0xff]  ;;  %v1822_v45 = vpop.f32.mrf.mxu0  ;;  %v15678_v38 = vld [vmem:[#allocation11_spill] sm:$0xff] }
 0x347   :  { %15672 = vst [vmem:[#allocation56_spill] sm:$0xff] %v11451_v25  ;;  %v11462_v62 = vpop.eup %8147  ;;  %v4564_v33 = vand.u32 2147483647, %v11302_v55  ;;  %v4566_v48 = vand.u32 2147483648, %v11302_v55  ;;  %8153 = vrcp.f32 %v11423_v27  ;;  %v2088_v59 = vadd.f32 %v2087_v12, %v1998_v36  ;;  %5951 = vmatpush.bf16.msra.mxu3 %v7684_v34  ;;  %v1911_v56 = vpop.f32.mrf.mxu1  ;;  %v15677_v36 = vld [vmem:[#allocation81_spill] sm:$0xff] }
 0x348   :  { %15673 = vst [vmem:[#allocation88_spill] sm:$0xff] %v11457_v6  ;;  %v11467_v63 = vpop.eup %8149  ;;  %vm4515_vm9 = vweird.f32 %v11295_v11  ;;  %v4581_v22 = vand.u32 2147483648, %v11383_v1  ;;  %8155 = vpow2.f32 %v7426_v51  ;;  %v7429_v31 = vmul.f32 -1.442695, %v15674_v43  ;;  %2140 = vmatmul.bf16.gmra.mxu0 %v15678_v38  ;;  %2229 = vmatmul.bf16.gmra.mxu1 %v15679_v16  ;;  %v15682_v6 = vld [vmem:[#allocation110_spill] sm:$0xff] }
 0x349   :  { %v11473_v49 = vpop.eup %8151  ;;  %vm4501_vm10 = vweird.f32 %v11343_v4  ;;  %vm11476_vm11 = vcmp.eq.f32.partialorder %v4504_v41, 8.507059e+37  ;;  %v4513_v34 = vmul.f32 %v11374_v57, %v4512_v19  ;;  %vm4560_vm12 = vweird.f32 %v11302_v55  ;;  %v7870_v41 = vld [vmem:[%s14897_s2 + $0x64] sm:$0xf0]  ;;  %v7555_v19 = vld [vmem:[%s14897_s2 + $0xe0] sm:$0xf]  ;;  %2318 = vmatmul.bf16.gmra.mxu2 %v15678_v38  ;;  %2407 = vmatmul.bf16.gmra.mxu3 %v15679_v16 }
 0x34a   :  { %v11483_v12 = vmul.f32 %v15677_v36, %v2088_v59  ;;  %v1912_v51 = vadd.f32 %v1911_v56, %v1822_v45  ;;  %v4499_v59 = vadd.f32 %v11343_v4, %v4498_v15  ;;  %v4558_v45 = vmul.f32 %v11387_v20, %v4557_v7  ;;  %vm11531_vm0 = vmor %vm4500_vm8, %vm4501_vm10 }
 0x34b   :  { %v4571_v56 = vmul.f32 %v11462_v62, %v11383_v1  ;;  %v7492_v36 = vor.u32 %v7870_v41, %v7491_v24  ;;  %vm4516_vm13 = vweird.f32 %v11374_v57  ;;  %v4616_v8 = vmul.f32 %v11467_v63, %v11394_v9 }
 0x34c   :  { %v5111_v47 = vmul.f32 %v10900_v53, %v1912_v51  ;;  %v7556_v15 = vor.u32 %v7886_v3, %v7555_v19  ;;  %vm11509_vm14 = vcmp.eq.f32.partialorder %v4519_v50, 8.507059e+37  ;;  %v11513_v24 = vor.u32 1.1754944e-38, %v4566_v48  ;;  %vm11554_vm4 = vmor %vm4515_vm9, %vm4516_vm13 }
 0x34d   :  { %v4631_v41 = vmul.f32 %v11473_v49, %v11407_v28  ;;  %8157 = vpow2.f32 %v7429_v31  ;;  %v7430_v25 = vmul.f32 -1.442695, %v15682_v6  ;;  %5684 = vmatpush.bf16.msra.mxu0 %v7492_v36  ;;  %v11518_v52 = vpop.eup %8153  ;;  %vm4561_vm15 = vweird.f32 %v11387_v20  ;;  %v2089_v51 = vpop.f32.mrf.mxu3 }
 0x34e   :  { %v11521_v53 = vor.u32 1.1754944e-38, %v4581_v22  ;;  %v4626_v3 = vand.u32 2147483648, %v11394_v9  ;;  %5773 = vmatpush.bf16.msra.mxu1 %v7556_v15  ;;  %v11525_v16 = vpack.c.bf16 %v5111_v47, %v11429_v21  ;;  %v8156_v50 = vpop.eup %8155  ;;  %v4514_v38 = vadd.f32 %v11374_v57, %v4513_v34  ;;  %v2000_v21 = vpop.f32.mrf.mxu2  ;;  %vm11573_vm5 = vmor %vm4560_vm12, %vm4561_vm15 }
 0x34f   :  { %vm11536_vm1 = vcmp.eq.f32.partialorder %v4564_v33, 8.507059e+37  ;;  %v4572_v31 = vsub.f32 1.0, %v4571_v56  ;;  %vm4576_vm2 = vweird.f32 %v11462_v62  ;;  %v4624_v47 = vand.u32 2147483647, %v11394_v9  ;;  %v15688_v56 = vld [vmem:[#allocation111_spill] sm:$0xff]  ;;  %v1825_v6 = vpop.f32.mrf.mxu0  ;;  %v1914_v46 = vpop.f32.mrf.mxu1 }
 0x350   :  { %15683 = vst [vmem:[#allocation91_spill] sm:$0xff] %v11525_v16  ;;  %v4503_v26 = vsel %vm11531_vm0, %v11343_v4, %v4499_v59  ;;  %v4559_v19 = vadd.f32 %v11387_v20, %v4558_v45  ;;  %v4617_v36 = vsub.f32 1.0, %v4616_v8  ;;  %v2090_v15 = vadd.f32 %v2089_v51, %v2000_v21 }
 0x351   :  { %vm4575_vm3 = vweird.f32 %v11383_v1  ;;  %v4632_v33 = vsub.f32 1.0, %v4631_v41  ;;  %v4676_v34 = vmul.f32 %v11518_v52, %v11423_v27  ;;  %8159 = vpow2.f32 %v7430_v25 }
 0x352   :  { %v7433_v16 = vmul.f32 -1.442695, %v15688_v56  ;;  %v11558_v8 = vor.u32 1.1754944e-38, %v4626_v3  ;;  %v11560_v59 = vadd.f32 1.0, %v8156_v50  ;;  %v5112_v45 = vmul.f32 %v10960_v37, %v2090_v15  ;;  %v15703_v3 = vld [vmem:[#allocation13_spill] sm:$0xff]  ;;  %v15717_v15 = vld [vmem:[#allocation115_spill] sm:$0xff] }
 0x353   :  { %v1915_v41 = vadd.f32 %v1914_v46, %v1825_v6  ;;  %v8158_v25 = vpop.eup %8157  ;;  %v4508_v48 = vsel %vm11476_vm11, %v11454_v61, %v4503_v26  ;;  %v4518_v11 = vsel %vm11554_vm4, %v11374_v57, %v4514_v38  ;;  %v4573_v37 = vmul.f32 %v11462_v62, %v4572_v31  ;;  %v15693_v46 = vld [vmem:[#allocation112_spill] sm:$0xff]  ;;  %v15695_v31 = vld [vmem:[#allocation113_spill] sm:$0xff]  ;;  %vm11624_vm11 = vmor %vm4575_vm3, %vm4576_vm2 }
 0x354   :  { %vm4620_vm6 = vweird.f32 %v11394_v9  ;;  %v7434_v6 = vmul.f32 -1.442695, %v15693_v46  ;;  %v4563_v61 = vsel %vm11573_vm5, %v11387_v20, %v4559_v19  ;;  %v4618_v57 = vmul.f32 %v11467_v63, %v4617_v36 }
 0x355   :  { %v5115_v13 = vmul.f32 %v10968_v18, %v1915_v41  ;;  %v11586_v55 = vpack.c.bf16 %v5112_v45, %v11483_v12  ;;  %v4633_v50 = vmul.f32 %v11473_v49, %v4632_v33  ;;  %v4677_v38 = vsub.f32 1.0, %v4676_v34 }
 0x356   :  { %8161 = vpow2.f32 %v7433_v16  ;;  %v7437_v21 = vmul.f32 -1.442695, %v15695_v31  ;;  %v11591_v51 = vmul.f32 %v4508_v48, %v11118_v14  ;;  %v4523_v20 = vsel %vm11509_vm14, %v11460_v17, %v4518_v11  ;;  %v2003_v7 = vpop.f32.mrf.mxu2  ;;  %v2092_v17 = vpop.f32.mrf.mxu3 }
 0x357   :  { %15694 = vst [vmem:[#allocation57_spill] sm:$0xff] %v11586_v55  ;;  %v15696_v26 = vand.u32 2147483647, %v11383_v1  ;;  %8163 = vrcp.f32 %v11560_v59  ;;  %v11603_v12 = vadd.f32 1.0, %v8158_v25  ;;  %v8160_v16 = vpop.eup %8159  ;;  %v4574_v19 = vadd.f32 %v11462_v62, %v4573_v37  ;;  %v1827_v25 = vpop.f32.mrf.mxu0  ;;  %v15704_v37 = vld [vmem:[#allocation14_spill] sm:$0xff] }
 0x358   :  { %vm4621_vm8 = vweird.f32 %v11467_v63  ;;  %v4639_v14 = vand.u32 2147483647, %v11407_v28  ;;  %8165 = vpow2.f32 %v7434_v6  ;;  %v4568_v36 = vsel %vm11536_vm1, %v11513_v24, %v4563_v61  ;;  %v1916_v48 = vpop.f32.mrf.mxu1  ;;  %2145 = vmatmul.bf16.gmra.mxu0 %v15703_v3  ;;  %2234 = vmatmul.bf16.gmra.mxu1 %v15704_v37 }
 0x359   :  { %vm11598_vm7 = vcmp.eq.f32.partialorder %v15696_v26, 8.507059e+37  ;;  %vm11611_vm9 = vcmp.eq.f32.partialorder %v4624_v47, 8.507059e+37  ;;  %vm4636_vm10 = vweird.f32 %v11473_v49  ;;  %v4641_v33 = vand.u32 2147483648, %v11407_v28  ;;  %vm11648_vm13 = vmor %vm4620_vm6, %vm4621_vm8  ;;  %2323 = vmatmul.bf16.gmra.mxu2 %v15703_v3  ;;  %2412 = vmatmul.bf16.gmra.mxu3 %v15704_v37 }
 0x35a   :  { %v2093_v34 = vadd.f32 %v2092_v17, %v2003_v7  ;;  %v4619_v4 = vadd.f32 %v11467_v63, %v4618_v57  ;;  %v4634_v45 = vadd.f32 %v11473_v49, %v4633_v50  ;;  %v4678_v41 = vmul.f32 %v11518_v52, %v4677_v38  ;;  %v15705_v57 = vld [vmem:[#allocation114_spill] sm:$0xff] }
 0x35b   :  { %8167 = vpow2.f32 %v7437_v21  ;;  %v11629_v22 = vadd.f32 1.0, %v8160_v16  ;;  %v1917_v11 = vadd.f32 %v1916_v48, %v1827_v25  ;;  %v11635_v61 = vmul.f32 %v4523_v20, %v15628_v2 }
 0x35c   :  { %8169 = vrcp.f32 %v11603_v12  ;;  %v5116_v47 = vmul.f32 %v10977_v5, %v2093_v34  ;;  %v8162_v6 = vpop.eup %8161  ;;  %v4578_v1 = vsel %vm11624_vm11, %v11462_v62, %v4574_v19  ;;  %vm4635_vm12 = vweird.f32 %v11407_v28 }
 0x35d   :  { %v7438_v50 = vmul.f32 -1.442695, %v15705_v57  ;;  %v11642_v38 = vpop.eup %8163  ;;  %vm11652_vm14 = vcmp.eq.f32.partialorder %v4639_v14, 8.507059e+37  ;;  %v4642_v21 = vor.u32 1.1754944e-38, %v4641_v33  ;;  %v4684_v62 = vand.u32 2147483647, %v11423_v27  ;;  %vm11668_vm15 = vmor %vm4635_vm12, %vm4636_vm10 }
 0x35e   :  { %v5119_v28 = vmul.f32 %v10991_v39, %v1917_v11  ;;  %v8166_v20 = vpop.eup %8165  ;;  %v11661_v9 = vmul.f32 %v4568_v36, %v15629_v10  ;;  %v4623_v26 = vsel %vm11648_vm13, %v11467_v63, %v4619_v4  ;;  %vm4681_vm0 = vweird.f32 %v11518_v52  ;;  %v2005_v33 = vpop.f32.mrf.mxu2 }
 0x35f   :  { %v4686_v39 = vand.u32 2147483648, %v11423_v27  ;;  %v4638_v19 = vsel %vm11668_vm15, %v11473_v49, %v4634_v45  ;;  %v4679_v10 = vadd.f32 %v11518_v52, %v4678_v41  ;;  %8171 = vrcp.f32 %v11629_v22  ;;  %v2094_v34 = vpop.f32.mrf.mxu3  ;;  %v1830_v48 = vpop.f32.mrf.mxu0 }
 0x360   :  { %v11679_v14 = vpack.c.bf16 %v5119_v28, %v5115_v13  ;;  %v4583_v7 = vsel %vm11598_vm7, %v11521_v53, %v4578_v1  ;;  %v4691_v17 = vmul.f32 %v11642_v38, %v11560_v59  ;;  %v11686_v36 = vadd.f32 1.0, %v8162_v6  ;;  %v1919_v24 = vpop.f32.mrf.mxu1 }
 0x361   :  { %v8168_v63 = vpop.eup %8167  ;;  %8173 = vpow2.f32 %v7438_v50  ;;  %vm4680_vm1 = vweird.f32 %v11423_v27  ;;  %vm11691_vm2 = vcmp.eq.f32.partialorder %v4684_v62, 8.507059e+37  ;;  %v11695_v4 = vadd.f32 1.0, %v8166_v20  ;;  %v7675_v62 = vld [vmem:[%s14897_s2 + $0x1d0] sm:$0xf] }
 0x362   :  { %15712 = vst [vmem:[#allocation58_spill] sm:$0xff] %v11679_v14  ;;  %v11688_v49 = vpop.eup %8169  ;;  %v2095_v18 = vadd.f32 %v2094_v34, %v2005_v33  ;;  %v4628_v53 = vsel %vm11611_vm9, %v11558_v8, %v4623_v26  ;;  %v4643_v45 = vsel %vm11652_vm14, %v4642_v21, %v4638_v19  ;;  %vm11704_vm3 = vmor %vm4680_vm1, %vm4681_vm0  ;;  %v4687_v27 = vor.u32 1.1754944e-38, %v4686_v39  ;;  %v7900_v21 = vld [vmem:[%s14897_s2 + $0x154] sm:$0xf0] }
 0x363   :  { %v4701_v25 = vand.u32 2147483648, %v11560_v59  ;;  %v4683_v11 = vsel %vm11704_vm3, %v11518_v52, %v4679_v10  ;;  %v7315_v8 = vmul.f32 -1.442695, %v15717_v15  ;;  %v1920_v37 = vadd.f32 %v1919_v24, %v1830_v48  ;;  %v7916_v39 = vld [vmem:[%s14897_s2 + $0x1d4] sm:$0xf0] }
 0x364   :  { %v5120_v3 = vmul.f32 %v11073_v0, %v2095_v18  ;;  %v4692_v6 = vsub.f32 1.0, %v4691_v17  ;;  %v4736_v1 = vmul.f32 %v11688_v49, %v11603_v12  ;;  %8175 = vrcp.f32 %v11686_v36  ;;  %v7611_v0 = vld [vmem:[%s14897_s2 + $0x150] sm:$0xf]  ;;  %v15719_v34 = vld [vmem:[#allocation116_spill] sm:$0xff]  ;;  %v15720_v18 = vld [vmem:[#allocation117_spill] sm:$0xff] }
 0x365   :  { %v11717_v50 = vadd.f32 1.0, %v8168_v63  ;;  %v11719_v5 = vpop.eup %8171  ;;  %v11722_v2 = vmul.f32 %v4583_v7, %v15637_v30  ;;  %8177 = vrcp.f32 %v11695_v4  ;;  %v11726_v52 = vmul.f32 %v11139_v40, %v1920_v37 }
 0x366   :  { %v11737_v28 = vpack.c.bf16 %v5120_v3, %v5116_v47  ;;  %v11740_v20 = vmul.f32 %v4628_v53, %v15638_v44  ;;  %v11743_v40 = vmul.f32 %v4643_v45, %v15644_v60  ;;  %v4699_v26 = vand.u32 2147483647, %v11560_v59  ;;  %v2008_v7 = vpop.f32.mrf.mxu2 }
 0x367   :  { %v8174_v30 = vpop.eup %8173  ;;  %v7612_v16 = vor.u32 %v7900_v21, %v7611_v0  ;;  %v4688_v19 = vsel %vm11691_vm2, %v4687_v27, %v4683_v11  ;;  %vm4695_vm4 = vweird.f32 %v11560_v59  ;;  %v11752_v47 = vor.u32 1.1754944e-38, %v4701_v25  ;;  %v2097_v17 = vpop.f32.mrf.mxu3  ;;  %v15723_v0 = vld [vmem:[#allocation15_spill] sm:$0xff]  ;;  %v15724_v21 = vld [vmem:[#allocation16_spill] sm:$0xff] }
 0x368   :  { %15718 = vst [vmem:[#allocation95_spill] sm:$0xff] %v11737_v28  ;;  %8179 = vpow2.f32 %v7315_v8  ;;  %v7676_v44 = vor.u32 %v7916_v39, %v7675_v62  ;;  %v4693_v10 = vmul.f32 %v11642_v38, %v4692_v6  ;;  %v4737_v60 = vsub.f32 1.0, %v4736_v1  ;;  %v1832_v24 = vpop.f32.mrf.mxu0  ;;  %v1921_v11 = vpop.f32.mrf.mxu1  ;;  %2150 = vmatmul.bf16.gmra.mxu0 %v15723_v0  ;;  %2239 = vmatmul.bf16.gmra.mxu1 %v15724_v21  ;;  %v7483_v62 = vld [vmem:[%s14897_s2 + $0x50] sm:$0xf] }
 0x369   :  { %v4751_v63 = vmul.f32 %v11719_v5, %v11629_v22  ;;  %8181 = vrcp.f32 %v11717_v50  ;;  %5863 = vmatpush.bf16.msra.mxu2 %v7612_v16  ;;  %v11758_v33 = vadd.f32 1.0, %v8174_v30  ;;  %v7316_v13 = vmul.f32 -1.442695, %v15719_v34  ;;  %v7547_v30 = vld [vmem:[%s14897_s2 + $0xd0] sm:$0xf]  ;;  %2417 = vmatmul.bf16.gmra.mxu3 %v15724_v21 }
 0x36a   :  { %v7319_v53 = vmul.f32 -1.442695, %v15720_v18  ;;  %v2098_v45 = vadd.f32 %v2097_v17, %v2008_v7  ;;  %5952 = vmatpush.bf16.msra.mxu3 %v7676_v44  ;;  %v11762_v41 = vpop.eup %8175  ;;  %vm4740_vm5 = vweird.f32 %v11603_v12  ;;  %v4744_v27 = vand.u32 2147483647, %v11603_v12  ;;  %2328 = vmatmul.bf16.gmra.mxu2 %v15723_v0 }
 0x36b   :  { %v4746_v25 = vand.u32 2147483648, %v11603_v12  ;;  %v4761_v48 = vand.u32 2147483648, %v11629_v22  ;;  %v11768_v8 = vpop.eup %8177  ;;  %v11771_v3 = vmul.f32 %v4688_v19, %v15647_v23  ;;  %vm4696_vm6 = vweird.f32 %v11642_v38  ;;  %v7868_v23 = vld [vmem:[%s14897_s2 + $0x54] sm:$0xf0] }
 0x36c   :  { %vm11774_vm7 = vcmp.eq.f32.partialorder %v4699_v26, 8.507059e+37  ;;  %v11779_v6 = vmul.f32 %v11163_v58, %v2098_v45  ;;  %v1922_v1 = vadd.f32 %v1921_v11, %v1832_v24  ;;  %v4694_v58 = vadd.f32 %v11642_v38, %v4693_v10  ;;  %v7884_v19 = vld [vmem:[%s14897_s2 + $0xd4] sm:$0xf0]  ;;  %vm11824_vm10 = vmor %vm4695_vm4, %vm4696_vm6 }
 0x36d   :  { %v4738_v26 = vmul.f32 %v11688_v49, %v4737_v60  ;;  %v4752_v16 = vsub.f32 1.0, %v4751_v63  ;;  %v7484_v39 = vor.u32 %v7868_v23, %v7483_v62  ;;  %v4796_v7 = vmul.f32 %v11762_v41, %v11686_v36 }
 0x36e   :  { %v8180_v44 = vpop.eup %8179  ;;  %8183 = vrcp.f32 %v11758_v33  ;;  %v5127_v17 = vmul.f32 %v11234_v35, %v1922_v1  ;;  %v7548_v10 = vor.u32 %v7884_v19, %v7547_v30  ;;  %v4747_v63 = vor.u32 1.1754944e-38, %v4746_v25  ;;  %v2010_v62 = vpop.f32.mrf.mxu2 }
 0x36f   :  { %v11803_v60 = vpop.eup %8181  ;;  %v4759_v45 = vand.u32 2147483647, %v11629_v22  ;;  %v4811_v24 = vmul.f32 %v11768_v8, %v11695_v4  ;;  %8185 = vpow2.f32 %v7316_v13  ;;  %5685 = vmatpush.bf16.msra.mxu0 %v7484_v39  ;;  %vm11808_vm8 = vcmp.eq.f32.partialorder %v4744_v27, 8.507059e+37  ;;  %v2099_v23 = vpop.f32.mrf.mxu3 }
 0x370   :  { %vm4755_vm9 = vweird.f32 %v11629_v22  ;;  %v11813_v35 = vor.u32 1.1754944e-38, %v4761_v48  ;;  %v4804_v1 = vand.u32 2147483647, %v11686_v36  ;;  %v4806_v0 = vand.u32 2147483648, %v11686_v36  ;;  %5774 = vmatpush.bf16.msra.mxu1 %v7548_v10 }
 0x371   :  { %v11818_v25 = vpack.c.bf16 %v5127_v17, %v11726_v52  ;;  %v4739_v27 = vadd.f32 %v11688_v49, %v4738_v26  ;;  %vm4741_vm11 = vweird.f32 %v11688_v49  ;;  %v4753_v48 = vmul.f32 %v11719_v5, %v4752_v16  ;;  %v1835_v16 = vpop.f32.mrf.mxu0  ;;  %v1924_v17 = vpop.f32.mrf.mxu1 }
 0x372   :  { %v4819_v21 = vand.u32 2147483647, %v11695_v4  ;;  %v4698_v52 = vsel %vm11824_vm10, %v11642_v38, %v4694_v58  ;;  %v4797_v30 = vsub.f32 1.0, %v4796_v7  ;;  %v4856_v59 = vmul.f32 %v11803_v60, %v11717_v50  ;;  %vm11846_vm13 = vmor %vm4740_vm5, %vm4741_vm11  ;;  %v15751_v58 = vld [vmem:[#allocation120_spill] sm:$0xff] }
 0x373   :  { %15727 = vst [vmem:[#allocation61_spill] sm:$0xff] %v11818_v25  ;;  %v2100_v39 = vadd.f32 %v2099_v23, %v2010_v62  ;;  %vm4756_vm12 = vweird.f32 %v11719_v5  ;;  %v4812_v26 = vsub.f32 1.0, %v4811_v24  ;;  %v11838_v19 = vadd.f32 1.0, %v8180_v44  ;;  %v15734_v44 = vld [vmem:[#allocation118_spill] sm:$0xff] }
 0x374   :  { %8187 = vpow2.f32 %v7319_v53  ;;  %v11840_v10 = vpop.eup %8183  ;;  %vm11850_vm14 = vcmp.eq.f32.partialorder %v4759_v45, 8.507059e+37  ;;  %vm4800_vm15 = vweird.f32 %v11686_v36  ;;  %v4821_v53 = vand.u32 2147483648, %v11695_v4  ;;  %vm11897_vm3 = vmor %vm4755_vm9, %vm4756_vm12 }
 0x375   :  { %v7320_v7 = vmul.f32 -1.442695, %v15734_v44  ;;  %v5128_v24 = vmul.f32 %v11246_v29, %v2100_v39  ;;  %v1925_v13 = vadd.f32 %v1924_v17, %v1835_v16  ;;  %v8186_v62 = vpop.eup %8185  ;;  %v4703_v12 = vsel %vm11774_vm7, %v11752_v47, %v4698_v52 }
 0x376   :  { %v4743_v45 = vsel %vm11846_vm13, %v11688_v49, %v4739_v27  ;;  %v4754_v23 = vadd.f32 %v11719_v5, %v4753_v48  ;;  %v11865_v25 = vor.u32 1.1754944e-38, %v4806_v0  ;;  %vm4815_vm0 = vweird.f32 %v11695_v4 }
 0x377   :  { %v4798_v28 = vmul.f32 %v11762_v41, %v4797_v30  ;;  %v4857_v14 = vsub.f32 1.0, %v4856_v59  ;;  %v5131_v29 = vmul.f32 %v11264_v54, %v1925_v13  ;;  %v11871_v39 = vpack.c.bf16 %v5128_v24, %v11779_v6 }
 0x378   :  { %v4813_v47 = vmul.f32 %v11768_v8, %v4812_v26  ;;  %v4866_v37 = vand.u32 2147483648, %v11717_v50  ;;  %v4871_v49 = vmul.f32 %v11840_v10, %v11758_v33  ;;  %8189 = vrcp.f32 %v11838_v19  ;;  %v2102_v26 = vpop.f32.mrf.mxu3 }
 0x379   :  { %15735 = vst [vmem:[#allocation69_spill] sm:$0xff] %v11871_v39  ;;  %vm11878_vm1 = vcmp.eq.f32.partialorder %v4804_v1, 8.507059e+37  ;;  %v11882_v27 = vor.u32 1.1754944e-38, %v4821_v53  ;;  %vm4860_vm2 = vweird.f32 %v11717_v50  ;;  %v4864_v54 = vand.u32 2147483647, %v11717_v50  ;;  %v1837_v24 = vpop.f32.mrf.mxu0  ;;  %v1926_v13 = vpop.f32.mrf.mxu1 }
 0x37a   :  { %v11886_v6 = vadd.f32 1.0, %v8186_v62  ;;  %8191 = vpow2.f32 %v7320_v7  ;;  %v8188_v48 = vpop.eup %8187  ;;  %v11889_v52 = vmul.f32 %v4703_v12, %v15671_v42  ;;  %v4748_v30 = vsel %vm11808_vm8, %v4747_v63, %v4743_v45  ;;  %v2013_v42 = vpop.f32.mrf.mxu2  ;;  %v15742_v7 = vld [vmem:[#allocation119_spill] sm:$0xff]  ;;  %v15745_v12 = vld [vmem:[#allocation17_spill] sm:$0xff]  ;;  %v15746_v45 = vld [vmem:[#allocation18_spill] sm:$0xff] }
 0x37b   :  { %vm4801_vm4 = vweird.f32 %v11762_v41  ;;  %vm4816_vm5 = vweird.f32 %v11768_v8  ;;  %vm11903_vm6 = vcmp.eq.f32.partialorder %v4819_v21, 8.507059e+37  ;;  %v4758_v63 = vsel %vm11897_vm3, %v11719_v5, %v4754_v23  ;;  %2155 = vmatmul.bf16.gmra.mxu0 %v15745_v12  ;;  %2244 = vmatmul.bf16.gmra.mxu1 %v15746_v45 }
 0x37c   :  { %v4799_v22 = vadd.f32 %v11762_v41, %v4798_v28  ;;  %v4858_v11 = vmul.f32 %v11803_v60, %v4857_v14  ;;  %v2103_v16 = vadd.f32 %v2102_v26, %v2013_v42  ;;  %v4814_v17 = vadd.f32 %v11768_v8, %v4813_v47  ;;  %vm11937_vm9 = vmor %vm4800_vm15, %vm4801_vm4  ;;  %2333 = vmatmul.bf16.gmra.mxu2 %v15745_v12 }
 0x37d   :  { %v4867_v38 = vor.u32 1.1754944e-38, %v4866_v37  ;;  %v4872_v53 = vsub.f32 1.0, %v4871_v49  ;;  %v7323_v21 = vmul.f32 -1.442695, %v15742_v7  ;;  %vm11914_vm7 = vcmp.eq.f32.partialorder %v4864_v54, 8.507059e+37  ;;  %vm11950_vm11 = vmor %vm4815_vm0, %vm4816_vm5  ;;  %2422 = vmatmul.bf16.gmra.mxu3 %v15746_v45 }
 0x37e   :  { %vm4875_vm8 = vweird.f32 %v11758_v33  ;;  %8193 = vrcp.f32 %v11886_v6  ;;  %v11920_v5 = vadd.f32 1.0, %v8188_v48  ;;  %v5132_v14 = vmul.f32 %v11361_v32, %v2103_v16  ;;  %v11925_v23 = vpop.eup %8189 }
 0x37f   :  { %v1927_v28 = vadd.f32 %v1926_v13, %v1837_v24  ;;  %v11928_v47 = vmul.f32 %v4748_v30, %v15674_v43  ;;  %v4763_v37 = vsel %vm11850_vm14, %v11813_v35, %v4758_v63  ;;  %vm4861_vm10 = vweird.f32 %v11803_v60  ;;  %v15752_v30 = vld [vmem:[#allocation89_spill] sm:$0xff] }
 0x380   :  { %v4879_v49 = vand.u32 2147483647, %v11758_v33  ;;  %v8192_v54 = vpop.eup %8191  ;;  %v4803_v43 = vsel %vm11937_vm9, %v11762_v41, %v4799_v22  ;;  %v4859_v36 = vadd.f32 %v11803_v60, %v4858_v11  ;;  %v7324_v48 = vmul.f32 -1.442695, %v15751_v58  ;;  %v15753_v63 = vld [vmem:[#allocation121_spill] sm:$0xff]  ;;  %vm11977_vm12 = vmor %vm4860_vm2, %vm4861_vm10 }
 0x381   :  { %v5135_v1 = vmul.f32 %v15752_v30, %v1927_v28  ;;  %v4818_v41 = vsel %vm11950_vm11, %v11768_v8, %v4814_v17  ;;  %v4873_v4 = vmul.f32 %v11840_v10, %v4872_v53  ;;  %v4881_v42 = vand.u32 2147483648, %v11758_v33  ;;  %v1840_v32 = vpop.f32.mrf.mxu0  ;;  %v15762_v30 = vld [vmem:[#allocation122_spill] sm:$0xff]  ;;  %v15764_v33 = vld [vmem:[#allocation56_spill] sm:$0xff]  ;;  %v7667_v8 = vld [vmem:[%s14897_s2 + $0x1c0] sm:$0xf] }
 0x382   :  { %8195 = vpow2.f32 %v7323_v21  ;;  %v3026_v26 = vmul.f32 %v11925_v23, %v11838_v19  ;;  %v7327_v22 = vmul.f32 -1.442695, %v15753_v63  ;;  %v4808_v16 = vsel %vm11878_vm1, %v11865_v25, %v4803_v43  ;;  %v2015_v53 = vpop.f32.mrf.mxu2  ;;  %v2104_v21 = vpop.f32.mrf.mxu3  ;;  %v15759_v43 = vld [vmem:[#allocation55_spill] sm:$0xff]  ;;  %v15769_v17 = vld [vmem:[#allocation124_spill] sm:$0xff] }
 0x383   :  { %8197 = vrcp.f32 %v11920_v5  ;;  %v11968_v11 = vpack.c.bf16 %v5135_v1, %v5131_v29  ;;  %vm4876_vm13 = vweird.f32 %v11840_v10  ;;  %vm11982_vm14 = vcmp.eq.f32.partialorder %v4879_v49, 8.507059e+37  ;;  %v1929_v49 = vpop.f32.mrf.mxu1 }
 0x384   :  { %v11986_v29 = vadd.f32 1.0, %v8192_v54  ;;  %v11988_v0 = vpop.eup %8193  ;;  %v4823_v50 = vsel %vm11903_vm6, %v11882_v27, %v4818_v41  ;;  %v4863_v25 = vsel %vm11977_vm12, %v11803_v60, %v4859_v36  ;;  %8199 = vpow2.f32 %v7324_v48  ;;  %vm12006_vm15 = vmor %vm4875_vm8, %vm4876_vm13 }
 0x385   :  { %15754 = vst [vmem:[#allocation97_spill] sm:$0xff] %v11968_v11  ;;  %v2105_v24 = vadd.f32 %v2104_v21, %v2015_v53  ;;  %v4874_v13 = vadd.f32 %v11840_v10, %v4873_v4  ;;  %v4882_v28 = vor.u32 1.1754944e-38, %v4881_v42  ;;  %v3034_v12 = vand.u32 2147483647, %v11838_v19  ;;  %v15763_v4 = vld [vmem:[#allocation110_spill] sm:$0xff]  ;;  %v15766_v53 = vld [vmem:[#allocation123_spill] sm:$0xff] }
 0x386   :  { %v3036_v45 = vand.u32 2147483648, %v11838_v19  ;;  %v3027_v54 = vsub.f32 1.0, %v3026_v26  ;;  %8201 = vpow2.f32 %v7327_v22  ;;  %v1930_v27 = vadd.f32 %v1929_v49, %v1840_v32  ;;  %v7603_v26 = vld [vmem:[%s14897_s2 + $0x140] sm:$0xf]  ;;  %v7898_v22 = vld [vmem:[%s14897_s2 + $0x144] sm:$0xf0] }
 0x387   :  { %v5136_v59 = vmul.f32 %v15759_v43, %v2105_v24  ;;  %v4868_v60 = vsel %vm11914_vm7, %v4867_v38, %v4863_v25  ;;  %v3041_v48 = vmul.f32 %v11988_v0, %v11886_v6  ;;  %8203 = vrcp.f32 %v11986_v29  ;;  %v7914_v24 = vld [vmem:[%s14897_s2 + $0x1c4] sm:$0xf0] }
 0x388   :  { %v8196_v35 = vpop.eup %8195  ;;  %v7328_v1 = vmul.f32 -1.442695, %v15762_v30  ;;  %v12017_v62 = vmul.f32 %v4763_v37, %v15763_v4  ;;  %v12020_v38 = vmul.f32 %v4808_v16, %v15688_v56  ;;  %v12023_v42 = vmul.f32 %v15764_v33, %v1930_v27 }
 0x389   :  { %v12014_v41 = vpop.eup %8197  ;;  %v12034_v37 = vpack.c.bf16 %v5136_v59, %v5132_v14  ;;  %v12037_v56 = vmul.f32 %v4823_v50, %v15693_v46  ;;  %v4878_v16 = vsel %vm12006_vm15, %v11840_v10, %v4874_v13  ;;  %v7331_v21 = vmul.f32 -1.442695, %v15766_v53 }
 0x38a   :  { %v7604_v25 = vor.u32 %v7898_v22, %v7603_v26  ;;  %v8200_v32 = vpop.eup %8199  ;;  %v12047_v49 = vmul.f32 %v4868_v60, %v15695_v31  ;;  %v3028_v14 = vmul.f32 %v11925_v23, %v3027_v54  ;;  %vm3030_vm0 = vweird.f32 %v11838_v19  ;;  %v2018_v59 = vpop.f32.mrf.mxu2 }
 0x38b   :  { %15765 = vst [vmem:[#allocation165_spill] sm:$0xff] %v12034_v37  ;;  %v7668_v46 = vor.u32 %v7914_v24, %v7667_v8  ;;  %v12051_v50 = vor.u32 1.1754944e-38, %v3036_v45  ;;  %v3042_v43 = vsub.f32 1.0, %v3041_v48  ;;  %v3086_v10 = vmul.f32 %v12014_v41, %v11920_v5  ;;  %v2107_v27 = vpop.f32.mrf.mxu3  ;;  %v1931_v33 = vpop.f32.mrf.mxu1  ;;  %v7475_v24 = vld [vmem:[%s14897_s2 + $0x40] sm:$0xf] }
 0x38c   :  { %v12055_v13 = vadd.f32 1.0, %v8196_v35  ;;  %5864 = vmatpush.bf16.msra.mxu2 %v7604_v25  ;;  %v8202_v36 = vpop.eup %8201  ;;  %v4883_v31 = vsel %vm11982_vm14, %v4882_v28, %v4878_v16  ;;  %vm12059_vm1 = vcmp.eq.f32.partialorder %v3034_v12, 8.507059e+37  ;;  %v3049_v45 = vand.u32 2147483647, %v11886_v6  ;;  %v1842_v12 = vpop.f32.mrf.mxu0  ;;  %v15771_v16 = vld [vmem:[#allocation19_spill] sm:$0xff]  ;;  %v15772_v25 = vld [vmem:[#allocation20_spill] sm:$0xff] }
 0x38d   :  { %8205 = vpow2.f32 %v7328_v1  ;;  %v2108_v60 = vadd.f32 %v2107_v27, %v2018_v59  ;;  %5953 = vmatpush.bf16.msra.mxu3 %v7668_v46  ;;  %v12064_v48 = vpop.eup %8203  ;;  %vm3045_vm2 = vweird.f32 %v11886_v6  ;;  %v3051_v35 = vand.u32 2147483648, %v11886_v6  ;;  %v15770_v1 = vld [vmem:[#allocation88_spill] sm:$0xff]  ;;  %2160 = vmatmul.bf16.gmra.mxu0 %v15771_v16  ;;  %v7882_v27 = vld [vmem:[%s14897_s2 + $0xc4] sm:$0xf0] }
 0x38e   :  { %v12068_v4 = vadd.f32 1.0, %v8200_v32  ;;  %8207 = vpow2.f32 %v7331_v21  ;;  %v7332_v28 = vmul.f32 -1.442695, %v15769_v17  ;;  %v3029_v26 = vadd.f32 %v11925_v23, %v3028_v14  ;;  %2249 = vmatmul.bf16.gmra.mxu1 %v15772_v25  ;;  %v7866_v21 = vld [vmem:[%s14897_s2 + $0x44] sm:$0xf0]  ;;  %2338 = vmatmul.bf16.gmra.mxu2 %v15771_v16 }
 0x38f   :  { %vm3031_vm3 = vweird.f32 %v11925_v23  ;;  %v5140_v22 = vmul.f32 %v15770_v1, %v2108_v60  ;;  %v1932_v8 = vadd.f32 %v1931_v33, %v1842_v12  ;;  %v7539_v32 = vld [vmem:[%s14897_s2 + $0xc0] sm:$0xf]  ;;  %v3043_v14 = vmul.f32 %v11988_v0, %v3042_v43  ;;  %2427 = vmatmul.bf16.gmra.mxu3 %v15772_v25 }
 0x390   :  { %v3087_v46 = vsub.f32 1.0, %v3086_v10  ;;  %8209 = vrcp.f32 %v12055_v13  ;;  %v7476_v59 = vor.u32 %v7866_v21, %v7475_v24  ;;  %v3101_v60 = vmul.f32 %v12064_v48, %v11986_v29  ;;  %vm12104_vm4 = vmor %vm3030_vm0, %vm3031_vm3 }
 0x391   :  { %v12092_v12 = vadd.f32 1.0, %v8202_v36  ;;  %v5143_v33 = vmul.f32 %v11591_v51, %v1932_v8  ;;  %v7540_v43 = vor.u32 %v7882_v27, %v7539_v32  ;;  %v12098_v10 = vmul.f32 %v4883_v31, %v15705_v57 }
 0x392   :  { %vm12108_vm5 = vcmp.eq.f32.partialorder %v3049_v45, 8.507059e+37  ;;  %v3094_v51 = vand.u32 2147483647, %v11920_v5  ;;  %8211 = vrcp.f32 %v12068_v4  ;;  %5686 = vmatpush.bf16.msra.mxu0 %v7476_v59  ;;  %v3033_v57 = vsel %vm12104_vm4, %v11925_v23, %v3029_v26  ;;  %v2020_v21 = vpop.f32.mrf.mxu2 }
 0x393   :  { %v8206_v8 = vpop.eup %8205  ;;  %v3052_v31 = vor.u32 1.1754944e-38, %v3051_v35  ;;  %8213 = vpow2.f32 %v7332_v28  ;;  %5775 = vmatpush.bf16.msra.mxu1 %v7540_v43  ;;  %v12118_v19 = vpack.c.bf16 %v5143_v33, %v12023_v42  ;;  %v3044_v16 = vadd.f32 %v11988_v0, %v3043_v14  ;;  %v2109_v32 = vpop.f32.mrf.mxu3 }
 0x394   :  { %v8208_v45 = vpop.eup %8207  ;;  %vm3046_vm6 = vweird.f32 %v11988_v0  ;;  %v3088_v25 = vmul.f32 %v12014_v41, %v3087_v46  ;;  %v3096_v24 = vand.u32 2147483648, %v11920_v5  ;;  %vm3090_vm7 = vweird.f32 %v11920_v5  ;;  %v1845_v59 = vpop.f32.mrf.mxu0 }
 0x395   :  { %15777 = vst [vmem:[#allocation92_spill] sm:$0xff] %v12118_v19  ;;  %v3102_v23 = vsub.f32 1.0, %v3101_v60  ;;  %8215 = vrcp.f32 %v12092_v12  ;;  %v2110_v35 = vadd.f32 %v2109_v32, %v2020_v21  ;;  %v3038_v42 = vsel %vm12059_vm1, %v12051_v50, %v3033_v57  ;;  %v1934_v27 = vpop.f32.mrf.mxu1  ;;  %vm12142_vm9 = vmor %vm3045_vm2, %vm3046_vm6 }
 0x396   :  { %v12126_v28 = vpop.eup %8209  ;;  %vm12131_vm8 = vcmp.eq.f32.partialorder %v3094_v51, 8.507059e+37  ;;  %v3109_v14 = vand.u32 2147483647, %v11986_v29  ;;  %v12136_v46 = vadd.f32 1.0, %v8206_v8  ;;  %v3111_v50 = vand.u32 2147483648, %v11986_v29 }
 0x397   :  { %v12147_v54 = vadd.f32 1.0, %v8208_v45  ;;  %v5144_v33 = vmul.f32 %v11635_v61, %v2110_v35  ;;  %v1935_v43 = vadd.f32 %v1934_v27, %v1845_v59  ;;  %v3048_v51 = vsel %vm12142_vm9, %v11988_v0, %v3044_v16  ;;  %v15783_v0 = vld [vmem:[#allocation125_spill] sm:$0xff] }
 0x398   :  { %v12150_v1 = vpop.eup %8211  ;;  %v3089_v8 = vadd.f32 %v12014_v41, %v3088_v25  ;;  %vm3091_vm10 = vweird.f32 %v12014_v41  ;;  %v3097_v6 = vor.u32 1.1754944e-38, %v3096_v24  ;;  %v3103_v21 = vmul.f32 %v12064_v48, %v3102_v23 }
 0x399   :  { %v8214_v57 = vpop.eup %8213  ;;  %v3146_v45 = vmul.f32 %v12126_v28, %v12055_v13  ;;  %v5147_v61 = vmul.f32 %v11661_v9, %v1935_v43  ;;  %v12161_v32 = vpack.c.bf16 %v5144_v33, %v5140_v22  ;;  %v12164_v35 = vmul.f32 %v3038_v42, %v15717_v15  ;;  %vm12175_vm12 = vmor %vm3090_vm7, %vm3091_vm10 }
 0x39a   :  { %vm3105_vm11 = vweird.f32 %v11986_v29  ;;  %8217 = vrcp.f32 %v12136_v46  ;;  %v7335_v16 = vmul.f32 -1.442695, %v15783_v0  ;;  %v3053_v24 = vsel %vm12108_vm5, %v3052_v31, %v3048_v51  ;;  %v2023_v42 = vpop.f32.mrf.mxu2  ;;  %v15792_v29 = vld [vmem:[#allocation126_spill] sm:$0xff] }
 0x39b   :  { %15782 = vst [vmem:[#allocation94_spill] sm:$0xff] %v12161_v32  ;;  %v12169_v25 = vpop.eup %8215  ;;  %vm12179_vm13 = vcmp.eq.f32.partialorder %v3109_v14, 8.507059e+37  ;;  %v3112_v22 = vor.u32 1.1754944e-38, %v3111_v50  ;;  %8219 = vrcp.f32 %v12147_v54  ;;  %v3093_v23 = vsel %vm12175_vm12, %v12014_v41, %v3089_v8  ;;  %v2112_v59 = vpop.f32.mrf.mxu3 }
 0x39c   :  { %v3156_v36 = vand.u32 2147483648, %v12055_v13  ;;  %v3161_v5 = vmul.f32 %v12150_v1, %v12068_v4  ;;  %v12190_v31 = vadd.f32 1.0, %v8214_v57  ;;  %v3104_v14 = vadd.f32 %v12064_v48, %v3103_v21  ;;  %v1847_v51 = vpop.f32.mrf.mxu0 }
 0x39d   :  { %vm3106_vm14 = vweird.f32 %v12064_v48  ;;  %v3147_v27 = vsub.f32 1.0, %v3146_v45  ;;  %v2113_v60 = vadd.f32 %v2112_v59, %v2023_v42  ;;  %v12195_v50 = vmul.f32 %v3053_v24, %v15719_v34  ;;  %v1936_v8 = vpop.f32.mrf.mxu1  ;;  %v15788_v45 = vld [vmem:[#allocation21_spill] sm:$0xff]  ;;  %v15789_v24 = vld [vmem:[#allocation22_spill] sm:$0xff] }
 0x39e   :  { %v3154_v41 = vand.u32 2147483647, %v12055_v13  ;;  %v3171_v33 = vand.u32 2147483648, %v12068_v4  ;;  %v3206_v43 = vmul.f32 %v12169_v25, %v12092_v12  ;;  %v3098_v57 = vsel %vm12131_vm8, %v3097_v6, %v3093_v23  ;;  %2165 = vmatmul.bf16.gmra.mxu0 %v15788_v45  ;;  %2254 = vmatmul.bf16.gmra.mxu1 %v15789_v24  ;;  %vm12215_vm0 = vmor %vm3105_vm11, %vm3106_vm14 }
 0x39f   :  { %vm3150_vm15 = vweird.f32 %v12055_v13  ;;  %8221 = vpow2.f32 %v7335_v16  ;;  %v12205_v21 = vmul.f32 %v11722_v2, %v2113_v60  ;;  %v1937_v34 = vadd.f32 %v1936_v8, %v1847_v51  ;;  %2343 = vmatmul.bf16.gmra.mxu2 %v15788_v45  ;;  %2432 = vmatmul.bf16.gmra.mxu3 %v15789_v24 }
 0x3a0   :  { %v12209_v9 = vpop.eup %8217  ;;  %v12219_v6 = vor.u32 1.1754944e-38, %v3156_v36  ;;  %v3162_v16 = vsub.f32 1.0, %v3161_v5  ;;  %v3169_v2 = vand.u32 2147483647, %v12068_v4  ;;  %8223 = vrcp.f32 %v12190_v31 }
 0x3a1   :  { %v12223_v23 = vpop.eup %8219  ;;  %v3108_v42 = vsel %vm12215_vm0, %v12064_v48, %v3104_v14  ;;  %v3148_v59 = vmul.f32 %v12126_v28, %v3147_v27  ;;  %v7336_v60 = vmul.f32 -1.442695, %v15792_v29  ;;  %v5151_v51 = vmul.f32 %v11740_v20, %v1937_v34 }
 0x3a2   :  { %v12234_v36 = vmul.f32 %v3098_v57, %v15720_v18  ;;  %vm3165_vm1 = vweird.f32 %v12068_v4  ;;  %v12237_v5 = vor.u32 1.1754944e-38, %v3171_v33  ;;  %v3207_v8 = vsub.f32 1.0, %v3206_v43  ;;  %v15796_v43 = vld [vmem:[#allocation127_spill] sm:$0xff]  ;;  %v2025_v34 = vpop.f32.mrf.mxu2 }
 0x3a3   :  { %v3216_v48 = vand.u32 2147483648, %v12092_v12  ;;  %vm3151_vm2 = vweird.f32 %v12126_v28  ;;  %vm12241_vm3 = vcmp.eq.f32.partialorder %v3154_v41, 8.507059e+37  ;;  %vm3166_vm4 = vweird.f32 %v12150_v1  ;;  %v2114_v45 = vpop.f32.mrf.mxu3 }
 0x3a4   :  { %v3221_v20 = vmul.f32 %v12209_v9, %v12136_v46  ;;  %v12248_v18 = vpack.c.bf16 %v5151_v51, %v5147_v61  ;;  %v3113_v27 = vsel %vm12179_vm13, %v3112_v22, %v3108_v42  ;;  %v3163_v33 = vmul.f32 %v12150_v1, %v3162_v16  ;;  %v1850_v32 = vpop.f32.mrf.mxu0  ;;  %vm12274_vm6 = vmor %vm3150_vm15, %vm3151_vm2 }
 0x3a5   :  { %vm3210_vm5 = vweird.f32 %v12092_v12  ;;  %v3266_v41 = vmul.f32 %v12223_v23, %v12147_v54  ;;  %v7339_v57 = vmul.f32 -1.442695, %v15796_v43  ;;  %v8222_v24 = vpop.eup %8221  ;;  %v3149_v26 = vadd.f32 %v12126_v28, %v3148_v59  ;;  %v1939_v19 = vpop.f32.mrf.mxu1  ;;  %vm12321_vm11 = vmor %vm3165_vm1, %vm3166_vm4 }
 0x3a6   :  { %15795 = vst [vmem:[#allocation166_spill] sm:$0xff] %v12248_v18  ;;  %v3214_v61 = vand.u32 2147483647, %v12092_v12  ;;  %8225 = vpow2.f32 %v7336_v60  ;;  %v2115_v51 = vadd.f32 %v2114_v45, %v2025_v34  ;;  %v12259_v15 = vpop.eup %8223  ;;  %v3208_v22 = vmul.f32 %v12169_v25, %v3207_v8 }
 0x3a7   :  { %v12262_v16 = vor.u32 1.1754944e-38, %v3216_v48  ;;  %v3229_v42 = vand.u32 2147483647, %v12136_v46  ;;  %v3231_v18 = vand.u32 2147483648, %v12136_v46  ;;  %v12267_v37 = vmul.f32 %v3113_v27, %v15734_v44 }
 0x3a8   :  { %v3222_v59 = vsub.f32 1.0, %v3221_v20  ;;  %v5152_v11 = vmul.f32 %v11743_v40, %v2115_v51  ;;  %v1940_v60 = vadd.f32 %v1939_v19, %v1850_v32  ;;  %v12279_v48 = vadd.f32 %v12150_v1, %v3163_v33  ;;  %v7595_v32 = vld [vmem:[%s14897_s2 + $0x130] sm:$0xf] }
 0x3a9   :  { %v3267_v34 = vsub.f32 1.0, %v3266_v41  ;;  %v12281_v45 = vadd.f32 1.0, %v8222_v24  ;;  %8227 = vpow2.f32 %v7339_v57  ;;  %v3153_v40 = vsel %vm12274_vm6, %v12126_v28, %v3149_v26  ;;  %v7896_v28 = vld [vmem:[%s14897_s2 + $0x134] sm:$0xf0] }
 0x3aa   :  { %vm12286_vm7 = vcmp.eq.f32.partialorder %v3169_v2, 8.507059e+37  ;;  %vm3225_vm8 = vweird.f32 %v12136_v46  ;;  %v3281_v13 = vmul.f32 %v12259_v15, %v12190_v31  ;;  %v12294_v19 = vmul.f32 %v11771_v3, %v1940_v60  ;;  %v7659_v2 = vld [vmem:[%s14897_s2 + $0x1b0] sm:$0xf]  ;;  %v15802_v3 = vld [vmem:[#allocation130_spill] sm:$0xff]  ;;  %v7912_v57 = vld [vmem:[%s14897_s2 + $0x1b4] sm:$0xf0] }
 0x3ab   :  { %v12306_v20 = vpack.c.bf16 %v5152_v11, %v12205_v21  ;;  %v12309_v27 = vadd.f32 %v12169_v25, %v3208_v22  ;;  %vm3211_vm9 = vweird.f32 %v12169_v25  ;;  %vm3270_vm10 = vweird.f32 %v12147_v54 }
 0x3ac   :  { %v7340_v33 = vmul.f32 -1.442695, %v15802_v3  ;;  %v7596_v41 = vor.u32 %v7896_v28, %v7595_v32  ;;  %v8226_v24 = vpop.eup %8225  ;;  %vm12325_vm12 = vcmp.eq.f32.partialorder %v3214_v61, 8.507059e+37  ;;  %v3223_v26 = vmul.f32 %v12209_v9, %v3222_v59  ;;  %v15807_v32 = vld [vmem:[#allocation131_spill] sm:$0xff]  ;;  %v2117_v59 = vpop.f32.mrf.mxu3  ;;  %vm12346_vm13 = vmor %vm3210_vm5, %vm3211_vm9 }
 0x3ad   :  { %15801 = vst [vmem:[#allocation98_spill] sm:$0xff] %v12306_v20  ;;  %v12330_v51 = vor.u32 1.1754944e-38, %v3231_v18  ;;  %v3274_v22 = vand.u32 2147483647, %v12147_v54  ;;  %v7660_v60 = vor.u32 %v7912_v57, %v7659_v2  ;;  %v3158_v8 = vsel %vm12241_vm3, %v12219_v6, %v3153_v40  ;;  %v2028_v20 = vpop.f32.mrf.mxu2  ;;  %v15812_v40 = vld [vmem:[#allocation132_spill] sm:$0xff] }
 0x3ae   :  { %v3168_v4 = vsel %vm12321_vm11, %v12150_v1, %v12279_v48  ;;  %v3268_v61 = vmul.f32 %v12223_v23, %v3267_v34  ;;  %v7343_v28 = vmul.f32 -1.442695, %v15807_v32  ;;  %5865 = vmatpush.bf16.msra.mxu2 %v7596_v41  ;;  %vm3226_vm14 = vweird.f32 %v12209_v9  ;;  %v1941_v41 = vpop.f32.mrf.mxu1  ;;  %v7880_v18 = vld [vmem:[%s14897_s2 + $0xb4] sm:$0xf0]  ;;  %v15834_v34 = vld [vmem:[#allocation25_spill] sm:$0xff] }
 0x3af   :  { %v3282_v6 = vsub.f32 1.0, %v3281_v13  ;;  %8229 = vrcp.f32 %v12281_v45  ;;  %v2118_v1 = vadd.f32 %v2117_v59, %v2028_v20  ;;  %5954 = vmatpush.bf16.msra.mxu3 %v7660_v60  ;;  %v8228_v14 = vpop.eup %8227  ;;  %v3213_v48 = vsel %vm12346_vm13, %v12169_v25, %v12309_v27  ;;  %v1852_v13 = vpop.f32.mrf.mxu0  ;;  %v15813_v25 = vld [vmem:[#allocation23_spill] sm:$0xff]  ;;  %vm12400_vm1 = vmor %vm3225_vm8, %vm3226_vm14 }
 0x3b0   :  { %vm12356_vm15 = vcmp.eq.f32.partialorder %v3229_v42, 8.507059e+37  ;;  %v12360_v12 = vadd.f32 1.0, %v8226_v24  ;;  %8231 = vpow2.f32 %v7340_v33  ;;  %v7344_v2 = vmul.f32 -1.442695, %v15812_v40  ;;  %2170 = vmatmul.bf16.gmra.mxu0 %v15813_v25  ;;  %v15814_v42 = vld [vmem:[#allocation24_spill] sm:$0xff]  ;;  %2348 = vmatmul.bf16.gmra.mxu2 %v15813_v25 }
 0x3b1   :  { %v3224_v20 = vadd.f32 %v12209_v9, %v3223_v26  ;;  %vm3271_vm0 = vweird.f32 %v12223_v23  ;;  %v12366_v57 = vmul.f32 %v11889_v52, %v2118_v1  ;;  %v1942_v11 = vadd.f32 %v1941_v41, %v1852_v13  ;;  %2259 = vmatmul.bf16.gmra.mxu1 %v15814_v42  ;;  %v7467_v27 = vld [vmem:[%s14897_s2 + $0x30] sm:$0xf]  ;;  %v7864_v33 = vld [vmem:[%s14897_s2 + $0x34] sm:$0xf0]  ;;  %v15815_v26 = vld [vmem:[#allocation133_spill] sm:$0xff]  ;;  %2437 = vmatmul.bf16.gmra.mxu3 %v15814_v42 }
 0x3b2   :  { %v7531_v24 = vld [vmem:[%s14897_s2 + $0xb0] sm:$0xf]  ;;  %v3269_v52 = vadd.f32 %v12223_v23, %v3268_v61  ;;  %8233 = vpow2.f32 %v7343_v28  ;;  %v7347_v60 = vmul.f32 -1.442695, %v15815_v26  ;;  %v7468_v59 = vor.u32 %v7864_v33, %v7467_v27  ;;  %vm12411_vm2 = vmor %vm3270_vm10, %vm3271_vm0 }
 0x3b3   :  { %v3283_v1 = vmul.f32 %v12259_v15, %v3282_v6  ;;  %v12385_v13 = vadd.f32 1.0, %v8228_v14  ;;  %v5159_v41 = vmul.f32 %v11928_v47, %v1942_v11  ;;  %v7532_v39 = vor.u32 %v7880_v18, %v7531_v24 }
 0x3b4   :  { %v12391_v61 = vmul.f32 %v3158_v8, %v15742_v7  ;;  %v3173_v28 = vsel %vm12286_vm7, %v12237_v5, %v3168_v4  ;;  %v3276_v47 = vand.u32 2147483648, %v12147_v54  ;;  %8235 = vpow2.f32 %v7344_v2  ;;  %5687 = vmatpush.bf16.msra.mxu0 %v7468_v59  ;;  %v2119_v11 = vpop.f32.mrf.mxu3 }
 0x3b5   :  { %v12405_v14 = vpop.eup %8229  ;;  %vm12415_vm3 = vcmp.eq.f32.partialorder %v3274_v22, 8.507059e+37  ;;  %v3289_v5 = vand.u32 2147483647, %v12190_v31  ;;  %8237 = vrcp.f32 %v12360_v12  ;;  %5776 = vmatpush.bf16.msra.mxu1 %v7532_v39  ;;  %v12422_v44 = vpack.c.bf16 %v5159_v41, %v12294_v19  ;;  %v2030_v2 = vpop.f32.mrf.mxu2 }
 0x3b6   :  { %v8232_v8 = vpop.eup %8231  ;;  %v3218_v54 = vsel %vm12325_vm12, %v12262_v16, %v3213_v48  ;;  %v3228_v22 = vsel %vm12400_vm1, %v12209_v9, %v3224_v20  ;;  %v3273_v4 = vsel %vm12411_vm2, %v12223_v23, %v3269_v52  ;;  %8239 = vpow2.f32 %v7347_v60  ;;  %v1944_v20 = vpop.f32.mrf.mxu1 }
 0x3b7   :  { %15822 = vst [vmem:[#allocation68_spill] sm:$0xff] %v12422_v44  ;;  %v3284_v39 = vadd.f32 %v12259_v15, %v3283_v1  ;;  %vm3286_vm4 = vweird.f32 %v12259_v15  ;;  %8241 = vrcp.f32 %v12385_v13  ;;  %v2120_v19 = vadd.f32 %v2119_v11, %v2030_v2  ;;  %v1855_v23 = vpop.f32.mrf.mxu0  ;;  %v15832_v2 = vld [vmem:[#allocation135_spill] sm:$0xff] }
 0x3b8   :  { %v8234_v21 = vpop.eup %8233  ;;  %v3277_v16 = vor.u32 1.1754944e-38, %v3276_v47  ;;  %vm3285_vm5 = vweird.f32 %v12190_v31  ;;  %v3291_v9 = vand.u32 2147483648, %v12190_v31  ;;  %v3326_v48 = vmul.f32 %v12405_v14, %v12281_v45 }
 0x3b9   :  { %v3233_v25 = vsel %vm12356_vm15, %v12330_v51, %v3228_v22  ;;  %v12443_v42 = vadd.f32 1.0, %v8232_v8  ;;  %v5160_v27 = vmul.f32 %v12017_v62, %v2120_v19  ;;  %v1945_v33 = vadd.f32 %v1944_v20, %v1855_v23  ;;  %vm12456_vm6 = vmor %vm3285_vm5, %vm3286_vm4  ;;  %v15835_v51 = vld [vmem:[#allocation26_spill] sm:$0xff] }
 0x3ba   :  { %v8236_v24 = vpop.eup %8235  ;;  %v12447_v52 = vmul.f32 %v3173_v28, %v15751_v58  ;;  %v12450_v31 = vmul.f32 %v3218_v54, %v15753_v63  ;;  %v3278_v60 = vsel %vm12415_vm3, %v3277_v16, %v3273_v4  ;;  %vm12460_vm7 = vcmp.eq.f32.partialorder %v3289_v5, 8.507059e+37  ;;  %v15830_v54 = vld [vmem:[#allocation136_spill] sm:$0xff]  ;;  %v15831_v4 = vld [vmem:[#allocation134_spill] sm:$0xff] }
 0x3bb   :  { %v12464_v62 = vpop.eup %8237  ;;  %v3288_v58 = vsel %vm12456_vm6, %v12259_v15, %v3284_v39  ;;  %v12469_v63 = vadd.f32 1.0, %v8234_v21  ;;  %v5163_v59 = vmul.f32 %v12020_v38, %v1945_v33  ;;  %v12473_v18 = vpack.c.bf16 %v5160_v27, %v12366_v57  ;;  %v15828_v38 = vld [vmem:[#allocation128_spill] sm:$0xff]  ;;  %v15829_v57 = vld [vmem:[#allocation129_spill] sm:$0xff] }
 0x3bc   :  { %v8240_v1 = vpop.eup %8239  ;;  %v12476_v41 = vmul.f32 %v3233_v25, %v15762_v30  ;;  %v3292_v28 = vor.u32 1.1754944e-38, %v3291_v9  ;;  %v3327_v6 = vsub.f32 1.0, %v3326_v48  ;;  %v3336_v47 = vand.u32 2147483648, %v12281_v45  ;;  %v2122_v39 = vpop.f32.mrf.mxu3 }
 0x3bd   :  { %15827 = vst [vmem:[#allocation99_spill] sm:$0xff] %v12473_v18  ;;  %v12479_v7 = vpop.eup %8241  ;;  %v12482_v46 = vmul.f32 %v3278_v60, %v15766_v53  ;;  %8243 = vrcp.f32 %v12443_v42  ;;  %v12485_v15 = vadd.f32 1.0, %v8236_v24  ;;  %v12489_v5 = vadd.f32 %v15829_v57, %v15828_v38  ;;  %v2033_v53 = vpop.f32.mrf.mxu2  ;;  %v15841_v18 = vld [vmem:[#allocation139_spill] sm:$0xff] }
 0x3be   :  { %v3293_v30 = vsel %vm12460_vm7, %v3292_v28, %v3288_v58  ;;  %v3334_v8 = vand.u32 2147483647, %v12281_v45  ;;  %v7348_v22 = vmul.f32 -1.442695, %v15830_v54  ;;  %v12497_v11 = vadd.f32 %v15832_v2, %v15831_v4  ;;  %v1946_v27 = vpop.f32.mrf.mxu1 }
 0x3bf   :  { %vm3330_vm8 = vweird.f32 %v12281_v45  ;;  %v3341_v19 = vmul.f32 %v12464_v62, %v12360_v12  ;;  %8245 = vrcp.f32 %v12469_v63  ;;  %v12503_v21 = vadd.f32 1.0, %v8240_v1  ;;  %v1857_v25 = vpop.f32.mrf.mxu0 }
 0x3c0   :  { %15833 = vst [vmem:[#allocation74_spill] sm:$0xff] %v12497_v11  ;;  %v2123_v16 = vadd.f32 %v2122_v39, %v2033_v53  ;;  %v3328_v9 = vmul.f32 %v12405_v14, %v3327_v6  ;;  %v12506_v48 = vor.u32 1.1754944e-38, %v3336_v47  ;;  %v3351_v23 = vand.u32 2147483648, %v12360_v12  ;;  %2175 = vmatmul.bf16.gmra.mxu0 %v15834_v34  ;;  %2353 = vmatmul.bf16.gmra.mxu2 %v15834_v34 }
 0x3c1   :  { %v3386_v20 = vmul.f32 %v12479_v7, %v12385_v13  ;;  %8247 = vrcp.f32 %v12485_v15  ;;  %v7351_v33 = vmul.f32 -1.442695, %v12489_v5  ;;  %v1947_v60 = vadd.f32 %v1946_v27, %v1857_v25  ;;  %2264 = vmatmul.bf16.gmra.mxu1 %v15835_v51  ;;  %2442 = vmatmul.bf16.gmra.mxu3 %v15835_v51 }
 0x3c2   :  { %v12514_v24 = vmul.f32 %v12037_v56, %v2123_v16  ;;  %v12519_v58 = vmul.f32 %v3293_v30, %v15769_v17  ;;  %v3349_v1 = vand.u32 2147483647, %v12360_v12  ;;  %v3394_v28 = vand.u32 2147483647, %v12385_v13 }
 0x3c3   :  { %v3396_v6 = vand.u32 2147483648, %v12385_v13  ;;  %v12524_v47 = vpop.eup %8243  ;;  %vm12526_vm9 = vcmp.eq.f32.partialorder %v3334_v8, 8.507059e+37  ;;  %v3342_v56 = vsub.f32 1.0, %v3341_v19  ;;  %v3411_v57 = vand.u32 2147483648, %v12443_v42 }
 0x3c4   :  { %8249 = vrcp.f32 %v12503_v21  ;;  %v5167_v17 = vmul.f32 %v12047_v49, %v1947_v60  ;;  %vm3331_vm10 = vweird.f32 %v12405_v14  ;;  %v12536_v30 = vor.u32 1.1754944e-38, %v3351_v23  ;;  %v2124_v23 = vpop.f32.mrf.mxu3 }
 0x3c5   :  { %v3456_v8 = vand.u32 2147483648, %v12469_v63  ;;  %8251 = vpow2.f32 %v7348_v22  ;;  %v12539_v4 = vpop.eup %8245  ;;  %v3329_v2 = vadd.f32 %v12405_v14, %v3328_v9  ;;  %vm3345_vm11 = vweird.f32 %v12360_v12  ;;  %v2035_v22 = vpop.f32.mrf.mxu2  ;;  %vm12562_vm14 = vmor %vm3330_vm8, %vm3331_vm10 }
 0x3c6   :  { %v3387_v53 = vsub.f32 1.0, %v3386_v20  ;;  %8253 = vpow2.f32 %v7351_v33  ;;  %v12543_v49 = vpack.c.bf16 %v5167_v17, %v5163_v59  ;;  %vm3346_vm12 = vweird.f32 %v12464_v62 }
 0x3c7   :  { %v12546_v39 = vor.u32 1.1754944e-38, %v3396_v6  ;;  %v3401_v19 = vmul.f32 %v12524_v47, %v12443_v42  ;;  %v12551_v25 = vpop.eup %8247  ;;  %v3343_v9 = vmul.f32 %v12464_v62, %v3342_v56  ;;  %vm3390_vm13 = vweird.f32 %v12385_v13  ;;  %v2136_v6 = vpop.f32.mrf.mxu0  ;;  %vm12629_vm4 = vmor %vm3345_vm11, %vm3346_vm12 }
 0x3c8   :  { %15838 = vst [vmem:[#allocation101_spill] sm:$0xff] %v12543_v49  ;;  %v12555_v20 = vor.u32 1.1754944e-38, %v3411_v57  ;;  %v7352_v59 = vmul.f32 -1.442695, %v12497_v11  ;;  %v2125_v27 = vadd.f32 %v2124_v23, %v2035_v22  ;;  %vm3391_vm15 = vweird.f32 %v12479_v7  ;;  %v2225_v56 = vpop.f32.mrf.mxu1 }
 0x3c9   :  { %v3446_v60 = vmul.f32 %v12539_v4, %v12469_v63  ;;  %v12570_v51 = vor.u32 1.1754944e-38, %v3456_v8  ;;  %v3333_v45 = vsel %vm12562_vm14, %v12405_v14, %v3329_v2  ;;  %v3388_v17 = vmul.f32 %v12479_v7, %v3387_v53  ;;  %v7587_v2 = vld [vmem:[%s14897_s2 + $0x120] sm:$0xf]  ;;  %v7894_v53 = vld [vmem:[%s14897_s2 + $0x124] sm:$0xf0]  ;;  %vm12652_vm6 = vmor %vm3390_vm13, %vm3391_vm15 }
 0x3ca   :  { %v12572_v57 = vpop.eup %8249  ;;  %v5168_v22 = vmul.f32 %v12098_v10, %v2125_v27  ;;  %v2226_v23 = vadd.f32 %v2225_v56, %v2136_v6  ;;  %v3402_v49 = vsub.f32 1.0, %v3401_v19  ;;  %v3461_v34 = vmul.f32 %v12551_v25, %v12485_v15  ;;  %v7910_v6 = vld [vmem:[%s14897_s2 + $0x1a4] sm:$0xf0] }
 0x3cb   :  { %v8252_v16 = vpop.eup %8251  ;;  %v7355_v44 = vmul.f32 -1.442695, %v15841_v18  ;;  %v12584_v11 = vadd.f32 %v12464_v62, %v3343_v9  ;;  %vm12586_vm0 = vcmp.eq.f32.partialorder %v3349_v1, 8.507059e+37  ;;  %vm3406_vm1 = vweird.f32 %v12524_v47  ;;  %v7651_v1 = vld [vmem:[%s14897_s2 + $0x1a0] sm:$0xf] }
 0x3cc   :  { %v8254_v55 = vpop.eup %8253  ;;  %8255 = vpow2.f32 %v7352_v59  ;;  %v12592_v10 = vmul.f32 %v12164_v35, %v2226_v23  ;;  %v12604_v19 = vpack.c.bf16 %v5168_v22, %v12514_v24  ;;  %v3338_v35 = vsel %vm12526_vm9, %v12506_v48, %v3333_v45  ;;  %v15850_v22 = vld [vmem:[#allocation138_spill] sm:$0xff] }
 0x3cd   :  { %vm12609_vm2 = vcmp.eq.f32.partialorder %v3394_v28, 8.507059e+37  ;;  %v3447_v59 = vsub.f32 1.0, %v3446_v60  ;;  %v12615_v27 = vmul.f32 %v12572_v57, %v12503_v21  ;;  %v7588_v33 = vor.u32 %v7894_v53, %v7587_v2  ;;  %v2403_v2 = vpop.f32.mrf.mxu3  ;;  %v15857_v60 = vld [vmem:[#allocation27_spill] sm:$0xff] }
 0x3ce   :  { %15844 = vst [vmem:[#allocation70_spill] sm:$0xff] %v12604_v19  ;;  %v3389_v24 = vadd.f32 %v12479_v7, %v3388_v17  ;;  %vm3405_vm3 = vweird.f32 %v12443_v42  ;;  %v3471_v48 = vand.u32 2147483648, %v12485_v15  ;;  %v12623_v28 = vadd.f32 1.0, %v8252_v16  ;;  %v15849_v17 = vld [vmem:[#allocation137_spill] sm:$0xff]  ;;  %v2314_v16 = vpop.f32.mrf.mxu2 }
 0x3cf   :  { %v7652_v38 = vor.u32 %v7910_v6, %v7651_v1  ;;  %vm3450_vm5 = vweird.f32 %v12469_v63  ;;  %v3462_v56 = vsub.f32 1.0, %v3461_v34  ;;  %v12634_v45 = vadd.f32 1.0, %v8254_v55  ;;  %5866 = vmatpush.bf16.msra.mxu2 %v7588_v33  ;;  %v2138_v1 = vpop.f32.mrf.mxu0  ;;  %vm12725_vm13 = vmor %vm3405_vm3, %vm3406_vm1 }
 0x3d0   :  { %8257 = vpow2.f32 %v7355_v44  ;;  %v12638_v23 = vadd.f32 %v15850_v22, %v15849_v17  ;;  %v12641_v53 = vmul.f32 %v3338_v35, %v15783_v0  ;;  %v3348_v12 = vsel %vm12629_vm4, %v12464_v62, %v12584_v11  ;;  %v15853_v11 = vld [vmem:[#allocation140_spill] sm:$0xff]  ;;  %v2227_v35 = vpop.f32.mrf.mxu1  ;;  %2180 = vmatmul.bf16.gmra.mxu0 %v15857_v60  ;;  %v7523_v22 = vld [vmem:[%s14897_s2 + $0xa0] sm:$0xf]  ;;  %2358 = vmatmul.bf16.gmra.mxu2 %v15857_v60 }
 0x3d1   :  { %v3403_v34 = vmul.f32 %v12524_v47, %v3402_v49  ;;  %v2404_v55 = vadd.f32 %v2403_v2, %v2314_v16  ;;  %5955 = vmatpush.bf16.msra.mxu3 %v7652_v38  ;;  %v3448_v0 = vmul.f32 %v12539_v4, %v3447_v59  ;;  %vm3451_vm7 = vweird.f32 %v12539_v4  ;;  %v15858_v17 = vld [vmem:[#allocation28_spill] sm:$0xff] }
 0x3d2   :  { %vm3465_vm8 = vweird.f32 %v12485_v15  ;;  %v3507_v62 = vsub.f32 1.0, %v12615_v27  ;;  %v7356_v49 = vmul.f32 -1.442695, %v15853_v11  ;;  %v8256_v33 = vpop.eup %8255  ;;  %v3393_v13 = vsel %vm12652_vm6, %v12479_v7, %v3389_v24  ;;  %2269 = vmatmul.bf16.gmra.mxu1 %v15858_v17  ;;  %v7459_v7 = vld [vmem:[%s14897_s2 + $0x20] sm:$0xf]  ;;  %2447 = vmatmul.bf16.gmra.mxu3 %v15858_v17  ;;  %vm12741_vm15 = vmor %vm3450_vm5, %vm3451_vm7 }
 0x3d3   :  { %v15854_v6 = vand.u32 2147483647, %v12443_v42  ;;  %8259 = vrcp.f32 %v12623_v28  ;;  %v12672_v59 = vmul.f32 %v12195_v50, %v2404_v55  ;;  %v2228_v27 = vadd.f32 %v2227_v35, %v2138_v1  ;;  %v7862_v24 = vld [vmem:[%s14897_s2 + $0x24] sm:$0xf0] }
 0x3d4   :  { %v3463_v50 = vmul.f32 %v12551_v25, %v3462_v56  ;;  %8261 = vrcp.f32 %v12634_v45  ;;  %v7359_v16 = vmul.f32 -1.442695, %v12638_v23  ;;  %v7460_v2 = vor.u32 %v7862_v24, %v7459_v7  ;;  %v7878_v55 = vld [vmem:[%s14897_s2 + $0xa4] sm:$0xf0] }
 0x3d5   :  { %vm12666_vm9 = vcmp.eq.f32.partialorder %v15854_v6, 8.507059e+37  ;;  %v3404_v44 = vadd.f32 %v12524_v47, %v3403_v34  ;;  %v15859_v1 = vand.u32 2147483647, %v12469_v63  ;;  %v3472_v6 = vor.u32 1.1754944e-38, %v3471_v48  ;;  %v15871_v63 = vld [vmem:[#allocation142_spill] sm:$0xff] }
 0x3d6   :  { %v5049_v56 = vmul.f32 %v12234_v36, %v2228_v27  ;;  %v7524_v7 = vor.u32 %v7878_v55, %v7523_v22  ;;  %v8258_v24 = vpop.eup %8257  ;;  %v3353_v8 = vsel %vm12586_vm0, %v12536_v30, %v3348_v12  ;;  %v3449_v34 = vadd.f32 %v12539_v4, %v3448_v0  ;;  %5688 = vmatpush.bf16.msra.mxu0 %v7460_v2 }
 0x3d7   :  { %vm12694_vm10 = vcmp.eq.f32.partialorder %v15859_v1, 8.507059e+37  ;;  %v15862_v1 = vand.u32 2147483647, %v12485_v15  ;;  %v12711_v48 = vadd.f32 1.0, %v8256_v33  ;;  %8263 = vpow2.f32 %v7356_v49  ;;  %v2405_v49 = vpop.f32.mrf.mxu3 }
 0x3d8   :  { %v3398_v36 = vsel %vm12609_vm2, %v12546_v39, %v3393_v13  ;;  %vm3466_vm12 = vweird.f32 %v12551_v25  ;;  %v3508_v30 = vmul.f32 %v12572_v57, %v3507_v62  ;;  %v12719_v14 = vpack.c.bf16 %v5049_v56, %v12592_v10  ;;  %5777 = vmatpush.bf16.msra.mxu1 %v7524_v7  ;;  %v15868_v39 = vld [vmem:[#allocation141_spill] sm:$0xff]  ;;  %v2316_v62 = vpop.f32.mrf.mxu2  ;;  %v2230_v2 = vpop.f32.mrf.mxu1 }
 0x3d9   :  { %vm12707_vm11 = vcmp.eq.f32.partialorder %v15862_v1, 8.507059e+37  ;;  %v3464_v0 = vadd.f32 %v12551_v25, %v3463_v50  ;;  %vm3510_vm14 = vweird.f32 %v12503_v21  ;;  %8265 = vpow2.f32 %v7359_v16  ;;  %v12732_v10 = vpop.eup %8259  ;;  %v2141_v16 = vpop.f32.mrf.mxu0  ;;  %vm12760_vm0 = vmor %vm3465_vm8, %vm3466_vm12 }
 0x3da   :  { %15865 = vst [vmem:[#allocation71_spill] sm:$0xff] %v12719_v14  ;;  %v7360_v9 = vmul.f32 -1.442695, %v15868_v39  ;;  %v3408_v33 = vsel %vm12725_vm13, %v12524_v47, %v3404_v44  ;;  %v3514_v13 = vand.u32 2147483647, %v12503_v21  ;;  %v12746_v27 = vadd.f32 1.0, %v8258_v24  ;;  %v12748_v17 = vpop.eup %8261 }
 0x3db   :  { %v2406_v60 = vadd.f32 %v2405_v49, %v2316_v62  ;;  %v3453_v22 = vsel %vm12741_vm15, %v12539_v4, %v3449_v34  ;;  %v3516_v47 = vand.u32 2147483648, %v12503_v21  ;;  %8267 = vrcp.f32 %v12711_v48 }
 0x3dc   :  { %v7363_v50 = vmul.f32 -1.442695, %v15871_v63  ;;  %v3509_v44 = vadd.f32 %v12572_v57, %v3508_v30  ;;  %vm3511_vm1 = vweird.f32 %v12572_v57  ;;  %v2231_v56 = vadd.f32 %v2230_v2, %v2141_v16  ;;  %v15877_v16 = vld [vmem:[#allocation29_spill] sm:$0xff] }
 0x3dd   :  { %v5050_v4 = vmul.f32 %v12267_v37, %v2406_v60  ;;  %v8264_v7 = vpop.eup %8263  ;;  %v3413_v24 = vsel %vm12666_vm9, %v12555_v20, %v3408_v33  ;;  %v3468_v15 = vsel %vm12760_vm0, %v12551_v25, %v3464_v0  ;;  %v3521_v34 = vmul.f32 %v12732_v10, %v12623_v28  ;;  %vm12795_vm2 = vmor %vm3510_vm14, %vm3511_vm1 }
 0x3de   :  { %8269 = vpow2.f32 %v7360_v9  ;;  %v3566_v1 = vmul.f32 %v12748_v17, %v12634_v45  ;;  %v5053_v30 = vmul.f32 %v12391_v61, %v2231_v56  ;;  %v12783_v20 = vmul.f32 %v3353_v8, %v15792_v29 }
 0x3df   :  { %8271 = vrcp.f32 %v12746_v27  ;;  %v12779_v37 = vpack.c.bf16 %v5050_v4, %v12672_v59  ;;  %v8266_v38 = vpop.eup %8265  ;;  %v12786_v25 = vmul.f32 %v3398_v36, %v15796_v43  ;;  %v3458_v12 = vsel %vm12694_vm10, %v12570_v51, %v3453_v22  ;;  %v2408_v9 = vpop.f32.mrf.mxu3  ;;  %v15881_v59 = vld [vmem:[#allocation143_spill] sm:$0xff] }
 0x3e0   :  { %8273 = vpow2.f32 %v7363_v50  ;;  %v3473_v29 = vsel %vm12707_vm11, %v3472_v6, %v3468_v15  ;;  %v3513_v43 = vsel %vm12795_vm2, %v12572_v57, %v3509_v44  ;;  %vm3515_vm3 = vcmp.eq.f32.partialorder %v3514_v13, 8.507059e+37  ;;  %v2319_v0 = vpop.f32.mrf.mxu2  ;;  %v2232_v60 = vpop.f32.mrf.mxu1  ;;  %2185 = vmatmul.bf16.gmra.mxu0 %v15877_v16  ;;  %2363 = vmatmul.bf16.gmra.mxu2 %v15877_v16 }
 0x3e1   :  { %15874 = vst [vmem:[#allocation96_spill] sm:$0xff] %v12779_v37  ;;  %v12804_v61 = vadd.f32 1.0, %v8264_v7  ;;  %v12806_v51 = vpop.eup %8267  ;;  %v12809_v8 = vmul.f32 %v3413_v24, %v15802_v3  ;;  %v3517_v21 = vor.u32 1.1754944e-38, %v3516_v47  ;;  %v3522_v35 = vsub.f32 1.0, %v3521_v34  ;;  %v2143_v13 = vpop.f32.mrf.mxu0 }
 0x3e2   :  { %v3531_v36 = vand.u32 2147483648, %v12623_v28  ;;  %v12813_v19 = vmul.f32 %v3458_v12, %v15807_v32  ;;  %v3567_v6 = vsub.f32 1.0, %v3566_v1  ;;  %v12815_v62 = vadd.f32 1.0, %v8266_v38  ;;  %v7876_v38 = vld [vmem:[%s14897_s2 + $0x94] sm:$0xf0] }
 0x3e3   :  { %v2409_v57 = vadd.f32 %v2408_v9, %v2319_v0  ;;  %v12818_v33 = vmul.f32 %v3473_v29, %v15812_v40  ;;  %v3518_v42 = vsel %vm3515_vm3, %v3517_v21, %v3513_v43  ;;  %vm3525_vm4 = vweird.f32 %v12623_v28  ;;  %v15878_v40 = vld [vmem:[#allocation30_spill] sm:$0xff] }
 0x3e4   :  { %v8270_v49 = vpop.eup %8269  ;;  %v3529_v3 = vand.u32 2147483647, %v12623_v28  ;;  %v3581_v32 = vmul.f32 %v12806_v51, %v12711_v48  ;;  %8275 = vrcp.f32 %v12804_v61  ;;  %v2233_v50 = vadd.f32 %v2232_v60, %v2143_v13  ;;  %2274 = vmatmul.bf16.gmra.mxu1 %v15878_v40  ;;  %2452 = vmatmul.bf16.gmra.mxu3 %v15878_v40 }
 0x3e5   :  { %v12822_v22 = vpop.eup %8271  ;;  %v5054_v47 = vmul.f32 %v12447_v52, %v2409_v57  ;;  %v3523_v55 = vmul.f32 %v12732_v10, %v3522_v35  ;;  %v12831_v44 = vor.u32 1.1754944e-38, %v3531_v36  ;;  %v3574_v4 = vand.u32 2147483647, %v12634_v45 }
 0x3e6   :  { %v8274_v2 = vpop.eup %8273  ;;  %v3576_v56 = vand.u32 2147483648, %v12634_v45  ;;  %v3568_v7 = vmul.f32 %v12748_v17, %v3567_v6  ;;  %8277 = vrcp.f32 %v12815_v62  ;;  %v12837_v24 = vadd.f32 1.0, %v8270_v49 }
 0x3e7   :  { %v5057_v52 = vmul.f32 %v12450_v31, %v2233_v50  ;;  %v12843_v15 = vmul.f32 %v3518_v42, %v15815_v26  ;;  %vm3570_vm5 = vweird.f32 %v12634_v45  ;;  %v3591_v34 = vand.u32 2147483648, %v12711_v48  ;;  %v2410_v0 = vpop.f32.mrf.mxu3 }
 0x3e8   :  { %v3626_v1 = vmul.f32 %v12822_v22, %v12746_v27  ;;  %vm12849_vm6 = vcmp.eq.f32.partialorder %v3529_v3, 8.507059e+37  ;;  %v3582_v12 = vsub.f32 1.0, %v3581_v32  ;;  %v12853_v31 = vadd.f32 1.0, %v8274_v2  ;;  %v2321_v36 = vpop.f32.mrf.mxu2  ;;  %v2235_v32 = vpop.f32.mrf.mxu1 }
 0x3e9   :  { %v7364_v29 = vmul.f32 -1.442695, %v15881_v59  ;;  %v12856_v43 = vpack.c.bf16 %v5057_v52, %v5053_v30  ;;  %vm3526_vm7 = vweird.f32 %v12732_v10  ;;  %vm3571_vm8 = vweird.f32 %v12748_v17  ;;  %v2146_v60 = vpop.f32.mrf.mxu0 }
 0x3ea   :  { %vm12860_vm9 = vcmp.eq.f32.partialorder %v3574_v4, 8.507059e+37  ;;  %v3577_v21 = vor.u32 1.1754944e-38, %v3576_v56  ;;  %v3636_v35 = vand.u32 2147483648, %v12746_v27  ;;  %v12865_v9 = vpop.eup %8275  ;;  %v3524_v6 = vadd.f32 %v12732_v10, %v3523_v55  ;;  %vm12881_vm11 = vmor %vm3525_vm4, %vm3526_vm7 }
 0x3eb   :  { %15882 = vst [vmem:[#allocation100_spill] sm:$0xff] %v12856_v43  ;;  %v3569_v30 = vadd.f32 %v12748_v17, %v3568_v7  ;;  %vm3585_vm10 = vweird.f32 %v12711_v48  ;;  %8279 = vrcp.f32 %v12837_v24  ;;  %v2411_v57 = vadd.f32 %v2410_v0, %v2321_v36  ;;  %vm12892_vm12 = vmor %vm3570_vm5, %vm3571_vm8  ;;  %v7908_v0 = vld [vmem:[%s14897_s2 + $0x194] sm:$0xf0] }
 0x3ec   :  { %v3589_v49 = vand.u32 2147483647, %v12711_v48  ;;  %v12872_v42 = vor.u32 1.1754944e-38, %v3591_v34  ;;  %v3627_v3 = vsub.f32 1.0, %v3626_v1  ;;  %v3634_v13 = vand.u32 2147483647, %v12746_v27  ;;  %v12875_v50 = vpop.eup %8277 }
 0x3ed   :  { %v3583_v40 = vmul.f32 %v12806_v51, %v3582_v12  ;;  %8281 = vrcp.f32 %v12853_v31  ;;  %v5058_v2 = vmul.f32 %v12476_v41, %v2411_v57  ;;  %v2236_v55 = vadd.f32 %v2235_v32, %v2146_v60  ;;  %v7579_v34 = vld [vmem:[%s14897_s2 + $0x110] sm:$0xf]  ;;  %v7892_v1 = vld [vmem:[%s14897_s2 + $0x114] sm:$0xf0] }
 0x3ee   :  { %v12896_v28 = vor.u32 1.1754944e-38, %v3636_v35  ;;  %v3641_v56 = vmul.f32 %v12865_v9, %v12804_v61  ;;  %v3651_v7 = vand.u32 2147483648, %v12804_v61  ;;  %8283 = vpow2.f32 %v7364_v29  ;;  %v7643_v12 = vld [vmem:[%s14897_s2 + $0x190] sm:$0xf] }
 0x3ef   :  { %v3528_v41 = vsel %vm12881_vm11, %v12732_v10, %v3524_v6  ;;  %v3573_v45 = vsel %vm12892_vm12, %v12748_v17, %v3569_v30  ;;  %v12908_v52 = vmul.f32 %v12482_v46, %v2236_v55  ;;  %v12919_v10 = vpack.c.bf16 %v5058_v2, %v5054_v47  ;;  %v15890_v17 = vld [vmem:[#allocation144_spill] sm:$0xff]  ;;  %v2413_v55 = vpop.f32.mrf.mxu3 }
 0x3f0   :  { %v3628_v29 = vmul.f32 %v12822_v22, %v3627_v3  ;;  %v12924_v46 = vmul.f32 %v12875_v50, %v12815_v62  ;;  %v7367_v35 = vmul.f32 -1.442695, %v15890_v17  ;;  %v7580_v36 = vor.u32 %v7892_v1, %v7579_v34  ;;  %v2324_v2 = vpop.f32.mrf.mxu2  ;;  %v15893_v1 = vld [vmem:[#allocation145_spill] sm:$0xff] }
 0x3f1   :  { %15889 = vst [vmem:[#allocation102_spill] sm:$0xff] %v12919_v10  ;;  %v12930_v6 = vpop.eup %8279  ;;  %v12933_v30 = vadd.f32 %v12806_v51, %v3583_v40  ;;  %vm3586_vm13 = vweird.f32 %v12806_v51  ;;  %vm12936_vm14 = vcmp.eq.f32.partialorder %v3589_v49, 8.507059e+37  ;;  %vm3630_vm15 = vweird.f32 %v12746_v27 }
 0x3f2   :  { %v3649_v57 = vand.u32 2147483647, %v12804_v61  ;;  %v7644_v3 = vor.u32 %v7908_v0, %v7643_v12  ;;  %v3533_v60 = vsel %vm12849_vm6, %v12831_v44, %v3528_v41  ;;  %v3642_v32 = vsub.f32 1.0, %v3641_v56  ;;  %5867 = vmatpush.bf16.msra.mxu2 %v7580_v36  ;;  %vm12958_vm0 = vmor %vm3585_vm10, %vm3586_vm13  ;;  %v2237_v41 = vpop.f32.mrf.mxu1  ;;  %v15899_v36 = vld [vmem:[#allocation36_spill] sm:$0xff] }
 0x3f3   :  { %v12945_v16 = vor.u32 1.1754944e-38, %v3651_v7  ;;  %v12948_v49 = vpop.eup %8281  ;;  %v3578_v4 = vsel %vm12860_vm9, %v3577_v21, %v3573_v45  ;;  %v3696_v34 = vand.u32 2147483648, %v12815_v62  ;;  %v7368_v12 = vmul.f32 -1.442695, %v15893_v1  ;;  %v2148_v7 = vpop.f32.mrf.mxu0 }
 0x3f4   :  { %v2414_v0 = vadd.f32 %v2413_v55, %v2324_v2  ;;  %5956 = vmatpush.bf16.msra.mxu3 %v7644_v3  ;;  %v8284_v44 = vpop.eup %8283  ;;  %v12963_v56 = vadd.f32 %v12822_v22, %v3628_v29  ;;  %v3687_v26 = vsub.f32 1.0, %v12924_v46  ;;  %v3701_v21 = vmul.f32 %v12930_v6, %v12837_v24  ;;  %2279 = vmatmul.bf16.gmra.mxu1 %v15899_v36  ;;  %v15900_v2 = vld [vmem:[#allocation146_spill] sm:$0xff] }
 0x3f5   :  { %8285 = vpow2.f32 %v7367_v35  ;;  %v3588_v48 = vsel %vm12958_vm0, %v12806_v51, %v12933_v30  ;;  %vm3631_vm1 = vweird.f32 %v12822_v22  ;;  %vm12973_vm2 = vcmp.eq.f32.partialorder %v3634_v13, 8.507059e+37  ;;  %v15898_v35 = vld [vmem:[#allocation34_spill] sm:$0xff]  ;;  %v7451_v51 = vld [vmem:[%s14897_s2 + $0x10] sm:$0xf]  ;;  %v7860_v13 = vld [vmem:[%s14897_s2 + $0x14] sm:$0xf0]  ;;  %2457 = vmatmul.bf16.gmra.mxu3 %v15899_v36 }
 0x3f6   :  { %vm3645_vm3 = vweird.f32 %v12804_v61  ;;  %v12979_v29 = vmul.f32 %v12519_v58, %v2414_v0  ;;  %v2238_v46 = vadd.f32 %v2237_v41, %v2148_v7  ;;  %2190 = vmatmul.bf16.gmra.mxu0 %v15898_v35  ;;  %v7515_v30 = vld [vmem:[%s14897_s2 + $0x90] sm:$0xf]  ;;  %v3643_v58 = vmul.f32 %v12865_v9, %v3642_v32  ;;  %2368 = vmatmul.bf16.gmra.mxu2 %v15898_v35  ;;  %vm13026_vm7 = vmor %vm3630_vm15, %vm3631_vm1  ;;  %v15910_v36 = vld [vmem:[#allocation148_spill] sm:$0xff] }
 0x3f7   :  { %v3746_v3 = vmul.f32 %v12948_v49, %v12853_v31  ;;  %v7371_v55 = vmul.f32 -1.442695, %v15900_v2  ;;  %v7452_v0 = vor.u32 %v7860_v13, %v7451_v51  ;;  %v12999_v7 = vadd.f32 1.0, %v8284_v44  ;;  %v15901_v13 = vld [vmem:[#allocation147_spill] sm:$0xff] }
 0x3f8   :  { %8287 = vpow2.f32 %v7368_v12  ;;  %v5065_v41 = vmul.f32 %v12641_v53, %v2238_v46  ;;  %v7516_v32 = vor.u32 %v7876_v38, %v7515_v30  ;;  %v13005_v40 = vmul.f32 %v3533_v60, %v15830_v54  ;;  %v2326_v47 = vpop.f32.mrf.mxu2 }
 0x3f9   :  { %vm3646_vm4 = vweird.f32 %v12865_v9  ;;  %vm3690_vm5 = vweird.f32 %v12815_v62  ;;  %v3702_v51 = vsub.f32 1.0, %v3701_v21  ;;  %v7372_v10 = vmul.f32 -1.442695, %v15901_v13  ;;  %5689 = vmatpush.bf16.msra.mxu0 %v7452_v0 }
 0x3fa   :  { %v13011_v12 = vmul.f32 %v3578_v4, %v12489_v5  ;;  %vm3691_vm6 = vweird.f32 %v12875_v50  ;;  %v13014_v53 = vor.u32 1.1754944e-38, %v3696_v34  ;;  %5778 = vmatpush.bf16.msra.mxu1 %v7516_v32  ;;  %v13017_v44 = vpack.c.bf16 %v5065_v41, %v12908_v52  ;;  %vm13062_vm11 = vmor %vm3645_vm3, %vm3646_vm4 }
 0x3fb   :  { %v8286_v54 = vpop.eup %8285  ;;  %v3593_v60 = vsel %vm12936_vm14, %v12872_v42, %v3588_v48  ;;  %vm13030_vm8 = vcmp.eq.f32.partialorder %v3649_v57, 8.507059e+37  ;;  %v3688_v52 = vmul.f32 %v12875_v50, %v3687_v26  ;;  %vm3705_vm9 = vweird.f32 %v12837_v24  ;;  %v2415_v42 = vpop.f32.mrf.mxu3  ;;  %vm13092_vm13 = vmor %vm3690_vm5, %vm3691_vm6  ;;  %v15924_v26 = vld [vmem:[#allocation150_spill] sm:$0xff] }
 0x3fc   :  { %15902 = vst [vmem:[#allocation103_spill] sm:$0xff] %v13017_v44  ;;  %v3747_v34 = vsub.f32 1.0, %v3746_v3  ;;  %8289 = vpow2.f32 %v7371_v55  ;;  %v3633_v27 = vsel %vm13026_vm7, %v12822_v22, %v12963_v56  ;;  %v3644_v21 = vadd.f32 %v12865_v9, %v3643_v58  ;;  %v2151_v3 = vpop.f32.mrf.mxu0  ;;  %v2240_v22 = vpop.f32.mrf.mxu1 }
 0x3fd   :  { %8291 = vrcp.f32 %v12999_v7  ;;  %v2416_v57 = vadd.f32 %v2415_v42, %v2326_v47  ;;  %v15907_v48 = vand.u32 2147483647, %v12815_v62  ;;  %v3703_v46 = vmul.f32 %v12930_v6, %v3702_v51 }
 0x3fe   :  { %v3709_v35 = vand.u32 2147483647, %v12837_v24  ;;  %8293 = vpow2.f32 %v7372_v10  ;;  %v7375_v30 = vmul.f32 -1.442695, %v15910_v36  ;;  %v8288_v56 = vpop.eup %8287  ;;  %v3711_v58 = vand.u32 2147483648, %v12837_v24  ;;  %v15923_v10 = vld [vmem:[#allocation44_spill] sm:$0xff] }
 0x3ff   :  { %vm13044_vm10 = vcmp.eq.f32.partialorder %v15907_v48, 8.507059e+37  ;;  %v13052_v55 = vadd.f32 1.0, %v8286_v54  ;;  %v5066_v0 = vmul.f32 %v12783_v20, %v2416_v57  ;;  %v2241_v38 = vadd.f32 %v2240_v22, %v2151_v3  ;;  %v15913_v54 = vld [vmem:[#allocation149_spill] sm:$0xff]  ;;  %v15914_v20 = vld [vmem:[#allocation74_spill] sm:$0xff] }
 0x400   :  { %v3638_v41 = vsel %vm12973_vm2, %v12896_v28, %v3633_v27  ;;  %v3689_v32 = vadd.f32 %v12875_v50, %v3688_v52  ;;  %v3748_v51 = vmul.f32 %v12948_v49, %v3747_v34  ;;  %v7376_v5 = vmul.f32 -1.442695, %v15913_v54  ;;  %v2329_v62 = vpop.f32.mrf.mxu2 }
 0x401   :  { %v13070_v47 = vmul.f32 %v3593_v60, %v15914_v20  ;;  %v3648_v28 = vsel %vm13062_vm11, %v12865_v9, %v3644_v21  ;;  %v5069_v45 = vmul.f32 %v12786_v25, %v2241_v38  ;;  %v13077_v61 = vpack.c.bf16 %v5066_v0, %v12979_v29 }
 0x402   :  { %v8290_v42 = vpop.eup %8289  ;;  %v3704_v27 = vadd.f32 %v12930_v6, %v3703_v46  ;;  %vm3706_vm12 = vweird.f32 %v12930_v6  ;;  %v13081_v52 = vadd.f32 1.0, %v8288_v56  ;;  %8295 = vpow2.f32 %v7375_v30 }
 0x403   :  { %15915 = vst [vmem:[#allocation104_spill] sm:$0xff] %v13077_v61  ;;  %v13083_v34 = vpop.eup %8291  ;;  %v13086_v60 = vmul.f32 %v3638_v41, %v15841_v18  ;;  %v3712_v9 = vor.u32 1.1754944e-38, %v3711_v58  ;;  %v3754_v29 = vand.u32 2147483647, %v12853_v31  ;;  %8297 = vrcp.f32 %v13052_v55  ;;  %v2418_v48 = vpop.f32.mrf.mxu3  ;;  %vm13110_vm15 = vmor %vm3705_vm9, %vm3706_vm12  ;;  %v15922_v41 = vld [vmem:[#allocation42_spill] sm:$0xff] }
 0x404   :  { %v8294_v21 = vpop.eup %8293  ;;  %v3693_v57 = vsel %vm13092_vm13, %v12875_v50, %v3689_v32  ;;  %v3749_v18 = vadd.f32 %v12948_v49, %v3748_v51  ;;  %vm3751_vm14 = vweird.f32 %v12948_v49  ;;  %8299 = vpow2.f32 %v7376_v5  ;;  %v2153_v24 = vpop.f32.mrf.mxu0  ;;  %2284 = vmatmul.bf16.gmra.mxu1 %v15923_v10 }
 0x405   :  { %v3653_v46 = vsel %vm13030_vm8, %v12945_v16, %v3648_v28  ;;  %vm3750_vm0 = vweird.f32 %v12853_v31  ;;  %v3756_v50 = vand.u32 2147483648, %v12853_v31  ;;  %v2419_v3 = vadd.f32 %v2418_v48, %v2329_v62  ;;  %v2242_v56 = vpop.f32.mrf.mxu1  ;;  %2462 = vmatmul.bf16.gmra.mxu3 %v15923_v10 }
 0x406   :  { %v3708_v22 = vsel %vm13110_vm15, %v12930_v6, %v3704_v27  ;;  %v3761_v16 = vmul.f32 %v13083_v34, %v12999_v7  ;;  %8301 = vrcp.f32 %v13081_v52  ;;  %v13122_v4 = vadd.f32 1.0, %v8290_v42  ;;  %vm13129_vm1 = vmor %vm3750_vm0, %vm3751_vm14  ;;  %2195 = vmatmul.bf16.gmra.mxu0 %v15922_v41  ;;  %2373 = vmatmul.bf16.gmra.mxu2 %v15922_v41 }
 0x407   :  { %v3698_v58 = vsel %vm13044_vm10, %v13014_v53, %v3693_v57  ;;  %v13133_v6 = vadd.f32 1.0, %v8294_v21  ;;  %v5070_v0 = vmul.f32 %v12809_v8, %v2419_v3  ;;  %v2243_v38 = vadd.f32 %v2242_v56, %v2153_v24 }
 0x408   :  { %v8296_v32 = vpop.eup %8295  ;;  %vm3710_vm2 = vcmp.eq.f32.partialorder %v3709_v35, 8.507059e+37  ;;  %v3753_v53 = vsel %vm13129_vm1, %v12948_v49, %v3749_v18  ;;  %vm3755_vm3 = vcmp.eq.f32.partialorder %v3754_v29, 8.507059e+37  ;;  %v7379_v51 = vmul.f32 -1.442695, %v15924_v26  ;;  %v2331_v18 = vpop.f32.mrf.mxu2 }
 0x409   :  { %v13142_v5 = vpop.eup %8297  ;;  %v3713_v20 = vsel %vm3710_vm2, %v3712_v9, %v3708_v22  ;;  %v3757_v28 = vor.u32 1.1754944e-38, %v3756_v50  ;;  %v3771_v8 = vand.u32 2147483648, %v12999_v7  ;;  %v5073_v42 = vmul.f32 %v12813_v19, %v2243_v38 }
 0x40a   :  { %v8300_v35 = vpop.eup %8299  ;;  %v13149_v27 = vmul.f32 %v3653_v46, %v15853_v11  ;;  %v13152_v49 = vmul.f32 %v3698_v58, %v12638_v23  ;;  %v3762_v25 = vsub.f32 1.0, %v3761_v16  ;;  %8303 = vrcp.f32 %v13122_v4 }
 0x40b   :  { %v3758_v9 = vsel %vm3755_vm3, %v3757_v28, %v3753_v53  ;;  %v3769_v29 = vand.u32 2147483647, %v12999_v7  ;;  %8305 = vrcp.f32 %v13133_v6  ;;  %v13157_v19 = vpack.c.bf16 %v5073_v42, %v5069_v45  ;;  %v2420_v62 = vpop.f32.mrf.mxu3  ;;  %v15926_v45 = vld [vmem:[#allocation151_spill] sm:$0xff]  ;;  %v7571_v28 = vld [vmem:[%s14897_s2 + $0x100] sm:$0xf] }
 0x40c   :  { %v13159_v21 = vpop.eup %8301  ;;  %v13162_v57 = vmul.f32 %v3713_v20, %v15868_v39  ;;  %vm3765_vm4 = vweird.f32 %v12999_v7  ;;  %v3806_v23 = vmul.f32 %v13142_v5, %v13052_v55  ;;  %v13167_v11 = vadd.f32 1.0, %v8296_v32  ;;  %v2156_v24 = vpop.f32.mrf.mxu0  ;;  %v7635_v42 = vld [vmem:[%s14897_s2 + $0x180] sm:$0xf]  ;;  %v7858_v32 = vld [vmem:[%s14897_s2 + $0x4] sm:$0xf0] }
 0x40d   :  { %15925 = vst [vmem:[#allocation105_spill] sm:$0xff] %v13157_v19  ;;  %8307 = vpow2.f32 %v7379_v51  ;;  %v13169_v48 = vor.u32 1.1754944e-38, %v3771_v8  ;;  %v13171_v46 = vadd.f32 1.0, %v8300_v35  ;;  %v7380_v30 = vmul.f32 -1.442695, %v15926_v45  ;;  %v2245_v56 = vpop.f32.mrf.mxu1 }
 0x40e   :  { %v2421_v50 = vadd.f32 %v2420_v62, %v2331_v18  ;;  %v13175_v39 = vmul.f32 %v3758_v9, %v15871_v63  ;;  %v3763_v3 = vmul.f32 %v13083_v34, %v3762_v25  ;;  %v3816_v22 = vand.u32 2147483648, %v13052_v55  ;;  %v7890_v8 = vld [vmem:[%s14897_s2 + $0x104] sm:$0xf0] }
 0x40f   :  { %v3831_v16 = vand.u32 2147483648, %v13081_v52  ;;  %v3814_v58 = vand.u32 2147483647, %v13052_v55  ;;  %v3821_v31 = vmul.f32 %v13159_v21, %v13081_v52  ;;  %v2246_v41 = vadd.f32 %v2245_v56, %v2156_v24  ;;  %v7906_v18 = vld [vmem:[%s14897_s2 + $0x184] sm:$0xf0] }
 0x410   :  { %v5074_v38 = vmul.f32 %v12818_v33, %v2421_v50  ;;  %v13184_v10 = vpop.eup %8303  ;;  %v3807_v63 = vsub.f32 1.0, %v3806_v23  ;;  %v3876_v53 = vand.u32 2147483648, %v13122_v4  ;;  %8309 = vrcp.f32 %v13167_v11 }
 0x411   :  { %v13189_v51 = vpop.eup %8305  ;;  %vm3766_vm5 = vweird.f32 %v13083_v34  ;;  %vm13192_vm6 = vcmp.eq.f32.partialorder %v3769_v29, 8.507059e+37  ;;  %8311 = vrcp.f32 %v13171_v46  ;;  %v13198_v33 = vmul.f32 %v12843_v15, %v2246_v41 }
 0x412   :  { %v13209_v35 = vpack.c.bf16 %v5074_v38, %v5070_v0  ;;  %v3764_v9 = vadd.f32 %v13083_v34, %v3763_v3  ;;  %vm3810_vm7 = vweird.f32 %v13052_v55  ;;  %v13213_v15 = vor.u32 1.1754944e-38, %v3816_v22  ;;  %vm13232_vm9 = vmor %vm3765_vm4, %vm3766_vm5 }
 0x413   :  { %v8308_v25 = vpop.eup %8307  ;;  %v13215_v29 = vor.u32 1.1754944e-38, %v3831_v16  ;;  %v7572_v23 = vor.u32 %v7890_v8, %v7571_v28  ;;  %v3822_v62 = vsub.f32 1.0, %v3821_v31  ;;  %v7636_v24 = vor.u32 %v7906_v18, %v7635_v42  ;;  %v2334_v16 = vpop.f32.mrf.mxu2  ;;  %v7443_v31 = vld [vmem:[%s14897_s2] sm:$0xf] }
 0x414   :  { %15929 = vst [vmem:[#allocation78_spill] sm:$0xff] %v13209_v35  ;;  %v3808_v56 = vmul.f32 %v13142_v5, %v3807_v63  ;;  %vm3811_vm8 = vweird.f32 %v13142_v5  ;;  %v3866_v3 = vmul.f32 %v13184_v10, %v13122_v4  ;;  %v3881_v22 = vmul.f32 %v13189_v51, %v13133_v6  ;;  %v2423_v38 = vpop.f32.mrf.mxu3 }
 0x415   :  { %5868 = vmatpush.bf16.msra.mxu2 %v7572_v23  ;;  %vm3825_vm10 = vweird.f32 %v13081_v52  ;;  %vm3826_vm11 = vweird.f32 %v13159_v21  ;;  %v13238_v41 = vor.u32 1.1754944e-38, %v3876_v53  ;;  %v13240_v63 = vadd.f32 1.0, %v8308_v25  ;;  %5957 = vmatpush.bf16.msra.mxu3 %v7636_v24  ;;  %v15934_v53 = vld [vmem:[#allocation152_spill] sm:$0xff]  ;;  %v2158_v25 = vpop.f32.mrf.mxu0  ;;  %v2247_v50 = vpop.f32.mrf.mxu1  ;;  %vm13292_vm14 = vmor %vm3810_vm7, %vm3811_vm8 }
 0x416   :  { %v2424_v28 = vadd.f32 %v2423_v38, %v2334_v16  ;;  %v13242_v8 = vpop.eup %8309  ;;  %v3768_v7 = vsel %vm13232_vm9, %v13083_v34, %v3764_v9  ;;  %vm13247_vm12 = vcmp.eq.f32.partialorder %v3814_v58, 8.507059e+37  ;;  %v3891_v23 = vand.u32 2147483648, %v13133_v6  ;;  %v15935_v58 = vld [vmem:[#allocation53_spill] sm:$0xff]  ;;  %v15936_v9 = vld [vmem:[#allocation54_spill] sm:$0xff]  ;;  %vm13324_vm2 = vmor %vm3825_vm10, %vm3826_vm11 }
 0x417   :  { %v3936_v18 = vand.u32 2147483648, %v13167_v11  ;;  %v7383_v0 = vmul.f32 -1.442695, %v15934_v53  ;;  %v13254_v16 = vpop.eup %8311  ;;  %v3823_v24 = vmul.f32 %v13159_v21, %v3822_v62  ;;  %8313 = vpow2.f32 %v7380_v30  ;;  %2200 = vmatmul.bf16.gmra.mxu0 %v15935_v58  ;;  %2289 = vmatmul.bf16.gmra.mxu1 %v15936_v9  ;;  %v7507_v30 = vld [vmem:[%s14897_s2 + $0x80] sm:$0xf] }
 0x418   :  { %v13258_v38 = vmul.f32 %v13005_v40, %v2424_v28  ;;  %v2248_v34 = vadd.f32 %v2247_v50, %v2158_v25  ;;  %v3809_v40 = vadd.f32 %v13142_v5, %v3808_v56  ;;  %v3867_v62 = vsub.f32 1.0, %v3866_v3  ;;  %v7874_v25 = vld [vmem:[%s14897_s2 + $0x84] sm:$0xf0]  ;;  %2378 = vmatmul.bf16.gmra.mxu2 %v15935_v58  ;;  %2467 = vmatmul.bf16.gmra.mxu3 %v15936_v9  ;;  %v15937_v3 = vld [vmem:[#allocation31_spill] sm:$0xff] }
 0x419   :  { %v3882_v50 = vsub.f32 1.0, %v3881_v22  ;;  %v7444_v28 = vor.u32 %v7858_v32, %v7443_v31  ;;  %v3926_v35 = vmul.f32 %v13242_v8, %v13167_v11  ;;  %8315 = vrcp.f32 %v13240_v63  ;;  %v15944_v31 = vld [vmem:[#allocation32_spill] sm:$0xff] }
 0x41a   :  { %v5081_v19 = vmul.f32 %v13011_v12, %v2248_v34  ;;  %v7508_v61 = vor.u32 %v7874_v25, %v7507_v30  ;;  %v3773_v32 = vsel %vm13192_vm6, %v13169_v48, %v3768_v7  ;;  %vm3870_vm13 = vweird.f32 %v13122_v4 }
 0x41b   :  { %v3941_v56 = vmul.f32 %v13254_v16, %v13171_v46  ;;  %8317 = vpow2.f32 %v7383_v0  ;;  %v7384_v22 = vmul.f32 -1.442695, %v15937_v3  ;;  %5690 = vmatpush.bf16.msra.mxu0 %v7444_v28  ;;  %v3824_v20 = vadd.f32 %v13159_v21, %v3823_v24  ;;  %v2336_v28 = vpop.f32.mrf.mxu2 }
 0x41c   :  { %v15940_v48 = vand.u32 2147483647, %v13081_v52  ;;  %vm3885_vm0 = vweird.f32 %v13133_v6  ;;  %v13304_v0 = vor.u32 1.1754944e-38, %v3891_v23  ;;  %v3934_v34 = vand.u32 2147483647, %v13167_v11  ;;  %5779 = vmatpush.bf16.msra.mxu1 %v7508_v61  ;;  %v2425_v25 = vpop.f32.mrf.mxu3 }
 0x41d   :  { %v13308_v55 = vpack.c.bf16 %v5081_v19, %v13198_v33  ;;  %v3813_v24 = vsel %vm13292_vm14, %v13142_v5, %v3809_v40  ;;  %v3868_v58 = vmul.f32 %v13184_v10, %v3867_v62  ;;  %v3883_v9 = vmul.f32 %v13189_v51, %v3882_v50  ;;  %v8314_v23 = vpop.eup %8313  ;;  %v2250_v62 = vpop.f32.mrf.mxu1 }
 0x41e   :  { %vm13299_vm15 = vcmp.eq.f32.partialorder %v15940_v48, 8.507059e+37  ;;  %v7387_v30 = vmul.f32 -1.442695, %v15944_v31  ;;  %v13317_v48 = vmul.f32 %v3773_v32, %v15881_v59  ;;  %vm3871_vm1 = vweird.f32 %v13184_v10  ;;  %v2161_v59 = vpop.f32.mrf.mxu0 }
 0x41f   :  { %15943 = vst [vmem:[#allocation106_spill] sm:$0xff] %v13308_v55  ;;  %v3927_v61 = vsub.f32 1.0, %v3926_v35  ;;  %v2426_v19 = vadd.f32 %v2425_v25, %v2336_v28  ;;  %vm3886_vm3 = vweird.f32 %v13189_v51  ;;  %v13329_v33 = vor.u32 1.1754944e-38, %v3936_v18  ;;  %v13331_v50 = vpop.eup %8315  ;;  %v15953_v25 = vld [vmem:[#allocation153_spill] sm:$0xff]  ;;  %vm13375_vm8 = vmor %vm3870_vm13, %vm3871_vm1 }
 0x420   :  { %v3942_v40 = vsub.f32 1.0, %v3941_v56  ;;  %8319 = vpow2.f32 %v7384_v22  ;;  %v3818_v35 = vsel %vm13247_vm12, %v13213_v15, %v3813_v24  ;;  %v3828_v52 = vsel %vm13324_vm2, %v13159_v21, %v3824_v20  ;;  %vm13397_vm10 = vmor %vm3885_vm0, %vm3886_vm3 }
 0x421   :  { %v15947_v32 = vand.u32 2147483647, %v13122_v4  ;;  %v15950_v18 = vand.u32 2147483647, %v13133_v6  ;;  %vm3930_vm6 = vweird.f32 %v13167_v11  ;;  %v5082_v15 = vmul.f32 %v13070_v47, %v2426_v19  ;;  %v8318_v22 = vpop.eup %8317 }
 0x422   :  { %v2251_v42 = vadd.f32 %v2250_v62, %v2161_v59  ;;  %v3869_v21 = vadd.f32 %v13184_v10, %v3868_v58  ;;  %v3884_v20 = vadd.f32 %v13189_v51, %v3883_v9  ;;  %v13355_v24 = vadd.f32 1.0, %v8314_v23  ;;  %v15955_v9 = vld [vmem:[#allocation154_spill] sm:$0xff] }
 0x423   :  { %vm13341_vm4 = vcmp.eq.f32.partialorder %v15947_v32, 8.507059e+37  ;;  %vm13347_vm5 = vcmp.eq.f32.partialorder %v15950_v18, 8.507059e+37  ;;  %8321 = vpow2.f32 %v7387_v30  ;;  %v3928_v28 = vmul.f32 %v13242_v8, %v3927_v61  ;;  %v2339_v62 = vpop.f32.mrf.mxu2 }
 0x424   :  { %v7388_v5 = vmul.f32 -1.442695, %v15953_v25  ;;  %v5085_v32 = vmul.f32 %v13086_v60, %v2251_v42  ;;  %v13361_v18 = vpack.c.bf16 %v5082_v15, %v13258_v38  ;;  %v3943_v47 = vmul.f32 %v13254_v16, %v3942_v40 }
 0x425   :  { %vm3945_vm7 = vweird.f32 %v13171_v46  ;;  %v3986_v58 = vmul.f32 %v13331_v50, %v13240_v63  ;;  %v7391_v23 = vmul.f32 -1.442695, %v15955_v9  ;;  %v13369_v30 = vmul.f32 %v3818_v35, %v15890_v17  ;;  %v2428_v35 = vpop.f32.mrf.mxu3 }
 0x426   :  { %15954 = vst [vmem:[#allocation157_spill] sm:$0xff] %v13361_v18  ;;  %vm13379_vm9 = vcmp.eq.f32.partialorder %v3934_v34, 8.507059e+37  ;;  %v3949_v61 = vand.u32 2147483647, %v13171_v46  ;;  %v3951_v19 = vand.u32 2147483648, %v13171_v46  ;;  %v13385_v40 = vadd.f32 1.0, %v8318_v22  ;;  %v8320_v17 = vpop.eup %8319  ;;  %v2163_v42 = vpop.f32.mrf.mxu0 }
 0x427   :  { %v3833_v59 = vsel %vm13299_vm15, %v13215_v29, %v3828_v52  ;;  %v3873_v4 = vsel %vm13375_vm8, %v13184_v10, %v3869_v21  ;;  %vm3931_vm11 = vweird.f32 %v13242_v8  ;;  %8323 = vrcp.f32 %v13355_v24  ;;  %v2252_v22 = vpop.f32.mrf.mxu1 }
 0x428   :  { %v3888_v29 = vsel %vm13397_vm10, %v13189_v51, %v3884_v20  ;;  %v3929_v10 = vadd.f32 %v13242_v8, %v3928_v28  ;;  %8325 = vpow2.f32 %v7388_v5  ;;  %v2429_v7 = vadd.f32 %v2428_v35, %v2339_v62  ;;  %v15962_v20 = vld [vmem:[#allocation59_spill] sm:$0xff]  ;;  %v15963_v28 = vld [vmem:[#allocation65_spill] sm:$0xff]  ;;  %vm13425_vm13 = vmor %vm3930_vm6, %vm3931_vm11 }
 0x429   :  { %v8322_v52 = vpop.eup %8321  ;;  %v3944_v6 = vadd.f32 %v13254_v16, %v3943_v47  ;;  %vm3946_vm12 = vweird.f32 %v13254_v16  ;;  %v3987_v15 = vsub.f32 1.0, %v3986_v58  ;;  %8327 = vpow2.f32 %v7391_v23  ;;  %2205 = vmatmul.bf16.gmra.mxu0 %v15962_v20  ;;  %2294 = vmatmul.bf16.gmra.mxu1 %v15963_v28  ;;  %v15966_v23 = vld [vmem:[#allocation33_spill] sm:$0xff] }
 0x42a   :  { %8329 = vrcp.f32 %v13385_v40  ;;  %v13410_v21 = vadd.f32 1.0, %v8320_v17  ;;  %v5086_v60 = vmul.f32 %v13149_v27, %v2429_v7  ;;  %v2253_v51 = vadd.f32 %v2252_v22, %v2163_v42  ;;  %2383 = vmatmul.bf16.gmra.mxu2 %v15962_v20  ;;  %2472 = vmatmul.bf16.gmra.mxu3 %v15963_v28  ;;  %vm13449_vm14 = vmor %vm3945_vm7, %vm3946_vm12 }
 0x42b   :  { %v3878_v5 = vsel %vm13341_vm4, %v13238_v41, %v3873_v4  ;;  %v3893_v47 = vsel %vm13347_vm5, %v13304_v0, %v3888_v29  ;;  %v3994_v27 = vand.u32 2147483647, %v13240_v63  ;;  %v7392_v17 = vmul.f32 -1.442695, %v15966_v23 }
 0x42c   :  { %v3933_v41 = vsel %vm13425_vm13, %v13242_v8, %v3929_v10  ;;  %v3996_v12 = vand.u32 2147483648, %v13240_v63  ;;  %v13435_v56 = vadd.f32 1.0, %v8322_v52  ;;  %v5089_v0 = vmul.f32 %v13152_v49, %v2253_v51  ;;  %v2341_v52 = vpop.f32.mrf.mxu2  ;;  %v7919_v8 = vld [vmem:[%s14897_s2 + $0x1f4] sm:$0xf] }
 0x42d   :  { %v13440_v11 = vpop.eup %8323  ;;  %v13443_v4 = vmul.f32 %v3833_v59, %v15893_v1  ;;  %vm13453_vm15 = vcmp.eq.f32.partialorder %v3949_v61, 8.507059e+37  ;;  %v3952_v49 = vor.u32 1.1754944e-38, %v3951_v19  ;;  %v3988_v62 = vmul.f32 %v13331_v50, %v3987_v15  ;;  %v15971_v59 = vld [vmem:[#allocation35_spill] sm:$0xff]  ;;  %v15982_v15 = vld [vmem:[#allocation73_spill] sm:$0xff] }
 0x42e   :  { %v8326_v35 = vpop.eup %8325  ;;  %v3948_v1 = vsel %vm13449_vm14, %v13254_v16, %v3944_v6  ;;  %8331 = vrcp.f32 %v13410_v21  ;;  %v7395_v46 = vmul.f32 -1.442695, %v15971_v59  ;;  %v13463_v29 = vpack.c.bf16 %v5089_v0, %v5085_v32  ;;  %v2430_v16 = vpop.f32.mrf.mxu3  ;;  %v7629_v0 = vld [vmem:[%s14897_s2 + $0x178] sm:$0xf0] }
 0x42f   :  { %v8328_v10 = vpop.eup %8327  ;;  %v13466_v61 = vmul.f32 %v3878_v5, %v15900_v2  ;;  %v13469_v7 = vmul.f32 %v3893_v47, %v15901_v13  ;;  %v3938_v19 = vsel %vm13379_vm9, %v13329_v33, %v3933_v41  ;;  %8333 = vpow2.f32 %v7392_v17  ;;  %v2166_v38 = vpop.f32.mrf.mxu0 }
 0x430   :  { %15972 = vst [vmem:[#allocation107_spill] sm:$0xff] %v13463_v29  ;;  %v13474_v6 = vpop.eup %8329  ;;  %vm13476_vm0 = vcmp.eq.f32.partialorder %v3994_v27, 8.507059e+37  ;;  %v3997_v32 = vor.u32 1.1754944e-38, %v3996_v12  ;;  %8335 = vrcp.f32 %v13435_v56  ;;  %v2431_v2 = vadd.f32 %v2430_v16, %v2341_v52  ;;  %v2255_v22 = vpop.f32.mrf.mxu1 }
 0x431   :  { %v3953_v13 = vsel %vm13453_vm15, %v3952_v49, %v3948_v1  ;;  %v3989_v42 = vadd.f32 %v13331_v50, %v3988_v62  ;;  %vm3991_vm1 = vweird.f32 %v13331_v50  ;;  %v4001_v51 = vmul.f32 %v13440_v11, %v13355_v24  ;;  %v15978_v62 = vld [vmem:[#allocation155_spill] sm:$0xff] }
 0x432   :  { %8337 = vpow2.f32 %v7395_v46  ;;  %v5090_v20 = vmul.f32 %v13162_v57, %v2431_v2  ;;  %v2256_v28 = vadd.f32 %v2255_v22, %v2166_v38  ;;  %v4011_v5 = vand.u32 2147483648, %v13355_v24  ;;  %v7903_v57 = vld [vmem:[%s14897_s2 + $0x174] sm:$0xf] }
 0x433   :  { %v4046_v47 = vmul.f32 %v13474_v6, %v13385_v40  ;;  %v13492_v58 = vadd.f32 1.0, %v8326_v35  ;;  %v13494_v27 = vadd.f32 1.0, %v8328_v10  ;;  %v13499_v41 = vmul.f32 %v3938_v19, %v15910_v36  ;;  %v15979_v19 = vld [vmem:[#allocation156_spill] sm:$0xff] }
 0x434   :  { %v13496_v17 = vpop.eup %8331  ;;  %vm3990_vm2 = vweird.f32 %v13240_v63  ;;  %v13503_v12 = vmul.f32 %v13175_v39, %v2256_v28  ;;  %v13514_v34 = vpack.c.bf16 %v5090_v20, %v5086_v60  ;;  %v13517_v63 = vmul.f32 %v3953_v13, %v15913_v54  ;;  %v7693_v60 = vld [vmem:[%s14897_s2 + $0x1f8] sm:$0xf0]  ;;  %v2344_v22 = vpop.f32.mrf.mxu2 }
 0x435   :  { %v8334_v36 = vpop.eup %8333  ;;  %vm13521_vm3 = vmor %vm3990_vm2, %vm3991_vm1  ;;  %v4056_v49 = vand.u32 2147483648, %v13385_v40  ;;  %v13527_v35 = vmul.f32 -1.442695, %v15978_v62  ;;  %v7632_v1 = vor.u32 %v7903_v57, %v7629_v0  ;;  %v4002_v10 = vsub.f32 1.0, %v4001_v51 }
 0x436   :  { %15975 = vst [vmem:[#allocation9_spill] sm:$0xff] %v13514_v34  ;;  %v13532_v46 = vpop.eup %8335  ;;  %v3993_v54 = vsel %vm13521_vm3, %v13331_v50, %v3989_v42  ;;  %v13538_v52 = vmul.f32 -1.442695, %v15979_v19  ;;  %v7696_v16 = vor.u32 %v7919_v8, %v7693_v60  ;;  %v13540_v2 = vor.u32 1.1754944e-38, %v4011_v5  ;;  %v2433_v20 = vpop.f32.mrf.mxu3  ;;  %v15980_v42 = vld [vmem:[#allocation37_spill] sm:$0xff] }
 0x437   :  { %v4047_v13 = vsub.f32 1.0, %v4046_v47  ;;  %v4061_v38 = vmul.f32 %v13496_v17, %v13410_v21  ;;  %8339 = vrcp.f32 %v13492_v58  ;;  %6217 = vmatpush.bf16.msrb.mxu2 %v7632_v1  ;;  %vm4005_vm4 = vweird.f32 %v13355_v24  ;;  %v2168_v39 = vpop.f32.mrf.mxu0 }
 0x438   :  { %v8338_v28 = vpop.eup %8337  ;;  %v4054_v50 = vand.u32 2147483647, %v13385_v40  ;;  %8341 = vrcp.f32 %v13494_v27  ;;  %v13549_v51 = vmul.f32 -1.442695, %v15980_v42  ;;  %v2434_v5 = vadd.f32 %v2433_v20, %v2344_v22  ;;  %6306 = vmatpush.bf16.msrb.mxu3 %v7696_v16  ;;  %v2257_v1 = vpop.f32.mrf.mxu1  ;;  %v15981_v22 = vld [vmem:[#allocation72_spill] sm:$0xff] }
 0x439   :  { %v3998_v47 = vsel %vm13476_vm0, %v3997_v32, %v3993_v54  ;;  %v13553_v57 = vor.u32 1.1754944e-38, %v4056_v49  ;;  %v4106_v0 = vmul.f32 %v13532_v46, %v13435_v56  ;;  %v13557_v8 = vadd.f32 1.0, %v8334_v36  ;;  %2210 = vmatmul.bf16.gmra.mxu0 %v15981_v22  ;;  %2299 = vmatmul.bf16.gmra.mxu1 %v15982_v15  ;;  %v7871_v32 = vld [vmem:[%s14897_s2 + $0x74] sm:$0xf]  ;;  %v7501_v36 = vld [vmem:[%s14897_s2 + $0x78] sm:$0xf0] }
 0x43a   :  { %v4003_v60 = vmul.f32 %v13440_v11, %v4002_v10  ;;  %vm4050_vm5 = vweird.f32 %v13385_v40  ;;  %v13562_v33 = vmul.f32 %v13317_v48, %v2434_v5  ;;  %v2258_v16 = vadd.f32 %v2257_v1, %v2168_v39  ;;  %v7887_v49 = vld [vmem:[%s14897_s2 + $0xf4] sm:$0xf]  ;;  %v7565_v5 = vld [vmem:[%s14897_s2 + $0xf8] sm:$0xf0]  ;;  %2388 = vmatmul.bf16.gmra.mxu2 %v15981_v22  ;;  %2477 = vmatmul.bf16.gmra.mxu3 %v15982_v15 }
 0x43b   :  { %v4048_v48 = vmul.f32 %v13474_v6, %v4047_v13  ;;  %v4062_v54 = vsub.f32 1.0, %v4061_v38  ;;  %v13576_v10 = vadd.f32 1.0, %v8338_v28  ;;  %v7504_v20 = vor.u32 %v7871_v32, %v7501_v36 }
 0x43c   :  { %v15983_v39 = vand.u32 2147483647, %v13355_v24  ;;  %v4071_v34 = vand.u32 2147483648, %v13410_v21  ;;  %v4116_v29 = vand.u32 2147483648, %v13435_v56  ;;  %v5097_v13 = vmul.f32 %v13369_v30, %v2258_v16 }
 0x43d   :  { %v7568_v38 = vor.u32 %v7887_v49, %v7565_v5  ;;  %v13592_v28 = vpop.eup %8339  ;;  %v13595_v32 = vmul.f32 %v3998_v47, %v15924_v26  ;;  %vm4006_vm7 = vweird.f32 %v13440_v11  ;;  %v4069_v36 = vand.u32 2147483647, %v13410_v21  ;;  %6039 = vmatpush.bf16.msrb.mxu0 %v7504_v20 }
 0x43e   :  { %vm13583_vm6 = vcmp.eq.f32.partialorder %v15983_v39, 8.507059e+37  ;;  %v4107_v39 = vsub.f32 1.0, %v4106_v0  ;;  %v13599_v18 = vpop.eup %8341  ;;  %v4004_v30 = vadd.f32 %v13440_v11, %v4003_v60  ;;  %vm13602_vm8 = vcmp.eq.f32.partialorder %v4054_v50, 8.507059e+37  ;;  %v2346_v50 = vpop.f32.mrf.mxu2  ;;  %vm13627_vm12 = vmor %vm4005_vm4, %vm4006_vm7 }
 0x43f   :  { %vm4065_vm9 = vweird.f32 %v13410_v21  ;;  %v4114_v22 = vand.u32 2147483647, %v13435_v56  ;;  %8343 = vrcp.f32 %v13557_v8  ;;  %6128 = vmatpush.bf16.msrb.mxu1 %v7568_v38  ;;  %v13610_v26 = vpack.c.bf16 %v5097_v13, %v13503_v12  ;;  %v2435_v60 = vpop.f32.mrf.mxu3  ;;  %v2171_v13 = vpop.f32.mrf.mxu0 }
 0x440   :  { %v4049_v47 = vadd.f32 %v13474_v6, %v4048_v48  ;;  %vm4051_vm10 = vweird.f32 %v13474_v6  ;;  %v4063_v0 = vmul.f32 %v13496_v17, %v4062_v54  ;;  %vm4110_vm11 = vweird.f32 %v13435_v56  ;;  %v2260_v38 = vpop.f32.mrf.mxu1  ;;  %v15997_v48 = vld [vmem:[#allocation46_spill] sm:$0xff] }
 0x441   :  { %15988 = vst [vmem:[#allocation10_spill] sm:$0xff] %v13610_v26  ;;  %8345 = vrcp.f32 %v13576_v10  ;;  %v13617_v15 = vor.u32 1.1754944e-38, %v4071_v34  ;;  %v13619_v49 = vor.u32 1.1754944e-38, %v4116_v29  ;;  %v4121_v12 = vmul.f32 %v13592_v28, %v13492_v58  ;;  %vm13643_vm13 = vmor %vm4050_vm5, %vm4051_vm10 }
 0x442   :  { %v2436_v20 = vadd.f32 %v2435_v60, %v2346_v50  ;;  %v4108_v54 = vmul.f32 %v13532_v46, %v4107_v39  ;;  %v4131_v34 = vand.u32 2147483648, %v13492_v58  ;;  %v4166_v29 = vmul.f32 %v13599_v18, %v13494_v27 }
 0x443   :  { %v4008_v50 = vsel %vm13627_vm12, %v13440_v11, %v4004_v30  ;;  %vm4066_vm14 = vweird.f32 %v13496_v17  ;;  %vm13648_vm15 = vcmp.eq.f32.partialorder %v4069_v36, 8.507059e+37  ;;  %v2261_v5 = vadd.f32 %v2260_v38, %v2171_v13 }
 0x444   :  { %v5098_v60 = vmul.f32 %v13443_v4, %v2436_v20  ;;  %v4053_v11 = vsel %vm13643_vm13, %v13474_v6, %v4049_v47  ;;  %v4064_v30 = vadd.f32 %v13496_v17, %v4063_v0  ;;  %vm4111_vm0 = vweird.f32 %v13532_v46  ;;  %vm13690_vm3 = vmor %vm4065_vm9, %vm4066_vm14 }
 0x445   :  { %vm13658_vm1 = vcmp.eq.f32.partialorder %v4114_v22, 8.507059e+37  ;;  %v7403_v36 = vmul.f32 -1.442695, %v15997_v48  ;;  %v13663_v26 = vpop.eup %8343  ;;  %v4122_v55 = vsub.f32 1.0, %v4121_v12  ;;  %8347 = vpow2.f32 %v13527_v35  ;;  %vm13705_vm5 = vmor %vm4110_vm11, %vm4111_vm0 }
 0x446   :  { %v5101_v4 = vmul.f32 %v13466_v61, %v2261_v5  ;;  %v13668_v20 = vpack.c.bf16 %v5098_v60, %v13562_v33  ;;  %v4013_v22 = vsel %vm13583_vm6, %v13540_v2, %v4008_v50  ;;  %v4109_v47 = vadd.f32 %v13532_v46, %v4108_v54  ;;  %v15998_v33 = vld [vmem:[#allocation48_spill] sm:$0xff]  ;;  %v2349_v54 = vpop.f32.mrf.mxu2 }
 0x447   :  { %v13670_v6 = vpop.eup %8345  ;;  %v4167_v0 = vsub.f32 1.0, %v4166_v29  ;;  %8349 = vpow2.f32 %v13538_v52  ;;  %vm4125_vm2 = vweird.f32 %v13492_v58  ;;  %v13678_v12 = vor.u32 1.1754944e-38, %v4131_v34  ;;  %v2438_v5 = vpop.f32.mrf.mxu3 }
 0x448   :  { %v4174_v61 = vand.u32 2147483647, %v13494_v27  ;;  %8351 = vpow2.f32 %v13549_v51  ;;  %v7404_v35 = vmul.f32 -1.442695, %v15998_v33  ;;  %v4058_v1 = vsel %vm13602_vm8, %v13553_v57, %v4053_v11  ;;  %v2173_v38 = vpop.f32.mrf.mxu0  ;;  %v2262_v50 = vpop.f32.mrf.mxu1  ;;  %v16003_v11 = vld [vmem:[#allocation77_spill] sm:$0xff] }
 0x449   :  { %vm4170_vm4 = vweird.f32 %v13494_v27  ;;  %v4176_v2 = vand.u32 2147483648, %v13494_v27  ;;  %v4181_v51 = vmul.f32 %v13663_v26, %v13557_v8  ;;  %8353 = vpow2.f32 %v7403_v36  ;;  %5691 = vmatmul.bf16.vlgmr.msra.gmra.mxu0 %v16003_v11  ;;  %v16109_v11 = vld [vmem:[#allocation107_spill] sm:$0xff] }
 0x44a   :  { %v4068_v57 = vsel %vm13690_vm3, %v13496_v17, %v4064_v30  ;;  %v4123_v16 = vmul.f32 %v13592_v28, %v4122_v55  ;;  %v4226_v34 = vmul.f32 %v13670_v6, %v13576_v10  ;;  %v2439_v29 = vadd.f32 %v2438_v5, %v2349_v54  ;;  %5869 = vmatmul.bf16.vlgmr.msra.gmra.mxu2 %v12719_v14 }
 0x44b   :  { %v13713_v13 = vmul.f32 %v4013_v22, %v15926_v45  ;;  %v4113_v17 = vsel %vm13705_vm5, %v13532_v46, %v4109_v47  ;;  %vm4126_vm6 = vweird.f32 %v13592_v28  ;;  %v4168_v56 = vmul.f32 %v13599_v18, %v4167_v0  ;;  %v8348_v24 = vpop.eup %8347  ;;  %v16004_v45 = vld [vmem:[#allocation82_spill] sm:$0xff]  ;;  %5958 = vmatmul.bf16.vlgmr.msra.gmra.mxu3 %v12779_v37 }
 0x44c   :  { %vm4171_vm7 = vweird.f32 %v13599_v18  ;;  %8355 = vpow2.f32 %v7404_v35  ;;  %v5102_v55 = vmul.f32 %v13469_v7, %v2439_v29  ;;  %v2263_v60 = vadd.f32 %v2262_v50, %v2173_v38  ;;  %5780 = vmatmul.bf16.vlgmr.msra.gmra.mxu1 %v16004_v45  ;;  %vm13769_vm11 = vmor %vm4125_vm2, %vm4126_vm6 }
 0x44d   :  { %v8350_v30 = vpop.eup %8349  ;;  %v13725_v46 = vmul.f32 %v4058_v1, %v15934_v53  ;;  %v4073_v36 = vsel %vm13648_vm15, %v13617_v15, %v4068_v57  ;;  %v13730_v22 = vor.u32 1.1754944e-38, %v4176_v2  ;;  %v4182_v47 = vsub.f32 1.0, %v4181_v51  ;;  %vm13784_vm12 = vmor %vm4170_vm4, %vm4171_vm7 }
 0x44e   :  { %v8352_v0 = vpop.eup %8351  ;;  %v4118_v7 = vsel %vm13658_vm1, %v13619_v49, %v4113_v17  ;;  %v4124_v35 = vadd.f32 %v13592_v28, %v4123_v16  ;;  %v4227_v52 = vsub.f32 1.0, %v4226_v34  ;;  %v5105_v54 = vmul.f32 %v13499_v41, %v2263_v60  ;;  %v2351_v29 = vpop.f32.mrf.mxu2  ;;  %v16014_v60 = vld [vmem:[#allocation49_spill] sm:$0xff] }
 0x44f   :  { %v8354_v53 = vpop.eup %8353  ;;  %v16005_v15 = vand.u32 2147483647, %v13492_v58  ;;  %v4169_v1 = vadd.f32 %v13599_v18, %v4168_v56  ;;  %vm4185_vm9 = vweird.f32 %v13557_v8  ;;  %v4189_v49 = vand.u32 2147483647, %v13557_v8 }
 0x450   :  { %v13748_v40 = vadd.f32 1.0, %v8348_v24  ;;  %v13751_v41 = vmul.f32 %v4073_v36, %v15937_v3  ;;  %vm13753_vm10 = vcmp.eq.f32.partialorder %v4174_v61, 8.507059e+37  ;;  %v4191_v51 = vand.u32 2147483648, %v13557_v8  ;;  %v2176_v27 = vpop.f32.mrf.mxu0  ;;  %v16027_v3 = vld [vmem:[#allocation102_spill] sm:$0xff] }
 0x451   :  { %vm13741_vm8 = vcmp.eq.f32.partialorder %v16005_v15, 8.507059e+37  ;;  %v13758_v5 = vadd.f32 1.0, %v8350_v30  ;;  %v13760_v57 = vpack.c.bf16 %v5105_v54, %v5101_v4  ;;  %v13763_v21 = vmul.f32 %v4118_v7, %v15944_v31  ;;  %v2440_v4 = vpop.f32.mrf.mxu3  ;;  %v16015_v7 = vld [vmem:[#allocation50_spill] sm:$0xff]  ;;  %v7917_v15 = vld [vmem:[%s14897_s2 + $0x1e4] sm:$0xf] }
 0x452   :  { %v4183_v61 = vmul.f32 %v13663_v26, %v4182_v47  ;;  %v4234_v16 = vand.u32 2147483647, %v13576_v10  ;;  %v13775_v34 = vadd.f32 1.0, %v8352_v0  ;;  %v8356_v17 = vpop.eup %8355  ;;  %v4128_v31 = vsel %vm13769_vm11, %v13592_v28, %v4124_v35  ;;  %v2265_v28 = vpop.f32.mrf.mxu1 }
 0x453   :  { %v4228_v56 = vmul.f32 %v13670_v6, %v4227_v52  ;;  %v13789_v38 = vadd.f32 1.0, %v8354_v53  ;;  %v2441_v50 = vadd.f32 %v2440_v4, %v2351_v29  ;;  %v4173_v24 = vsel %vm13784_vm12, %v13599_v18, %v4169_v1  ;;  %v7621_v53 = vld [vmem:[%s14897_s2 + $0x168] sm:$0xf0] }
 0x454   :  { %vm4186_vm13 = vweird.f32 %v13663_v26  ;;  %vm4231_vm14 = vweird.f32 %v13670_v6  ;;  %8357 = vrcp.f32 %v13748_v40  ;;  %v7407_v30 = vmul.f32 -1.442695, %v16014_v60 }
 0x455   :  { %8359 = vrcp.f32 %v13758_v5  ;;  %v5106_v36 = vmul.f32 %v13517_v63, %v2441_v50  ;;  %v2266_v47 = vadd.f32 %v2265_v28, %v2176_v27  ;;  %v4184_v0 = vadd.f32 %v13663_v26, %v4183_v61  ;;  %v7901_v63 = vld [vmem:[%s14897_s2 + $0x164] sm:$0xf]  ;;  %v16018_v61 = vld [vmem:[#allocation158_spill] sm:$0xff]  ;;  %vm13837_vm0 = vmor %vm4185_vm9, %vm4186_vm13 }
 0x456   :  { %8361 = vrcp.f32 %v13775_v34  ;;  %v13802_v18 = vadd.f32 1.0, %v8356_v17  ;;  %v7408_v35 = vmul.f32 -1.442695, %v16015_v7  ;;  %v4229_v52 = vadd.f32 %v13670_v6, %v4228_v56  ;;  %v7685_v17 = vld [vmem:[%s14897_s2 + $0x1e8] sm:$0xf0] }
 0x457   :  { %8363 = vrcp.f32 %v13789_v38  ;;  %v13808_v54 = vmul.f32 %v13595_v32, %v2266_v47  ;;  %v13819_v1 = vpack.c.bf16 %v5106_v36, %v5102_v55  ;;  %vm13821_vm15 = vcmp.eq.f32.partialorder %v4189_v49, 8.507059e+37 }
 0x458   :  { %v4236_v32 = vand.u32 2147483648, %v13576_v10  ;;  %v7411_v29 = vmul.f32 -1.442695, %v16018_v61  ;;  %v7624_v4 = vor.u32 %v7901_v63, %v7621_v53  ;;  %v4133_v58 = vsel %vm13741_vm8, %v13678_v12, %v4128_v31  ;;  %v2178_v36 = vpop.f32.mrf.mxu0  ;;  %v7493_v53 = vld [vmem:[%s14897_s2 + $0x68] sm:$0xf0] }
 0x459   :  { %vm4230_vm1 = vweird.f32 %v13576_v10  ;;  %8365 = vpow2.f32 %v7407_v30  ;;  %v7688_v49 = vor.u32 %v7917_v15, %v7685_v17  ;;  %v4178_v50 = vsel %vm13753_vm10, %v13730_v22, %v4173_v24  ;;  %v2354_v10 = vpop.f32.mrf.mxu2  ;;  %v2443_v31 = vpop.f32.mrf.mxu3 }
 0x45a   :  { %v13842_v56 = vpop.eup %8357  ;;  %v4192_v39 = vor.u32 1.1754944e-38, %v4191_v51  ;;  %vm13849_vm2 = vmor %vm4230_vm1, %vm4231_vm14  ;;  %vm13853_vm3 = vcmp.eq.f32.partialorder %v4234_v16, 8.507059e+37  ;;  %8367 = vrcp.f32 %v13802_v18  ;;  %6218 = vmatpush.bf16.msrb.mxu2 %v7624_v4  ;;  %v4188_v22 = vsel %vm13837_vm0, %v13663_v26, %v4184_v0  ;;  %v2267_v47 = vpop.f32.mrf.mxu1  ;;  %v7557_v4 = vld [vmem:[%s14897_s2 + $0xe8] sm:$0xf0] }
 0x45b   :  { %v13858_v27 = vpop.eup %8359  ;;  %v4233_v2 = vsel %vm13849_vm2, %v13670_v6, %v4229_v52  ;;  %8369 = vpow2.f32 %v7408_v35  ;;  %v2444_v51 = vadd.f32 %v2443_v31, %v2354_v10  ;;  %6307 = vmatpush.bf16.msrb.mxu3 %v7688_v49  ;;  %v13869_v24 = vmul.f32 %v4133_v58, %v15953_v25  ;;  %v16025_v35 = vld [vmem:[#allocation86_spill] sm:$0xff]  ;;  %v16026_v52 = vld [vmem:[#allocation83_spill] sm:$0xff]  ;;  %v7869_v25 = vld [vmem:[%s14897_s2 + $0x64] sm:$0xf]  ;;  %5874 = vmatmul.bf16.gmra.mxu2 %v12856_v43 }
 0x45c   :  { %v13866_v16 = vpop.eup %8361  ;;  %v4237_v28 = vor.u32 1.1754944e-38, %v4236_v32  ;;  %v4251_v30 = vand.u32 2147483648, %v13748_v40  ;;  %8371 = vpow2.f32 %v7411_v29  ;;  %v13875_v26 = vmul.f32 %v4178_v50, %v15955_v9  ;;  %5696 = vmatmul.bf16.gmra.mxu0 %v16025_v35  ;;  %5785 = vmatmul.bf16.gmra.mxu1 %v16026_v52  ;;  %v7885_v9 = vld [vmem:[%s14897_s2 + $0xe4] sm:$0xf]  ;;  %v16028_v10 = vld [vmem:[#allocation159_spill] sm:$0xff] }
 0x45d   :  { %v13872_v63 = vpop.eup %8363  ;;  %v5110_v6 = vmul.f32 %v13713_v13, %v2444_v51  ;;  %v2268_v0 = vadd.f32 %v2267_v47, %v2178_v36  ;;  %v4193_v13 = vsel %vm13821_vm15, %v4192_v39, %v4188_v22  ;;  %v4241_v32 = vmul.f32 %v13842_v56, %v13748_v40  ;;  %5963 = vmatmul.bf16.gmra.mxu3 %v16027_v3 }
 0x45e   :  { %v4238_v15 = vsel %vm13853_vm3, %v4237_v28, %v4233_v2  ;;  %v7496_v29 = vor.u32 %v7869_v25, %v7493_v53  ;;  %v4286_v58 = vmul.f32 %v13858_v27, %v13758_v5  ;;  %v7560_v49 = vor.u32 %v7885_v9, %v7557_v4 }
 0x45f   :  { %v8366_v17 = vpop.eup %8365  ;;  %v5113_v55 = vmul.f32 %v13725_v46, %v2268_v0  ;;  %v4249_v39 = vand.u32 2147483647, %v13748_v40  ;;  %v4301_v12 = vmul.f32 %v13866_v16, %v13775_v34  ;;  %v4346_v8 = vmul.f32 %v13872_v63, %v13789_v38 }
 0x460   :  { %v13903_v50 = vpop.eup %8367  ;;  %v7412_v31 = vmul.f32 -1.442695, %v16028_v10  ;;  %6040 = vmatpush.bf16.msrb.mxu0 %v7496_v29  ;;  %v13912_v46 = vmul.f32 %v4193_v13, %v15966_v23  ;;  %v13914_v2 = vor.u32 1.1754944e-38, %v4251_v30  ;;  %v4294_v51 = vand.u32 2147483647, %v13758_v5  ;;  %6129 = vmatpush.bf16.msrb.mxu1 %v7560_v49 }
 0x461   :  { %v8370_v22 = vpop.eup %8369  ;;  %v13918_v28 = vpack.c.bf16 %v5113_v55, %v13808_v54  ;;  %v13921_v47 = vmul.f32 %v4238_v15, %v15971_v59  ;;  %v4242_v0 = vsub.f32 1.0, %v4241_v32  ;;  %v4296_v25 = vand.u32 2147483648, %v13758_v5  ;;  %v2356_v9 = vpop.f32.mrf.mxu2 }
 0x462   :  { %v8372_v36 = vpop.eup %8371  ;;  %v4311_v53 = vand.u32 2147483648, %v13775_v34  ;;  %v2445_v23 = vpop.f32.mrf.mxu3  ;;  %v4287_v13 = vsub.f32 1.0, %v4286_v58  ;;  %v4309_v30 = vand.u32 2147483647, %v13775_v34  ;;  %v13926_v29 = vadd.f32 1.0, %v8366_v17 }
 0x463   :  { %v2446_v4 = vadd.f32 %v2445_v23, %v2356_v9  ;;  %vm4245_vm4 = vweird.f32 %v13748_v40  ;;  %v4302_v54 = vsub.f32 1.0, %v4301_v12  ;;  %v4347_v55 = vsub.f32 1.0, %v4346_v8  ;;  %v2181_v32 = vpop.f32.mrf.mxu0  ;;  %v2270_v49 = vpop.f32.mrf.mxu1 }
 0x464   :  { %v4361_v59 = vmul.f32 %v13903_v50, %v13802_v18  ;;  %v13931_v15 = vadd.f32 1.0, %v8370_v22  ;;  %vm4290_vm5 = vweird.f32 %v13758_v5  ;;  %v13934_v3 = vadd.f32 1.0, %v8372_v36 }
 0x465   :  { %8373 = vpow2.f32 %v7412_v31  ;;  %v5114_v17 = vmul.f32 %v13751_v41, %v2446_v4  ;;  %v2271_v58 = vadd.f32 %v2270_v49, %v2181_v32  ;;  %v4243_v9 = vmul.f32 %v13842_v56, %v4242_v0 }
 0x466   :  { %vm4246_vm6 = vweird.f32 %v13842_v56  ;;  %v13939_v12 = vor.u32 1.1754944e-38, %v4296_v25  ;;  %vm4305_vm7 = vweird.f32 %v13775_v34  ;;  %v13942_v8 = vor.u32 1.1754944e-38, %v4311_v53 }
 0x467   :  { %v4288_v22 = vmul.f32 %v13858_v27, %v4287_v13  ;;  %8375 = vrcp.f32 %v13926_v29  ;;  %v5117_v36 = vmul.f32 %v13763_v21, %v2271_v58  ;;  %v13947_v31 = vpack.c.bf16 %v5114_v17, %v5110_v6  ;;  %v16031_v21 = vld [vmem:[#allocation64_spill] sm:$0xff]  ;;  %vm13985_vm0 = vmor %vm4245_vm4, %vm4246_vm6 }
 0x468   :  { %v4303_v41 = vmul.f32 %v13866_v16, %v4302_v54  ;;  %vm4350_vm8 = vweird.f32 %v13789_v38  ;;  %v4362_v0 = vsub.f32 1.0, %v4361_v59  ;;  %8377 = vrcp.f32 %v13931_v15 }
 0x469   :  { %vm13952_vm9 = vcmp.eq.f32.partialorder %v4249_v39, 8.507059e+37  ;;  %v4348_v53 = vmul.f32 %v13872_v63, %v4347_v55  ;;  %v4354_v23 = vand.u32 2147483647, %v13789_v38  ;;  %8379 = vrcp.f32 %v13934_v3  ;;  %v2359_v59 = vpop.f32.mrf.mxu2 }
 0x46a   :  { %v7415_v6 = vmul.f32 -1.442695, %v16031_v21  ;;  %vm13960_vm10 = vcmp.eq.f32.partialorder %v4294_v51, 8.507059e+37  ;;  %vm13964_vm11 = vcmp.eq.f32.partialorder %v4309_v30, 8.507059e+37  ;;  %v4356_v39 = vand.u32 2147483648, %v13789_v38  ;;  %v2448_v32 = vpop.f32.mrf.mxu3 }
 0x46b   :  { %vm4365_vm12 = vweird.f32 %v13802_v18  ;;  %v4369_v54 = vand.u32 2147483647, %v13802_v18  ;;  %v4371_v55 = vand.u32 2147483648, %v13802_v18  ;;  %v8374_v49 = vpop.eup %8373  ;;  %v4244_v51 = vadd.f32 %v13842_v56, %v4243_v9  ;;  %v2183_v52 = vpop.f32.mrf.mxu0  ;;  %5879 = vmatmul.bf16.gmra.mxu2 %v13017_v44 }
 0x46c   :  { %v4289_v17 = vadd.f32 %v13858_v27, %v4288_v22  ;;  %vm4291_vm13 = vweird.f32 %v13858_v27  ;;  %v2449_v30 = vadd.f32 %v2448_v32, %v2359_v59  ;;  %v4304_v58 = vadd.f32 %v13866_v16, %v4303_v41  ;;  %v2272_v35 = vpop.f32.mrf.mxu1  ;;  %v16038_v32 = vld [vmem:[#allocation84_spill] sm:$0xff] }
 0x46d   :  { %vm4306_vm14 = vweird.f32 %v13866_v16  ;;  %vm4351_vm15 = vweird.f32 %v13872_v63  ;;  %v4363_v43 = vmul.f32 %v13903_v50, %v4362_v0  ;;  %v13979_v37 = vpop.eup %8375  ;;  %v4349_v22 = vadd.f32 %v13872_v63, %v4348_v53  ;;  %5701 = vmatmul.bf16.gmra.mxu0 %v16038_v32  ;;  %v16039_v0 = vld [vmem:[#allocation40_spill] sm:$0xff]  ;;  %vm13999_vm1 = vmor %vm4290_vm5, %vm4291_vm13  ;;  %v16055_v53 = vld [vmem:[#allocation62_spill] sm:$0xff] }
 0x46e   :  { %8381 = vpow2.f32 %v7415_v6  ;;  %v5118_v41 = vmul.f32 %v13869_v24, %v2449_v30  ;;  %v2273_v59 = vadd.f32 %v2272_v35, %v2183_v52  ;;  %5790 = vmatmul.bf16.gmra.mxu1 %v16039_v0  ;;  %v13993_v14 = vpop.eup %8377  ;;  %vm14003_vm2 = vcmp.eq.f32.partialorder %v4354_v23, 8.507059e+37  ;;  %vm14021_vm3 = vmor %vm4305_vm7, %vm4306_vm14 }
 0x46f   :  { %v4357_v24 = vor.u32 1.1754944e-38, %v4356_v39  ;;  %v4372_v35 = vor.u32 1.1754944e-38, %v4371_v55  ;;  %v14007_v52 = vadd.f32 1.0, %v8374_v49  ;;  %v14009_v6 = vpop.eup %8379  ;;  %v4248_v30 = vsel %vm13985_vm0, %v13842_v56, %v4244_v51  ;;  %v16046_v55 = vld [vmem:[#allocation104_spill] sm:$0xff]  ;;  %vm14036_vm5 = vmor %vm4350_vm8, %vm4351_vm15 }
 0x470   :  { %v4293_v5 = vsel %vm13999_vm1, %v13858_v27, %v4289_v17  ;;  %vm4366_vm4 = vweird.f32 %v13903_v50  ;;  %v5121_v39 = vmul.f32 %v13875_v26, %v2273_v59  ;;  %5968 = vmatmul.bf16.gmra.mxu3 %v16046_v55  ;;  %v4308_v56 = vsel %vm14021_vm3, %v13866_v16, %v4304_v58  ;;  %v16051_v17 = vld [vmem:[#allocation66_spill] sm:$0xff]  ;;  %v16052_v59 = vld [vmem:[#allocation60_spill] sm:$0xff] }
 0x471   :  { %v4364_v27 = vadd.f32 %v13903_v50, %v4363_v43  ;;  %vm14041_vm6 = vcmp.eq.f32.partialorder %v4369_v54, 8.507059e+37  ;;  %v4406_v49 = vmul.f32 %v13979_v37, %v13926_v29  ;;  %v4416_v51 = vand.u32 2147483648, %v13926_v29  ;;  %v2361_v23 = vpop.f32.mrf.mxu2  ;;  %vm14073_vm7 = vmor %vm4365_vm12, %vm4366_vm4 }
 0x472   :  { %v4353_v16 = vsel %vm14036_vm5, %v13872_v63, %v4349_v22  ;;  %v4421_v38 = vmul.f32 %v13993_v14, %v13931_v15  ;;  %v7416_v58 = vmul.f32 -1.442695, %v16051_v17  ;;  %v14054_v9 = vpack.c.bf16 %v5121_v39, %v5117_v36  ;;  %v2450_v63 = vpop.f32.mrf.mxu3 }
 0x473   :  { %v4253_v43 = vsel %vm13952_vm9, %v13914_v2, %v4248_v30  ;;  %v4466_v54 = vmul.f32 %v14009_v6, %v13934_v3  ;;  %8383 = vrcp.f32 %v14007_v52  ;;  %v7419_v40 = vmul.f32 -1.442695, %v16052_v59  ;;  %v2186_v4 = vpop.f32.mrf.mxu0 }
 0x474   :  { %v8382_v22 = vpop.eup %8381  ;;  %v4298_v34 = vsel %vm13960_vm10, %v13939_v12, %v4293_v5  ;;  %v4313_v36 = vsel %vm13964_vm11, %v13942_v8, %v4308_v56  ;;  %v4414_v25 = vand.u32 2147483647, %v13926_v29  ;;  %v2451_v30 = vadd.f32 %v2450_v63, %v2361_v23  ;;  %v2275_v5 = vpop.f32.mrf.mxu1 }
 0x475   :  { %v4358_v39 = vsel %vm14003_vm2, %v4357_v24, %v4353_v16  ;;  %v4368_v12 = vsel %vm14073_vm7, %v13903_v50, %v4364_v27  ;;  %v4407_v13 = vsub.f32 1.0, %v4406_v49  ;;  %v14083_v8 = vor.u32 1.1754944e-38, %v4416_v51  ;;  %v7613_v51 = vld [vmem:[%s14897_s2 + $0x158] sm:$0xf0]  ;;  %v7915_v16 = vld [vmem:[%s14897_s2 + $0x1d4] sm:$0xf] }
 0x476   :  { %v4422_v18 = vsub.f32 1.0, %v4421_v38  ;;  %8385 = vpow2.f32 %v7416_v58  ;;  %v5122_v56 = vmul.f32 %v13912_v46, %v2451_v30  ;;  %v2276_v55 = vadd.f32 %v2275_v5, %v2186_v4  ;;  %v7899_v46 = vld [vmem:[%s14897_s2 + $0x154] sm:$0xf]  ;;  %v7677_v58 = vld [vmem:[%s14897_s2 + $0x1d8] sm:$0xf0] }
 0x477   :  { %vm4410_vm8 = vweird.f32 %v13926_v29  ;;  %v4467_v23 = vsub.f32 1.0, %v4466_v54  ;;  %v14087_v63 = vadd.f32 1.0, %v8382_v22  ;;  %8387 = vpow2.f32 %v7419_v40  ;;  %v16058_v4 = vld [vmem:[#allocation63_spill] sm:$0xff] }
 0x478   :  { %v7420_v24 = vmul.f32 -1.442695, %v16055_v53  ;;  %v4998_v50 = vmul.f32 %v4253_v43, %v15978_v62  ;;  %v5001_v27 = vmul.f32 %v4298_v34, %v15979_v19  ;;  %v14093_v49 = vmul.f32 %v13921_v47, %v2276_v55 }
 0x479   :  { %v14104_v38 = vpack.c.bf16 %v5122_v56, %v5118_v41  ;;  %v14106_v62 = vpop.eup %8383  ;;  %v14109_v19 = vmul.f32 %v4313_v36, %v15980_v42  ;;  %v4408_v47 = vmul.f32 %v13979_v37, %v4407_v13  ;;  %vm4411_vm9 = vweird.f32 %v13979_v37  ;;  %v2364_v34 = vpop.f32.mrf.mxu2 }
 0x47a   :  { %v7616_v55 = vor.u32 %v7899_v46, %v7613_v51  ;;  %v14117_v43 = vmul.f32 %v4358_v39, %v15997_v48  ;;  %v14121_v41 = vsel %vm14041_vm6, %v4372_v35, %v4368_v12  ;;  %vm4425_vm10 = vweird.f32 %v13931_v15  ;;  %v2453_v36 = vpop.f32.mrf.mxu3  ;;  %v16060_v51 = vld [vmem:[#allocation41_spill] sm:$0xff]  ;;  %vm14163_vm14 = vmor %vm4410_vm8, %vm4411_vm9 }
 0x47b   :  { %v7680_v42 = vor.u32 %v7915_v16, %v7677_v58  ;;  %v4423_v54 = vmul.f32 %v13993_v14, %v4422_v18  ;;  %v4429_v40 = vand.u32 2147483647, %v13931_v15  ;;  %v4468_v22 = vmul.f32 %v14009_v6, %v4467_v23  ;;  %v2188_v56 = vpop.f32.mrf.mxu0  ;;  %v16061_v16 = vld [vmem:[#allocation43_spill] sm:$0xff] }
 0x47c   :  { %8389 = vpow2.f32 %v7420_v24  ;;  %6219 = vmatpush.bf16.msrb.mxu2 %v7616_v55  ;;  %v8386_v2 = vpop.eup %8385  ;;  %vm14127_vm11 = vcmp.eq.f32.partialorder %v4414_v25, 8.507059e+37  ;;  %v4431_v35 = vand.u32 2147483648, %v13931_v15  ;;  %v4481_v26 = vmul.f32 %v14106_v62, %v14007_v52  ;;  %v16059_v25 = vld [vmem:[#allocation161_spill] sm:$0xff]  ;;  %v2277_v23 = vpop.f32.mrf.mxu1  ;;  %v7485_v55 = vld [vmem:[%s14897_s2 + $0x58] sm:$0xf0] }
 0x47d   :  { %8391 = vrcp.f32 %v14087_v63  ;;  %v2454_v30 = vadd.f32 %v2453_v36, %v2364_v34  ;;  %6308 = vmatpush.bf16.msrb.mxu3 %v7680_v42  ;;  %v8388_v39 = vpop.eup %8387  ;;  %v4409_v12 = vadd.f32 %v13979_v37, %v4408_v47  ;;  %v4474_v13 = vand.u32 2147483647, %v13934_v3  ;;  %5706 = vmatmul.bf16.gmra.mxu0 %v16060_v51  ;;  %v7867_v47 = vld [vmem:[%s14897_s2 + $0x54] sm:$0xf] }
 0x47e   :  { %v7423_v5 = vmul.f32 -1.442695, %v16058_v4  ;;  %v7424_v18 = vmul.f32 -1.442695, %v16059_v25  ;;  %vm4426_vm12 = vweird.f32 %v13993_v14  ;;  %vm4471_vm13 = vweird.f32 %v14009_v6  ;;  %5795 = vmatmul.bf16.gmra.mxu1 %v16061_v16  ;;  %v7883_v58 = vld [vmem:[%s14897_s2 + $0xd4] sm:$0xf] }
 0x47f   :  { %v5126_v24 = vmul.f32 %v4998_v50, %v2454_v30  ;;  %v2278_v46 = vadd.f32 %v2277_v23, %v2188_v56  ;;  %v4424_v42 = vadd.f32 %v13993_v14, %v4423_v54  ;;  %v4469_v50 = vadd.f32 %v14009_v6, %v4468_v22  ;;  %v7549_v30 = vld [vmem:[%s14897_s2 + $0xd8] sm:$0xf0]  ;;  %v16064_v22 = vld [vmem:[#allocation105_spill] sm:$0xff]  ;;  %vm14175_vm15 = vmor %vm4425_vm10, %vm4426_vm12 }
 0x480   :  { %v14154_v34 = vadd.f32 1.0, %v8386_v2  ;;  %v7488_v36 = vor.u32 %v7867_v47, %v7485_v55  ;;  %v4482_v23 = vsub.f32 1.0, %v4481_v26  ;;  %v14167_v16 = vadd.f32 1.0, %v8388_v39  ;;  %5884 = vmatmul.bf16.gmra.mxu2 %v16064_v22  ;;  %v16065_v2 = vld [vmem:[#allocation78_spill] sm:$0xff] }
 0x481   :  { %v5129_v54 = vmul.f32 %v5001_v27, %v2278_v46  ;;  %5973 = vmatmul.bf16.gmra.mxu3 %v16065_v2  ;;  %v7552_v47 = vor.u32 %v7883_v58, %v7549_v30  ;;  %vm14179_vm0 = vcmp.eq.f32.partialorder %v4429_v40, 8.507059e+37  ;;  %vm4470_vm1 = vweird.f32 %v13934_v3 }
 0x482   :  { %v8390_v55 = vpop.eup %8389  ;;  %v4476_v27 = vand.u32 2147483648, %v13934_v3  ;;  %8393 = vpow2.f32 %v7423_v5  ;;  %6041 = vmatpush.bf16.msrb.mxu0 %v7488_v36  ;;  %v4413_v15 = vsel %vm14163_vm14, %v13979_v37, %v4409_v12  ;;  %v4432_v39 = vor.u32 1.1754944e-38, %v4431_v35  ;;  %vm14192_vm2 = vmor %vm4470_vm1, %vm4471_vm13  ;;  %v2366_v12 = vpop.f32.mrf.mxu2 }
 0x483   :  { %v14185_v26 = vpop.eup %8391  ;;  %8395 = vpow2.f32 %v7424_v18  ;;  %6130 = vmatpush.bf16.msrb.mxu1 %v7552_v47  ;;  %v14197_v46 = vpack.c.bf16 %v5129_v54, %v14093_v49  ;;  %v4428_v3 = vsel %vm14175_vm15, %v13993_v14, %v4424_v42  ;;  %v4473_v37 = vsel %vm14192_vm2, %v14009_v6, %v4469_v50  ;;  %v2455_v5 = vpop.f32.mrf.mxu3  ;;  %v16074_v42 = vld [vmem:[#allocation162_spill] sm:$0xff] }
 0x484   :  { %vm14205_vm3 = vcmp.eq.f32.partialorder %v4474_v13, 8.507059e+37  ;;  %8397 = vrcp.f32 %v14154_v34  ;;  %v4483_v18 = vmul.f32 %v14106_v62, %v4482_v23  ;;  %v14212_v49 = vadd.f32 1.0, %v8390_v55  ;;  %v2191_v36 = vpop.f32.mrf.mxu0  ;;  %v2280_v30 = vpop.f32.mrf.mxu1 }
 0x485   :  { %8399 = vrcp.f32 %v14167_v16  ;;  %v2456_v58 = vadd.f32 %v2455_v5, %v2366_v12  ;;  %v4418_v14 = vsel %vm14127_vm11, %v14083_v8, %v4413_v15  ;;  %v4477_v6 = vor.u32 1.1754944e-38, %v4476_v27 }
 0x486   :  { %v4526_v13 = vmul.f32 %v14185_v26, %v14087_v63  ;;  %v7427_v50 = vmul.f32 -1.442695, %v16074_v42  ;;  %v4489_v56 = vand.u32 2147483647, %v14007_v52  ;;  %v4491_v23 = vand.u32 2147483648, %v14007_v52 }
 0x487   :  { %v5130_v54 = vmul.f32 %v14109_v19, %v2456_v58  ;;  %v2281_v47 = vadd.f32 %v2280_v30, %v2191_v36  ;;  %v5006_v48 = vmul.f32 %v14121_v41, %v15998_v33  ;;  %v4433_v8 = vsel %vm14179_vm0, %v4432_v39, %v4428_v3 }
 0x488   :  { %v8394_v55 = vpop.eup %8393  ;;  %v4478_v29 = vsel %vm14205_vm3, %v4477_v6, %v4473_v37  ;;  %vm4486_vm4 = vweird.f32 %v14106_v62  ;;  %v4484_v15 = vadd.f32 %v14106_v62, %v4483_v18  ;;  %8401 = vrcp.f32 %v14212_v49 }
 0x489   :  { %v8396_v27 = vpop.eup %8395  ;;  %v5133_v19 = vmul.f32 %v14117_v43, %v2281_v47  ;;  %v14233_v40 = vpack.c.bf16 %v5130_v54, %v5126_v24  ;;  %v5009_v33 = vmul.f32 %v4418_v14, %v16014_v60  ;;  %vm4485_vm5 = vweird.f32 %v14007_v52  ;;  %v16079_v14 = vld [vmem:[#allocation163_spill] sm:$0xff] }
 0x48a   :  { %v14235_v12 = vpop.eup %8397  ;;  %v4527_v41 = vsub.f32 1.0, %v4526_v13  ;;  %8403 = vpow2.f32 %v7427_v50  ;;  %v14242_v39 = vmul.f32 %v4433_v8, %v16015_v7  ;;  %vm14244_vm6 = vcmp.eq.f32.partialorder %v4489_v56, 8.507059e+37  ;;  %vm14255_vm7 = vmor %vm4485_vm5, %vm4486_vm4  ;;  %v2369_v5 = vpop.f32.mrf.mxu2  ;;  %v16080_v56 = vld [vmem:[#allocation164_spill] sm:$0xff] }
 0x48b   :  { %v14239_v51 = vpop.eup %8399  ;;  %v4492_v43 = vor.u32 1.1754944e-38, %v4491_v23  ;;  %v14248_v24 = vadd.f32 1.0, %v8394_v55  ;;  %v14251_v37 = vmul.f32 %v4478_v29, %v16018_v61  ;;  %vm4530_vm8 = vweird.f32 %v14087_v63  ;;  %v2458_v18 = vpop.f32.mrf.mxu3 }
 0x48c   :  { %v4534_v7 = vand.u32 2147483647, %v14087_v63  ;;  %v4536_v52 = vand.u32 2147483648, %v14087_v63  ;;  %v14262_v35 = vadd.f32 1.0, %v8396_v27  ;;  %v4488_v61 = vsel %vm14255_vm7, %v14106_v62, %v4484_v15  ;;  %v2193_v54 = vpop.f32.mrf.mxu0  ;;  %v2282_v47 = vpop.f32.mrf.mxu1  ;;  %v16081_v27 = vld [vmem:[#allocation90_spill] sm:$0xff]  ;;  %v16082_v15 = vld [vmem:[#allocation93_spill] sm:$0xff] }
 0x48d   :  { %v4541_v58 = vmul.f32 %v14235_v12, %v14154_v34  ;;  %v7428_v6 = vmul.f32 -1.442695, %v16079_v14  ;;  %v2459_v13 = vadd.f32 %v2458_v18, %v2369_v5  ;;  %v4528_v50 = vmul.f32 %v14185_v26, %v4527_v41  ;;  %5711 = vmatmul.bf16.gmra.mxu0 %v16081_v27  ;;  %v7605_v5 = vld [vmem:[%s14897_s2 + $0x148] sm:$0xf0] }
 0x48e   :  { %v4586_v30 = vmul.f32 %v14239_v51, %v14167_v16  ;;  %v7431_v23 = vmul.f32 -1.442695, %v16080_v56  ;;  %v14275_v55 = vpop.eup %8401  ;;  %v4551_v62 = vand.u32 2147483648, %v14154_v34  ;;  %8405 = vrcp.f32 %v14248_v24  ;;  %5800 = vmatmul.bf16.gmra.mxu1 %v16082_v15 }
 0x48f   :  { %v5134_v8 = vmul.f32 %v5006_v48, %v2459_v13  ;;  %v2283_v29 = vadd.f32 %v2282_v47, %v2193_v54  ;;  %v4493_v60 = vsel %vm14244_vm6, %v4492_v43, %v4488_v61  ;;  %vm4531_vm9 = vweird.f32 %v14185_v26  ;;  %v16085_v54 = vld [vmem:[#allocation106_spill] sm:$0xff]  ;;  %v16086_v47 = vld [vmem:[#allocation157_spill] sm:$0xff] }
 0x490   :  { %v8404_v41 = vpop.eup %8403  ;;  %vm14284_vm10 = vcmp.eq.f32.partialorder %v4534_v7, 8.507059e+37  ;;  %8407 = vrcp.f32 %v14262_v35  ;;  %v4542_v18 = vsub.f32 1.0, %v4541_v58  ;;  %v4596_v48 = vand.u32 2147483648, %v14167_v16  ;;  %5889 = vmatmul.bf16.gmra.mxu2 %v16085_v54  ;;  %vm14315_vm13 = vmor %vm4530_vm8, %vm4531_vm9 }
 0x491   :  { %8409 = vpow2.f32 %v7428_v6  ;;  %v5137_v13 = vmul.f32 %v5009_v33, %v2283_v29  ;;  %5978 = vmatmul.bf16.gmra.mxu3 %v16086_v47  ;;  %v4529_v3 = vadd.f32 %v14185_v26, %v4528_v50  ;;  %v4587_v43 = vsub.f32 1.0, %v4586_v30  ;;  %v16088_v29 = vld [vmem:[#allocation67_spill] sm:$0xff] }
 0x492   :  { %v4601_v7 = vmul.f32 %v14275_v55, %v14212_v49  ;;  %8411 = vpow2.f32 %v7431_v23  ;;  %v4537_v61 = vor.u32 1.1754944e-38, %v4536_v52  ;;  %vm4545_vm11 = vweird.f32 %v14154_v34  ;;  %v2371_v52 = vpop.f32.mrf.mxu2 }
 0x493   :  { %v14296_v36 = vor.u32 1.1754944e-38, %v4551_v62  ;;  %v14298_v58 = vadd.f32 1.0, %v8404_v41  ;;  %v14300_v6 = vpack.c.bf16 %v5137_v13, %v5133_v19  ;;  %v14303_v33 = vmul.f32 %v4493_v60, %v16028_v10  ;;  %v2460_v47 = vpop.f32.mrf.mxu3 }
 0x494   :  { %vm4590_vm12 = vweird.f32 %v14167_v16  ;;  %v4594_v50 = vand.u32 2147483647, %v14167_v16  ;;  %v7432_v23 = vmul.f32 -1.442695, %v16088_v29  ;;  %v14309_v54 = vpop.eup %8405  ;;  %v4543_v10 = vmul.f32 %v14235_v12, %v4542_v18  ;;  %v2196_v27 = vpop.f32.mrf.mxu0  ;;  %v16091_v18 = vld [vmem:[#allocation79_spill] sm:$0xff] }
 0x495   :  { %16087 = vst [vmem:[#allocation38_spill] sm:$0xff] %v14300_v6  ;;  %vm4546_vm14 = vweird.f32 %v14235_v12  ;;  %v14321_v62 = vor.u32 1.1754944e-38, %v4596_v48  ;;  %v2461_v41 = vadd.f32 %v2460_v47, %v2371_v52  ;;  %v4533_v13 = vsel %vm14315_vm13, %v14185_v26, %v4529_v3  ;;  %v2285_v2 = vpop.f32.mrf.mxu1  ;;  %v16100_v3 = vld [vmem:[#allocation80_spill] sm:$0xff] }
 0x496   :  { %v14323_v60 = vpop.eup %8407  ;;  %v4588_v30 = vmul.f32 %v14239_v51, %v4587_v43  ;;  %v4602_v63 = vsub.f32 1.0, %v4601_v7  ;;  %v4611_v15 = vand.u32 2147483648, %v14212_v49  ;;  %8413 = vrcp.f32 %v14298_v58  ;;  %vm14384_vm3 = vmor %vm4545_vm11, %vm4546_vm14 }
 0x497   :  { %v8410_v22 = vpop.eup %8409  ;;  %v7435_v48 = vmul.f32 -1.442695, %v16091_v18  ;;  %v5138_v47 = vmul.f32 %v14242_v39, %v2461_v41  ;;  %v2286_v52 = vadd.f32 %v2285_v2, %v2196_v27  ;;  %vm4591_vm15 = vweird.f32 %v14239_v51  ;;  %v7897_v27 = vld [vmem:[%s14897_s2 + $0x144] sm:$0xf] }
 0x498   :  { %v8412_v44 = vpop.eup %8411  ;;  %v4646_v26 = vmul.f32 %v14309_v54, %v14248_v24  ;;  %8415 = vpow2.f32 %v7432_v23  ;;  %v4538_v43 = vsel %vm14284_vm10, %v4537_v61, %v4533_v13  ;;  %v14340_v7 = vadd.f32 %v14235_v12, %v4543_v10  ;;  %v7913_v61 = vld [vmem:[%s14897_s2 + $0x1c4] sm:$0xf]  ;;  %vm14403_vm4 = vmor %vm4590_vm12, %vm4591_vm15 }
 0x499   :  { %v16092_v19 = vand.u32 2147483647, %v14154_v34  ;;  %v14349_v2 = vmul.f32 %v14251_v37, %v2286_v52  ;;  %v14360_v23 = vpack.c.bf16 %v5138_v47, %v5134_v8  ;;  %v14363_v10 = vadd.f32 %v14239_v51, %v4588_v30  ;;  %v7669_v8 = vld [vmem:[%s14897_s2 + $0x1c8] sm:$0xf0] }
 0x49a   :  { %vm14365_vm1 = vcmp.eq.f32.partialorder %v4594_v50, 8.507059e+37  ;;  %vm4605_vm2 = vweird.f32 %v14212_v49  ;;  %v4661_v41 = vmul.f32 %v14323_v60, %v14262_v35  ;;  %v14372_v13 = vadd.f32 1.0, %v8410_v22 }
 0x49b   :  { %vm14344_vm0 = vcmp.eq.f32.partialorder %v16092_v19, 8.507059e+37  ;;  %16095 = vst [vmem:[#allocation39_spill] sm:$0xff] %v14360_v23  ;;  %v7608_v52 = vor.u32 %v7897_v27, %v7605_v5  ;;  %v4603_v47 = vmul.f32 %v14275_v55, %v4602_v63  ;;  %v14378_v30 = vadd.f32 1.0, %v8412_v44  ;;  %v2374_v63 = vpop.f32.mrf.mxu2  ;;  %v2463_v44 = vpop.f32.mrf.mxu3  ;;  %v16110_v23 = vld [vmem:[#allocation9_spill] sm:$0xff] }
 0x49c   :  { %8417 = vpow2.f32 %v7435_v48  ;;  %v7672_v50 = vor.u32 %v7913_v61, %v7669_v8  ;;  %v14388_v22 = vor.u32 1.1754944e-38, %v4611_v15  ;;  %v4647_v27 = vsub.f32 1.0, %v4646_v26  ;;  %v14392_v48 = vpop.eup %8413  ;;  %v16108_v15 = vld [vmem:[#allocation51_spill] sm:$0xff] }
 0x49d   :  { %v4656_v5 = vand.u32 2147483648, %v14248_v24  ;;  %v7436_v0 = vmul.f32 -1.442695, %v16100_v3  ;;  %6220 = vmatpush.bf16.msrb.mxu2 %v7608_v52  ;;  %v5017_v61 = vmul.f32 %v4538_v43, %v16031_v21  ;;  %v4548_v34 = vsel %vm14384_vm3, %v14235_v12, %v14340_v7  ;;  %v16106_v7 = vld [vmem:[#allocation75_spill] sm:$0xff]  ;;  %v2287_v19 = vpop.f32.mrf.mxu1 }
 0x49e   :  { %vm4606_vm5 = vweird.f32 %v14275_v55  ;;  %v2464_v26 = vadd.f32 %v2463_v44, %v2374_v63  ;;  %6309 = vmatpush.bf16.msrb.mxu3 %v7672_v50  ;;  %v8416_v52 = vpop.eup %8415  ;;  %v4593_v21 = vsel %vm14403_vm4, %v14239_v51, %v14363_v10  ;;  %v16103_v12 = vand.u32 2147483647, %v14212_v49  ;;  %v2198_v50 = vpop.f32.mrf.mxu0  ;;  %v16107_v44 = vld [vmem:[#allocation45_spill] sm:$0xff]  ;;  %5805 = vmatmul.bf16.gmra.mxu1 %v16108_v15 }
 0x49f   :  { %vm4650_vm7 = vweird.f32 %v14248_v24  ;;  %v4662_v16 = vsub.f32 1.0, %v4661_v41  ;;  %8419 = vrcp.f32 %v14372_v13  ;;  %v7439_v8 = vmul.f32 -1.442695, %v16106_v7  ;;  %5716 = vmatmul.bf16.gmra.mxu0 %v16107_v44  ;;  %v7865_v41 = vld [vmem:[%s14897_s2 + $0x44] sm:$0xf]  ;;  %vm14459_vm9 = vmor %vm4605_vm2, %vm4606_vm5 }
 0x4a0   :  { %vm14414_vm6 = vcmp.eq.f32.partialorder %v16103_v12, 8.507059e+37  ;;  %v4604_v63 = vadd.f32 %v14275_v55, %v4603_v47  ;;  %8421 = vrcp.f32 %v14378_v30  ;;  %v14424_v51 = vmul.f32 %v14303_v33, %v2464_v26  ;;  %v7477_v12 = vld [vmem:[%s14897_s2 + $0x48] sm:$0xf0]  ;;  %v7881_v47 = vld [vmem:[%s14897_s2 + $0xc4] sm:$0xf]  ;;  %5894 = vmatmul.bf16.gmra.mxu2 %v16109_v11 }
 0x4a1   :  { %v2288_v10 = vadd.f32 %v2287_v19, %v2198_v50  ;;  %v4648_v33 = vmul.f32 %v14309_v54, %v4647_v27  ;;  %v4706_v26 = vmul.f32 %v14392_v48, %v14298_v58  ;;  %8423 = vpow2.f32 %v7436_v0  ;;  %v7541_v19 = vld [vmem:[%s14897_s2 + $0xc8] sm:$0xf0]  ;;  %5983 = vmatmul.bf16.gmra.mxu3 %v16110_v23 }
 0x4a2   :  { %v7480_v50 = vor.u32 %v7865_v41, %v7477_v12  ;;  %v8418_v15 = vpop.eup %8417  ;;  %v4657_v44 = vor.u32 1.1754944e-38, %v4656_v5  ;;  %v14443_v32 = vadd.f32 1.0, %v8416_v52  ;;  %v7544_v6 = vor.u32 %v7881_v47, %v7541_v19 }
 0x4a3   :  { %v5145_v45 = vmul.f32 %v5017_v61, %v2288_v10  ;;  %v4553_v27 = vsel %vm14344_vm0, %v14296_v36, %v4548_v34  ;;  %v4663_v0 = vmul.f32 %v14323_v60, %v4662_v16  ;;  %vm4665_vm8 = vweird.f32 %v14262_v35  ;;  %v2465_v16 = vpop.f32.mrf.mxu3 }
 0x4a4   :  { %8425 = vpow2.f32 %v7439_v8  ;;  %6042 = vmatpush.bf16.msrb.mxu0 %v7480_v50  ;;  %v4598_v5 = vsel %vm14365_vm1, %v14321_v62, %v4593_v21  ;;  %vm4651_vm10 = vweird.f32 %v14309_v54  ;;  %v4669_v36 = vand.u32 2147483647, %v14262_v35  ;;  %6131 = vmatpush.bf16.msrb.mxu1 %v7544_v6  ;;  %v2376_v21 = vpop.f32.mrf.mxu2 }
 0x4a5   :  { %v14466_v39 = vpack.c.bf16 %v5145_v45, %v14349_v2  ;;  %v14468_v34 = vpop.eup %8419  ;;  %v4608_v62 = vsel %vm14459_vm9, %v14275_v55, %v4604_v63  ;;  %v4649_v49 = vadd.f32 %v14309_v54, %v4648_v33  ;;  %v4707_v37 = vsub.f32 1.0, %v4706_v26  ;;  %v16113_v45 = vld [vmem:[#allocation76_spill] sm:$0xff]  ;;  %v2290_v47 = vpop.f32.mrf.mxu1  ;;  %vm14492_vm12 = vmor %vm4650_vm7, %vm4651_vm10 }
 0x4a6   :  { %v14474_v52 = vadd.f32 1.0, %v8418_v15  ;;  %v14476_v8 = vpop.eup %8421  ;;  %v5018_v6 = vmul.f32 %v4553_v27, %v16051_v17  ;;  %8427 = vrcp.f32 %v14443_v32  ;;  %v7440_v2 = vmul.f32 -1.442695, %v16113_v45  ;;  %v2201_v15 = vpop.f32.mrf.mxu0 }
 0x4a7   :  { %v2466_v10 = vadd.f32 %v2465_v16, %v2376_v21  ;;  %v8424_v41 = vpop.eup %8423  ;;  %v5021_v12 = vmul.f32 %v4598_v5, %v16052_v59  ;;  %v4664_v55 = vadd.f32 %v14323_v60, %v4663_v0  ;;  %vm4666_vm11 = vweird.f32 %v14323_v60 }
 0x4a8   :  { %v4671_v63 = vand.u32 2147483648, %v14262_v35  ;;  %v4613_v17 = vsel %vm14414_vm6, %v14388_v22, %v4608_v62  ;;  %v4721_v59 = vmul.f32 %v14468_v34, %v14372_v13  ;;  %v2291_v50 = vadd.f32 %v2290_v47, %v2201_v15  ;;  %vm14507_vm13 = vmor %vm4665_vm8, %vm4666_vm11 }
 0x4a9   :  { %v5146_v26 = vmul.f32 %v5018_v6, %v2466_v10  ;;  %v4653_v27 = vsel %vm14492_vm12, %v14309_v54, %v4649_v49  ;;  %v4708_v22 = vmul.f32 %v14392_v48, %v4707_v37  ;;  %v4766_v43 = vmul.f32 %v14476_v8, %v14378_v30 }
 0x4aa   :  { %v8426_v19 = vpop.eup %8425  ;;  %8429 = vrcp.f32 %v14474_v52  ;;  %v14511_v5 = vadd.f32 1.0, %v8424_v41  ;;  %v5149_v61 = vmul.f32 %v5021_v12, %v2291_v50  ;;  %v16118_v54 = vand.u32 2147483647, %v14248_v24 }
 0x4ab   :  { %8431 = vpow2.f32 %v7440_v2  ;;  %v14514_v62 = vpack.c.bf16 %v5146_v26, %v14424_v51  ;;  %v4668_v49 = vsel %vm14507_vm13, %v14323_v60, %v4664_v55  ;;  %vm4670_vm15 = vcmp.eq.f32.partialorder %v4669_v36, 8.507059e+37  ;;  %v2468_v12 = vpop.f32.mrf.mxu3 }
 0x4ac   :  { %vm4655_vm14 = vcmp.eq.f32.partialorder %v16118_v54, 8.507059e+37  ;;  %v4714_v35 = vand.u32 2147483647, %v14298_v58  ;;  %v14522_v37 = vpop.eup %8427  ;;  %v4672_v16 = vor.u32 1.1754944e-38, %v4671_v63  ;;  %v4722_v6 = vsub.f32 1.0, %v4721_v59  ;;  %v2379_v41 = vpop.f32.mrf.mxu2 }
 0x4ad   :  { %v4658_v21 = vsel %vm4655_vm14, %v4657_v44, %v4653_v27  ;;  %v14524_v2 = vadd.f32 1.0, %v8426_v19  ;;  %v5022_v51 = vmul.f32 %v4613_v17, %v16055_v53  ;;  %vm4711_vm0 = vweird.f32 %v14392_v48  ;;  %v2292_v17 = vpop.f32.mrf.mxu1  ;;  %v16121_v19 = vld [vmem:[#allocation47_spill] sm:$0xff] }
 0x4ae   :  { %v4716_v24 = vand.u32 2147483648, %v14298_v58  ;;  %v4767_v10 = vsub.f32 1.0, %v4766_v43  ;;  %v4673_v60 = vsel %vm4670_vm15, %v4672_v16, %v4668_v49  ;;  %v4709_v36 = vadd.f32 %v14392_v48, %v4708_v22  ;;  %v2203_v47 = vpop.f32.mrf.mxu0 }
 0x4af   :  { %8433 = vrcp.f32 %v14511_v5  ;;  %v2469_v55 = vadd.f32 %v2468_v12, %v2379_v41  ;;  %v5025_v63 = vmul.f32 %v4658_v21, %v16058_v4  ;;  %vm4710_vm1 = vweird.f32 %v14298_v58  ;;  %5721 = vmatmul.bf16.gmra.mxu0 %v16121_v19  ;;  %v16122_v4 = vld [vmem:[#allocation160_spill] sm:$0xff]  ;;  %v16125_v21 = vld [vmem:[#allocation10_spill] sm:$0xff] }
 0x4b0   :  { %v14531_v44 = vpop.eup %8429  ;;  %vm14535_vm2 = vcmp.eq.f32.partialorder %v4714_v35, 8.507059e+37  ;;  %v4781_v15 = vmul.f32 %v14522_v37, %v14443_v32  ;;  %v4723_v59 = vmul.f32 %v14468_v34, %v4722_v6  ;;  %8435 = vrcp.f32 %v14524_v2  ;;  %5810 = vmatmul.bf16.gmra.mxu1 %v16122_v4  ;;  %vm14548_vm3 = vmor %vm4710_vm1, %vm4711_vm0  ;;  %5899 = vmatmul.bf16.gmra.mxu2 %v16125_v21 }
 0x4b1   :  { %v8432_v33 = vpop.eup %8431  ;;  %v5150_v26 = vmul.f32 %v5022_v51, %v2469_v55  ;;  %v2293_v50 = vadd.f32 %v2292_v17, %v2203_v47  ;;  %v5026_v58 = vmul.f32 %v4673_v60, %v16059_v25  ;;  %v4717_v22 = vor.u32 1.1754944e-38, %v4716_v24  ;;  %5988 = vmatmul.bf16.gmra.mxu3 %v13668_v20 }
 0x4b2   :  { %v4729_v43 = vand.u32 2147483647, %v14372_v13  ;;  %v4768_v0 = vmul.f32 %v14476_v8, %v4767_v10  ;;  %v4713_v54 = vsel %vm14548_vm3, %v14392_v48, %v4709_v36  ;;  %v4731_v49 = vand.u32 2147483648, %v14372_v13 }
 0x4b3   :  { %v4826_v25 = vmul.f32 %v14531_v44, %v14474_v52  ;;  %v5153_v35 = vmul.f32 %v5025_v63, %v2293_v50  ;;  %vm4726_vm4 = vweird.f32 %v14468_v34  ;;  %v4774_v16 = vand.u32 2147483647, %v14378_v30  ;;  %v2470_v63 = vpop.f32.mrf.mxu3 }
 0x4b4   :  { %v4782_v6 = vsub.f32 1.0, %v4781_v15  ;;  %v14564_v51 = vadd.f32 1.0, %v8432_v33  ;;  %v4724_v48 = vadd.f32 %v14468_v34, %v4723_v59  ;;  %vm4725_vm5 = vweird.f32 %v14372_v13  ;;  %v2381_v55 = vpop.f32.mrf.mxu2 }
 0x4b5   :  { %v14566_v24 = vpop.eup %8433  ;;  %vm4771_vm6 = vweird.f32 %v14476_v8  ;;  %v14571_v10 = vpack.c.bf16 %v5153_v35, %v5149_v61  ;;  %v4718_v41 = vsel %vm14535_vm2, %v4717_v22, %v4713_v54  ;;  %vm14575_vm7 = vcmp.eq.f32.partialorder %v4729_v43, 8.507059e+37  ;;  %vm14585_vm8 = vmor %vm4725_vm5, %vm4726_vm4  ;;  %v2295_v22 = vpop.f32.mrf.mxu1  ;;  %v7911_v35 = vld [vmem:[%s14897_s2 + $0x1b4] sm:$0xf] }
 0x4b6   :  { %v4769_v60 = vadd.f32 %v14476_v8, %v4768_v0  ;;  %v4776_v36 = vand.u32 2147483648, %v14378_v30  ;;  %v14581_v15 = vpop.eup %8435  ;;  %v4732_v61 = vor.u32 1.1754944e-38, %v4731_v49  ;;  %vm4770_vm9 = vweird.f32 %v14378_v30  ;;  %v2206_v27 = vpop.f32.mrf.mxu0  ;;  %v7895_v49 = vld [vmem:[%s14897_s2 + $0x134] sm:$0xf] }
 0x4b7   :  { %v4827_v53 = vsub.f32 1.0, %v4826_v25  ;;  %v2471_v47 = vadd.f32 %v2470_v63, %v2381_v55  ;;  %vm14590_vm10 = vmor %vm4770_vm9, %vm4771_vm6  ;;  %vm14594_vm11 = vcmp.eq.f32.partialorder %v4774_v16, 8.507059e+37  ;;  %v4783_v59 = vmul.f32 %v14522_v37, %v4782_v6  ;;  %v7597_v25 = vld [vmem:[%s14897_s2 + $0x138] sm:$0xf0] }
 0x4b8   :  { %v4841_v50 = vmul.f32 %v14566_v24, %v14511_v5  ;;  %8437 = vrcp.f32 %v14564_v51  ;;  %v5029_v30 = vmul.f32 %v4718_v41, %v16074_v42  ;;  %v4728_v43 = vsel %vm14585_vm8, %v14468_v34, %v4724_v48  ;;  %v7661_v6 = vld [vmem:[%s14897_s2 + $0x1b8] sm:$0xf0] }
 0x4b9   :  { %v5154_v0 = vmul.f32 %v5026_v58, %v2471_v47  ;;  %v2296_v54 = vadd.f32 %v2295_v22, %v2206_v27  ;;  %v4773_v42 = vsel %vm14590_vm10, %v14476_v8, %v4769_v60  ;;  %v4777_v16 = vor.u32 1.1754944e-38, %v4776_v36 }
 0x4ba   :  { %v4886_v34 = vmul.f32 %v14581_v15, %v14524_v2  ;;  %v7600_v58 = vor.u32 %v7895_v49, %v7597_v25  ;;  %v4828_v48 = vmul.f32 %v14531_v44, %v4827_v53  ;;  %v7664_v55 = vor.u32 %v7911_v35, %v7661_v6 }
 0x4bb   :  { %v5157_v41 = vmul.f32 %v5029_v30, %v2296_v54  ;;  %v14624_v63 = vpack.c.bf16 %v5154_v0, %v5150_v26  ;;  %v4733_v13 = vsel %vm14575_vm7, %v4732_v61, %v4728_v43  ;;  %v4784_v8 = vadd.f32 %v14522_v37, %v4783_v59  ;;  %v2473_v59 = vpop.f32.mrf.mxu3 }
 0x4bc   :  { %vm4786_vm12 = vweird.f32 %v14522_v37  ;;  %v4842_v60 = vsub.f32 1.0, %v4841_v50  ;;  %6221 = vmatpush.bf16.msrb.mxu2 %v7600_v58  ;;  %v4778_v36 = vsel %vm14594_vm11, %v4777_v16, %v4773_v42  ;;  %vm4785_vm13 = vweird.f32 %v14443_v32  ;;  %6310 = vmatpush.bf16.msrb.mxu3 %v7664_v55  ;;  %v2384_v17 = vpop.f32.mrf.mxu2  ;;  %v16136_v42 = vld [vmem:[#allocation87_spill] sm:$0xff]  ;;  %v7469_v55 = vld [vmem:[%s14897_s2 + $0x38] sm:$0xf0] }
 0x4bd   :  { %v4789_v26 = vand.u32 2147483647, %v14443_v32  ;;  %v4791_v47 = vand.u32 2147483648, %v14443_v32  ;;  %v4836_v12 = vand.u32 2147483648, %v14474_v52  ;;  %v4887_v61 = vsub.f32 1.0, %v4886_v34  ;;  %vm14639_vm14 = vmor %vm4785_vm13, %vm4786_vm12  ;;  %v2297_v0 = vpop.f32.mrf.mxu1 }
 0x4be   :  { %v14633_v53 = vpop.eup %8437  ;;  %v5030_v50 = vmul.f32 %v4733_v13, %v16079_v14  ;;  %v4829_v33 = vadd.f32 %v14531_v44, %v4828_v48  ;;  %vm4831_vm15 = vweird.f32 %v14531_v44  ;;  %v2474_v22 = vadd.f32 %v2473_v59, %v2384_v17  ;;  %v2208_v14 = vpop.f32.mrf.mxu0  ;;  %v7863_v48 = vld [vmem:[%s14897_s2 + $0x34] sm:$0xf] }
 0x4bf   :  { %v5033_v30 = vmul.f32 %v4778_v36, %v16080_v56  ;;  %v4788_v32 = vsel %vm14639_vm14, %v14522_v37, %v4784_v8  ;;  %vm4830_vm0 = vweird.f32 %v14474_v52  ;;  %v4843_v43 = vmul.f32 %v14566_v24, %v4842_v60  ;;  %5726 = vmatmul.bf16.gmra.mxu0 %v16136_v42  ;;  %v16137_v56 = vld [vmem:[#allocation52_spill] sm:$0xff]  ;;  %v7879_v13 = vld [vmem:[%s14897_s2 + $0xb4] sm:$0xf] }
 0x4c0   :  { %v4834_v54 = vand.u32 2147483647, %v14474_v52  ;;  %v4901_v49 = vmul.f32 %v14633_v53, %v14564_v51  ;;  %v5158_v25 = vmul.f32 %v5030_v50, %v2474_v22  ;;  %v2298_v35 = vadd.f32 %v2297_v0, %v2208_v14  ;;  %5815 = vmatmul.bf16.gmra.mxu1 %v16137_v56  ;;  %vm14658_vm2 = vmor %vm4830_vm0, %vm4831_vm15  ;;  %5904 = vmatmul.bf16.gmra.mxu2 %v13760_v57  ;;  %v7533_v36 = vld [vmem:[%s14897_s2 + $0xb8] sm:$0xf0] }
 0x4c1   :  { %vm4790_vm1 = vcmp.eq.f32.partialorder %v4789_v26, 8.507059e+37  ;;  %v4792_v16 = vor.u32 1.1754944e-38, %v4791_v47  ;;  %v4837_v34 = vor.u32 1.1754944e-38, %v4836_v12  ;;  %v4888_v52 = vmul.f32 %v14581_v15, %v4887_v61  ;;  %5993 = vmatmul.bf16.gmra.mxu3 %v13819_v1 }
 0x4c2   :  { %v4833_v58 = vsel %vm14658_vm2, %v14531_v44, %v4829_v33  ;;  %vm4845_vm3 = vweird.f32 %v14511_v5  ;;  %v5161_v6 = vmul.f32 %v5033_v30, %v2298_v35  ;;  %v4844_v8 = vadd.f32 %v14566_v24, %v4843_v43 }
 0x4c3   :  { %v4793_v44 = vsel %vm4790_vm1, %v4792_v16, %v4788_v32  ;;  %vm4846_vm4 = vweird.f32 %v14566_v24  ;;  %v7472_v60 = vor.u32 %v7863_v48, %v7469_v55  ;;  %vm4835_vm5 = vcmp.eq.f32.partialorder %v4834_v54, 8.507059e+37  ;;  %v2475_v27 = vpop.f32.mrf.mxu3 }
 0x4c4   :  { %v4902_v26 = vsub.f32 1.0, %v4901_v49  ;;  %v7536_v47 = vor.u32 %v7879_v13, %v7533_v36  ;;  %v14683_v12 = vpack.c.bf16 %v5161_v6, %v5157_v41  ;;  %v4838_v61 = vsel %vm4835_vm5, %v4837_v34, %v4833_v58  ;;  %v2386_v50 = vpop.f32.mrf.mxu2  ;;  %vm14693_vm7 = vmor %vm4845_vm3, %vm4846_vm4 }
 0x4c5   :  { %v4851_v17 = vand.u32 2147483648, %v14511_v5  ;;  %v4889_v59 = vadd.f32 %v14581_v15, %v4888_v52  ;;  %vm4891_vm6 = vweird.f32 %v14581_v15  ;;  %6043 = vmatpush.bf16.msrb.mxu0 %v7472_v60  ;;  %v5034_v33 = vmul.f32 %v4793_v44, %v16088_v29  ;;  %v2300_v0 = vpop.f32.mrf.mxu1 }
 0x4c6   :  { %v4849_v41 = vand.u32 2147483647, %v14511_v5  ;;  %v4896_v30 = vand.u32 2147483648, %v14524_v2  ;;  %v2476_v32 = vadd.f32 %v2475_v27, %v2386_v50  ;;  %6132 = vmatpush.bf16.msrb.mxu1 %v7536_v47  ;;  %v4848_v43 = vsel %vm14693_vm7, %v14566_v24, %v4844_v8  ;;  %v2211_v14 = vpop.f32.mrf.mxu0 }
 0x4c7   :  { %vm4890_vm8 = vweird.f32 %v14524_v2  ;;  %v4894_v29 = vand.u32 2147483647, %v14524_v2  ;;  %v5037_v54 = vmul.f32 %v4838_v61, %v16091_v18  ;;  %v4903_v5 = vmul.f32 %v14633_v53, %v4902_v26  ;;  %v16142_v61 = vld [vmem:[#allocation91_spill] sm:$0xff] }
 0x4c8   :  { %vm4892_vm9 = vmor %vm4890_vm8, %vm4891_vm6  ;;  %v5162_v49 = vmul.f32 %v5034_v33, %v2476_v32  ;;  %v2301_v35 = vadd.f32 %v2300_v0, %v2211_v14  ;;  %v4852_v16 = vor.u32 1.1754944e-38, %v4851_v17  ;;  %vm4850_vm10 = vcmp.eq.f32.partialorder %v4849_v41, 8.507059e+37  ;;  %v16143_v17 = vld [vmem:[#allocation57_spill] sm:$0xff] }
 0x4c9   :  { %v4893_v37 = vsel %vm4892_vm9, %v14581_v15, %v4889_v59  ;;  %v4897_v24 = vor.u32 1.1754944e-38, %v4896_v30  ;;  %vm4895_vm11 = vcmp.eq.f32.partialorder %v4894_v29, 8.507059e+37  ;;  %v4904_v18 = vadd.f32 %v14633_v53, %v4903_v5  ;;  %v7893_v32 = vld [vmem:[%s14897_s2 + $0x124] sm:$0xf] }
 0x4ca   :  { %v5165_v34 = vmul.f32 %v5037_v54, %v2301_v35  ;;  %v14709_v52 = vpack.c.bf16 %v5162_v49, %v5158_v25  ;;  %v4853_v2 = vsel %vm4850_vm10, %v4852_v16, %v4848_v43  ;;  %vm4906_vm12 = vweird.f32 %v14633_v53  ;;  %v7589_v43 = vld [vmem:[%s14897_s2 + $0x128] sm:$0xf0]  ;;  %v7909_v29 = vld [vmem:[%s14897_s2 + $0x1a4] sm:$0xf] }
 0x4cb   :  { %v4898_v58 = vsel %vm4895_vm11, %v4897_v24, %v4893_v37  ;;  %v4911_v6 = vand.u32 2147483648, %v14564_v51  ;;  %v2478_v55 = vpop.f32.mrf.mxu3  ;;  %v5038_v13 = vmul.f32 %v4853_v2, %v16100_v3  ;;  %vm4905_vm13 = vweird.f32 %v14564_v51  ;;  %v16144_v2 = vld [vmem:[#allocation58_spill] sm:$0xff] }
 0x4cc   :  { %v2389_v48 = vpop.f32.mrf.mxu2  ;;  %v4909_v15 = vand.u32 2147483647, %v14564_v51  ;;  %v5041_v25 = vmul.f32 %v4898_v58, %v16106_v7  ;;  %vm4907_vm14 = vmor %vm4905_vm13, %vm4906_vm12  ;;  %v7592_v0 = vor.u32 %v7893_v32, %v7589_v43  ;;  %v16145_v58 = vld [vmem:[#allocation95_spill] sm:$0xff] }
 0x4cd   :  { %v2479_v44 = vadd.f32 %v2478_v55, %v2389_v48  ;;  %v2302_v60 = vpop.f32.mrf.mxu1  ;;  %v4908_v36 = vsel %vm4907_vm14, %v14633_v53, %v4904_v18  ;;  %v4912_v59 = vor.u32 1.1754944e-38, %v4911_v6  ;;  %v7861_v18 = vld [vmem:[%s14897_s2 + $0x24] sm:$0xf]  ;;  %v7461_v6 = vld [vmem:[%s14897_s2 + $0x28] sm:$0xf0] }
 0x4ce   :  { %v2213_v8 = vpop.f32.mrf.mxu0  ;;  %vm4910_vm15 = vcmp.eq.f32.partialorder %v4909_v15, 8.507059e+37  ;;  %6222 = vmatpush.bf16.msrb.mxu2 %v7592_v0  ;;  %v7464_v48 = vor.u32 %v7861_v18, %v7461_v6  ;;  %v7877_v55 = vld [vmem:[%s14897_s2 + $0xa4] sm:$0xf] }
 0x4cf   :  { %v5166_v26 = vmul.f32 %v5038_v13, %v2479_v44  ;;  %v2303_v47 = vadd.f32 %v2302_v60, %v2213_v8  ;;  %5731 = vmatmul.bf16.gmra.mxu0 %v16142_v61  ;;  %v4913_v51 = vsel %vm4910_vm15, %v4912_v59, %v4908_v36  ;;  %v7525_v13 = vld [vmem:[%s14897_s2 + $0xa8] sm:$0xf0] }
 0x4d0   :  { %5820 = vmatmul.bf16.gmra.mxu1 %v16143_v17  ;;  %5909 = vmatmul.bf16.gmra.mxu2 %v13918_v28  ;;  %v5042_v53 = vmul.f32 %v4913_v51, %v16113_v45  ;;  %v7653_v45 = vld [vmem:[%s14897_s2 + $0x1a8] sm:$0xf0]  ;;  %v7528_v44 = vor.u32 %v7877_v55, %v7525_v13 }
 0x4d1   :  { %v5169_v3 = vmul.f32 %v5041_v25, %v2303_v47  ;;  %5998 = vmatmul.bf16.gmra.mxu3 %v13947_v31  ;;  %v7656_v5 = vor.u32 %v7909_v29, %v7653_v45  ;;  %6044 = vmatpush.bf16.msrb.mxu0 %v7464_v48 }
 0x4d2   :  { %6133 = vmatpush.bf16.msrb.mxu1 %v7528_v44  ;;  %v16148_v44 = vld [vmem:[#allocation97_spill] sm:$0xff] }
 0x4d3   :  { %v14723_v7 = vpack.c.bf16 %v5169_v3, %v5165_v34  ;;  %v2480_v27 = vpop.f32.mrf.mxu3  ;;  %6311 = vmatpush.bf16.msrb.mxu3 %v7656_v5  ;;  %v7891_v5 = vld [vmem:[%s14897_s2 + $0x114] sm:$0xf] }
 0x4d4   :  { %v2391_v50 = vpop.f32.mrf.mxu2 }
 0x4d5   :  { %v2481_v33 = vadd.f32 %v2480_v27, %v2391_v50  ;;  %v5781_v41 = vpop.f32.mrf.mxu1 }
 0x4d6   :  { %v5692_v22 = vpop.f32.mrf.mxu0 }
 0x4d7   :  { %v5170_v30 = vmul.f32 %v5042_v53, %v2481_v33  ;;  %v5782_v54 = vadd.f32 %v5781_v41, %v5692_v22  ;;  %v16146_v22 = vld [vmem:[#allocation61_spill] sm:$0xff] }
 0x4d8   :  { %v16147_v41 = vld [vmem:[#allocation69_spill] sm:$0xff] }
 0x4d9   :  { %v14735_v14 = vpack.c.bf16 %v5170_v30, %v5166_v26 }
 0x4db   :  { %v5959_v35 = vpop.f32.mrf.mxu3 }
 0x4dc   :  { %v5870_v49 = vpop.f32.mrf.mxu2 }
 0x4dd   :  { %v5871_v16 = vadd.f32 %v5870_v49, %v5782_v54  ;;  %v5783_v24 = vpop.f32.mrf.mxu1  ;;  %v7581_v49 = vld [vmem:[%s14897_s2 + $0x118] sm:$0xf0] }
 0x4de   :  { %v5694_v37 = vpop.f32.mrf.mxu0 }
 0x4df   :  { %v5960_v34 = vadd.f32 %v5959_v35, %v5871_v16  ;;  %5736 = vmatmul.bf16.gmra.mxu0 %v16144_v2  ;;  %v5784_v15 = vadd.f32 %v5783_v24, %v5694_v37  ;;  %v7584_v35 = vor.u32 %v7891_v5, %v7581_v49  ;;  %v7907_v16 = vld [vmem:[%s14897_s2 + $0x194] sm:$0xf]  ;;  %v7645_v37 = vld [vmem:[%s14897_s2 + $0x198] sm:$0xf0] }
 0x4e0   :  { %5825 = vmatmul.bf16.gmra.mxu1 %v16145_v58  ;;  %5914 = vmatmul.bf16.gmra.mxu2 %v14054_v9 }
 0x4e1   :  { %6590 = vst [vmem:[#allocation6] sm:$0xff] %v5960_v34  ;;  %6003 = vmatmul.bf16.gmra.mxu3 %v14104_v38  ;;  %v7648_v34 = vor.u32 %v7907_v16, %v7645_v37  ;;  %6223 = vmatpush.bf16.msrb.mxu2 %v7584_v35  ;;  %v16152_v16 = vld [vmem:[#allocation92_spill] sm:$0xff]  ;;  %v16153_v37 = vld [vmem:[#allocation94_spill] sm:$0xff] }
 0x4e3   :  { %v5961_v8 = vpop.f32.mrf.mxu3  ;;  %6312 = vmatpush.bf16.msrb.mxu3 %v7648_v34 }
 0x4e4   :  { %v5872_v25 = vpop.f32.mrf.mxu2 }
 0x4e5   :  { %v5873_v60 = vadd.f32 %v5872_v25, %v5784_v15  ;;  %v5786_v26 = vpop.f32.mrf.mxu1  ;;  %v16149_v25 = vld [vmem:[#allocation165_spill] sm:$0xff] }
 0x4e6   :  { %v5697_v36 = vpop.f32.mrf.mxu0 }
 0x4e7   :  { %v5962_v47 = vadd.f32 %v5961_v8, %v5873_v60  ;;  %v5787_v59 = vadd.f32 %v5786_v26, %v5697_v36  ;;  %v16150_v8 = vld [vmem:[#allocation38_spill] sm:$0xff]  ;;  %v16151_v60 = vld [vmem:[#allocation39_spill] sm:$0xff]  ;;  %v7453_v26 = vld [vmem:[%s14897_s2 + $0x18] sm:$0xf0] }
 0x4e8   :  { %v7859_v36 = vld [vmem:[%s14897_s2 + $0x14] sm:$0xf] }
 0x4e9   :  { %6592 = vst [vmem:[#allocation6 + $0x10] sm:$0xff] %v5962_v47  ;;  %v7456_v47 = vor.u32 %v7859_v36, %v7453_v26  ;;  %v7573_v36 = vld [vmem:[%s14897_s2 + $0x108] sm:$0xf0] }
 0x4eb   :  { %v5964_v51 = vpop.f32.mrf.mxu3  ;;  %6045 = vmatpush.bf16.msrb.mxu0 %v7456_v47  ;;  %v7905_v47 = vld [vmem:[%s14897_s2 + $0x184] sm:$0xf] }
 0x4ec   :  { %v5875_v3 = vpop.f32.mrf.mxu2 }
 0x4ed   :  { %v5876_v50 = vadd.f32 %v5875_v3, %v5787_v59  ;;  %v5788_v53 = vpop.f32.mrf.mxu1  ;;  %v7875_v59 = vld [vmem:[%s14897_s2 + $0x94] sm:$0xf]  ;;  %v7517_v3 = vld [vmem:[%s14897_s2 + $0x98] sm:$0xf0] }
 0x4ee   :  { %v5699_v27 = vpop.f32.mrf.mxu0 }
 0x4ef   :  { %v5965_v33 = vadd.f32 %v5964_v51, %v5876_v50  ;;  %5741 = vmatmul.bf16.gmra.mxu0 %v16146_v22  ;;  %v5789_v30 = vadd.f32 %v5788_v53, %v5699_v27  ;;  %v7520_v50 = vor.u32 %v7875_v59, %v7517_v3  ;;  %v7637_v59 = vld [vmem:[%s14897_s2 + $0x188] sm:$0xf0] }
 0x4f0   :  { %5830 = vmatmul.bf16.gmra.mxu1 %v16147_v41  ;;  %5919 = vmatmul.bf16.gmra.mxu2 %v14197_v46 }
 0x4f1   :  { %6594 = vst [vmem:[#allocation6 + $0x20] sm:$0xff] %v5965_v33  ;;  %6008 = vmatmul.bf16.gmra.mxu3 %v14233_v40  ;;  %6134 = vmatpush.bf16.msrb.mxu1 %v7520_v50 }
 0x4f3   :  { %v5966_v43 = vpop.f32.mrf.mxu3 }
 0x4f4   :  { %v5877_v32 = vpop.f32.mrf.mxu2 }
 0x4f5   :  { %v5878_v29 = vadd.f32 %v5877_v32, %v5789_v30  ;;  %v5791_v45 = vpop.f32.mrf.mxu1 }
 0x4f6   :  { %v5702_v0 = vpop.f32.mrf.mxu0 }
 0x4f7   :  { %v5967_v54 = vadd.f32 %v5966_v43, %v5878_v29  ;;  %v5792_v24 = vadd.f32 %v5791_v45, %v5702_v0 }
 0x4f9   :  { %6596 = vst [vmem:[#allocation6 + $0x30] sm:$0xff] %v5967_v54 }
 0x4fb   :  { %v5969_v6 = vpop.f32.mrf.mxu3 }
 0x4fc   :  { %v5880_v18 = vpop.f32.mrf.mxu2 }
 0x4fd   :  { %v5881_v48 = vadd.f32 %v5880_v18, %v5792_v24  ;;  %v5793_v13 = vpop.f32.mrf.mxu1 }
 0x4fe   :  { %v5704_v55 = vpop.f32.mrf.mxu0 }
 0x4ff   :  { %v5970_v15 = vadd.f32 %v5969_v6, %v5881_v48  ;;  %5746 = vmatmul.bf16.gmra.mxu0 %v16148_v44  ;;  %v5794_v51 = vadd.f32 %v5793_v13, %v5704_v55 }
 0x500   :  { %5835 = vmatmul.bf16.gmra.mxu1 %v16149_v25  ;;  %5924 = vmatmul.bf16.gmra.mxu2 %v16150_v8 }
 0x501   :  { %6598 = vst [vmem:[#allocation6 + $0x40] sm:$0xff] %v5970_v15  ;;  %6013 = vmatmul.bf16.gmra.mxu3 %v16151_v60  ;;  %v7889_v15 = vld [vmem:[%s14897_s2 + $0x104] sm:$0xf] }
 0x502   :  { %v7576_v26 = vor.u32 %v7889_v15, %v7573_v36 }
 0x503   :  { %v5971_v53 = vpop.f32.mrf.mxu3 }
 0x504   :  { %v5882_v27 = vpop.f32.mrf.mxu2  ;;  %6224 = vmatpush.bf16.msrb.mxu2 %v7576_v26 }
 0x505   :  { %v5883_v33 = vadd.f32 %v5882_v27, %v5794_v51  ;;  %v5796_v32 = vpop.f32.mrf.mxu1  ;;  %v7640_v51 = vor.u32 %v7905_v47, %v7637_v59 }
 0x506   :  { %v5707_v30 = vpop.f32.mrf.mxu0 }
 0x507   :  { %v5972_v43 = vadd.f32 %v5971_v53, %v5883_v33  ;;  %v5797_v29 = vadd.f32 %v5796_v32, %v5707_v30  ;;  %6313 = vmatpush.bf16.msrb.mxu3 %v7640_v51 }
 0x509   :  { %6600 = vst [vmem:[#allocation6 + $0x50] sm:$0xff] %v5972_v43  ;;  %v16154_v43 = vld [vmem:[#allocation166_spill] sm:$0xff] }
 0x50b   :  { %v5974_v45 = vpop.f32.mrf.mxu3 }
 0x50c   :  { %v5885_v0 = vpop.f32.mrf.mxu2 }
 0x50d   :  { %v5886_v54 = vadd.f32 %v5885_v0, %v5797_v29  ;;  %v5798_v49 = vpop.f32.mrf.mxu1  ;;  %v16155_v29 = vld [vmem:[#allocation98_spill] sm:$0xff]  ;;  %v7857_v0 = vld [vmem:[%s14897_s2 + $0x4] sm:$0xf] }
 0x50e   :  { %v5709_v5 = vpop.f32.mrf.mxu0 }
 0x50f   :  { %v5975_v35 = vadd.f32 %v5974_v45, %v5886_v54  ;;  %5751 = vmatmul.bf16.gmra.mxu0 %v16152_v16  ;;  %v5799_v24 = vadd.f32 %v5798_v49, %v5709_v5  ;;  %v7445_v45 = vld [vmem:[%s14897_s2 + $0x8] sm:$0xf0]  ;;  %v7873_v5 = vld [vmem:[%s14897_s2 + $0x84] sm:$0xf] }
 0x510   :  { %5840 = vmatmul.bf16.gmra.mxu1 %v16153_v37  ;;  %5929 = vmatmul.bf16.gmra.mxu2 %v14466_v39  ;;  %v7448_v54 = vor.u32 %v7857_v0, %v7445_v45  ;;  %v7509_v49 = vld [vmem:[%s14897_s2 + $0x88] sm:$0xf0]  ;;  %s8494_s2 = smov [#allocation6]  }
 0x511   :  { %6602 = vst [vmem:[#allocation6 + $0x60] sm:$0xff] %v5975_v35  ;;  %6018 = vmatmul.bf16.gmra.mxu3 %v14514_v62  ;;  %s6658_s29 = sshll.u32 %s8494_s2, 4  ;;  %s6659_s29 = int_to_ptr.vmem [resolvable:$true] %s6658_s29 }
 0x512   :  { %6046 = vmatpush.bf16.msrb.mxu0 %v7448_v54 }
 0x513   :  { %v5976_v18 = vpop.f32.mrf.mxu3 }
 0x514   :  { %v5887_v34 = vpop.f32.mrf.mxu2 }
 0x515   :  { %v5888_v6 = vadd.f32 %v5887_v34, %v5799_v24  ;;  %v5801_v55 = vpop.f32.mrf.mxu1  ;;  %v7512_v24 = vor.u32 %v7873_v5, %v7509_v49 }
 0x516   :  { %v5712_v48 = vpop.f32.mrf.mxu0 }
 0x517   :  { %v5977_v13 = vadd.f32 %v5976_v18, %v5888_v6  ;;  %v5802_v3 = vadd.f32 %v5801_v55, %v5712_v48  ;;  %6135 = vmatpush.bf16.msrb.mxu1 %v7512_v24 }
 0x519   :  { %6604 = vst [vmem:[#allocation6 + $0x70] sm:$0xff] %v5977_v13 }
 0x51b   :  { %v5979_v27 = vpop.f32.mrf.mxu3 }
 0x51c   :  { %v5890_v50 = vpop.f32.mrf.mxu2 }
 0x51d   :  { %v5891_v53 = vadd.f32 %v5890_v50, %v5802_v3  ;;  %v5803_v30 = vpop.f32.mrf.mxu1  ;;  %v16156_v50 = vld [vmem:[#allocation68_spill] sm:$0xff] }
 0x51e   :  { %v5714_v33 = vpop.f32.mrf.mxu0 }
 0x51f   :  { %v5980_v32 = vadd.f32 %v5979_v27, %v5891_v53  ;;  %5756 = vmatmul.bf16.gmra.mxu0 %v16154_v43  ;;  %v5804_v35 = vadd.f32 %v5803_v30, %v5714_v33  ;;  %v16157_v27 = vld [vmem:[#allocation99_spill] sm:$0xff] }
 0x520   :  { %5845 = vmatmul.bf16.gmra.mxu1 %v16155_v29  ;;  %5934 = vmatmul.bf16.gmra.mxu2 %v14571_v10 }
 0x521   :  { %6606 = vst [vmem:[#allocation6 + $0x80] sm:$0xff] %v5980_v32  ;;  %6023 = vmatmul.bf16.gmra.mxu3 %v14624_v63 }
 0x523   :  { %v5981_v18 = vpop.f32.mrf.mxu3 }
 0x524   :  { %v5892_v34 = vpop.f32.mrf.mxu2 }
 0x525   :  { %v5893_v6 = vadd.f32 %v5892_v34, %v5804_v35  ;;  %v5806_v55 = vpop.f32.mrf.mxu1 }
 0x526   :  { %v5717_v48 = vpop.f32.mrf.mxu0 }
 0x527   :  { %v5982_v13 = vadd.f32 %v5981_v18, %v5893_v6  ;;  %v5807_v15 = vadd.f32 %v5806_v55, %v5717_v48  ;;  %v16158_v48 = vld [vmem:[#allocation101_spill] sm:$0xff]  ;;  %v16159_v55 = vld [vmem:[#allocation70_spill] sm:$0xff] }
 0x529   :  { %6608 = vst [vmem:[#allocation6 + $0x90] sm:$0xff] %v5982_v13 }
 0x52b   :  { %v5984_v26 = vpop.f32.mrf.mxu3 }
 0x52c   :  { %v5895_v36 = vpop.f32.mrf.mxu2 }
 0x52d   :  { %v5896_v47 = vadd.f32 %v5895_v36, %v5807_v15  ;;  %v5808_v3 = vpop.f32.mrf.mxu1 }
 0x52e   :  { %v5719_v59 = vpop.f32.mrf.mxu0 }
 0x52f   :  { %v5985_v51 = vadd.f32 %v5984_v26, %v5896_v47  ;;  %5761 = vmatmul.bf16.gmra.mxu0 %v16156_v50  ;;  %v5809_v53 = vadd.f32 %v5808_v3, %v5719_v59 }
 0x530   :  { %5850 = vmatmul.bf16.gmra.mxu1 %v16157_v27  ;;  %5939 = vmatmul.bf16.gmra.mxu2 %v14683_v12 }
 0x531   :  { %6610 = vst [vmem:[#allocation6 + $0xa0] sm:$0xff] %v5985_v51  ;;  %6028 = vmatmul.bf16.gmra.mxu3 %v14709_v52 }
 0x533   :  { %v5986_v30 = vpop.f32.mrf.mxu3 }
 0x534   :  { %v5897_v33 = vpop.f32.mrf.mxu2 }
 0x535   :  { %v5898_v32 = vadd.f32 %v5897_v33, %v5809_v53  ;;  %v5811_v45 = vpop.f32.mrf.mxu1 }
 0x536   :  { %v5722_v0 = vpop.f32.mrf.mxu0 }
 0x537   :  { %v5987_v54 = vadd.f32 %v5986_v30, %v5898_v32  ;;  %v5812_v5 = vadd.f32 %v5811_v45, %v5722_v0 }
 0x539   :  { %6612 = vst [vmem:[#allocation6 + $0xb0] sm:$0xff] %v5987_v54  ;;  %v16160_v54 = vld [vmem:[#allocation77_spill] sm:$0xff] }
 0x53b   :  { %v5989_v35 = vpop.f32.mrf.mxu3 }
 0x53c   :  { %v5900_v49 = vpop.f32.mrf.mxu2 }
 0x53d   :  { %v5901_v24 = vadd.f32 %v5900_v49, %v5812_v5  ;;  %v5813_v18 = vpop.f32.mrf.mxu1  ;;  %v16161_v5 = vld [vmem:[#allocation82_spill] sm:$0xff]  ;;  %v16162_v49 = vld [vmem:[#allocation71_spill] sm:$0xff] }
 0x53e   :  { %v5724_v34 = vpop.f32.mrf.mxu0 }
 0x53f   :  { %v5990_v6 = vadd.f32 %v5989_v35, %v5901_v24  ;;  %5766 = vmatmul.bf16.gmra.mxu0 %v16158_v48  ;;  %v5814_v13 = vadd.f32 %v5813_v18, %v5724_v34  ;;  %v16163_v35 = vld [vmem:[#allocation96_spill] sm:$0xff] }
 0x540   :  { %5855 = vmatmul.bf16.gmra.mxu1 %v16159_v55  ;;  %5944 = vmatmul.bf16.gmra.mxu2 %v14723_v7 }
 0x541   :  { %6614 = vst [vmem:[#allocation6 + $0xc0] sm:$0xff] %v5990_v6  ;;  %6033 = vmatmul.bf16.gmra.mxu3 %v14735_v14 }
 0x543   :  { %v5991_v36 = vpop.f32.mrf.mxu3 }
 0x544   :  { %v5902_v15 = vpop.f32.mrf.mxu2 }
 0x545   :  { %v5903_v26 = vadd.f32 %v5902_v15, %v5814_v13  ;;  %v5816_v59 = vpop.f32.mrf.mxu1 }
 0x546   :  { %v5727_v47 = vpop.f32.mrf.mxu0 }
 0x547   :  { %v5992_v3 = vadd.f32 %v5991_v36, %v5903_v26  ;;  %v5817_v51 = vadd.f32 %v5816_v59, %v5727_v47 }
 0x549   :  { %6616 = vst [vmem:[#allocation6 + $0xd0] sm:$0xff] %v5992_v3 }
 0x54b   :  { %v5994_v33 = vpop.f32.mrf.mxu3 }
 0x54c   :  { %v5905_v53 = vpop.f32.mrf.mxu2 }
 0x54d   :  { %v5906_v30 = vadd.f32 %v5905_v53, %v5817_v51  ;;  %v5818_v0 = vpop.f32.mrf.mxu1 }
 0x54e   :  { %v5729_v32 = vpop.f32.mrf.mxu0 }
 0x54f   :  { %v5995_v45 = vadd.f32 %v5994_v33, %v5906_v30  ;;  %6047 = vmatmul.bf16.vlgmr.msrb.gmra.mxu0 %v16160_v54  ;;  %v5819_v24 = vadd.f32 %v5818_v0, %v5729_v32  ;;  %v16164_v30 = vld [vmem:[#allocation86_spill] sm:$0xff]  ;;  %v16166_v32 = vld [vmem:[#allocation100_spill] sm:$0xff] }
 0x550   :  { %6136 = vmatmul.bf16.vlgmr.msrb.gmra.mxu1 %v16161_v5  ;;  %6225 = vmatmul.bf16.vlgmr.msrb.gmra.mxu2 %v16162_v49  ;;  %v16167_v0 = vld [vmem:[#allocation102_spill] sm:$0xff] }
 0x551   :  { %6618 = vst [vmem:[#allocation6 + $0xe0] sm:$0xff] %v5995_v45  ;;  %6314 = vmatmul.bf16.vlgmr.msrb.gmra.mxu3 %v16163_v35  ;;  %v16165_v45 = vld [vmem:[#allocation83_spill] sm:$0xff] }
 0x553   :  { %v5996_v18 = vpop.f32.mrf.mxu3 }
 0x554   :  { %v5907_v34 = vpop.f32.mrf.mxu2 }
 0x555   :  { %v5908_v6 = vadd.f32 %v5907_v34, %v5819_v24  ;;  %v5821_v15 = vpop.f32.mrf.mxu1 }
 0x556   :  { %v5732_v13 = vpop.f32.mrf.mxu0 }
 0x557   :  { %v5997_v36 = vadd.f32 %v5996_v18, %v5908_v6  ;;  %v5822_v26 = vadd.f32 %v5821_v15, %v5732_v13 }
 0x559   :  { %6620 = vst [vmem:[#allocation6 + $0xf0] sm:$0xff] %v5997_v36 }
 0x55b   :  { %v5999_v59 = vpop.f32.mrf.mxu3 }
 0x55c   :  { %v5910_v47 = vpop.f32.mrf.mxu2 }
 0x55d   :  { %v5911_v3 = vadd.f32 %v5910_v47, %v5822_v26  ;;  %v5823_v53 = vpop.f32.mrf.mxu1 }
 0x55e   :  { %v5734_v51 = vpop.f32.mrf.mxu0 }
 0x55f   :  { %v6000_v33 = vadd.f32 %v5999_v59, %v5911_v3  ;;  %6052 = vmatmul.bf16.gmra.mxu0 %v16164_v30  ;;  %v5824_v54 = vadd.f32 %v5823_v53, %v5734_v51  ;;  %v16168_v3 = vld [vmem:[#allocation84_spill] sm:$0xff]  ;;  %v16170_v51 = vld [vmem:[#allocation103_spill] sm:$0xff] }
 0x560   :  { %6141 = vmatmul.bf16.gmra.mxu1 %v16165_v45  ;;  %6230 = vmatmul.bf16.gmra.mxu2 %v16166_v32  ;;  %v16171_v53 = vld [vmem:[#allocation104_spill] sm:$0xff] }
 0x561   :  { %6622 = vst [vmem:[#allocation6 + $0x100] sm:$0xff] %v6000_v33  ;;  %6319 = vmatmul.bf16.gmra.mxu3 %v16167_v0  ;;  %v16169_v33 = vld [vmem:[#allocation40_spill] sm:$0xff] }
 0x563   :  { %v6001_v49 = vpop.f32.mrf.mxu3 }
 0x564   :  { %v5912_v5 = vpop.f32.mrf.mxu2 }
 0x565   :  { %v5913_v35 = vadd.f32 %v5912_v5, %v5824_v54  ;;  %v5826_v34 = vpop.f32.mrf.mxu1 }
 0x566   :  { %v5737_v24 = vpop.f32.mrf.mxu0 }
 0x567   :  { %v6002_v18 = vadd.f32 %v6001_v49, %v5913_v35  ;;  %v5827_v6 = vadd.f32 %v5826_v34, %v5737_v24 }
 0x569   :  { %6624 = vst [vmem:[#allocation6 + $0x110] sm:$0xff] %v6002_v18 }
 0x56b   :  { %v6004_v15 = vpop.f32.mrf.mxu3 }
 0x56c   :  { %v5915_v13 = vpop.f32.mrf.mxu2 }
 0x56d   :  { %v5916_v36 = vadd.f32 %v5915_v13, %v5827_v6  ;;  %v5828_v47 = vpop.f32.mrf.mxu1 }
 0x56e   :  { %v5739_v26 = vpop.f32.mrf.mxu0 }
 0x56f   :  { %v6005_v59 = vadd.f32 %v6004_v15, %v5916_v36  ;;  %6057 = vmatmul.bf16.gmra.mxu0 %v16168_v3  ;;  %v5829_v30 = vadd.f32 %v5828_v47, %v5739_v26  ;;  %v16172_v36 = vld [vmem:[#allocation41_spill] sm:$0xff]  ;;  %v16175_v47 = vld [vmem:[#allocation78_spill] sm:$0xff] }
 0x570   :  { %6146 = vmatmul.bf16.gmra.mxu1 %v16169_v33  ;;  %6235 = vmatmul.bf16.gmra.mxu2 %v16170_v51  ;;  %v16174_v26 = vld [vmem:[#allocation105_spill] sm:$0xff] }
 0x571   :  { %6626 = vst [vmem:[#allocation6 + $0x120] sm:$0xff] %v6005_v59  ;;  %6324 = vmatmul.bf16.gmra.mxu3 %v16171_v53  ;;  %v16173_v59 = vld [vmem:[#allocation43_spill] sm:$0xff] }
 0x573   :  { %v6006_v32 = vpop.f32.mrf.mxu3 }
 0x574   :  { %v5917_v45 = vpop.f32.mrf.mxu2 }
 0x575   :  { %v5918_v0 = vadd.f32 %v5917_v45, %v5829_v30  ;;  %v5831_v5 = vpop.f32.mrf.mxu1 }
 0x576   :  { %v5742_v54 = vpop.f32.mrf.mxu0 }
 0x577   :  { %v6007_v49 = vadd.f32 %v6006_v32, %v5918_v0  ;;  %v5832_v35 = vadd.f32 %v5831_v5, %v5742_v54 }
 0x579   :  { %6628 = vst [vmem:[#allocation6 + $0x130] sm:$0xff] %v6007_v49 }
 0x57b   :  { %v6009_v34 = vpop.f32.mrf.mxu3 }
 0x57c   :  { %v5920_v24 = vpop.f32.mrf.mxu2 }
 0x57d   :  { %v5921_v18 = vadd.f32 %v5920_v24, %v5832_v35  ;;  %v5833_v13 = vpop.f32.mrf.mxu1 }
 0x57e   :  { %v5744_v6 = vpop.f32.mrf.mxu0 }
 0x57f   :  { %v6010_v15 = vadd.f32 %v6009_v34, %v5921_v18  ;;  %6062 = vmatmul.bf16.gmra.mxu0 %v16172_v36  ;;  %v5834_v3 = vadd.f32 %v5833_v13, %v5744_v6  ;;  %v16176_v18 = vld [vmem:[#allocation90_spill] sm:$0xff]  ;;  %v16179_v13 = vld [vmem:[#allocation157_spill] sm:$0xff] }
 0x580   :  { %6151 = vmatmul.bf16.gmra.mxu1 %v16173_v59  ;;  %6240 = vmatmul.bf16.gmra.mxu2 %v16174_v26  ;;  %v16178_v6 = vld [vmem:[#allocation106_spill] sm:$0xff] }
 0x581   :  { %6630 = vst [vmem:[#allocation6 + $0x140] sm:$0xff] %v6010_v15  ;;  %6329 = vmatmul.bf16.gmra.mxu3 %v16175_v47  ;;  %v16177_v15 = vld [vmem:[#allocation93_spill] sm:$0xff] }
 0x583   :  { %v6011_v51 = vpop.f32.mrf.mxu3 }
 0x584   :  { %v5922_v33 = vpop.f32.mrf.mxu2 }
 0x585   :  { %v5923_v53 = vadd.f32 %v5922_v33, %v5834_v3  ;;  %v5836_v45 = vpop.f32.mrf.mxu1 }
 0x586   :  { %v5747_v30 = vpop.f32.mrf.mxu0 }
 0x587   :  { %v6012_v32 = vadd.f32 %v6011_v51, %v5923_v53  ;;  %v5837_v0 = vadd.f32 %v5836_v45, %v5747_v30 }
 0x589   :  { %6632 = vst [vmem:[#allocation6 + $0x150] sm:$0xff] %v6012_v32 }
 0x58b   :  { %v6014_v5 = vpop.f32.mrf.mxu3 }
 0x58c   :  { %v5925_v54 = vpop.f32.mrf.mxu2 }
 0x58d   :  { %v5926_v49 = vadd.f32 %v5925_v54, %v5837_v0  ;;  %v5838_v24 = vpop.f32.mrf.mxu1 }
 0x58e   :  { %v5749_v35 = vpop.f32.mrf.mxu0 }
 0x58f   :  { %v6015_v34 = vadd.f32 %v6014_v5, %v5926_v49  ;;  %6067 = vmatmul.bf16.gmra.mxu0 %v16176_v18  ;;  %v5839_v36 = vadd.f32 %v5838_v24, %v5749_v35  ;;  %v16180_v49 = vld [vmem:[#allocation45_spill] sm:$0xff] }
 0x590   :  { %6156 = vmatmul.bf16.gmra.mxu1 %v16177_v15  ;;  %6245 = vmatmul.bf16.gmra.mxu2 %v16178_v6 }
 0x591   :  { %6634 = vst [vmem:[#allocation6 + $0x160] sm:$0xff] %v6015_v34  ;;  %6334 = vmatmul.bf16.gmra.mxu3 %v16179_v13  ;;  %v16181_v34 = vld [vmem:[#allocation51_spill] sm:$0xff] }
 0x593   :  { %v6016_v26 = vpop.f32.mrf.mxu3 }
 0x594   :  { %v5927_v59 = vpop.f32.mrf.mxu2 }
 0x595   :  { %v5928_v47 = vadd.f32 %v5927_v59, %v5839_v36  ;;  %v5841_v33 = vpop.f32.mrf.mxu1 }
 0x596   :  { %v5752_v3 = vpop.f32.mrf.mxu0 }
 0x597   :  { %v6017_v51 = vadd.f32 %v6016_v26, %v5928_v47  ;;  %v5842_v53 = vadd.f32 %v5841_v33, %v5752_v3 }
 0x599   :  { %6636 = vst [vmem:[#allocation6 + $0x170] sm:$0xff] %v6017_v51 }
 0x59b   :  { %v6019_v45 = vpop.f32.mrf.mxu3 }
 0x59c   :  { %v5930_v30 = vpop.f32.mrf.mxu2 }
 0x59d   :  { %v5931_v32 = vadd.f32 %v5930_v30, %v5842_v53  ;;  %v5843_v54 = vpop.f32.mrf.mxu1 }
 0x59e   :  { %v5754_v0 = vpop.f32.mrf.mxu0 }
 0x59f   :  { %v6020_v5 = vadd.f32 %v6019_v45, %v5931_v32  ;;  %6072 = vmatmul.bf16.gmra.mxu0 %v16180_v49  ;;  %v5844_v35 = vadd.f32 %v5843_v54, %v5754_v0 }
 0x5a0   :  { %6161 = vmatmul.bf16.gmra.mxu1 %v16181_v34  ;;  %6250 = vmatmul.bf16.gmra.mxu2 %v16109_v11 }
 0x5a1   :  { %6638 = vst [vmem:[#allocation6 + $0x180] sm:$0xff] %v6020_v5  ;;  %6339 = vmatmul.bf16.gmra.mxu3 %v16110_v23 }
 0x5a3   :  { %v6021_v18 = vpop.f32.mrf.mxu3 }
 0x5a4   :  { %v5932_v24 = vpop.f32.mrf.mxu2 }
 0x5a5   :  { %v5933_v15 = vadd.f32 %v5932_v24, %v5844_v35  ;;  %v5846_v13 = vpop.f32.mrf.mxu1 }
 0x5a6   :  { %v5757_v6 = vpop.f32.mrf.mxu0 }
 0x5a7   :  { %v6022_v36 = vadd.f32 %v6021_v18, %v5933_v15  ;;  %v5847_v59 = vadd.f32 %v5846_v13, %v5757_v6 }
 0x5a9   :  { %6640 = vst [vmem:[#allocation6 + $0x190] sm:$0xff] %v6022_v36 }
 0x5ab   :  { %v6024_v47 = vpop.f32.mrf.mxu3 }
 0x5ac   :  { %v5935_v26 = vpop.f32.mrf.mxu2 }
 0x5ad   :  { %v5936_v3 = vadd.f32 %v5935_v26, %v5847_v59  ;;  %v5848_v51 = vpop.f32.mrf.mxu1 }
 0x5ae   :  { %v5759_v33 = vpop.f32.mrf.mxu0 }
 0x5af   :  { %v6025_v53 = vadd.f32 %v6024_v47, %v5936_v3  ;;  %6077 = vmatmul.bf16.gmra.mxu0 %v16121_v19  ;;  %v5849_v11 = vadd.f32 %v5848_v51, %v5759_v33 }
 0x5b0   :  { %6166 = vmatmul.bf16.gmra.mxu1 %v16122_v4  ;;  %6255 = vmatmul.bf16.gmra.mxu2 %v16125_v21 }
 0x5b1   :  { %6642 = vst [vmem:[#allocation6 + $0x1a0] sm:$0xff] %v6025_v53  ;;  %6344 = vmatmul.bf16.gmra.mxu3 %v13668_v20 }
 0x5b3   :  { %v6026_v30 = vpop.f32.mrf.mxu3 }
 0x5b4   :  { %v5937_v23 = vpop.f32.mrf.mxu2 }
 0x5b5   :  { %v5938_v45 = vadd.f32 %v5937_v23, %v5849_v11  ;;  %v5851_v0 = vpop.f32.mrf.mxu1 }
 0x5b6   :  { %v5762_v32 = vpop.f32.mrf.mxu0 }
 0x5b7   :  { %v6027_v54 = vadd.f32 %v6026_v30, %v5938_v45  ;;  %v5852_v5 = vadd.f32 %v5851_v0, %v5762_v32 }
 0x5b9   :  { %6644 = vst [vmem:[#allocation6 + $0x1b0] sm:$0xff] %v6027_v54 }
 0x5bb   :  { %v6029_v34 = vpop.f32.mrf.mxu3 }
 0x5bc   :  { %v5940_v49 = vpop.f32.mrf.mxu2 }
 0x5bd   :  { %v5941_v35 = vadd.f32 %v5940_v49, %v5852_v5  ;;  %v5853_v24 = vpop.f32.mrf.mxu1 }
 0x5be   :  { %v5764_v19 = vpop.f32.mrf.mxu0 }
 0x5bf   :  { %v6030_v4 = vadd.f32 %v6029_v34, %v5941_v35  ;;  %6082 = vmatmul.bf16.gmra.mxu0 %v16136_v42  ;;  %v5854_v20 = vadd.f32 %v5853_v24, %v5764_v19 }
 0x5c0   :  { %6171 = vmatmul.bf16.gmra.mxu1 %v16137_v56  ;;  %6260 = vmatmul.bf16.gmra.mxu2 %v13760_v57 }
 0x5c1   :  { %6646 = vst [vmem:[#allocation6 + $0x1c0] sm:$0xff] %v6030_v4  ;;  %6349 = vmatmul.bf16.gmra.mxu3 %v13819_v1 }
 0x5c3   :  { %v6031_v18 = vpop.f32.mrf.mxu3 }
 0x5c4   :  { %v5942_v21 = vpop.f32.mrf.mxu2 }
 0x5c5   :  { %v5943_v15 = vadd.f32 %v5942_v21, %v5854_v20  ;;  %v5856_v13 = vpop.f32.mrf.mxu1 }
 0x5c6   :  { %v5767_v6 = vpop.f32.mrf.mxu0 }
 0x5c7   :  { %v6032_v36 = vadd.f32 %v6031_v18, %v5943_v15  ;;  %v5857_v59 = vadd.f32 %v5856_v13, %v5767_v6 }
 0x5c9   :  { %6648 = vst [vmem:[#allocation6 + $0x1d0] sm:$0xff] %v6032_v36 }
 0x5cb   :  { %v6034_v47 = vpop.f32.mrf.mxu3 }
 0x5cc   :  { %v5945_v26 = vpop.f32.mrf.mxu2 }
 0x5cd   :  { %v5946_v3 = vadd.f32 %v5945_v26, %v5857_v59  ;;  %v5858_v33 = vpop.f32.mrf.mxu1 }
 0x5ce   :  { %v5769_v42 = vpop.f32.mrf.mxu0 }
 0x5cf   :  { %v6035_v56 = vadd.f32 %v6034_v47, %v5946_v3  ;;  %6087 = vmatmul.bf16.gmra.mxu0 %v16142_v61  ;;  %v5859_v57 = vadd.f32 %v5858_v33, %v5769_v42 }
 0x5d0   :  { %6176 = vmatmul.bf16.gmra.mxu1 %v16143_v17  ;;  %6265 = vmatmul.bf16.gmra.mxu2 %v13918_v28 }
 0x5d1   :  { %6650 = vst [vmem:[#allocation6 + $0x1e0] sm:$0xff] %v6035_v56  ;;  %6354 = vmatmul.bf16.gmra.mxu3 %v13947_v31 }
 0x5d3   :  { %v6036_v51 = vpop.f32.mrf.mxu3 }
 0x5d4   :  { %v5947_v1 = vpop.f32.mrf.mxu2 }
 0x5d5   :  { %v5948_v53 = vadd.f32 %v5947_v1, %v5859_v57  ;;  %v6137_v23 = vpop.f32.mrf.mxu1 }
 0x5d6   :  { %v6048_v11 = vpop.f32.mrf.mxu0 }
 0x5d7   :  { %v6037_v30 = vadd.f32 %v6036_v51, %v5948_v53  ;;  %v6138_v45 = vadd.f32 %v6137_v23, %v6048_v11 }
 0x5d9   :  { %6652 = vst [vmem:[#allocation6 + $0x1f0] sm:$0xff] %v6037_v30 }
 0x5db   :  { %v6315_v0 = vpop.f32.mrf.mxu3 }
 0x5dc   :  { %v6226_v32 = vpop.f32.mrf.mxu2 }
 0x5dd   :  { %v6227_v54 = vadd.f32 %v6226_v32, %v6138_v45  ;;  %v6139_v5 = vpop.f32.mrf.mxu1 }
 0x5de   :  { %v6050_v61 = vpop.f32.mrf.mxu0 }
 0x5df   :  { %v6316_v17 = vadd.f32 %v6315_v0, %v6227_v54  ;;  %6092 = vmatmul.bf16.gmra.mxu0 %v16144_v2  ;;  %v6140_v28 = vadd.f32 %v6139_v5, %v6050_v61 }
 0x5e0   :  { %6181 = vmatmul.bf16.gmra.mxu1 %v16145_v58  ;;  %6270 = vmatmul.bf16.gmra.mxu2 %v14054_v9 }
 0x5e1   :  { %6591 = vst [vmem:[#allocation6 + $0x8] sm:$0xff] %v6316_v17  ;;  %6359 = vmatmul.bf16.gmra.mxu3 %v14104_v38 }
 0x5e3   :  { %v6317_v49 = vpop.f32.mrf.mxu3 }
 0x5e4   :  { %v6228_v31 = vpop.f32.mrf.mxu2 }
 0x5e5   :  { %v6229_v34 = vadd.f32 %v6228_v31, %v6140_v28  ;;  %v6142_v19 = vpop.f32.mrf.mxu1 }
 0x5e6   :  { %v6053_v35 = vpop.f32.mrf.mxu0 }
 0x5e7   :  { %v6318_v24 = vadd.f32 %v6317_v49, %v6229_v34  ;;  %v6143_v4 = vadd.f32 %v6142_v19, %v6053_v35 }
 0x5e9   :  { %6593 = vst [vmem:[#allocation6 + $0x18] sm:$0xff] %v6318_v24 }
 0x5eb   :  { %v6320_v21 = vpop.f32.mrf.mxu3 }
 0x5ec   :  { %v6231_v20 = vpop.f32.mrf.mxu2 }
 0x5ed   :  { %v6232_v18 = vadd.f32 %v6231_v20, %v6143_v4  ;;  %v6144_v15 = vpop.f32.mrf.mxu1 }
 0x5ee   :  { %v6055_v2 = vpop.f32.mrf.mxu0 }
 0x5ef   :  { %v6321_v58 = vadd.f32 %v6320_v21, %v6232_v18  ;;  %6097 = vmatmul.bf16.gmra.mxu0 %v16146_v22  ;;  %v6145_v9 = vadd.f32 %v6144_v15, %v6055_v2 }
 0x5f0   :  { %6186 = vmatmul.bf16.gmra.mxu1 %v16147_v41  ;;  %6275 = vmatmul.bf16.gmra.mxu2 %v14197_v46 }
 0x5f1   :  { %6595 = vst [vmem:[#allocation6 + $0x28] sm:$0xff] %v6321_v58  ;;  %6364 = vmatmul.bf16.gmra.mxu3 %v14233_v40 }
 0x5f3   :  { %v6322_v6 = vpop.f32.mrf.mxu3 }
 0x5f4   :  { %v6233_v38 = vpop.f32.mrf.mxu2 }
 0x5f5   :  { %v6234_v13 = vadd.f32 %v6233_v38, %v6145_v9  ;;  %v6147_v59 = vpop.f32.mrf.mxu1 }
 0x5f6   :  { %v6058_v36 = vpop.f32.mrf.mxu0 }
 0x5f7   :  { %v6323_v26 = vadd.f32 %v6322_v6, %v6234_v13  ;;  %v6148_v47 = vadd.f32 %v6147_v59, %v6058_v36 }
 0x5f9   :  { %6597 = vst [vmem:[#allocation6 + $0x38] sm:$0xff] %v6323_v26 }
 0x5fb   :  { %v6325_v42 = vpop.f32.mrf.mxu3 }
 0x5fc   :  { %v6236_v3 = vpop.f32.mrf.mxu2 }
 0x5fd   :  { %v6237_v33 = vadd.f32 %v6236_v3, %v6148_v47  ;;  %v6149_v56 = vpop.f32.mrf.mxu1 }
 0x5fe   :  { %v6060_v22 = vpop.f32.mrf.mxu0 }
 0x5ff   :  { %v6326_v41 = vadd.f32 %v6325_v42, %v6237_v33  ;;  %6102 = vmatmul.bf16.gmra.mxu0 %v16148_v44  ;;  %v6150_v46 = vadd.f32 %v6149_v56, %v6060_v22 }
 0x600   :  { %6191 = vmatmul.bf16.gmra.mxu1 %v16149_v25  ;;  %6280 = vmatmul.bf16.gmra.mxu2 %v16150_v8 }
 0x601   :  { %6599 = vst [vmem:[#allocation6 + $0x48] sm:$0xff] %v6326_v41  ;;  %6369 = vmatmul.bf16.gmra.mxu3 %v16151_v60 }
 0x603   :  { %v6327_v57 = vpop.f32.mrf.mxu3 }
 0x604   :  { %v6238_v40 = vpop.f32.mrf.mxu2 }
 0x605   :  { %v6239_v1 = vadd.f32 %v6238_v40, %v6150_v46  ;;  %v6152_v53 = vpop.f32.mrf.mxu1 }
 0x606   :  { %v6063_v51 = vpop.f32.mrf.mxu0 }
 0x607   :  { %v6328_v11 = vadd.f32 %v6327_v57, %v6239_v1  ;;  %v6153_v23 = vadd.f32 %v6152_v53, %v6063_v51 }
 0x609   :  { %6601 = vst [vmem:[#allocation6 + $0x58] sm:$0xff] %v6328_v11 }
 0x60b   :  { %v6330_v45 = vpop.f32.mrf.mxu3 }
 0x60c   :  { %v6241_v30 = vpop.f32.mrf.mxu2 }
 0x60d   :  { %v6242_v32 = vadd.f32 %v6241_v30, %v6153_v23  ;;  %v6154_v0 = vpop.f32.mrf.mxu1 }
 0x60e   :  { %v6065_v44 = vpop.f32.mrf.mxu0 }
 0x60f   :  { %v6331_v25 = vadd.f32 %v6330_v45, %v6242_v32  ;;  %6107 = vmatmul.bf16.gmra.mxu0 %v16152_v16  ;;  %v6155_v8 = vadd.f32 %v6154_v0, %v6065_v44 }
 0x610   :  { %6196 = vmatmul.bf16.gmra.mxu1 %v16153_v37  ;;  %6285 = vmatmul.bf16.gmra.mxu2 %v14466_v39 }
 0x611   :  { %6603 = vst [vmem:[#allocation6 + $0x68] sm:$0xff] %v6331_v25  ;;  %6374 = vmatmul.bf16.gmra.mxu3 %v14514_v62 }
 0x613   :  { %v6332_v54 = vpop.f32.mrf.mxu3 }
 0x614   :  { %v6243_v60 = vpop.f32.mrf.mxu2 }
 0x615   :  { %v6244_v61 = vadd.f32 %v6243_v60, %v6155_v8  ;;  %v6157_v17 = vpop.f32.mrf.mxu1 }
 0x616   :  { %v6068_v5 = vpop.f32.mrf.mxu0 }
 0x617   :  { %v6333_v28 = vadd.f32 %v6332_v54, %v6244_v61  ;;  %v6158_v31 = vadd.f32 %v6157_v17, %v6068_v5 }
 0x619   :  { %6605 = vst [vmem:[#allocation6 + $0x78] sm:$0xff] %v6333_v28 }
 0x61b   :  { %v6335_v34 = vpop.f32.mrf.mxu3 }
 0x61c   :  { %v6246_v49 = vpop.f32.mrf.mxu2 }
 0x61d   :  { %v6247_v35 = vadd.f32 %v6246_v49, %v6158_v31  ;;  %v6159_v19 = vpop.f32.mrf.mxu1 }
 0x61e   :  { %v6070_v16 = vpop.f32.mrf.mxu0 }
 0x61f   :  { %v6336_v37 = vadd.f32 %v6335_v34, %v6247_v35  ;;  %6112 = vmatmul.bf16.gmra.mxu0 %v16154_v43  ;;  %v6160_v39 = vadd.f32 %v6159_v19, %v6070_v16 }
 0x620   :  { %6201 = vmatmul.bf16.gmra.mxu1 %v16155_v29  ;;  %6290 = vmatmul.bf16.gmra.mxu2 %v14571_v10 }
 0x621   :  { %6607 = vst [vmem:[#allocation6 + $0x88] sm:$0xff] %v6336_v37  ;;  %6379 = vmatmul.bf16.gmra.mxu3 %v14624_v63 }
 0x623   :  { %v6337_v24 = vpop.f32.mrf.mxu3 }
 0x624   :  { %v6248_v62 = vpop.f32.mrf.mxu2 }
 0x625   :  { %v6249_v4 = vadd.f32 %v6248_v62, %v6160_v39  ;;  %v6162_v21 = vpop.f32.mrf.mxu1 }
 0x626   :  { %v6073_v20 = vpop.f32.mrf.mxu0 }
 0x627   :  { %v6338_v18 = vadd.f32 %v6337_v24, %v6249_v4  ;;  %v6163_v2 = vadd.f32 %v6162_v21, %v6073_v20 }
 0x629   :  { %6609 = vst [vmem:[#allocation6 + $0x98] sm:$0xff] %v6338_v18 }
 0x62b   :  { %v6340_v58 = vpop.f32.mrf.mxu3 }
 0x62c   :  { %v6251_v15 = vpop.f32.mrf.mxu2 }
 0x62d   :  { %v6252_v9 = vadd.f32 %v6251_v15, %v6163_v2  ;;  %v6164_v38 = vpop.f32.mrf.mxu1 }
 0x62e   :  { %v6075_v43 = vpop.f32.mrf.mxu0 }
 0x62f   :  { %v6341_v29 = vadd.f32 %v6340_v58, %v6252_v9  ;;  %6117 = vmatmul.bf16.gmra.mxu0 %v16156_v50  ;;  %v6165_v10 = vadd.f32 %v6164_v38, %v6075_v43 }
 0x630   :  { %6206 = vmatmul.bf16.gmra.mxu1 %v16157_v27  ;;  %6295 = vmatmul.bf16.gmra.mxu2 %v14683_v12 }
 0x631   :  { %6611 = vst [vmem:[#allocation6 + $0xa8] sm:$0xff] %v6341_v29  ;;  %6384 = vmatmul.bf16.gmra.mxu3 %v14709_v52 }
 0x633   :  { %v6342_v6 = vpop.f32.mrf.mxu3 }
 0x634   :  { %v6253_v63 = vpop.f32.mrf.mxu2 }
 0x635   :  { %v6254_v13 = vadd.f32 %v6253_v63, %v6165_v10  ;;  %v6167_v59 = vpop.f32.mrf.mxu1 }
 0x636   :  { %v6078_v36 = vpop.f32.mrf.mxu0 }
 0x637   :  { %v6343_v26 = vadd.f32 %v6342_v6, %v6254_v13  ;;  %v6168_v47 = vadd.f32 %v6167_v59, %v6078_v36 }
 0x639   :  { %6613 = vst [vmem:[#allocation6 + $0xb8] sm:$0xff] %v6343_v26 }
 0x63b   :  { %v6345_v42 = vpop.f32.mrf.mxu3 }
 0x63c   :  { %v6256_v3 = vpop.f32.mrf.mxu2 }
 0x63d   :  { %v6257_v33 = vadd.f32 %v6256_v3, %v6168_v47  ;;  %v6169_v22 = vpop.f32.mrf.mxu1 }
 0x63e   :  { %v6080_v50 = vpop.f32.mrf.mxu0 }
 0x63f   :  { %v6346_v27 = vadd.f32 %v6345_v42, %v6257_v33  ;;  %6122 = vmatmul.bf16.gmra.mxu0 %v16158_v48  ;;  %v6170_v12 = vadd.f32 %v6169_v22, %v6080_v50 }
 0x640   :  { %6211 = vmatmul.bf16.gmra.mxu1 %v16159_v55  ;;  %6300 = vmatmul.bf16.gmra.mxu2 %v14723_v7 }
 0x641   :  { %6615 = vst [vmem:[#allocation6 + $0xc8] sm:$0xff] %v6346_v27  ;;  %6389 = vmatmul.bf16.gmra.mxu3 %v14735_v14 }
 0x643   :  { %v6347_v56 = vpop.f32.mrf.mxu3 }
 0x644   :  { %v6258_v52 = vpop.f32.mrf.mxu2 }
 0x645   :  { %v6259_v41 = vadd.f32 %v6258_v52, %v6170_v12  ;;  %v6172_v40 = vpop.f32.mrf.mxu1 }
 0x646   :  { %v6083_v46 = vpop.f32.mrf.mxu0 }
 0x647   :  { %v6348_v57 = vadd.f32 %v6347_v56, %v6259_v41  ;;  %v6173_v1 = vadd.f32 %v6172_v40, %v6083_v46 }
 0x649   :  { %6617 = vst [vmem:[#allocation6 + $0xd8] sm:$0xff] %v6348_v57 }
 0x64b   :  { %v6350_v53 = vpop.f32.mrf.mxu3 }
 0x64c   :  { %v6261_v51 = vpop.f32.mrf.mxu2 }
 0x64d   :  { %v6262_v11 = vadd.f32 %v6261_v51, %v6173_v1  ;;  %v6174_v23 = vpop.f32.mrf.mxu1 }
 0x64e   :  { %v6085_v48 = vpop.f32.mrf.mxu0 }
 0x64f   :  { %v6351_v55 = vadd.f32 %v6350_v53, %v6262_v11  ;;  %v6175_v30 = vadd.f32 %v6174_v23, %v6085_v48 }
 0x651   :  { %6619 = vst [vmem:[#allocation6 + $0xe8] sm:$0xff] %v6351_v55 }
 0x653   :  { %v6352_v45 = vpop.f32.mrf.mxu3 }
 0x654   :  { %v6263_v7 = vpop.f32.mrf.mxu2 }
 0x655   :  { %v6264_v14 = vadd.f32 %v6263_v7, %v6175_v30  ;;  %v6177_v44 = vpop.f32.mrf.mxu1 }
 0x656   :  { %v6088_v32 = vpop.f32.mrf.mxu0 }
 0x657   :  { %v6353_v0 = vadd.f32 %v6352_v45, %v6264_v14  ;;  %v6178_v25 = vadd.f32 %v6177_v44, %v6088_v32 }
 0x659   :  { %6621 = vst [vmem:[#allocation6 + $0xf8] sm:$0xff] %v6353_v0 }
 0x65b   :  { %v6355_v60 = vpop.f32.mrf.mxu3 }
 0x65c   :  { %v6266_v8 = vpop.f32.mrf.mxu2 }
 0x65d   :  { %v6267_v54 = vadd.f32 %v6266_v8, %v6178_v25  ;;  %v6179_v5 = vpop.f32.mrf.mxu1 }
 0x65e   :  { %v6090_v61 = vpop.f32.mrf.mxu0 }
 0x65f   :  { %v6356_v17 = vadd.f32 %v6355_v60, %v6267_v54  ;;  %v6180_v28 = vadd.f32 %v6179_v5, %v6090_v61 }
 0x661   :  { %6623 = vst [vmem:[#allocation6 + $0x108] sm:$0xff] %v6356_v17 }
 0x663   :  { %v6357_v49 = vpop.f32.mrf.mxu3 }
 0x664   :  { %v6268_v31 = vpop.f32.mrf.mxu2 }
 0x665   :  { %v6269_v34 = vadd.f32 %v6268_v31, %v6180_v28  ;;  %v6182_v16 = vpop.f32.mrf.mxu1 }
 0x666   :  { %v6093_v35 = vpop.f32.mrf.mxu0 }
 0x667   :  { %v6358_v19 = vadd.f32 %v6357_v49, %v6269_v34  ;;  %v6183_v37 = vadd.f32 %v6182_v16, %v6093_v35 }
 0x669   :  { %6625 = vst [vmem:[#allocation6 + $0x118] sm:$0xff] %v6358_v19 }
 0x66b   :  { %v6360_v62 = vpop.f32.mrf.mxu3 }
 0x66c   :  { %v6271_v39 = vpop.f32.mrf.mxu2 }
 0x66d   :  { %v6272_v24 = vadd.f32 %v6271_v39, %v6183_v37  ;;  %v6184_v20 = vpop.f32.mrf.mxu1 }
 0x66e   :  { %v6095_v4 = vpop.f32.mrf.mxu0 }
 0x66f   :  { %v6361_v21 = vadd.f32 %v6360_v62, %v6272_v24  ;;  %v6185_v18 = vadd.f32 %v6184_v20, %v6095_v4 }
 0x671   :  { %6627 = vst [vmem:[#allocation6 + $0x128] sm:$0xff] %v6361_v21 }
 0x673   :  { %v6362_v15 = vpop.f32.mrf.mxu3 }
 0x674   :  { %v6273_v2 = vpop.f32.mrf.mxu2 }
 0x675   :  { %v6274_v58 = vadd.f32 %v6273_v2, %v6185_v18  ;;  %v6187_v43 = vpop.f32.mrf.mxu1 }
 0x676   :  { %v6098_v9 = vpop.f32.mrf.mxu0 }
 0x677   :  { %v6363_v38 = vadd.f32 %v6362_v15, %v6274_v58  ;;  %v6188_v29 = vadd.f32 %v6187_v43, %v6098_v9 }
 0x679   :  { %6629 = vst [vmem:[#allocation6 + $0x138] sm:$0xff] %v6363_v38 }
 0x67b   :  { %v6365_v63 = vpop.f32.mrf.mxu3 }
 0x67c   :  { %v6276_v10 = vpop.f32.mrf.mxu2 }
 0x67d   :  { %v6277_v6 = vadd.f32 %v6276_v10, %v6188_v29  ;;  %v6189_v36 = vpop.f32.mrf.mxu1 }
 0x67e   :  { %v6100_v13 = vpop.f32.mrf.mxu0 }
 0x67f   :  { %v6366_v59 = vadd.f32 %v6365_v63, %v6277_v6  ;;  %v6190_v26 = vadd.f32 %v6189_v36, %v6100_v13 }
 0x681   :  { %6631 = vst [vmem:[#allocation6 + $0x148] sm:$0xff] %v6366_v59 }
 0x683   :  { %v6367_v3 = vpop.f32.mrf.mxu3 }
 0x684   :  { %v6278_v47 = vpop.f32.mrf.mxu2 }
 0x685   :  { %v6279_v42 = vadd.f32 %v6278_v47, %v6190_v26  ;;  %v6192_v50 = vpop.f32.mrf.mxu1 }
 0x686   :  { %v6103_v33 = vpop.f32.mrf.mxu0 }
 0x687   :  { %v6368_v22 = vadd.f32 %v6367_v3, %v6279_v42  ;;  %v6193_v27 = vadd.f32 %v6192_v50, %v6103_v33 }
 0x689   :  { %6633 = vst [vmem:[#allocation6 + $0x158] sm:$0xff] %v6368_v22 }
 0x68b   :  { %v6370_v52 = vpop.f32.mrf.mxu3 }
 0x68c   :  { %v6281_v12 = vpop.f32.mrf.mxu2 }
 0x68d   :  { %v6282_v56 = vadd.f32 %v6281_v12, %v6193_v27  ;;  %v6194_v46 = vpop.f32.mrf.mxu1 }
 0x68e   :  { %v6105_v41 = vpop.f32.mrf.mxu0 }
 0x68f   :  { %v6371_v40 = vadd.f32 %v6370_v52, %v6282_v56  ;;  %v6195_v57 = vadd.f32 %v6194_v46, %v6105_v41 }
 0x691   :  { %6635 = vst [vmem:[#allocation6 + $0x168] sm:$0xff] %v6371_v40 }
 0x693   :  { %v6372_v51 = vpop.f32.mrf.mxu3 }
 0x694   :  { %v6283_v1 = vpop.f32.mrf.mxu2 }
 0x695   :  { %v6284_v53 = vadd.f32 %v6283_v1, %v6195_v57  ;;  %v6197_v48 = vpop.f32.mrf.mxu1 }
 0x696   :  { %v6108_v11 = vpop.f32.mrf.mxu0 }
 0x697   :  { %v6373_v23 = vadd.f32 %v6372_v51, %v6284_v53  ;;  %v6198_v55 = vadd.f32 %v6197_v48, %v6108_v11 }
 0x699   :  { %6637 = vst [vmem:[#allocation6 + $0x178] sm:$0xff] %v6373_v23 }
 0x69b   :  { %v6375_v7 = vpop.f32.mrf.mxu3 }
 0x69c   :  { %v6286_v30 = vpop.f32.mrf.mxu2 }
 0x69d   :  { %v6287_v45 = vadd.f32 %v6286_v30, %v6198_v55  ;;  %v6199_v32 = vpop.f32.mrf.mxu1 }
 0x69e   :  { %v6110_v14 = vpop.f32.mrf.mxu0 }
 0x69f   :  { %v6376_v44 = vadd.f32 %v6375_v7, %v6287_v45  ;;  %v6200_v0 = vadd.f32 %v6199_v32, %v6110_v14 }
 0x6a1   :  { %6639 = vst [vmem:[#allocation6 + $0x188] sm:$0xff] %v6376_v44 }
 0x6a3   :  { %v6377_v8 = vpop.f32.mrf.mxu3 }
 0x6a4   :  { %v6288_v25 = vpop.f32.mrf.mxu2 }
 0x6a5   :  { %v6289_v60 = vadd.f32 %v6288_v25, %v6200_v0  ;;  %v6202_v61 = vpop.f32.mrf.mxu1 }
 0x6a6   :  { %v6113_v54 = vpop.f32.mrf.mxu0 }
 0x6a7   :  { %v6378_v5 = vadd.f32 %v6377_v8, %v6289_v60  ;;  %v6203_v17 = vadd.f32 %v6202_v61, %v6113_v54 }
 0x6a9   :  { %6641 = vst [vmem:[#allocation6 + $0x198] sm:$0xff] %v6378_v5 }
 0x6ab   :  { %v6380_v31 = vpop.f32.mrf.mxu3 }
 0x6ac   :  { %v6291_v28 = vpop.f32.mrf.mxu2 }
 0x6ad   :  { %v6292_v49 = vadd.f32 %v6291_v28, %v6203_v17  ;;  %v6204_v35 = vpop.f32.mrf.mxu1 }
 0x6ae   :  { %v6115_v34 = vpop.f32.mrf.mxu0 }
 0x6af   :  { %v6381_v16 = vadd.f32 %v6380_v31, %v6292_v49  ;;  %v6205_v19 = vadd.f32 %v6204_v35, %v6115_v34 }
 0x6b1   :  { %6643 = vst [vmem:[#allocation6 + $0x1a8] sm:$0xff] %v6381_v16 }
 0x6b3   :  { %v6382_v39 = vpop.f32.mrf.mxu3 }
 0x6b4   :  { %v6293_v37 = vpop.f32.mrf.mxu2 }
 0x6b5   :  { %v6294_v62 = vadd.f32 %v6293_v37, %v6205_v19  ;;  %v6207_v4 = vpop.f32.mrf.mxu1 }
 0x6b6   :  { %v6118_v24 = vpop.f32.mrf.mxu0 }
 0x6b7   :  { %v6383_v20 = vadd.f32 %v6382_v39, %v6294_v62  ;;  %v6208_v21 = vadd.f32 %v6207_v4, %v6118_v24 }
 0x6b9   :  { %6645 = vst [vmem:[#allocation6 + $0x1b8] sm:$0xff] %v6383_v20 }
 0x6bb   :  { %v6385_v2 = vpop.f32.mrf.mxu3 }
 0x6bc   :  { %v6296_v18 = vpop.f32.mrf.mxu2 }
 0x6bd   :  { %v6297_v15 = vadd.f32 %v6296_v18, %v6208_v21  ;;  %v6209_v9 = vpop.f32.mrf.mxu1 }
 0x6be   :  { %v6120_v58 = vpop.f32.mrf.mxu0 }
 0x6bf   :  { %v6386_v43 = vadd.f32 %v6385_v2, %v6297_v15  ;;  %v6210_v38 = vadd.f32 %v6209_v9, %v6120_v58 }
 0x6c1   :  { %6647 = vst [vmem:[#allocation6 + $0x1c8] sm:$0xff] %v6386_v43 }
 0x6c3   :  { %v6387_v10 = vpop.f32.mrf.mxu3 }
 0x6c4   :  { %v6298_v29 = vpop.f32.mrf.mxu2 }
 0x6c5   :  { %v6299_v63 = vadd.f32 %v6298_v29, %v6210_v38  ;;  %v6212_v13 = vpop.f32.mrf.mxu1 }
 0x6c6   :  { %v6123_v6 = vpop.f32.mrf.mxu0 }
 0x6c7   :  { %v6388_v36 = vadd.f32 %v6387_v10, %v6299_v63  ;;  %v6213_v59 = vadd.f32 %v6212_v13, %v6123_v6 }
 0x6c9   :  { %6649 = vst [vmem:[#allocation6 + $0x1d8] sm:$0xff] %v6388_v36 }
 0x6cb   :  { %v6390_v47 = vpop.f32.mrf.mxu3 }
 0x6cc   :  { %v6301_v26 = vpop.f32.mrf.mxu2 }
 0x6cd   :  { %v6302_v3 = vadd.f32 %v6301_v26, %v6213_v59  ;;  %v6214_v50 = vpop.f32.mrf.mxu1 }
 0x6ce   :  { %v6125_v33 = vpop.f32.mrf.mxu0 }
 0x6cf   :  { %v6391_v42 = vadd.f32 %v6390_v47, %v6302_v3  ;;  %v6215_v22 = vadd.f32 %v6214_v50, %v6125_v33 }
 0x6d1   :  { %6651 = vst [vmem:[#allocation6 + $0x1e8] sm:$0xff] %v6391_v42 }
 0x6d3   :  { %v6392_v52 = vpop.f32.mrf.mxu3 }
 0x6d4   :  { %v6303_v27 = vpop.f32.mrf.mxu2 }
 0x6d5   :  { %v6304_v12 = vadd.f32 %v6303_v27, %v6215_v22 }
 0x6d7   :  { %v6393_v56 = vadd.f32 %v6392_v52, %v6304_v12 }
 0x6d9   :  { %6653 = vst [vmem:[#allocation6 + $0x1f8] sm:$0xff] %v6393_v56 }
 0x6da   :  { %6666 = dma.vmem_to_hbm [thread:$0]  %s6659_s29, 8192, %s6661_s5, [#allocation5], %s8495_s6, %s8495_s6, %s8496_s0  }
 0x6db   :  { %8489 = dma.done.wait [#allocation5], 8192  }
 0x6dc   :  { %8490 = vsyncadd [#allocation5], 4294959104 }
 0x6dd   :  { %6671 = vsyncpa [#allocation4], 1 }
 0x6de   :  { %6672 = vsyncpa [#allocation5], 1 }

</bundles_post_ra>
